<compile_context>
chip_gen: v5e
topology: v5e:2x2
jax: 0.10.0
libtpu: 0.0.40
codegen_flags: <defaults>
</compile_context>

<pallas_src>
import functools

import jax
import jax.numpy as jnp
import numpy as np
from jax import lax
from jax.experimental import pallas as pl
from jax.experimental.pallas import tpu as pltpu

_VMEM_LIMIT = 32 * 1024 * 1024  # modest bump (helps v5e, <= default on v6e/v7x)


def _pick_tile(dim, target):
    """Largest power-of-two-ish tile <= target dividing dim (dim itself if small)."""
    if dim <= target:
        return dim
    t = target
    while dim % t:
        t //= 2
    return max(t, 1)


def _matmul_precision(dtype):
    # f32 contractions on the MXU default to truncated bf16 passes; request the
    # full-f32 multi-pass so the kernel matches an f32 reference.  bf16 inputs
    # already use the native MXU precision.
    return lax.Precision.HIGHEST if dtype == jnp.float32 else lax.Precision.DEFAULT


# ----------------------------------------------------------------------------
# Linear projection kernel: x (M, K) @ w.T where w is (Nout, K) PyTorch layout.
# ----------------------------------------------------------------------------
def _linear_kernel(x_ref, w_ref, o_ref, acc_ref, *, precision):
    @pl.when(pl.program_id(2) == 0)
    def _():
        acc_ref[...] = jnp.zeros_like(acc_ref)

    # Contract the last dim of both operands (weight kept in (out, in) layout).
    acc_ref[...] += lax.dot_general(
        x_ref[...], w_ref[...],
        dimension_numbers=(((1,), (1,)), ((), ())),
        precision=precision,
        preferred_element_type=jnp.float32)

    # Only write the output tile once, on the final K step.
    @pl.when(pl.program_id(2) == pl.num_programs(2) - 1)
    def _():
        o_ref[...] = acc_ref[...].astype(o_ref.dtype)


def linear(x, w, *, tm=256, tn=256, tk=512):
    """x: (M, K), w: (Nout, K)  ->  (M, Nout)   (no weight transpose in HBM)."""
    M, K = x.shape
    Nout, K2 = w.shape
    assert K == K2
    tm = _pick_tile(M, tm)
    tn = _pick_tile(Nout, tn)
    tk = _pick_tile(K, tk)
    kernel = functools.partial(_linear_kernel,
                               precision=_matmul_precision(x.dtype))
    return pl.pallas_call(
        kernel,
        out_shape=jax.ShapeDtypeStruct((M, Nout), x.dtype),
        grid_spec=pltpu.PrefetchScalarGridSpec(
            num_scalar_prefetch=0,
            grid=(M // tm, Nout // tn, K // tk),
            in_specs=[
                pl.BlockSpec((tm, tk), lambda i, j, k: (i, k)),
                pl.BlockSpec((tn, tk), lambda i, j, k: (j, k)),
            ],
            out_specs=pl.BlockSpec((tm, tn), lambda i, j, k: (i, j)),
            scratch_shapes=[pltpu.VMEM((tm, tn), jnp.float32)],
        ),
        compiler_params=pltpu.CompilerParams(
            dimension_semantics=("parallel", "parallel", "arbitrary"),
            vmem_limit_bytes=_VMEM_LIMIT),
    )(x, w)


# ----------------------------------------------------------------------------
# Flash-style MQA attention kernel (rotary + scale fused, heads folded into M)
# ----------------------------------------------------------------------------
def _mqa_flash_kernel(q_ref, kv_ref, cq_ref, sq_ref, ck_ref, sk_ref, o_ref,
                      q_scr, m_scr, l_scr, acc_scr, *, window_left, precision):
    _, tq, hq, d = q_ref.shape       # q block: (1, tq, Hq, D)
    _, tk, _ = kv_ref.shape          # kv block: (1, tk, 2*D)
    half = d // 2
    ki = pl.program_id(2)
    nk = pl.num_programs(2)
    q_start = pl.program_id(1) * tq
    k_start = ki * tk

    @pl.when(ki == 0)
    def _init():
        m_scr[...] = jnp.full_like(m_scr, -jnp.inf)
        l_scr[...] = jnp.zeros_like(l_scr)
        acc_scr[...] = jnp.zeros_like(acc_scr)
        # Rotary + softmax scale (folded into the q tables) applied once per
        # q tile, entirely in VMEM; heads folded into the sublane/M axis.
        q = q_ref[0].astype(jnp.float32)                     # (tq, hq, d)
        cq = cq_ref[...][:, None, :]                         # (tq, 1, d)
        sq = sq_ref[...][:, None, :]
        q = q * cq + pltpu.roll(q, shift=half, axis=2) * sq
        q_scr[...] = q.reshape(tq * hq, d).astype(q_scr.dtype)

    # Tile-level skip: causal "future" tiles and, when a non-negative sliding
    # window is set, tiles entirely left of the window.
    in_range = k_start <= q_start + tq - 1
    if window_left >= 0:
        in_range = jnp.logical_and(
            in_range, k_start + tk - 1 >= q_start - window_left)

    # Only boundary tiles need an element-level mask (interior tiles are fully
    # visible) -- saves the per-element iota/compare work on most tiles.
    needs_mask = k_start + tk - 1 > q_start
    if window_left >= 0:
        needs_mask = jnp.logical_or(
            needs_mask, q_start + tq - 1 - k_start > window_left)

    def _step(apply_mask):
        # Rotary on the K half of the kv tile, in VMEM (v is left untouched).
        kvt = kv_ref[0]                                      # (tk, 2d)
        k = kvt[:, :d].astype(jnp.float32)
        v = kvt[:, d:]
        k = (k * ck_ref[...] + pltpu.roll(k, shift=half, axis=1) * sk_ref[...]
             ).astype(kvt.dtype)

        q2 = q_scr[...]                                      # (tq*hq, d)
        s = lax.dot_general(q2, k, (((1,), (1,)), ((), ())),
                            precision=precision,
                            preferred_element_type=jnp.float32)  # (tq*hq, tk)

        if apply_mask:
            row = q_start + (lax.broadcasted_iota(jnp.int32, s.shape, 0) // hq)
            col = k_start + lax.broadcasted_iota(jnp.int32, s.shape, 1)
            mask = col <= row                                # causal
            if window_left >= 0:                             # neg => unbounded
                mask = jnp.logical_and(mask, row - col <= window_left)
            s = jnp.where(mask, s, -jnp.inf)

        m_prev = m_scr[...]
        m_cur = jnp.max(s, axis=-1, keepdims=True)
        m_new = jnp.maximum(m_prev, m_cur)
        alpha = jnp.where(m_new > -jnp.inf, jnp.exp(m_prev - m_new), 0.0)
        p = jnp.exp(s - m_new)
        if apply_mask:
            p = jnp.where(mask, p, 0.0)                      # kill masked cols
        l_scr[...] = alpha * l_scr[...] + jnp.sum(p, axis=-1, keepdims=True)
        acc_scr[...] = alpha * acc_scr[...] + jnp.dot(
            p.astype(v.dtype), v, precision=precision,
            preferred_element_type=jnp.float32)
        m_scr[...] = m_new

    @pl.when(jnp.logical_and(in_range, needs_mask))
    def _boundary():
        _step(True)

    @pl.when(jnp.logical_and(in_range, jnp.logical_not(needs_mask)))
    def _interior():
        _step(False)

    @pl.when(ki == nk - 1)
    def _finalize():
        inv = pl.reciprocal(l_scr[...], approx=True)         # EUP slot, ~free
        o_ref[0] = (acc_scr[...] * inv).reshape(tq, hq, d).astype(o_ref.dtype)


def mqa_attention(q, kv, cos_q, sin_q, cos_k, sin_k, *, window_left,
                  block_q=256, block_k=256):
    """q: (N, T, Hq, D); kv: (N, T, 2*D) = [k | v]  ->  (N, T, Hq, D)."""
    N, T, Hq, D = q.shape
    assert kv.shape == (N, T, 2 * D)
    tq = _pick_tile(T, block_q)
    tk = _pick_tile(T, block_k)
    kernel = functools.partial(_mqa_flash_kernel, window_left=window_left,
                               precision=_matmul_precision(q.dtype))
    return pl.pallas_call(
        kernel,
        out_shape=jax.ShapeDtypeStruct((N, T, Hq, D), q.dtype),
        grid_spec=pltpu.PrefetchScalarGridSpec(
            num_scalar_prefetch=0,
            grid=(N, T // tq, T // tk),
            in_specs=[
                pl.BlockSpec((1, tq, Hq, D), lambda b, i, j: (b, i, 0, 0)),
                pl.BlockSpec((1, tk, 2 * D), lambda b, i, j: (b, j, 0)),
                pl.BlockSpec((tq, D), lambda b, i, j: (i, 0)),   # cos (q rows)
                pl.BlockSpec((tq, D), lambda b, i, j: (i, 0)),   # sin (q rows)
                pl.BlockSpec((tk, D), lambda b, i, j: (j, 0)),   # cos (k rows)
                pl.BlockSpec((tk, D), lambda b, i, j: (j, 0)),   # sin (k rows)
            ],
            out_specs=pl.BlockSpec((1, tq, Hq, D), lambda b, i, j: (b, i, 0, 0)),
            scratch_shapes=[
                pltpu.VMEM((tq * Hq, D), q.dtype),        # rotated+scaled q
                pltpu.VMEM((tq * Hq, 1), jnp.float32),    # running max
                pltpu.VMEM((tq * Hq, 1), jnp.float32),    # running sum
                pltpu.VMEM((tq * Hq, D), jnp.float32),    # output accumulator
            ],
        ),
        compiler_params=pltpu.CompilerParams(
            dimension_semantics=("parallel", "parallel", "arbitrary"),
            vmem_limit_bytes=_VMEM_LIMIT),
    )(q, kv, cos_q, sin_q, cos_k, sin_k)


# ----------------------------------------------------------------------------
# Rotary tables (flash-attn RotaryEmbedding, interleaved=False / NeoX style).
# Roll formulation: rot(x) = x * cos_full + roll(x, D/2) * sin_signed
#   cos_full = [cos, cos], sin_signed = [-sin, sin]; softmax scale folded into
#   the q tables so the kernel never multiplies the score matrix.
# ----------------------------------------------------------------------------
def rotary_tables(T, D, *, q_scale, base=10000.0):
    inv_freq = 1.0 / (base ** (jnp.arange(0, D, 2, dtype=jnp.float32) / D))
    t = jnp.arange(T, dtype=jnp.float32)
    freqs = jnp.outer(t, inv_freq)                   # (T, D/2)
    cos = jnp.cos(freqs)
    sin = jnp.sin(freqs)
    cos_full = jnp.concatenate([cos, cos], axis=-1)          # (T, D)
    sin_signed = jnp.concatenate([-sin, sin], axis=-1)       # (T, D)
    return (cos_full * q_scale, sin_signed * q_scale, cos_full, sin_signed)


# ----------------------------------------------------------------------------
# SlidingMQA forward
# ----------------------------------------------------------------------------
def sliding_mqa_forward(x, params, *, head_dim, q_heads, kv_heads, window_size,
                        block_q=256, block_k=256):
    assert kv_heads == 1, "multi-query attention: kv_heads must be 1"
    N, T, C = x.shape
    D = head_dim
    x2 = x.reshape(N * T, C)

    # Projections consume the PyTorch (out_features, in_features) weights
    # directly (no .T copy in HBM).
    q = linear(x2, params["wq"]).reshape(N, T, q_heads, D)
    kv = linear(x2, params["wkv"]).reshape(N, T, 2 * D)      # [k | v] last axis

    cos_q, sin_q, cos_k, sin_k = rotary_tables(T, D, q_scale=D ** -0.5)

    # flash_attn semantics: window_size=(-window_size, 0) -> negative left
    # window -> unbounded left window -> plain causal attention.
    o = mqa_attention(q, kv, cos_q, sin_q, cos_k, sin_k,
                      window_left=-window_size,
                      block_q=block_q, block_k=block_k)

    o2 = o.reshape(N * T, q_heads * D)
    return linear(o2, params["wo"]).reshape(N, T, C)


# ----------------------------------------------------------------------------
# Pure-JAX reference (for correctness check)
# ----------------------------------------------------------------------------
def _apply_rotary_ref(x, base=10000.0):
    _, T, _, D = x.shape
    half = D // 2
    inv_freq = 1.0 / (base ** (jnp.arange(0, D, 2, dtype=jnp.float32) / D))
    t = jnp.arange(T, dtype=jnp.float32)
    freqs = jnp.outer(t, inv_freq)
    cos = jnp.cos(freqs)[None, :, None, :]
    sin = jnp.sin(freqs)[None, :, None, :]
    x1, x2 = x[..., :half], x[..., half:]
    return jnp.concatenate([x1 * cos - x2 * sin, x1 * sin + x2 * cos], axis=-1)


def sliding_mqa_reference(x, params, *, head_dim, q_heads, kv_heads, window_size):
    N, T, C = x.shape
    hp = lax.Precision.HIGHEST
    q = jnp.matmul(x, params["wq"].T, precision=hp).reshape(N, T, q_heads, head_dim)
    kv = jnp.matmul(x, params["wkv"].T, precision=hp).reshape(
        N, T, 2, kv_heads, head_dim)
    q = _apply_rotary_ref(q)
    k = _apply_rotary_ref(kv[:, :, 0])[:, :, 0]
    v = kv[:, :, 1, 0]
    s = jnp.einsum("nihd,njd->nhij", q, k, precision=hp) * head_dim ** -0.5
    i = jnp.arange(T)[:, None]
    j = jnp.arange(T)[None, :]
    mask = j <= i                      # negative left window => causal only
    s = jnp.where(mask[None, None], s, -jnp.inf)
    p = jax.nn.softmax(s, axis=-1)
    o = jnp.einsum("nhij,njd->nihd", p, v, precision=hp).reshape(N, T, C)
    return jnp.matmul(o, params["wo"].T, precision=hp)


if __name__ == "__main__":
    # Module-default channel structure (dim == q_heads * head_dim), small
    # batch / sequence; small attention blocks to exercise the flash tiling,
    # causal tile skipping and boundary masking.
    dim, head_dim, q_heads, kv_heads, window_size = 1024, 128, 8, 1, 1024
    N, T = 2, 64

    key = jax.random.PRNGKey(0)
    k1, k2, k3, k4 = jax.random.split(key, 4)
    std = dim ** (-0.5)
    params = {
        "wq": jax.random.normal(k1, (q_heads * head_dim, dim), jnp.float32) * std,
        "wkv": jax.random.normal(k2, (2 * kv_heads * head_dim, dim), jnp.float32) * std,
        "wo": jax.random.normal(k3, (dim, dim), jnp.float32) * std,
    }
    x = jax.random.normal(k4, (N, T, dim), jnp.float32)

    out = sliding_mqa_forward(x, params, head_dim=head_dim, q_heads=q_heads,
                              kv_heads=kv_heads, window_size=window_size,
                              block_q=16, block_k=16)
    out = jax.block_until_ready(out)

    ref = sliding_mqa_reference(x, params, head_dim=head_dim, q_heads=q_heads,
                                kv_heads=kv_heads, window_size=window_size)
    # Kernel uses HIGHEST-precision f32 contractions to match the reference;
    # 1e-2 tolerance leaves margin for the approx softmax reciprocal and any
    # residual MXU / accumulation-order differences.
    np.testing.assert_allclose(np.asarray(out), np.asarray(ref),
                               atol=1e-2, rtol=1e-2)
    print("KERNEL_OK")
</pallas_src>

<mosaic_0001>
module attributes {stable_mosaic.version = 11 : i64} {
  func.func @_linear_kernel(%arg0: i32, %arg1: i32, %arg2: i32, %arg3: memref<128x512xf32, #tpu.memory_space<vmem>>, %arg4: memref<256x512xf32, #tpu.memory_space<vmem>>, %arg5: memref<128x256xf32, #tpu.memory_space<vmem>>, %arg6: memref<128x256xf32, #tpu.memory_space<vmem>>) attributes {dimension_semantics = [#tpu.dimension_semantics<parallel>, #tpu.dimension_semantics<parallel>, #tpu.dimension_semantics<arbitrary>], iteration_bounds = array<i64: 1, 4, 2>, scalar_prefetch = 0 : i64, scratch_operands = 1 : i64, tpu.core_type = #tpu.core_type<tc>, window_params = [{transform_indices = @transform_0, window_bounds = array<i64: 128, 512>}, {transform_indices = @transform_1, window_bounds = array<i64: 256, 512>}, {transform_indices = @transform_2, window_bounds = array<i64: 128, 256>}]} {
    %c0_i32 = arith.constant 0 : i32
    %0 = arith.cmpi eq, %arg2, %c0_i32 : i32
    %1 = arith.extui %0 : i1 to i32
    %c0_i32_0 = arith.constant 0 : i32
    %2 = arith.cmpi ne, %1, %c0_i32_0 : i32
    scf.if %2 {
      %cst_9 = arith.constant 0.000000e+00 : f32
      %12 = vector.broadcast %cst_9 : f32 to vector<128x256xf32>
      %c0_10 = arith.constant 0 : index
      %c0_11 = arith.constant 0 : index
      %13 = vector.load %arg6[%c0_10, %c0_11] : memref<128x256xf32, #tpu.memory_space<vmem>>, vector<128x256xf32>
      tpu.vector_store %arg6[%c0_10, %c0_11], %12 {strides = array<i32>} : memref<128x256xf32, #tpu.memory_space<vmem>>, vector<128x256xf32>,
    } else {
    }
    %c0 = arith.constant 0 : index
    %c0_1 = arith.constant 0 : index
    %3 = vector.load %arg6[%c0, %c0_1] : memref<128x256xf32, #tpu.memory_space<vmem>>, vector<128x256xf32>
    %c0_2 = arith.constant 0 : index
    %c0_3 = arith.constant 0 : index
    %4 = vector.load %arg3[%c0_2, %c0_3] : memref<128x512xf32, #tpu.memory_space<vmem>>, vector<128x512xf32>
    %c0_4 = arith.constant 0 : index
    %c0_5 = arith.constant 0 : index
    %5 = vector.load %arg4[%c0_4, %c0_5] : memref<256x512xf32, #tpu.memory_space<vmem>>, vector<256x512xf32>
    %cst = arith.constant dense<0.000000e+00> : vector<128x256xf32>
    %6 = tpu.matmul %4, %5, %cst {dimension_numbers = #tpu.dot_dimension_numbers<[1], [1], [0], [0], [0, 0, 1, 0], [], []>, precision = #tpu.contract_precision<fp32>} : vector<128x512xf32>, vector<256x512xf32>, vector<128x256xf32> -> vector<128x256xf32>
    %7 = arith.addf %3, %6 : vector<128x256xf32>
    %c0_6 = arith.constant 0 : index
    %c0_7 = arith.constant 0 : index
    %8 = vector.load %arg6[%c0_6, %c0_7] : memref<128x256xf32, #tpu.memory_space<vmem>>, vector<128x256xf32>
    tpu.vector_store %arg6[%c0_6, %c0_7], %7 {strides = array<i32>} : memref<128x256xf32, #tpu.memory_space<vmem>>, vector<128x256xf32>,
    %c1_i32 = arith.constant 1 : i32
    %9 = arith.cmpi eq, %arg2, %c1_i32 : i32
    %10 = arith.extui %9 : i1 to i32
    %c0_i32_8 = arith.constant 0 : i32
    %11 = arith.cmpi ne, %10, %c0_i32_8 : i32
    scf.if %11 {
      %c0_9 = arith.constant 0 : index
      %c0_10 = arith.constant 0 : index
      %12 = vector.load %arg6[%c0_9, %c0_10] : memref<128x256xf32, #tpu.memory_space<vmem>>, vector<128x256xf32>
      %c0_11 = arith.constant 0 : index
      %c0_12 = arith.constant 0 : index
      %13 = vector.load %arg5[%c0_11, %c0_12] : memref<128x256xf32, #tpu.memory_space<vmem>>, vector<128x256xf32>
      tpu.vector_store %arg5[%c0_11, %c0_12], %12 {strides = array<i32>} : memref<128x256xf32, #tpu.memory_space<vmem>>, vector<128x256xf32>,
    } else {
    }
    return
  }
  func.func @transform_0(%arg0: i32, %arg1: i32, %arg2: i32) -> (i32, i32) {
    %c0_i32 = arith.constant 0 : i32
    return %arg0, %arg2 : i32, i32
  }
  func.func @transform_1(%arg0: i32, %arg1: i32, %arg2: i32) -> (i32, i32) {
    %c0_i32 = arith.constant 0 : i32
    return %arg1, %arg2 : i32, i32
  }
  func.func @transform_2(%arg0: i32, %arg1: i32, %arg2: i32) -> (i32, i32) {
    %c0_i32 = arith.constant 0 : i32
    return %arg0, %arg1 : i32, i32
  }
}

</mosaic_0001>

<bundles_post_ra>
// kernel: tpu_custom_call.1
= control target key start
LH: loop header
LB: loop body
LE: loop exit
PB: predicated region body
PF: predicated region fallthrough
CT: control target
= control target key end

     0   :  { %s12063_s0 = inlined_call_operand.hbm [shape: f32[128,1024], index: 0, kind: input, shape index: {}]   ;;  %s12064_s1 = inlined_call_operand.hbm [shape: f32[1024,1024], index: 1, kind: input, shape index: {}]   ;;  %s12065_s2 = inlined_call_operand.hbm [shape: f32[128,1024], index: 2, kind: output, shape index: {}]  }
   0x1   :  { %12568 = sst [smem:[#allocation278_spill]] %s12063_s0 }
   0x2   :  { %12569 = sst [smem:[#allocation279_spill]] %s12065_s2 }
   0x3   :  { %7 = vsyncpa [#allocation4], 0 }
   0x4   :  { %9 = vsyncpa [#allocation4 + $0x1], 0 }
   0x5   :  { %10 = vsyncpa [#allocation7], 0 }
   0x6   :  { %12 = vsyncpa [#allocation7 + $0x1], 0 }
   0x7   :  { %13 = vsyncpa [#allocation5], 0 }
   0x8   :  { %15 = vsyncpa [#allocation5 + $0x1], 0  ;;  %s7619_s9 = smov 0   ;;  %s7621_s10 = smov 0  }
   0x9   :  { %s7623_s11 = smov 0   ;;  %s7625_s12 = smov 0  }
   0xa   :  { %s7627_s13 = smov 0   ;;  %s7629_s14 = smov 0  }
   0xb   :  { %s7631_s15 = smov 0   ;;  %s7633_s16 = smov 0  }
   0xc   :  { %s7635_s17 = smov 0   ;;  %s7637_s18 = smov 0  }
   0xd   :  { %s7639_s19 = smov 0   ;;  %s7641_s20 = smov 0  }
   0xe   :  { %s7643_s21 = smov 0   ;;  %s7645_s22 = smov 0  }
   0xf LB: > { %12570 = sst [smem:[#allocation12_spill]] %s7551_s11  ;;  %s33_s23 = sadd.s32 1, %s7587_s20  ;;  %s7595_s22 = sphi %s7645_s22, %s21_s22   ;;  %s7591_s21 = sphi %s7643_s21, %s13331_s21   ;;  %s7587_s20 = sphi %s7641_s20, %s13330_s20   ;;  %s7583_s19 = sphi %s7639_s19, %s13329_s19   ;;  %s7579_s18 = sphi %s7637_s18, %s13328_s18   ;;  %s7575_s17 = sphi %s7635_s17, %s13319_s17   ;;  %s7571_s16 = sphi %s7633_s16, %s13327_s16   ;;  %s7567_s15 = sphi %s7631_s15, %s13326_s15   ;;  %s7563_s14 = sphi %s7629_s14, %s13317_s14   ;;  %s7559_s13 = sphi %s7627_s13, %s13325_s13   ;;  %s7555_s12 = sphi %s7625_s12, %s13324_s12   ;;  %s7551_s11 = sphi %s7623_s11, %s13315_s11   ;;  %s7547_s10 = sphi %s7621_s10, %s13323_s10   ;;  %s7543_s9 = sphi %s7619_s9, %s13322_s9  }
  0x10   : > { %12571 = sst [smem:[#allocation13_spill]] %s7563_s14  ;;  %s12066_s24 = sadd.s32 4294967295, %s7595_s22  }
  0x11   : > { %12572 = sst [smem:[#allocation14_spill]] %s7575_s17  ;;  %p7689_p0 = scmp.ge.s32.totalorder %s33_s23, 2 }
  0x12   : > { %p56_p1 = scmp.ne.s32.totalorder %s7575_s17, %s7571_s16  ;;  %p57_p2 = scmp.eq.s32.totalorder %s7595_s22, 0 }
  0x13   : > { %s13333_s23 = smov (%p7689_p0, %s33_s23), 0  ;;  %s49_s26 = sadd.s32 1, %s7575_s17 }
  0x14   : > { %12574 = sst [smem:[#allocation15_spill]] %s13333_s23  ;;  %p62_p3 = scmp.ne.s32.totalorder %s7571_s16, %s7567_s15 }
  0x15   : > { %s7704_s27 = ssub.s32 %s7587_s20, %s13333_s23  ;;  %p7708_p4 = scmp.eq.s32.totalorder %s12066_s24, 0 }
  0x16   : > { %p47_p5 = scmp.eq.s32.totalorder %s7704_s27, 0  ;;  %p7715_p6 = por %p57_p2, %p56_p1 }
  0x17   : > { %p7721_p7 = por %p7708_p4, %p62_p3  ;;  %p12069_p8 = scmp.lt.s32.totalorder %s7595_s22, 8 }
  0x18   : > { %s7726_s3 = scalar_select %p47_p5, %s7575_s17, %s49_s26  }
  0x19   : > { %s142_s4 = sand.u32 1, %s7575_s17   ;;  %s7244_s6 = sshll.u32 %s7587_s20, 5 }
  0x1a   : > { %12578 = sst [smem:[#allocation16_spill]] %s7726_s3  ;;  %s7225_s5 = sshll.u32 %s142_s4, 9 }
  0x1b   : > { %s12579_s0 = sld [smem:[#allocation278_spill]]  ;;  %s146_s24 = scalar_lea.vmem [#allocation3], %s7225_s5 }
  0x1c   : > { %s157_s23 = sshll.u32 %s146_s24, 4  ;;  %p7254_p9 = pnand %p12069_p8, %p7715_p6  ;;  %s158_s23 = int_to_ptr.vmem [resolvable:$true] %s157_s23 }
  0x1d   : > { %s143_s26 = scalar_lea.sflag [#allocation4], %s142_s4  ;;  %s12071_s5 = smov 512  }
  0x1e   : > { %s12072_s7 = smov 32   ;;  %p7233_p10 = scmp.ge.s32.totalorder %s7595_s22, 1 }
  0x1f   : > { %p190_p11 = scmp.lt.s32.totalorder %s7595_s22, 9  ;;  %s12580_s24 = sadd.s32 4294967295, %s7595_s22  }
  0x20   : > { %p7745_p12 = scmp.eq.s32.totalorder %s12580_s24, 7  ;;  %s7222_s8 = sadd.s32 4294967294, %s7595_s22  }
  0x21   : > { %s154_s15 = scalar_lea.hbm %s12579_s0, %s7244_s6  ;;  %s12070_s6 = smov 1024  }
  0x22   : > { %s155_s2 = sshll.u32 %s154_s15, 4  ;;  %p7749_p13 = pnand %p7233_p10, %p190_p11  ;;  %s156_s2 = int_to_ptr.hbm [resolvable:$true] %s155_s2 }
  0x23   : > { %7256 = dma.hbm_to_vmem [thread:$0]  (!%p7254_p9), %s156_s2, 8192, %s158_s23, %s143_s26, %s12070_s6, %s12071_s5, %s12072_s7  }
  0x24   : > { %s36_s15 = sadd.s32 1, %s7591_s21  ;;  %s77_s2 = sadd.s32 1, %s7563_s14 }
  0x25   : > { %s13335_s15 = smov (!%p7689_p0, %s36_s15), %s7591_s21  ;;  %p90_p1 = scmp.ne.s32.totalorder %s7559_s13, %s7555_s12 }
  0x26   : > { %p38_p3 = scmp.ge.s32.totalorder %s13335_s15, 4  ;;  %s105_s26 = sadd.s32 1, %s7551_s11 }
  0x27   : > { %p7765_p6 = por %p90_p1, %p7708_p4  ;;  %p115_p0 = scmp.ne.s32.totalorder %s7551_s11, %s7547_s10 }
  0x28   : > { %s13337_s15 = smov (%p38_p3, %s13335_s15), 0  ;;  %p121_p9 = scmp.ne.s32.totalorder %s7547_s10, %s7543_s9 }
  0x29   : > { %12584 = sst [smem:[#allocation17_spill]] %s13337_s15  ;;  %s72_s12 = ssub.s32 %s7591_s21, %s13337_s15 }
  0x2a   : > { %p122_p10 = scmp.eq.s32.totalorder %s7222_s8, 7  ;;  %s74_s25 = sor.u32 %s72_s12, %s7704_s27 }
  0x2b   : > { %p103_p11 = scmp.eq.s32.totalorder %s72_s12, 0  ;;  %p75_p8 = scmp.eq.s32.totalorder %s74_s25, 0 }
  0x2c   : > { %p7781_p5 = por %p7745_p12, %p115_p0  ;;  %p7791_p4 = por %p122_p10, %p121_p9 }
  0x2d   : > { %s7786_s24 = scalar_select %p103_p11, %s7551_s11, %s105_s26  }
  0x2e   : > { %s7789_s6 = scalar_select %p75_p8, %s7563_s14, %s77_s2  }
  0x2f   : > { %12586 = sst [smem:[#allocation18_spill]] %s7786_s24  ;;  %s167_s7 = sand.u32 1, %s7563_s14  }
  0x30   : > { %12587 = sst [smem:[#allocation19_spill]] %s7789_s6  ;;  %p12589_p1 = scmp.ne.s32.totalorder %s7563_s14, %s7559_s13 }
  0x31   : > { %s7228_s27 = sshll.u32 %s167_s7, 10  ;;  %s7230_s8 = sshll.u32 %s7587_s20, 2 }
  0x32   : > { %p86_p3 = por %p12589_p1, %p57_p2  ;;  %s7245_s12 = sshll.u32 %s7591_s21, 8 }
  0x33   : > { %s171_s29 = scalar_lea.vmem [#allocation6], %s7228_s27  ;;  %s177_s0 = sadd.s32 %s7245_s12, %s7230_s8 }
  0x34   : > { %s182_s25 = sshll.u32 %s171_s29, 4  ;;  %s7232_s15 = sshll.u32 %s177_s0, 3  ;;  %s183_s25 = int_to_ptr.vmem [resolvable:$true] %s182_s25 }
  0x35   : > { %p12590_p12 = scmp.lt.s32.totalorder %s7595_s22, 8  ;;  %s179_s3 = scalar_lea.hbm %s12064_s1, %s7232_s15 }
  0x36   : > { %s180_s17 = sshll.u32 %s179_s3, 4  ;;  %s168_s6 = scalar_lea.sflag [#allocation7], %s167_s7  ;;  %s181_s17 = int_to_ptr.hbm [resolvable:$true] %s180_s17 }
  0x37   : > { %p7257_p0 = pnand %p12590_p12, %p86_p3  ;;  %s12591_s24 = smov 32  }
  0x38   : > { %s12592_s14 = smov 512   ;;  %s12593_s11 = smov 1024  }
  0x39   : > { %7259 = dma.hbm_to_vmem [thread:$0]  (!%p7257_p0), %s181_s17, 16384, %s183_s25, %s168_s6, %s12593_s11, %s12592_s14, %s12591_s24  }
  0x3a   : > { %194 = sbr.rel (%p7749_p13) target bundleno = 1903 (0x76f), region = 28 }
  0x3f   : > { %s196_s0 = sand.u32 1, %s7571_s16  }
  0x40   : > { %s7234_s27 = sshll.u32 %s196_s0, 9  ;;  %s197_s8 = scalar_lea.sflag [#allocation4], %s196_s0 }
  0x41   : > { %s7814_s12 = scalar_lea.vmem [#allocation3], %s7234_s27 }
  0x42   : > { %7530 = dma.done.wait (%p7721_p7), %s197_s8, 8192  }
  0x43   : > { %7532 = vsyncadd (%p7721_p7), %s197_s8, 4294959104  ;;  %s206_s3 = sand.u32 1, %s7559_s13  }
  0x44   : > { %s7235_s7 = sshll.u32 %s206_s3, 10  ;;  %s207_s11 = scalar_lea.sflag [#allocation7], %s206_s3 }
  0x45   : > { %s7821_s14 = scalar_lea.vmem [#allocation6], %s7235_s7 }
  0x46   : > { %7534 = dma.done.wait (%p7765_p6), %s207_s11, 16384  }
  0x47   : > { %7536 = vsyncadd (%p7765_p6), %s207_s11, 4294950912  ;;  %s234_s17 = sand.u32 1, %s7547_s10   ;;  %p7237_p2 = scmp.ne.s32.totalorder %s7579_s18, 0 }
  0x48   : > { %s7236_s6 = sshll.u32 %s234_s17, 8 }
  0x49   : > { %s7830_s4 = scalar_lea.vmem [#allocation8], %s7236_s6  ;;  %246 = sbr.rel (%p7237_p2) target bundleno = 111 (0x6f), region = 40 }
  0x4e   : > { %v7600_v0 = vmov 0.0  }
  0x4f   : > { %247 = vst [vmem:[#allocation2 + $0xb0] sm:$0xff] %v7600_v0 }
  0x50   : > { %248 = vst [vmem:[#allocation2] sm:$0xff] %v7600_v0 }
  0x51   : > { %249 = vst [vmem:[#allocation2 + $0xd8] sm:$0xff] %v7600_v0 }
  0x52   : > { %250 = vst [vmem:[#allocation2 + $0x18] sm:$0xff] %v7600_v0 }
  0x53   : > { %251 = vst [vmem:[#allocation2 + $0x50] sm:$0xff] %v7600_v0 }
  0x54   : > { %252 = vst [vmem:[#allocation2 + $0x68] sm:$0xff] %v7600_v0 }
  0x55   : > { %253 = vst [vmem:[#allocation2 + $0x30] sm:$0xff] %v7600_v0 }
  0x56   : > { %254 = vst [vmem:[#allocation2 + $0x48] sm:$0xff] %v7600_v0 }
  0x57   : > { %255 = vst [vmem:[#allocation2 + $0x80] sm:$0xff] %v7600_v0 }
  0x58   : > { %256 = vst [vmem:[#allocation2 + $0x88] sm:$0xff] %v7600_v0 }
  0x59   : > { %257 = vst [vmem:[#allocation2 + $0xe8] sm:$0xff] %v7600_v0 }
  0x5a   : > { %258 = vst [vmem:[#allocation2 + $0xb8] sm:$0xff] %v7600_v0 }
  0x5b   : > { %259 = vst [vmem:[#allocation2 + $0x60] sm:$0xff] %v7600_v0 }
  0x5c   : > { %260 = vst [vmem:[#allocation2 + $0xf0] sm:$0xff] %v7600_v0 }
  0x5d   : > { %261 = vst [vmem:[#allocation2 + $0x8] sm:$0xff] %v7600_v0 }
  0x5e   : > { %262 = vst [vmem:[#allocation2 + $0x78] sm:$0xff] %v7600_v0 }
  0x5f   : > { %263 = vst [vmem:[#allocation2 + $0x38] sm:$0xff] %v7600_v0 }
  0x60   : > { %264 = vst [vmem:[#allocation2 + $0x58] sm:$0xff] %v7600_v0 }
  0x61   : > { %265 = vst [vmem:[#allocation2 + $0x40] sm:$0xff] %v7600_v0 }
  0x62   : > { %266 = vst [vmem:[#allocation2 + $0xc8] sm:$0xff] %v7600_v0 }
  0x63   : > { %267 = vst [vmem:[#allocation2 + $0xe0] sm:$0xff] %v7600_v0 }
  0x64   : > { %268 = vst [vmem:[#allocation2 + $0x90] sm:$0xff] %v7600_v0 }
  0x65   : > { %269 = vst [vmem:[#allocation2 + $0x70] sm:$0xff] %v7600_v0 }
  0x66   : > { %270 = vst [vmem:[#allocation2 + $0xc0] sm:$0xff] %v7600_v0 }
  0x67   : > { %271 = vst [vmem:[#allocation2 + $0xa8] sm:$0xff] %v7600_v0 }
  0x68   : > { %272 = vst [vmem:[#allocation2 + $0xd0] sm:$0xff] %v7600_v0 }
  0x69   : > { %273 = vst [vmem:[#allocation2 + $0x10] sm:$0xff] %v7600_v0 }
  0x6a   : > { %274 = vst [vmem:[#allocation2 + $0x28] sm:$0xff] %v7600_v0 }
  0x6b   : > { %275 = vst [vmem:[#allocation2 + $0xa0] sm:$0xff] %v7600_v0 }
  0x6c   : > { %276 = vst [vmem:[#allocation2 + $0xf8] sm:$0xff] %v7600_v0 }
  0x6d   : > { %277 = vst [vmem:[#allocation2 + $0x20] sm:$0xff] %v7600_v0 }
  0x6e   : > { %278 = vst [vmem:[#allocation2 + $0x98] sm:$0xff] %v7600_v0 }
  0x6f PF: > { %v435_v1 = vld [vmem:[%s7821_s14 + $0x1e0] sm:$0xff]  ;;  %p7238_p7 = scmp.ne.s32.totalorder %s7579_s18, 1 }
  0x70   : > { %v431_v2 = vld [vmem:[%s7821_s14 + $0x1c0] sm:$0xff]  ;;  %v7836_v4 = vand.u32 4294901760, %v435_v1 }
  0x71   : > { %v427_v3 = vld [vmem:[%s7821_s14 + $0x1a0] sm:$0xff]  ;;  %v7838_v5 = vand.u32 4294901760, %v431_v2 }
  0x72   : > { %v7840_v6 = vand.u32 4294901760, %v427_v3  ;;  %v423_v7 = vld [vmem:[%s7821_s14 + $0x180] sm:$0xff]  ;;  %504 = vmatpush.xpose.msra.mxu0 %v7836_v4  ;;  %v7845_v8 = vsub.f32 %v435_v1, %v7836_v4  ;;  %955 = vmatpush.xpose.msra.mxu3 %v7836_v4 }
  0x73   : > { %v7849_v9 = vsub.f32 %v431_v2, %v7838_v5  ;;  %v7851_v10 = vand.u32 4294901760, %v423_v7  ;;  %v419_v12 = vld [vmem:[%s7821_s14 + $0x160] sm:$0xff] }
  0x74   : > { %v7854_v11 = vsub.f32 %v427_v3, %v7840_v6  ;;  %827 = vmatpush.xpose.msra.mxu2 %v7845_v8  ;;  %v666_v13 = vand.u32 4294901760, %v7845_v8  ;;  %v7860_v15 = vand.u32 4294901760, %v419_v12  ;;  %v415_v20 = vld [vmem:[%s7821_s14 + $0x140] sm:$0xff] }
  0x75   : > { %v672_v14 = vand.u32 4294901760, %v7849_v9  ;;  %v7872_v19 = vsub.f32 %v423_v7, %v7851_v10  ;;  %v7876_v22 = vand.u32 4294901760, %v415_v20  ;;  %v411_v27 = vld [vmem:[%s7821_s14 + $0x120] sm:$0xff] }
  0x76   : > { %506 = vmatpush.xpose.msra.mxu0 %v7838_v5  ;;  %v667_v16 = vsub.f32 %v7845_v8, %v666_v13  ;;  %957 = vmatpush.xpose.msra.mxu3 %v7838_v5  ;;  %v678_v18 = vand.u32 4294901760, %v7854_v11  ;;  %v7884_v26 = vsub.f32 %v419_v12, %v7860_v15  ;;  %v7889_v28 = vand.u32 4294901760, %v411_v27  ;;  %v407_v33 = vld [vmem:[%s7821_s14 + $0x100] sm:$0xff] }
  0x77   : > { %v673_v17 = vsub.f32 %v7849_v9, %v672_v14  ;;  %v684_v25 = vand.u32 4294901760, %v7872_v19  ;;  %v7897_v32 = vsub.f32 %v415_v20, %v7876_v22  ;;  %v7909_v37 = vand.u32 4294901760, %v407_v33  ;;  %v403_v39 = vld [vmem:[%s7821_s14 + $0xe0] sm:$0xff] }
  0x78   : > { %v668_v21 = vand.u32 4294901760, %v667_v16  ;;  %830 = vmatpush.xpose.msra.mxu2 %v7849_v9  ;;  %v679_v24 = vsub.f32 %v7854_v11, %v678_v18  ;;  %v12091_v31 = vand.u32 4294901760, %v7884_v26  ;;  %v7903_v34 = vsub.f32 %v411_v27, %v7889_v28  ;;  %v399_v45 = vld [vmem:[%s7821_s14 + $0xc0] sm:$0xff] }
  0x79   : > { %v674_v23 = vand.u32 4294901760, %v673_v17  ;;  %v685_v30 = vsub.f32 %v7872_v19, %v684_v25  ;;  %v12087_v38 = vand.u32 4294901760, %v7897_v32  ;;  %v7920_v43 = vand.u32 4294901760, %v403_v39  ;;  %v395_v51 = vld [vmem:[%s7821_s14 + $0xa0] sm:$0xff]  ;;  %v436_v17 = vld [vmem:[%s7821_s14 + $0x1e8] sm:$0xff] }
  0x7a   : > { %508 = vmatpush.xpose.msra.mxu0 %v7840_v6  ;;  %669 = vmatpush.xpose.msra.mxu1 %v668_v21  ;;  %v680_v29 = vand.u32 4294901760, %v679_v24  ;;  %v691_v36 = vsub.f32 %v7884_v26, %v12091_v31  ;;  %v12086_v40 = vand.u32 4294901760, %v7903_v34  ;;  %v7923_v44 = vsub.f32 %v407_v33, %v7909_v37  ;;  %v391_v57 = vld [vmem:[%s7821_s14 + $0x80] sm:$0xff] }
  0x7b   : > { %959 = vmatpush.xpose.msra.mxu3 %v7840_v6  ;;  %v686_v35 = vand.u32 4294901760, %v685_v30  ;;  %v697_v42 = vsub.f32 %v7897_v32, %v12087_v38  ;;  %v7932_v48 = vand.u32 4294901760, %v399_v45  ;;  %v7936_v50 = vsub.f32 %v403_v39, %v7920_v43  ;;  %v387_v63 = vld [vmem:[%s7821_s14 + $0x60] sm:$0xff] }
  0x7c   : > { %833 = vmatpush.xpose.msra.mxu2 %v7854_v11  ;;  %v692_v41 = vand.u32 4294901760, %v691_v36  ;;  %v703_v46 = vsub.f32 %v7903_v34, %v12086_v40  ;;  %v12084_v49 = vand.u32 4294901760, %v7923_v44  ;;  %v7945_v54 = vand.u32 4294901760, %v395_v51  ;;  %v383_v12 = vld [vmem:[%s7821_s14 + $0x40] sm:$0xff]  ;;  %v432_v36 = vld [vmem:[%s7821_s14 + $0x1c8] sm:$0xff] }
  0x7d   : > { %v698_v47 = vand.u32 4294901760, %v697_v42  ;;  %v12083_v55 = vand.u32 4294901760, %v7936_v50  ;;  %v7949_v56 = vsub.f32 %v399_v45, %v7932_v48  ;;  %v7954_v58 = vand.u32 4294901760, %v391_v57  ;;  %v311_v27 = vld [vmem:[%s7814_s12] sm:$0xff] }
  0x7e   : > { %510 = vmatpush.xpose.msra.mxu0 %v7851_v10  ;;  %675 = vmatpush.xpose.msra.mxu1 %v674_v23  ;;  %v704_v52 = vand.u32 4294901760, %v703_v46  ;;  %v709_v53 = vsub.f32 %v7923_v44, %v12084_v49  ;;  %v7962_v62 = vsub.f32 %v395_v51, %v7945_v54  ;;  %v7974_v3 = vand.u32 4294901760, %v387_v63  ;;  %v375_v46 = vld [vmem:[%s7821_s14] sm:$0xff] }
  0x7f   : > { %961 = vmatpush.xpose.msra.mxu3 %v7851_v10  ;;  %v715_v60 = vsub.f32 %v7936_v50, %v12083_v55  ;;  %v12082_v61 = vand.u32 4294901760, %v7949_v56  ;;  %v7968_v0 = vsub.f32 %v391_v57, %v7954_v58  ;;  %v7986_v23 = vand.u32 4294901760, %v383_v12 }
  0x80   : > { %836 = vmatpush.xpose.msra.mxu2 %v7872_v19  ;;  %v710_v59 = vand.u32 4294901760, %v709_v53  ;;  %v12080_v7 = vand.u32 4294901760, %v7962_v62  ;;  %v7989_v24 = vsub.f32 %v387_v63, %v7974_v3  ;;  %v7995_v30 = vand.u32 4294901760, %v436_v17 }
  0x81   : > { %v716_v1 = vand.u32 4294901760, %v715_v60  ;;  %v721_v2 = vsub.f32 %v7949_v56, %v12082_v61  ;;  %v12079_v16 = vand.u32 4294901760, %v7968_v0  ;;  %v8008_v45 = vsub.f32 %v383_v12, %v7986_v23  ;;  %v319_v61 = vld [vmem:[%s7814_s12 + $0x40] sm:$0xff] }
  0x82   : > { %512 = vmatpush.xpose.msra.mxu0 %v7860_v15  ;;  %681 = vmatpush.xpose.msra.mxu1 %v680_v29  ;;  %v727_v21 = vsub.f32 %v7962_v62, %v12080_v7  ;;  %v379_v29 = vld [vmem:[%s7821_s14 + $0x20] sm:$0xff]  ;;  %v12077_v42 = vand.u32 4294901760, %v7989_v24  ;;  %v8016_v51 = vand.u32 4294901760, %v432_v36  ;;  %v8088_v40 = vand.u32 4294901760, %v319_v61 }
  0x83   : > { %963 = vmatpush.xpose.msra.mxu3 %v7860_v15  ;;  %v722_v20 = vand.u32 4294901760, %v721_v2  ;;  %v733_v33 = vsub.f32 %v7968_v0, %v12079_v16  ;;  %v12078_v60 = vand.u32 4294901760, %v8008_v45  ;;  %v428_v2 = vld [vmem:[%s7821_s14 + $0x1a8] sm:$0xff]  ;;  %v12610_v19 = vand.u32 4294901760, %v7884_v26 }
  0x84   : > { %839 = vmatpush.xpose.msra.mxu2 %v7884_v26  ;;  %v728_v39 = vand.u32 4294901760, %v727_v21  ;;  %v739_v57 = vsub.f32 %v7989_v24, %v12077_v42  ;;  %12601 = vst [vmem:[#allocation27_spill] sm:$0xff] %v8088_v40  ;;  %v8110_v8 = vsub.f32 %v319_v61, %v8088_v40 }
  0x86   : > { %514 = vmatpush.xpose.msra.mxu0 %v7876_v22  ;;  %687 = vmatpush.xpose.msra.mxu1 %v686_v35  ;;  %v8000_v35 = vand.u32 4294901760, %v311_v27  ;;  %12602 = vst [vmem:[#allocation28_spill] sm:$0xff] %v8110_v8 }
  0x87   : > { %965 = vmatpush.xpose.msra.mxu3 %v7876_v22 }
  0x88   : > { %842 = vmatpush.xpose.msra.mxu2 %v7897_v32  ;;  %12594 = vst [vmem:[#allocation20_spill] sm:$0xff] %v8000_v35  ;;  %v8019_v53 = vsub.f32 %v311_v27, %v8000_v35 }
  0x8a   : > { %516 = vmatpush.xpose.msra.mxu0 %v7889_v28  ;;  %693 = vmatpush.xpose.msra.mxu1 %v692_v41  ;;  %v8004_v41 = vand.u32 4294901760, %v379_v29  ;;  %12595 = vst [vmem:[#allocation21_spill] sm:$0xff] %v8019_v53  ;;  %v8042_v21 = vand.u32 4294901760, %v8019_v53 }
  0x8b   : > { %967 = vmatpush.xpose.msra.mxu3 %v7889_v28 }
  0x8c   : > { %845 = vmatpush.xpose.msra.mxu2 %v7903_v34  ;;  %v8029_v63 = vsub.f32 %v379_v29, %v8004_v41  ;;  %12596 = vst [vmem:[#allocation22_spill] sm:$0xff] %v8042_v21  ;;  %v740_v29 = vand.u32 4294901760, %v739_v57 }
  0x8e   : > { %518 = vmatpush.xpose.msra.mxu0 %v7909_v37  ;;  %699 = vmatpush.xpose.msra.mxu1 %v698_v47  ;;  %v8014_v47 = vsub.f32 %v436_v17, %v7995_v30  ;;  %v8037_v17 = vsub.f32 %v432_v36, %v8016_v51 }
  0x8f   : > { %969 = vmatpush.xpose.msra.mxu3 %v7909_v37 }
  0x90   : > { %848 = vmatpush.xpose.msra.mxu2 %v7923_v44  ;;  %v12081_v12 = vand.u32 4294901760, %v8014_v47  ;;  %v12088_v57 = vand.u32 4294901760, %v8037_v17 }
  0x92   : > { %520 = vmatpush.xpose.msra.mxu0 %v7920_v43  ;;  %705 = vmatpush.xpose.msra.mxu1 %v704_v52  ;;  %v734_v52 = vand.u32 4294901760, %v733_v33  ;;  %v745_v33 = vsub.f32 %v8008_v45, %v12078_v60  ;;  %v538_v60 = vsub.f32 %v8019_v53, %v8042_v21 }
  0x93   : > { %971 = vmatpush.xpose.msra.mxu3 %v7920_v43 }
  0x94   : > { %851 = vmatpush.xpose.msra.mxu2 %v7936_v50  ;;  %v8083_v49 = vand.u32 4294901760, %v538_v60 }
  0x96   : > { %522 = vmatpush.xpose.msra.mxu0 %v7932_v48  ;;  %711 = vmatpush.xpose.msra.mxu1 %v710_v59  ;;  %v8025_v59 = vand.u32 4294901760, %v375_v46  ;;  %12599 = vst [vmem:[#allocation25_spill] sm:$0xff] %v8083_v49 }
  0x97   : > { %973 = vmatpush.xpose.msra.mxu3 %v7932_v48 }
  0x98   : > { %854 = vmatpush.xpose.msra.mxu2 %v7949_v56  ;;  %v8052_v36 = vsub.f32 %v375_v46, %v8025_v59  ;;  %v746_v46 = vand.u32 4294901760, %v745_v33 }
  0x9a   : > { %524 = vmatpush.xpose.msra.mxu0 %v7945_v54  ;;  %717 = vmatpush.xpose.msra.mxu1 %v716_v1  ;;  %v315_v1 = vld [vmem:[%s7814_s12 + $0x20] sm:$0xff] }
  0x9b   : > { %975 = vmatpush.xpose.msra.mxu3 %v7945_v54  ;;  %v8044_v27 = vand.u32 4294901760, %v315_v1 }
  0x9c   : > { %857 = vmatpush.xpose.msra.mxu2 %v7962_v62 }
  0x9d   : > { %12597 = vst [vmem:[#allocation23_spill] sm:$0xff] %v8044_v27  ;;  %v8066_v16 = vsub.f32 %v315_v1, %v8044_v27  ;;  %v1479_v1 = vsub.f32 %v8037_v17, %v12088_v57 }
  0x9e   : > { %526 = vmatpush.xpose.msra.mxu0 %v7954_v58  ;;  %723 = vmatpush.xpose.msra.mxu1 %v722_v20  ;;  %v8039_v20 = vand.u32 4294901760, %v428_v2 }
  0x9f   : > { %977 = vmatpush.xpose.msra.mxu3 %v7954_v58  ;;  %12598 = vst [vmem:[#allocation24_spill] sm:$0xff] %v8066_v16  ;;  %v1480_v60 = vand.u32 4294901760, %v1479_v1  ;;  %v420_v1 = vld [vmem:[%s7821_s14 + $0x168] sm:$0xff] }
  0xa0   : > { %860 = vmatpush.xpose.msra.mxu2 %v7968_v0  ;;  %v8061_v42 = vsub.f32 %v428_v2, %v8039_v20  ;;  %v424_v2 = vld [vmem:[%s7821_s14 + $0x188] sm:$0xff]  ;;  %v8121_v31 = vand.u32 4294901760, %v420_v1 }
  0xa1   : > { %v8081_v33 = vand.u32 4294901760, %v424_v2 }
  0xa2   : > { %528 = vmatpush.xpose.msra.mxu0 %v7974_v3  ;;  %729 = vmatpush.xpose.msra.mxu1 %v728_v39  ;;  %v12085_v39 = vand.u32 4294901760, %v8029_v63  ;;  %v8132_v9 = vsub.f32 %v420_v1, %v8121_v31 }
  0xa3   : > { %979 = vmatpush.xpose.msra.mxu3 %v7974_v3  ;;  %v8095_v57 = vsub.f32 %v424_v2, %v8081_v33 }
  0xa4   : > { %863 = vmatpush.xpose.msra.mxu2 %v7989_v24  ;;  %v751_v7 = vsub.f32 %v8029_v63, %v12085_v39  ;;  %v8086_v39 = vand.u32 4294901760, %v8066_v16 }
  0xa6   : > { %530 = vmatpush.xpose.msra.mxu0 %v7986_v23  ;;  %735 = vmatpush.xpose.msra.mxu1 %v734_v52  ;;  %v1473_v52 = vsub.f32 %v8014_v47, %v12081_v12  ;;  %v12090_v12 = vand.u32 4294901760, %v8052_v36  ;;  %12600 = vst [vmem:[#allocation26_spill] sm:$0xff] %v8086_v39  ;;  %v752_v38 = vand.u32 4294901760, %v751_v7  ;;  %v546_v2 = vsub.f32 %v8066_v16, %v8086_v39 }
  0xa7   : > { %981 = vmatpush.xpose.msra.mxu3 %v7986_v23 }
  0xa8   : > { %866 = vmatpush.xpose.msra.mxu2 %v8008_v45  ;;  %v1474_v55 = vand.u32 4294901760, %v1473_v52  ;;  %v757_v52 = vsub.f32 %v8052_v36, %v12090_v12  ;;  %v8123_v61 = vand.u32 4294901760, %v546_v2 }
  0xaa   : > { %532 = vmatpush.xpose.msra.mxu0 %v8004_v41  ;;  %741 = vmatpush.xpose.msra.mxu1 %v740_v29  ;;  %v12089_v29 = vand.u32 4294901760, %v8061_v42  ;;  %12603 = vst [vmem:[#allocation29_spill] sm:$0xff] %v8123_v61 }
  0xab   : > { %983 = vmatpush.xpose.msra.mxu3 %v8004_v41 }
  0xac   : > { %869 = vmatpush.xpose.msra.mxu2 %v8029_v63  ;;  %v1485_v7 = vsub.f32 %v8061_v42, %v12089_v29 }
  0xae   : > { %534 = vmatpush.xpose.msra.mxu0 %v8025_v59  ;;  %747 = vmatpush.xpose.msra.mxu1 %v746_v46  ;;  %v12093_v46 = vand.u32 4294901760, %v8095_v57  ;;  %v1486_v29 = vand.u32 4294901760, %v1485_v7 }
  0xaf   : > { %985 = vmatpush.xpose.msra.mxu3 %v8025_v59 }
  0xb0   : > { %872 = vmatpush.xpose.msra.mxu2 %v8052_v36  ;;  %v1491_v12 = vsub.f32 %v8095_v57, %v12093_v46 }
  0xb1   : > { %540 = vmatmul.f32.vlgmr.msra.gmra.mxu0 %v8083_v49 }
  0xb2   : > { %1086 = vmatpush.xpose.msrb.mxu0 %v666_v13  ;;  %753 = vmatpush.xpose.msra.mxu1 %v752_v38  ;;  %v758_v13 = vand.u32 4294901760, %v757_v52  ;;  %v8127_v38 = vand.u32 4294901760, %v8110_v8 }
  0xb3   : > { %1475 = vmatpush.xpose.msrb.mxu3 %v1474_v55  ;;  %v323_v55 = vld [vmem:[%s7814_s12 + $0x60] sm:$0xff]  ;;  %875 = vmatmul.f32.vlgmr.msra.gmra.mxu2 %v8019_v53 }
  0xb4   : > { %1310 = vmatpush.xpose.msrb.mxu2 %v7995_v30  ;;  %989 = vmatmul.f32.vlgmr.msra.gmra.mxu3 %v8042_v21  ;;  %12604 = vst [vmem:[#allocation30_spill] sm:$0xff] %v8127_v38  ;;  %v8129_v52 = vand.u32 4294901760, %v323_v55  ;;  %v554_v7 = vsub.f32 %v8110_v8, %v8127_v38 }
  0xb6   : > { %1090 = vmatpush.xpose.msrb.mxu0 %v672_v14  ;;  %12605 = vst [vmem:[#allocation31_spill] sm:$0xff] %v8129_v52  ;;  %759 = vmatpush.xpose.msra.mxu1 %v758_v13  ;;  %v1492_v14 = vand.u32 4294901760, %v1491_v12  ;;  %v8143_v2 = vsub.f32 %v323_v55, %v8129_v52  ;;  %v8158_v13 = vand.u32 4294901760, %v554_v7 }
  0xb7   : > { %1481 = vmatpush.xpose.msrb.mxu3 %v1480_v60  ;;  %v12092_v60 = vand.u32 4294901760, %v8132_v9 }
  0xb8   : > { %1312 = vmatpush.xpose.msrb.mxu2 %v8016_v51  ;;  %12606 = vst [vmem:[#allocation32_spill] sm:$0xff] %v8143_v2  ;;  %v8161_v55 = vand.u32 4294901760, %v8143_v2 }
  0xb9   : > { %548 = vmatmul.f32.gmra.mxu0 %v8123_v61  ;;  %761 = vmatmul.f32.vlgmr.msra.gmra.mxu1 %v8000_v35  ;;  %v1497_v11 = vsub.f32 %v8132_v9, %v12092_v60  ;;  %12607 = vst [vmem:[#allocation33_spill] sm:$0xff] %v8158_v13 }
  0xba   : > { %1213 = vmatpush.xpose.msrb.mxu1 %v7836_v4  ;;  %1094 = vmatpush.xpose.msrb.mxu0 %v678_v18  ;;  %v327_v4 = vld [vmem:[%s7814_s12 + $0x80] sm:$0xff]  ;;  %v416_v18 = vld [vmem:[%s7821_s14 + $0x148] sm:$0xff]  ;;  %12608 = vst [vmem:[#allocation34_spill] sm:$0xff] %v8161_v55 }
  0xbb   : > { %1487 = vmatpush.xpose.msrb.mxu3 %v1486_v29  ;;  %880 = vmatmul.f32.gmra.mxu2 %v8066_v16  ;;  %v1498_v12 = vand.u32 4294901760, %v1497_v11  ;;  %v8156_v29 = vand.u32 4294901760, %v416_v18  ;;  %v8163_v1 = vand.u32 4294901760, %v327_v4  ;;  %v412_v11 = vld [vmem:[%s7821_s14 + $0x128] sm:$0xff]  ;;  %v12664_v16 = vand.u32 4294901760, %v8037_v17 }
  0xbc   : > { %995 = vmatmul.f32.gmra.mxu3 %v8086_v39  ;;  %1314 = vmatpush.xpose.msrb.mxu2 %v8039_v20 }
  0xbd   : > { %12609 = vst [vmem:[#allocation35_spill] sm:$0xff] %v8163_v1  ;;  %v8178_v7 = vsub.f32 %v327_v4, %v8163_v1  ;;  %v8191_v4 = vand.u32 4294901760, %v412_v11 }
  0xbe   : > { %1215 = vmatpush.xpose.msrb.mxu1 %v7838_v5  ;;  %1098 = vmatpush.xpose.msrb.mxu0 %v684_v25  ;;  %v8167_v5 = vsub.f32 %v416_v18, %v8156_v29  ;;  %v12612_v18 = vand.u32 4294901760, %v7897_v32  ;;  %v12616_v32 = vand.u32 4294901760, %v7903_v34  ;;  %v408_v34 = vld [vmem:[%s7821_s14 + $0x108] sm:$0xff] }
  0xbf   : > { %1493 = vmatpush.xpose.msrb.mxu3 %v1492_v14  ;;  %v562_v14 = vsub.f32 %v8143_v2, %v8161_v55  ;;  %12611 = vst [vmem:[#allocation36_spill] sm:$0xff] %v8178_v7  ;;  %v8196_v60 = vand.u32 4294901760, %v8178_v7 }
  0xc0   : > { %1316 = vmatpush.xpose.msrb.mxu2 %v8081_v33  ;;  %v12094_v25 = vand.u32 4294901760, %v8167_v5 }
  0xc1   : > { %556 = vmatmul.f32.gmra.mxu0 %v8158_v13  ;;  %765 = vmatmul.f32.gmra.mxu1 %v8044_v27  ;;  %12614 = vst [vmem:[#allocation38_spill] sm:$0xff] %v8196_v60 }
  0xc2   : > { %1217 = vmatpush.xpose.msrb.mxu1 %v7840_v6  ;;  %1102 = vmatpush.xpose.msrb.mxu0 %v12610_v19  ;;  %v331_v6 = vld [vmem:[%s7814_s12 + $0xa0] sm:$0xff]  ;;  %v1503_v26 = vsub.f32 %v8167_v5, %v12094_v25  ;;  %v8193_v19 = vand.u32 4294901760, %v562_v14 }
  0xc3   : > { %1499 = vmatpush.xpose.msrb.mxu3 %v1498_v12  ;;  %885 = vmatmul.f32.gmra.mxu2 %v8110_v8  ;;  %v8198_v46 = vand.u32 4294901760, %v331_v6 }
  0xc4   : > { %1001 = vmatmul.f32.gmra.mxu3 %v8127_v38  ;;  %1318 = vmatpush.xpose.msrb.mxu2 %v8121_v31  ;;  %v1504_v12 = vand.u32 4294901760, %v1503_v26  ;;  %12613 = vst [vmem:[#allocation37_spill] sm:$0xff] %v8193_v19  ;;  %v570_v26 = vsub.f32 %v8178_v7, %v8196_v60 }
  0xc5   : > { %12615 = vst [vmem:[#allocation39_spill] sm:$0xff] %v8198_v46 }
  0xc6   : > { %1219 = vmatpush.xpose.msrb.mxu1 %v7851_v10  ;;  %1106 = vmatpush.xpose.msrb.mxu0 %v12612_v18  ;;  %v8202_v10 = vsub.f32 %v412_v11, %v8191_v4  ;;  %v8213_v18 = vsub.f32 %v331_v6, %v8198_v46  ;;  %v335_v11 = vld [vmem:[%s7814_s12 + $0xc0] sm:$0xff]  ;;  %v12618_v6 = vand.u32 4294901760, %v7923_v44  ;;  %v8228_v25 = vand.u32 4294901760, %v570_v26 }
  0xc7   : > { %1505 = vmatpush.xpose.msrb.mxu3 %v1504_v12 }
  0xc8   : > { %1320 = vmatpush.xpose.msrb.mxu2 %v8156_v29  ;;  %v12097_v14 = vand.u32 4294901760, %v8202_v10  ;;  %12617 = vst [vmem:[#allocation40_spill] sm:$0xff] %v8213_v18 }
  0xc9   : > { %564 = vmatmul.f32.gmra.mxu0 %v8193_v19  ;;  %769 = vmatmul.f32.gmra.mxu1 %v8088_v40  ;;  %12619 = vst [vmem:[#allocation41_spill] sm:$0xff] %v8228_v25  ;;  %v8233_v19 = vand.u32 4294901760, %v335_v11 }
  0xca   : > { %1221 = vmatpush.xpose.msrb.mxu1 %v7860_v15  ;;  %1110 = vmatpush.xpose.msrb.mxu0 %v12616_v32  ;;  %v1509_v15 = vsub.f32 %v8202_v10, %v12097_v14  ;;  %v8224_v32 = vand.u32 4294901760, %v408_v34  ;;  %v12624_v14 = vand.u32 4294901760, %v7949_v56 }
  0xcb   : > { %890 = vmatmul.f32.gmra.mxu2 %v8143_v2  ;;  %12621 = vst [vmem:[#allocation43_spill] sm:$0xff] %v8233_v19 }
  0xcc   : > { %1007 = vmatmul.f32.gmra.mxu3 %v8161_v55  ;;  %1322 = vmatpush.xpose.msrb.mxu2 %v8191_v4  ;;  %v1510_v12 = vand.u32 4294901760, %v1509_v15  ;;  %v8231_v55 = vand.u32 4294901760, %v8213_v18  ;;  %v12622_v15 = vand.u32 4294901760, %v7936_v50  ;;  %v404_v50 = vld [vmem:[%s7821_s14 + $0xe8] sm:$0xff] }
  0xce   : > { %1223 = vmatpush.xpose.msrb.mxu1 %v7876_v22  ;;  %1114 = vmatpush.xpose.msrb.mxu0 %v12618_v6  ;;  %12620 = vst [vmem:[#allocation42_spill] sm:$0xff] %v8231_v55  ;;  %v8237_v22 = vsub.f32 %v408_v34, %v8224_v32  ;;  %v578_v26 = vsub.f32 %v8213_v18, %v8231_v55  ;;  %v339_v34 = vld [vmem:[%s7814_s12 + $0xe0] sm:$0xff] }
  0xcf   : > { %1511 = vmatpush.xpose.msrb.mxu3 %v1510_v12  ;;  %v8248_v12 = vsub.f32 %v335_v11, %v8233_v19 }
  0xd0   : > { %1324 = vmatpush.xpose.msrb.mxu2 %v8224_v32  ;;  %v12100_v44 = vand.u32 4294901760, %v8237_v22  ;;  %v8262_v11 = vand.u32 4294901760, %v578_v26 }
  0xd1   : > { %572 = vmatmul.f32.gmra.mxu0 %v8228_v25  ;;  %773 = vmatmul.f32.gmra.mxu1 %v8129_v52  ;;  %12623 = vst [vmem:[#allocation44_spill] sm:$0xff] %v8248_v12  ;;  %v8267_v25 = vand.u32 4294901760, %v339_v34 }
  0xd2   : > { %1225 = vmatpush.xpose.msrb.mxu1 %v7889_v28  ;;  %1118 = vmatpush.xpose.msrb.mxu0 %v12622_v15  ;;  %v1515_v28 = vsub.f32 %v8237_v22, %v12100_v44  ;;  %v8258_v15 = vand.u32 4294901760, %v404_v50  ;;  %12625 = vst [vmem:[#allocation45_spill] sm:$0xff] %v8262_v11  ;;  %v12630_v44 = vand.u32 4294901760, %v7968_v0 }
  0xd3   : > { %895 = vmatmul.f32.gmra.mxu2 %v8178_v7  ;;  %12627 = vst [vmem:[#allocation47_spill] sm:$0xff] %v8267_v25 }
  0xd4   : > { %1013 = vmatmul.f32.gmra.mxu3 %v8196_v60  ;;  %v1516_v6 = vand.u32 4294901760, %v1515_v28  ;;  %v8265_v60 = vand.u32 4294901760, %v8248_v12  ;;  %1326 = vmatpush.xpose.msrb.mxu2 %v8258_v15  ;;  %v8282_v28 = vsub.f32 %v339_v34, %v8267_v25 }
  0xd6   : > { %1227 = vmatpush.xpose.msrb.mxu1 %v7909_v37  ;;  %1122 = vmatpush.xpose.msrb.mxu0 %v12624_v14  ;;  %12626 = vst [vmem:[#allocation46_spill] sm:$0xff] %v8265_v60  ;;  %v8271_v37 = vsub.f32 %v404_v50, %v8258_v15  ;;  %v12628_v14 = vand.u32 4294901760, %v7962_v62  ;;  %v586_v26 = vsub.f32 %v8248_v12, %v8265_v60  ;;  %v343_v50 = vld [vmem:[%s7814_s12 + $0x100] sm:$0xff]  ;;  %v400_v62 = vld [vmem:[%s7821_s14 + $0xc8] sm:$0xff] }
  0xd7   : > { %1517 = vmatpush.xpose.msrb.mxu3 %v1516_v6  ;;  %12629 = vst [vmem:[#allocation48_spill] sm:$0xff] %v8282_v28 }
  0xd8   : > { %v12103_v56 = vand.u32 4294901760, %v8271_v37  ;;  %v8296_v34 = vand.u32 4294901760, %v586_v26 }
  0xd9   : > { %580 = vmatmul.f32.gmra.mxu0 %v8262_v11  ;;  %777 = vmatmul.f32.gmra.mxu1 %v8163_v1  ;;  %v8301_v11 = vand.u32 4294901760, %v343_v50 }
  0xda   : > { %1229 = vmatpush.xpose.msrb.mxu1 %v7920_v43  ;;  %1126 = vmatpush.xpose.msrb.mxu0 %v12628_v14  ;;  %v1521_v43 = vsub.f32 %v8271_v37, %v12103_v56  ;;  %v8292_v14 = vand.u32 4294901760, %v400_v62  ;;  %12631 = vst [vmem:[#allocation49_spill] sm:$0xff] %v8296_v34  ;;  %v12636_v56 = vand.u32 4294901760, %v8008_v45 }
  0xdb   : > { %900 = vmatmul.f32.gmra.mxu2 %v8213_v18  ;;  %12633 = vst [vmem:[#allocation51_spill] sm:$0xff] %v8301_v11  ;;  %v380_v18 = vld [vmem:[%s7821_s14 + $0x28] sm:$0xff] }
  0xdc   : > { %1019 = vmatmul.f32.gmra.mxu3 %v8231_v55  ;;  %v1522_v6 = vand.u32 4294901760, %v1521_v43  ;;  %v8299_v55 = vand.u32 4294901760, %v8282_v28  ;;  %1328 = vmatpush.xpose.msrb.mxu2 %v8292_v14  ;;  %v8316_v43 = vsub.f32 %v343_v50, %v8301_v11  ;;  %v8458_v7 = vand.u32 4294901760, %v380_v18 }
  0xde   : > { %1231 = vmatpush.xpose.msrb.mxu1 %v7932_v48  ;;  %1130 = vmatpush.xpose.msrb.mxu0 %v12630_v44  ;;  %12632 = vst [vmem:[#allocation50_spill] sm:$0xff] %v8299_v55  ;;  %v8305_v48 = vsub.f32 %v400_v62, %v8292_v14  ;;  %v12634_v44 = vand.u32 4294901760, %v7989_v24  ;;  %v594_v26 = vsub.f32 %v8282_v28, %v8299_v55  ;;  %v347_v62 = vld [vmem:[%s7814_s12 + $0x120] sm:$0xff]  ;;  %v396_v24 = vld [vmem:[%s7821_s14 + $0xa8] sm:$0xff] }
  0xdf   : > { %1523 = vmatpush.xpose.msrb.mxu3 %v1522_v6  ;;  %12635 = vst [vmem:[#allocation52_spill] sm:$0xff] %v8316_v43 }
  0xe0   : > { %v12106_v0 = vand.u32 4294901760, %v8305_v48  ;;  %v8330_v50 = vand.u32 4294901760, %v594_v26 }
  0xe1   : > { %588 = vmatmul.f32.gmra.mxu0 %v8296_v34  ;;  %781 = vmatmul.f32.gmra.mxu1 %v8198_v46  ;;  %v8335_v34 = vand.u32 4294901760, %v347_v62 }
  0xe2   : > { %1233 = vmatpush.xpose.msrb.mxu1 %v7945_v54  ;;  %1134 = vmatpush.xpose.msrb.mxu0 %v12634_v44  ;;  %v1527_v54 = vsub.f32 %v8305_v48, %v12106_v0  ;;  %v8326_v44 = vand.u32 4294901760, %v396_v24  ;;  %12637 = vst [vmem:[#allocation53_spill] sm:$0xff] %v8330_v50  ;;  %v12642_v0 = vand.u32 4294901760, %v8052_v36 }
  0xe3   : > { %905 = vmatmul.f32.gmra.mxu2 %v8248_v12  ;;  %12639 = vst [vmem:[#allocation55_spill] sm:$0xff] %v8335_v34 }
  0xe4   : > { %1025 = vmatmul.f32.gmra.mxu3 %v8265_v60  ;;  %v1528_v6 = vand.u32 4294901760, %v1527_v54  ;;  %v8333_v60 = vand.u32 4294901760, %v8316_v43  ;;  %1330 = vmatpush.xpose.msrb.mxu2 %v8326_v44  ;;  %v8350_v54 = vsub.f32 %v347_v62, %v8335_v34 }
  0xe6   : > { %1235 = vmatpush.xpose.msrb.mxu1 %v7954_v58  ;;  %1138 = vmatpush.xpose.msrb.mxu0 %v12636_v56  ;;  %12638 = vst [vmem:[#allocation54_spill] sm:$0xff] %v8333_v60  ;;  %v8339_v58 = vsub.f32 %v396_v24, %v8326_v44  ;;  %v12640_v56 = vand.u32 4294901760, %v8029_v63  ;;  %v602_v26 = vsub.f32 %v8316_v43, %v8333_v60  ;;  %v351_v24 = vld [vmem:[%s7814_s12 + $0x140] sm:$0xff]  ;;  %v392_v63 = vld [vmem:[%s7821_s14 + $0x88] sm:$0xff] }
  0xe7   : > { %1529 = vmatpush.xpose.msrb.mxu3 %v1528_v6  ;;  %12641 = vst [vmem:[#allocation56_spill] sm:$0xff] %v8350_v54 }
  0xe8   : > { %v12109_v45 = vand.u32 4294901760, %v8339_v58  ;;  %v8364_v62 = vand.u32 4294901760, %v602_v26 }
  0xe9   : > { %596 = vmatmul.f32.gmra.mxu0 %v8330_v50  ;;  %785 = vmatmul.f32.gmra.mxu1 %v8233_v19  ;;  %v8369_v50 = vand.u32 4294901760, %v351_v24 }
  0xea   : > { %1237 = vmatpush.xpose.msrb.mxu1 %v7974_v3  ;;  %1142 = vmatpush.xpose.msrb.mxu0 %v12640_v56  ;;  %v1533_v3 = vsub.f32 %v8339_v58, %v12109_v45  ;;  %v8360_v56 = vand.u32 4294901760, %v392_v63  ;;  %12643 = vst [vmem:[#allocation57_spill] sm:$0xff] %v8364_v62 }
  0xeb   : > { %910 = vmatmul.f32.gmra.mxu2 %v8282_v28  ;;  %12645 = vst [vmem:[#allocation59_spill] sm:$0xff] %v8369_v50  ;;  %v8383_v26 = vsub.f32 %v351_v24, %v8369_v50 }
  0xec   : > { %1031 = vmatmul.f32.gmra.mxu3 %v8299_v55  ;;  %v1534_v6 = vand.u32 4294901760, %v1533_v3  ;;  %v8367_v55 = vand.u32 4294901760, %v8350_v54  ;;  %1332 = vmatpush.xpose.msrb.mxu2 %v8360_v56  ;;  %v355_v3 = vld [vmem:[%s7814_s12 + $0x160] sm:$0xff] }
  0xed   : > { %12646 = vst [vmem:[#allocation60_spill] sm:$0xff] %v8383_v26 }
  0xee   : > { %1239 = vmatpush.xpose.msrb.mxu1 %v7986_v23  ;;  %1146 = vmatpush.xpose.msrb.mxu0 %v12642_v0  ;;  %12644 = vst [vmem:[#allocation58_spill] sm:$0xff] %v8367_v55  ;;  %v8374_v23 = vsub.f32 %v392_v63, %v8360_v56  ;;  %v610_v0 = vsub.f32 %v8350_v54, %v8367_v55 }
  0xef   : > { %1535 = vmatpush.xpose.msrb.mxu3 %v1534_v6 }
  0xf0   : > { %v12111_v36 = vand.u32 4294901760, %v8374_v23  ;;  %v8397_v24 = vand.u32 4294901760, %v610_v0 }
  0xf1   : > { %604 = vmatmul.f32.gmra.mxu0 %v8364_v62  ;;  %789 = vmatmul.f32.gmra.mxu1 %v8267_v25  ;;  %v384_v62 = vld [vmem:[%s7821_s14 + $0x48] sm:$0xff] }
  0xf2   : > { %1633 = vmatpush.xpose.msra.mxu0 %v8014_v47  ;;  %1241 = vmatpush.xpose.msrb.mxu1 %v8004_v41  ;;  %v1539_v63 = vsub.f32 %v8374_v23, %v12111_v36  ;;  %v388_v41 = vld [vmem:[%s7821_s14 + $0x68] sm:$0xff]  ;;  %12647 = vst [vmem:[#allocation61_spill] sm:$0xff] %v8397_v24  ;;  %v8402_v36 = vand.u32 4294901760, %v355_v3  ;;  %v8426_v28 = vand.u32 4294901760, %v384_v62 }
  0xf3   : > { %915 = vmatmul.f32.gmra.mxu2 %v8316_v43  ;;  %v8394_v45 = vand.u32 4294901760, %v388_v41 }
  0xf4   : > { %1037 = vmatmul.f32.gmra.mxu3 %v8333_v60  ;;  %v1540_v6 = vand.u32 4294901760, %v1539_v63  ;;  %v8400_v60 = vand.u32 4294901760, %v8383_v26  ;;  %12649 = vst [vmem:[#allocation63_spill] sm:$0xff] %v8402_v36  ;;  %v8416_v63 = vsub.f32 %v355_v3, %v8402_v36 }
  0xf5   : > { %1334 = vmatpush.xpose.msrb.mxu2 %v8394_v45  ;;  %v8406_v43 = vsub.f32 %v388_v41, %v8394_v45  ;;  %v359_v41 = vld [vmem:[%s7814_s12 + $0x180] sm:$0xff] }
  0xf6   : > { %1636 = vmatpush.xpose.msra.mxu0 %v8037_v17  ;;  %1243 = vmatpush.xpose.msrb.mxu1 %v8025_v59  ;;  %12648 = vst [vmem:[#allocation62_spill] sm:$0xff] %v8400_v60  ;;  %v618_v0 = vsub.f32 %v8383_v26, %v8400_v60  ;;  %v8434_v12 = vand.u32 4294901760, %v359_v41  ;;  %v12668_v17 = vand.u32 4294901760, %v8061_v42 }
  0xf7   : > { %1541 = vmatpush.xpose.msrb.mxu3 %v1540_v6  ;;  %v12118_v59 = vand.u32 4294901760, %v8406_v43  ;;  %12650 = vst [vmem:[#allocation64_spill] sm:$0xff] %v8416_v63 }
  0xf8   : > { %v8429_v3 = vand.u32 4294901760, %v618_v0  ;;  %12653 = vst [vmem:[#allocation67_spill] sm:$0xff] %v8434_v12 }
  0xf9   : > { %612 = vmatmul.f32.gmra.mxu0 %v8397_v24  ;;  %793 = vmatmul.f32.gmra.mxu1 %v8301_v11  ;;  %v1545_v6 = vsub.f32 %v8406_v43, %v12118_v59  ;;  %v8438_v59 = vsub.f32 %v384_v62, %v8426_v28  ;;  %v363_v62 = vld [vmem:[%s7814_s12 + $0x1a0] sm:$0xff] }
  0xfa   : > { %1761 = vmatpush.xpose.msra.mxu1 %v7995_v30  ;;  %1639 = vmatpush.xpose.msra.mxu0 %v8061_v42  ;;  %12651 = vst [vmem:[#allocation65_spill] sm:$0xff] %v8429_v3  ;;  %v8466_v2 = vand.u32 4294901760, %v363_v62  ;;  %v312_v42 = vld [vmem:[%s7814_s12 + $0x8] sm:$0xff] }
  0xfb   : > { %920 = vmatmul.f32.gmra.mxu2 %v8350_v54  ;;  %v1546_v24 = vand.u32 4294901760, %v1545_v6  ;;  %v12125_v6 = vand.u32 4294901760, %v8438_v59 }
  0xfc   : > { %1043 = vmatmul.f32.gmra.mxu3 %v8367_v55  ;;  %v8432_v55 = vand.u32 4294901760, %v8416_v63  ;;  %1336 = vmatpush.xpose.msrb.mxu2 %v8426_v28  ;;  %12657 = vst [vmem:[#allocation71_spill] sm:$0xff] %v8466_v2 }
  0xfd   : > { %1547 = vmatpush.xpose.msrb.mxu3 %v1546_v24  ;;  %v8448_v24 = vsub.f32 %v359_v41, %v8434_v12  ;;  %v1551_v54 = vsub.f32 %v8438_v59, %v12125_v6  ;;  %v8470_v6 = vsub.f32 %v380_v18, %v8458_v7  ;;  %v367_v18 = vld [vmem:[%s7814_s12 + $0x1c0] sm:$0xff] }
  0xfe   : > { %1763 = vmatpush.xpose.msra.mxu1 %v8016_v51  ;;  %1642 = vmatpush.xpose.msra.mxu0 %v8095_v57  ;;  %12652 = vst [vmem:[#allocation66_spill] sm:$0xff] %v8432_v55  ;;  %v626_v0 = vsub.f32 %v8416_v63, %v8432_v55 }
  0xff   : > { %12654 = vst [vmem:[#allocation68_spill] sm:$0xff] %v8448_v24 }
 0x100   : > { %v8461_v41 = vand.u32 4294901760, %v626_v0  ;;  %1338 = vmatpush.xpose.msrb.mxu2 %v8458_v7 }
 0x101   : > { %620 = vmatmul.f32.gmra.mxu0 %v8429_v3  ;;  %797 = vmatmul.f32.gmra.mxu1 %v8335_v34  ;;  %v1552_v3 = vand.u32 4294901760, %v1551_v54  ;;  %v12132_v54 = vand.u32 4294901760, %v8470_v6 }
 0x102   : > { %1765 = vmatpush.xpose.msra.mxu1 %v8039_v20  ;;  %1645 = vmatpush.xpose.msra.mxu0 %v8132_v9  ;;  %12655 = vst [vmem:[#allocation69_spill] sm:$0xff] %v8461_v41 }
 0x103   : > { %925 = vmatmul.f32.gmra.mxu2 %v8383_v26  ;;  %1553 = vmatpush.xpose.msrb.mxu3 %v1552_v3  ;;  %v8480_v3 = vsub.f32 %v363_v62, %v8466_v2  ;;  %v376_v26 = vld [vmem:[%s7821_s14 + $0x8] sm:$0xff]  ;;  %v1557_v8 = vsub.f32 %v8470_v6, %v12132_v54  ;;  %v8502_v54 = vand.u32 4294901760, %v367_v18 }
 0x104   : > { %1049 = vmatmul.f32.gmra.mxu3 %v8400_v60  ;;  %v8464_v60 = vand.u32 4294901760, %v8448_v24  ;;  %v8488_v38 = vand.u32 4294901760, %v376_v26 }
 0x105   : > { %12658 = vst [vmem:[#allocation72_spill] sm:$0xff] %v8480_v3  ;;  %v8500_v13 = vand.u32 4294901760, %v8480_v3 }
 0x106   : > { %1767 = vmatpush.xpose.msra.mxu1 %v8081_v33  ;;  %1648 = vmatpush.xpose.msra.mxu0 %v8167_v5  ;;  %12656 = vst [vmem:[#allocation70_spill] sm:$0xff] %v8464_v60  ;;  %v634_v0 = vsub.f32 %v8448_v24, %v8464_v60  ;;  %v8494_v62 = vsub.f32 %v376_v26, %v8488_v38 }
 0x107   : > { %1340 = vmatpush.xpose.msrb.mxu2 %v8488_v38  ;;  %12660 = vst [vmem:[#allocation74_spill] sm:$0xff] %v8500_v13 }
 0x108   : > { %12661 = vst [vmem:[#allocation75_spill] sm:$0xff] %v8502_v54 }
 0x109   : > { %628 = vmatmul.f32.gmra.mxu0 %v8461_v41  ;;  %801 = vmatmul.f32.gmra.mxu1 %v8369_v50  ;;  %v1558_v41 = vand.u32 4294901760, %v1557_v8  ;;  %v12135_v8 = vand.u32 4294901760, %v8494_v62 }
 0x10a   : > { %1769 = vmatpush.xpose.msra.mxu1 %v8121_v31  ;;  %1651 = vmatpush.xpose.msra.mxu0 %v8202_v10 }
 0x10b   : > { %930 = vmatmul.f32.gmra.mxu2 %v8416_v63  ;;  %v12662_v63 = vand.u32 4294901760, %v8014_v47  ;;  %1559 = vmatpush.xpose.msrb.mxu3 %v1558_v41  ;;  %v1563_v26 = vsub.f32 %v8494_v62, %v12135_v8  ;;  %v8517_v47 = vsub.f32 %v367_v18, %v8502_v54 }
 0x10c   : > { %1055 = vmatmul.f32.gmra.mxu3 %v8432_v55  ;;  %v8497_v55 = vand.u32 4294901760, %v634_v0  ;;  %v642_v0 = vsub.f32 %v8480_v3, %v8500_v13 }
 0x10d   : > { %1892 = vmatpush.xpose.msra.mxu2 %v12662_v63  ;;  %12663 = vst [vmem:[#allocation76_spill] sm:$0xff] %v8517_v47  ;;  %v371_v63 = vld [vmem:[%s7814_s12 + $0x1e0] sm:$0xff]  ;;  %v1564_v41 = vand.u32 4294901760, %v1563_v26  ;;  %v8529_v18 = vand.u32 4294901760, %v8517_v47 }
 0x10e   : > { %1771 = vmatpush.xpose.msra.mxu1 %v8156_v29  ;;  %1654 = vmatpush.xpose.msra.mxu0 %v8237_v22  ;;  %12659 = vst [vmem:[#allocation73_spill] sm:$0xff] %v8497_v55  ;;  %v8526_v8 = vand.u32 4294901760, %v642_v0 }
 0x10f   : > { %1565 = vmatpush.xpose.msrb.mxu3 %v1564_v41  ;;  %12666 = vst [vmem:[#allocation78_spill] sm:$0xff] %v8529_v18  ;;  %v12673_v41 = vand.u32 4294901760, %v8132_v9  ;;  %v12675_v9 = vand.u32 4294901760, %v8167_v5 }
 0x110   : > { %12665 = vst [vmem:[#allocation77_spill] sm:$0xff] %v8526_v8 }
 0x111   : > { %636 = vmatmul.f32.gmra.mxu0 %v8497_v55  ;;  %805 = vmatmul.f32.gmra.mxu1 %v8402_v36  ;;  %v8531_v55 = vand.u32 4294901760, %v371_v63 }
 0x112   : > { %1773 = vmatpush.xpose.msra.mxu1 %v8191_v4  ;;  %1657 = vmatpush.xpose.msra.mxu0 %v8271_v37 }
 0x113   : > { %1896 = vmatpush.xpose.msra.mxu2 %v12664_v16  ;;  %12667 = vst [vmem:[#allocation79_spill] sm:$0xff] %v8531_v55  ;;  %2019 = vmatpush.xpose.msra.mxu3 %v7995_v30  ;;  %v650_v16 = vsub.f32 %v8517_v47, %v8529_v18  ;;  %v8543_v26 = vsub.f32 %v371_v63, %v8531_v55  ;;  %v12670_v30 = vand.u32 4294901760, %v8095_v57  ;;  %v8560_v57 = vand.u32 4294901760, %v312_v42 }
 0x114   : > { %1061 = vmatmul.f32.gmra.mxu3 %v8464_v60  ;;  %935 = vmatmul.f32.gmra.mxu2 %v8448_v24 }
 0x115   : > { %12669 = vst [vmem:[#allocation80_spill] sm:$0xff] %v8543_v26  ;;  %v8553_v0 = vand.u32 4294901760, %v650_v16  ;;  %v8556_v63 = vand.u32 4294901760, %v8543_v26 }
 0x116   : > { %1775 = vmatpush.xpose.msra.mxu1 %v8224_v32  ;;  %1660 = vmatpush.xpose.msra.mxu0 %v8305_v48  ;;  %12674 = vst [vmem:[#allocation83_spill] sm:$0xff] %v8560_v57 }
 0x117   : > { %1900 = vmatpush.xpose.msra.mxu2 %v12668_v17  ;;  %2021 = vmatpush.xpose.msra.mxu3 %v8016_v51  ;;  %12671 = vst [vmem:[#allocation81_spill] sm:$0xff] %v8553_v0  ;;  %v658_v51 = vsub.f32 %v8543_v26, %v8556_v63  ;;  %v316_v17 = vld [vmem:[%s7814_s12 + $0x28] sm:$0xff] }
 0x118   : > { %12672 = vst [vmem:[#allocation82_spill] sm:$0xff] %v8556_v63 }
 0x119   : > { %644 = vmatmul.f32.gmra.mxu0 %v8526_v8  ;;  %809 = vmatmul.f32.gmra.mxu1 %v8434_v12  ;;  %v8580_v16 = vand.u32 4294901760, %v658_v51 }
 0x11a   : > { %1777 = vmatpush.xpose.msra.mxu1 %v8258_v15  ;;  %1663 = vmatpush.xpose.msra.mxu0 %v8339_v58 }
 0x11b   : > { %1904 = vmatpush.xpose.msra.mxu2 %v12670_v30  ;;  %2023 = vmatpush.xpose.msra.mxu3 %v8039_v20  ;;  %v8574_v20 = vsub.f32 %v312_v42, %v8560_v57  ;;  %12677 = vst [vmem:[#allocation85_spill] sm:$0xff] %v8580_v16  ;;  %v12678_v30 = vand.u32 4294901760, %v8202_v10  ;;  %v320_v42 = vld [vmem:[%s7814_s12 + $0x48] sm:$0xff] }
 0x11c   : > { %1067 = vmatmul.f32.gmra.mxu3 %v8500_v13  ;;  %940 = vmatmul.f32.gmra.mxu2 %v8480_v3 }
 0x11d   : > { %12676 = vst [vmem:[#allocation84_spill] sm:$0xff] %v8574_v20  ;;  %v8585_v5 = vand.u32 4294901760, %v8574_v20 }
 0x11e   : > { %1779 = vmatpush.xpose.msra.mxu1 %v8292_v14  ;;  %1666 = vmatpush.xpose.msra.mxu0 %v8374_v23 }
 0x11f   : > { %1908 = vmatpush.xpose.msra.mxu2 %v12673_v41  ;;  %2025 = vmatpush.xpose.msra.mxu3 %v8081_v33  ;;  %12679 = vst [vmem:[#allocation86_spill] sm:$0xff] %v8585_v5  ;;  %v8587_v41 = vand.u32 4294901760, %v316_v17  ;;  %v12681_v33 = vand.u32 4294901760, %v8237_v22  ;;  %v1344_v10 = vsub.f32 %v8574_v20, %v8585_v5  ;;  %v12683_v22 = vand.u32 4294901760, %v8271_v37 }
 0x121   : > { %652 = vmatmul.f32.gmra.mxu0 %v8553_v0  ;;  %813 = vmatmul.f32.gmra.mxu1 %v8466_v2  ;;  %12680 = vst [vmem:[#allocation87_spill] sm:$0xff] %v8587_v41 }
 0x122   : > { %1781 = vmatpush.xpose.msra.mxu1 %v8326_v44  ;;  %1669 = vmatpush.xpose.msra.mxu0 %v8406_v43 }
 0x123   : > { %1912 = vmatpush.xpose.msra.mxu2 %v12675_v9  ;;  %2027 = vmatpush.xpose.msra.mxu3 %v8121_v31  ;;  %v8601_v31 = vsub.f32 %v316_v17, %v8587_v41  ;;  %v8609_v9 = vand.u32 4294901760, %v1344_v10 }
 0x124   : > { %1073 = vmatmul.f32.gmra.mxu3 %v8529_v18  ;;  %945 = vmatmul.f32.gmra.mxu2 %v8517_v47 }
 0x125   : > { %12682 = vst [vmem:[#allocation88_spill] sm:$0xff] %v8601_v31 }
 0x126   : > { %1783 = vmatpush.xpose.msra.mxu1 %v8360_v56  ;;  %1672 = vmatpush.xpose.msra.mxu0 %v8438_v59  ;;  %12684 = vst [vmem:[#allocation89_spill] sm:$0xff] %v8609_v9 }
 0x127   : > { %1916 = vmatpush.xpose.msra.mxu2 %v12678_v30  ;;  %2029 = vmatpush.xpose.msra.mxu3 %v8156_v29  ;;  %v8612_v30 = vand.u32 4294901760, %v8601_v31  ;;  %v12687_v29 = vand.u32 4294901760, %v8305_v48 }
 0x129   : > { %660 = vmatmul.f32.gmra.mxu0 %v8580_v16  ;;  %817 = vmatmul.f32.gmra.mxu1 %v8502_v54  ;;  %12685 = vst [vmem:[#allocation90_spill] sm:$0xff] %v8612_v30  ;;  %v1352_v37 = vsub.f32 %v8601_v31, %v8612_v30 }
 0x12a   : > { %1785 = vmatpush.xpose.msra.mxu1 %v8394_v45  ;;  %1675 = vmatpush.xpose.msra.mxu0 %v8470_v6 }
 0x12b   : > { %1920 = vmatpush.xpose.msra.mxu2 %v12681_v33  ;;  %v8614_v33 = vand.u32 4294901760, %v320_v42  ;;  %2031 = vmatpush.xpose.msra.mxu3 %v8191_v4  ;;  %v324_v4 = vld [vmem:[%s7814_s12 + $0x68] sm:$0xff] }
 0x12c   : > { %1079 = vmatmul.f32.gmra.mxu3 %v8556_v63  ;;  %950 = vmatmul.f32.gmra.mxu2 %v8543_v26  ;;  %v12689_v63 = vand.u32 4294901760, %v8339_v58  ;;  %v8638_v47 = vand.u32 4294901760, %v324_v4  ;;  %v12693_v58 = vand.u32 4294901760, %v8374_v23 }
 0x12d   : > { %12686 = vst [vmem:[#allocation91_spill] sm:$0xff] %v8614_v33  ;;  %v8627_v17 = vsub.f32 %v320_v42, %v8614_v33 }
 0x12e   : > { %1787 = vmatpush.xpose.msra.mxu1 %v8426_v28  ;;  %1678 = vmatpush.xpose.msra.mxu0 %v8494_v62  ;;  %v541_v51 = vpop.f32.mrf.mxu0  ;;  %12692 = vst [vmem:[#allocation95_spill] sm:$0xff] %v8638_v47  ;;  %v8652_v42 = vsub.f32 %v324_v4, %v8638_v47 }
 0x12f   : > { %1924 = vmatpush.xpose.msra.mxu2 %v12683_v22  ;;  %12688 = vst [vmem:[#allocation92_spill] sm:$0xff] %v8627_v17  ;;  %2033 = vmatpush.xpose.msra.mxu3 %v8224_v32 }
 0x130   : > { %12694 = vst [vmem:[#allocation96_spill] sm:$0xff] %v8652_v42 }
 0x131   : > { %821 = vmatmul.f32.gmra.mxu1 %v8531_v55  ;;  %1148 = vmatmul.f32.vlgmr.msrb.gmra.mxu0 %v8000_v35 }
 0x132   : > { %1789 = vmatpush.xpose.msra.mxu1 %v8458_v7 }
 0x133   : > { %1928 = vmatpush.xpose.msra.mxu2 %v12687_v29  ;;  %v8633_v29 = vand.u32 4294901760, %v1352_v37  ;;  %2035 = vmatpush.xpose.msra.mxu3 %v8258_v15  ;;  %v328_v15 = vld [vmem:[%s7814_s12 + $0x88] sm:$0xff] }
 0x134   : > { %1567 = vmatmul.f32.vlgmr.msrb.gmra.mxu3 %v8560_v57  ;;  %1346 = vmatmul.f32.vlgmr.msrb.gmra.mxu2 %v8609_v9  ;;  %v8636_v9 = vand.u32 4294901760, %v8627_v17 }
 0x135   : > { %12690 = vst [vmem:[#allocation93_spill] sm:$0xff] %v8633_v29 }
 0x136   : > { %1791 = vmatpush.xpose.msra.mxu1 %v8488_v38  ;;  %v549_v22 = vpop.f32.mrf.mxu0  ;;  %v762_v26 = vpop.f32.mrf.mxu1  ;;  %12691 = vst [vmem:[#allocation94_spill] sm:$0xff] %v8636_v9 }
 0x137   : > { %v990_v10 = vpop.f32.mrf.mxu3  ;;  %1932 = vmatpush.xpose.msra.mxu2 %v12689_v63  ;;  %v763_v16 = vadd.f32 %v762_v26, %v541_v51  ;;  %v876_v48 = vpop.f32.mrf.mxu2  ;;  %v1360_v63 = vsub.f32 %v8627_v17, %v8636_v9  ;;  %2037 = vmatpush.xpose.msra.mxu3 %v8292_v14 }
 0x139   : > { %v877_v32 = vadd.f32 %v876_v48, %v763_v16  ;;  %1152 = vmatmul.f32.gmra.mxu0 %v8044_v27  ;;  %1245 = vmatmul.f32.vlgmr.msrb.gmra.mxu1 %v8000_v35  ;;  %v12695_v48 = vand.u32 4294901760, %v8406_v43  ;;  %v12699_v43 = vand.u32 4294901760, %v8438_v59 }
 0x13b   : > { %1936 = vmatpush.xpose.msra.mxu2 %v12693_v58  ;;  %v8646_v26 = vadd.f32 %v990_v10, %v877_v32  ;;  %v8658_v32 = vand.u32 4294901760, %v1360_v63  ;;  %v8661_v58 = vand.u32 4294901760, %v8652_v42  ;;  %2039 = vmatpush.xpose.msra.mxu3 %v8326_v44  ;;  %v332_v44 = vld [vmem:[%s7814_s12 + $0xa8] sm:$0xff] }
 0x13c   : > { %1571 = vmatmul.f32.gmra.mxu3 %v8587_v41  ;;  %1354 = vmatmul.f32.gmra.mxu2 %v8633_v29  ;;  %v8663_v29 = vand.u32 4294901760, %v328_v15 }
 0x13d   : > { %12696 = vst [vmem:[#allocation97_spill] sm:$0xff] %v8658_v32 }
 0x13e   : > { %v557_v51 = vpop.f32.mrf.mxu0  ;;  %v766_v37 = vpop.f32.mrf.mxu1  ;;  %12697 = vst [vmem:[#allocation98_spill] sm:$0xff] %v8661_v58  ;;  %v8677_v63 = vsub.f32 %v328_v15, %v8663_v29 }
 0x13f   : > { %v996_v16 = vpop.f32.mrf.mxu3  ;;  %1940 = vmatpush.xpose.msra.mxu2 %v12695_v48  ;;  %v767_v23 = vadd.f32 %v766_v37, %v549_v22  ;;  %v881_v10 = vpop.f32.mrf.mxu2  ;;  %12698 = vst [vmem:[#allocation99_spill] sm:$0xff] %v8663_v29  ;;  %v1368_v22 = vsub.f32 %v8652_v42, %v8661_v58  ;;  %2041 = vmatpush.xpose.msra.mxu3 %v8360_v56 }
 0x140   : > { %12700 = vst [vmem:[#allocation100_spill] sm:$0xff] %v8677_v63 }
 0x141   : > { %v882_v14 = vadd.f32 %v881_v10, %v767_v23  ;;  %1156 = vmatmul.f32.gmra.mxu0 %v8088_v40  ;;  %1249 = vmatmul.f32.gmra.mxu1 %v8044_v27  ;;  %v12701_v10 = vand.u32 4294901760, %v8470_v6  ;;  %v12705_v6 = vand.u32 4294901760, %v8494_v62 }
 0x143   : > { %1944 = vmatpush.xpose.msra.mxu2 %v12699_v43  ;;  %v8671_v4 = vadd.f32 %v996_v16, %v882_v14  ;;  %v8683_v14 = vand.u32 4294901760, %v1368_v22  ;;  %v8686_v43 = vand.u32 4294901760, %v8677_v63  ;;  %2043 = vmatpush.xpose.msra.mxu3 %v8394_v45  ;;  %v336_v45 = vld [vmem:[%s7814_s12 + $0xc8] sm:$0xff] }
 0x144   : > { %1575 = vmatmul.f32.gmra.mxu3 %v8614_v33  ;;  %1362 = vmatmul.f32.gmra.mxu2 %v8658_v32  ;;  %v8688_v32 = vand.u32 4294901760, %v332_v44 }
 0x145   : > { %12702 = vst [vmem:[#allocation101_spill] sm:$0xff] %v8683_v14 }
 0x146   : > { %v565_v48 = vpop.f32.mrf.mxu0  ;;  %v770_v23 = vpop.f32.mrf.mxu1  ;;  %12703 = vst [vmem:[#allocation102_spill] sm:$0xff] %v8686_v43  ;;  %v8702_v22 = vsub.f32 %v332_v44, %v8688_v32 }
 0x147   : > { %v1002_v37 = vpop.f32.mrf.mxu3  ;;  %1948 = vmatpush.xpose.msra.mxu2 %v12701_v10  ;;  %v771_v59 = vadd.f32 %v770_v23, %v557_v51  ;;  %v886_v16 = vpop.f32.mrf.mxu2  ;;  %12704 = vst [vmem:[#allocation103_spill] sm:$0xff] %v8688_v32  ;;  %v1376_v51 = vsub.f32 %v8677_v63, %v8686_v43  ;;  %2045 = vmatpush.xpose.msra.mxu3 %v8426_v28 }
 0x148   : > { %12706 = vst [vmem:[#allocation104_spill] sm:$0xff] %v8702_v22 }
 0x149   : > { %v887_v56 = vadd.f32 %v886_v16, %v771_v59  ;;  %1160 = vmatmul.f32.gmra.mxu0 %v8129_v52  ;;  %1253 = vmatmul.f32.gmra.mxu1 %v8088_v40 }
 0x14b   : > { %1952 = vmatpush.xpose.msra.mxu2 %v12705_v6  ;;  %v8696_v15 = vadd.f32 %v1002_v37, %v887_v56  ;;  %v8706_v6 = vand.u32 4294901760, %v1376_v51  ;;  %v8709_v37 = vand.u32 4294901760, %v8702_v22  ;;  %v8711_v56 = vand.u32 4294901760, %v336_v45  ;;  %2047 = vmatpush.xpose.msra.mxu3 %v8458_v7  ;;  %v340_v7 = vld [vmem:[%s7814_s12 + $0xe8] sm:$0xff] }
 0x14c   : > { %1579 = vmatmul.f32.gmra.mxu3 %v8638_v47  ;;  %1370 = vmatmul.f32.gmra.mxu2 %v8683_v14 }
 0x14d   : > { %12707 = vst [vmem:[#allocation105_spill] sm:$0xff] %v8706_v6  ;;  %v8723_v51 = vsub.f32 %v336_v45, %v8711_v56 }
 0x14e   : > { %v573_v10 = vpop.f32.mrf.mxu0  ;;  %v774_v59 = vpop.f32.mrf.mxu1  ;;  %12708 = vst [vmem:[#allocation106_spill] sm:$0xff] %v8709_v37 }
 0x14f   : > { %v1008_v23 = vpop.f32.mrf.mxu3  ;;  %v775_v16 = vadd.f32 %v774_v59, %v565_v48  ;;  %v891_v62 = vpop.f32.mrf.mxu2  ;;  %12709 = vst [vmem:[#allocation107_spill] sm:$0xff] %v8711_v56  ;;  %v1384_v48 = vsub.f32 %v8702_v22, %v8709_v37  ;;  %2049 = vmatpush.xpose.msra.mxu3 %v8488_v38 }
 0x150   : > { %12710 = vst [vmem:[#allocation108_spill] sm:$0xff] %v8723_v51 }
 0x151   : > { %v892_v44 = vadd.f32 %v891_v62, %v775_v16  ;;  %1164 = vmatmul.f32.gmra.mxu0 %v8163_v1  ;;  %1257 = vmatmul.f32.gmra.mxu1 %v8129_v52  ;;  %v8727_v0 = vand.u32 4294901760, %v1384_v48  ;;  %v344_v48 = vld [vmem:[%s7814_s12 + $0x108] sm:$0xff] }
 0x153   : > { %v8717_v28 = vadd.f32 %v1008_v23, %v892_v44  ;;  %12711 = vst [vmem:[#allocation109_spill] sm:$0xff] %v8727_v0  ;;  %v8730_v23 = vand.u32 4294901760, %v8723_v51  ;;  %v8732_v44 = vand.u32 4294901760, %v340_v7 }
 0x154   : > { %1583 = vmatmul.f32.gmra.mxu3 %v8663_v29  ;;  %1378 = vmatmul.f32.gmra.mxu2 %v8706_v6 }
 0x155   : > { %12712 = vst [vmem:[#allocation110_spill] sm:$0xff] %v8730_v23  ;;  %v1392_v45 = vsub.f32 %v8723_v51, %v8730_v23 }
 0x156   : > { %v581_v16 = vpop.f32.mrf.mxu0  ;;  %v778_v62 = vpop.f32.mrf.mxu1  ;;  %12713 = vst [vmem:[#allocation111_spill] sm:$0xff] %v8732_v44 }
 0x157   : > { %v1014_v59 = vpop.f32.mrf.mxu3  ;;  %v779_v14 = vadd.f32 %v778_v62, %v573_v10  ;;  %v896_v18 = vpop.f32.mrf.mxu2  ;;  %v8743_v10 = vsub.f32 %v340_v7, %v8732_v44  ;;  %v8746_v8 = vand.u32 4294901760, %v1392_v45 }
 0x159   : > { %v897_v6 = vadd.f32 %v896_v18, %v779_v14  ;;  %1168 = vmatmul.f32.gmra.mxu0 %v8198_v46  ;;  %1261 = vmatmul.f32.gmra.mxu1 %v8163_v1  ;;  %12714 = vst [vmem:[#allocation112_spill] sm:$0xff] %v8743_v10 }
 0x15a   : > { %12715 = vst [vmem:[#allocation113_spill] sm:$0xff] %v8746_v8 }
 0x15b   : > { %v8737_v38 = vadd.f32 %v1014_v59, %v897_v6  ;;  %v8749_v6 = vand.u32 4294901760, %v8743_v10  ;;  %v8751_v59 = vand.u32 4294901760, %v344_v48 }
 0x15c   : > { %1587 = vmatmul.f32.gmra.mxu3 %v8688_v32  ;;  %1386 = vmatmul.f32.gmra.mxu2 %v8727_v0 }
 0x15d   : > { %12716 = vst [vmem:[#allocation114_spill] sm:$0xff] %v8749_v6  ;;  %v8762_v45 = vsub.f32 %v344_v48, %v8751_v59 }
 0x15e   : > { %v589_v18 = vpop.f32.mrf.mxu0  ;;  %v782_v14 = vpop.f32.mrf.mxu1  ;;  %12717 = vst [vmem:[#allocation115_spill] sm:$0xff] %v8751_v59 }
 0x15f   : > { %v1020_v62 = vpop.f32.mrf.mxu3  ;;  %v783_v3 = vadd.f32 %v782_v14, %v581_v16  ;;  %v901_v13 = vpop.f32.mrf.mxu2  ;;  %v1400_v16 = vsub.f32 %v8743_v10, %v8749_v6  ;;  %12718 = vst [vmem:[#allocation116_spill] sm:$0xff] %v8762_v45  ;;  %v348_v14 = vld [vmem:[%s7814_s12 + $0x128] sm:$0xff] }
 0x161   : > { %v902_v0 = vadd.f32 %v901_v13, %v783_v3  ;;  %1172 = vmatmul.f32.gmra.mxu0 %v8233_v19  ;;  %1265 = vmatmul.f32.gmra.mxu1 %v8198_v46  ;;  %v8765_v46 = vand.u32 4294901760, %v1400_v16 }
 0x163   : > { %v8756_v7 = vadd.f32 %v1020_v62, %v902_v0  ;;  %12719 = vst [vmem:[#allocation117_spill] sm:$0xff] %v8765_v46  ;;  %v8768_v0 = vand.u32 4294901760, %v8762_v45  ;;  %v8770_v62 = vand.u32 4294901760, %v348_v14 }
 0x164   : > { %1591 = vmatmul.f32.gmra.mxu3 %v8711_v56  ;;  %1394 = vmatmul.f32.gmra.mxu2 %v8746_v8 }
 0x165   : > { %12720 = vst [vmem:[#allocation118_spill] sm:$0xff] %v8768_v0  ;;  %v8781_v16 = vsub.f32 %v348_v14, %v8770_v62 }
 0x166   : > { %v597_v13 = vpop.f32.mrf.mxu0  ;;  %v786_v3 = vpop.f32.mrf.mxu1  ;;  %12721 = vst [vmem:[#allocation119_spill] sm:$0xff] %v8770_v62 }
 0x167   : > { %v1026_v24 = vpop.f32.mrf.mxu3  ;;  %v787_v60 = vadd.f32 %v786_v3, %v589_v18  ;;  %v906_v1 = vpop.f32.mrf.mxu2  ;;  %v1408_v18 = vsub.f32 %v8762_v45, %v8768_v0  ;;  %12722 = vst [vmem:[#allocation120_spill] sm:$0xff] %v8781_v16  ;;  %v352_v3 = vld [vmem:[%s7814_s12 + $0x148] sm:$0xff] }
 0x169   : > { %v907_v8 = vadd.f32 %v906_v1, %v787_v60  ;;  %1176 = vmatmul.f32.gmra.mxu0 %v8267_v25  ;;  %1269 = vmatmul.f32.gmra.mxu1 %v8233_v19  ;;  %v8784_v19 = vand.u32 4294901760, %v1408_v18 }
 0x16b   : > { %v8775_v48 = vadd.f32 %v1026_v24, %v907_v8  ;;  %12723 = vst [vmem:[#allocation121_spill] sm:$0xff] %v8784_v19  ;;  %v8787_v24 = vand.u32 4294901760, %v8781_v16  ;;  %v8789_v8 = vand.u32 4294901760, %v352_v3 }
 0x16c   : > { %1595 = vmatmul.f32.gmra.mxu3 %v8732_v44  ;;  %1402 = vmatmul.f32.gmra.mxu2 %v8765_v46 }
 0x16d   : > { %12724 = vst [vmem:[#allocation122_spill] sm:$0xff] %v8787_v24  ;;  %v8800_v18 = vsub.f32 %v352_v3, %v8789_v8 }
 0x16e   : > { %v605_v60 = vpop.f32.mrf.mxu0  ;;  %v790_v1 = vpop.f32.mrf.mxu1  ;;  %12725 = vst [vmem:[#allocation123_spill] sm:$0xff] %v8789_v8 }
 0x16f   : > { %v1032_v52 = vpop.f32.mrf.mxu3  ;;  %v791_v40 = vadd.f32 %v790_v1, %v597_v13  ;;  %v911_v27 = vpop.f32.mrf.mxu2  ;;  %v1416_v13 = vsub.f32 %v8781_v16, %v8787_v24  ;;  %12726 = vst [vmem:[#allocation124_spill] sm:$0xff] %v8800_v18  ;;  %v356_v1 = vld [vmem:[%s7814_s12 + $0x168] sm:$0xff] }
 0x171   : > { %v912_v46 = vadd.f32 %v911_v27, %v791_v40  ;;  %1180 = vmatmul.f32.gmra.mxu0 %v8301_v11  ;;  %1273 = vmatmul.f32.gmra.mxu1 %v8267_v25  ;;  %v8803_v25 = vand.u32 4294901760, %v1416_v13 }
 0x173   : > { %v8794_v14 = vadd.f32 %v1032_v52, %v912_v46  ;;  %12727 = vst [vmem:[#allocation125_spill] sm:$0xff] %v8803_v25  ;;  %v8806_v46 = vand.u32 4294901760, %v8800_v18  ;;  %v8808_v52 = vand.u32 4294901760, %v356_v1 }
 0x174   : > { %1599 = vmatmul.f32.gmra.mxu3 %v8751_v59  ;;  %1410 = vmatmul.f32.gmra.mxu2 %v8784_v19 }
 0x175   : > { %12728 = vst [vmem:[#allocation126_spill] sm:$0xff] %v8806_v46  ;;  %v8819_v13 = vsub.f32 %v356_v1, %v8808_v52 }
 0x176   : > { %v613_v40 = vpop.f32.mrf.mxu0  ;;  %v794_v27 = vpop.f32.mrf.mxu1  ;;  %12729 = vst [vmem:[#allocation127_spill] sm:$0xff] %v8808_v52 }
 0x177   : > { %v1038_v39 = vpop.f32.mrf.mxu3  ;;  %v795_v35 = vadd.f32 %v794_v27, %v605_v60  ;;  %v916_v61 = vpop.f32.mrf.mxu2  ;;  %v1424_v60 = vsub.f32 %v8800_v18, %v8806_v46  ;;  %12730 = vst [vmem:[#allocation128_spill] sm:$0xff] %v8819_v13  ;;  %v360_v27 = vld [vmem:[%s7814_s12 + $0x188] sm:$0xff] }
 0x179   : > { %v917_v19 = vadd.f32 %v916_v61, %v795_v35  ;;  %1184 = vmatmul.f32.gmra.mxu0 %v8335_v34  ;;  %1277 = vmatmul.f32.gmra.mxu1 %v8301_v11  ;;  %v8822_v11 = vand.u32 4294901760, %v1424_v60 }
 0x17b   : > { %v8813_v3 = vadd.f32 %v1038_v39, %v917_v19  ;;  %12731 = vst [vmem:[#allocation129_spill] sm:$0xff] %v8822_v11  ;;  %v8825_v39 = vand.u32 4294901760, %v8819_v13  ;;  %v8827_v19 = vand.u32 4294901760, %v360_v27 }
 0x17c   : > { %1603 = vmatmul.f32.gmra.mxu3 %v8770_v62  ;;  %1418 = vmatmul.f32.gmra.mxu2 %v8803_v25 }
 0x17d   : > { %12732 = vst [vmem:[#allocation130_spill] sm:$0xff] %v8825_v39  ;;  %v8838_v60 = vsub.f32 %v360_v27, %v8827_v19 }
 0x17e   : > { %v621_v35 = vpop.f32.mrf.mxu0  ;;  %v798_v61 = vpop.f32.mrf.mxu1  ;;  %12733 = vst [vmem:[#allocation131_spill] sm:$0xff] %v8827_v19 }
 0x17f   : > { %v1044_v53 = vpop.f32.mrf.mxu3  ;;  %v799_v21 = vadd.f32 %v798_v61, %v613_v40  ;;  %v921_v49 = vpop.f32.mrf.mxu2  ;;  %v1432_v40 = vsub.f32 %v8819_v13, %v8825_v39  ;;  %12734 = vst [vmem:[#allocation132_spill] sm:$0xff] %v8838_v60  ;;  %v364_v61 = vld [vmem:[%s7814_s12 + $0x1a8] sm:$0xff] }
 0x181   : > { %v922_v25 = vadd.f32 %v921_v49, %v799_v21  ;;  %1188 = vmatmul.f32.gmra.mxu0 %v8369_v50  ;;  %1281 = vmatmul.f32.gmra.mxu1 %v8335_v34  ;;  %v8841_v34 = vand.u32 4294901760, %v1432_v40 }
 0x183   : > { %v8832_v1 = vadd.f32 %v1044_v53, %v922_v25  ;;  %12735 = vst [vmem:[#allocation133_spill] sm:$0xff] %v8841_v34  ;;  %v8844_v53 = vand.u32 4294901760, %v8838_v60  ;;  %v8846_v25 = vand.u32 4294901760, %v364_v61 }
 0x184   : > { %1607 = vmatmul.f32.gmra.mxu3 %v8789_v8  ;;  %1426 = vmatmul.f32.gmra.mxu2 %v8822_v11 }
 0x185   : > { %12736 = vst [vmem:[#allocation134_spill] sm:$0xff] %v8844_v53  ;;  %v8857_v40 = vsub.f32 %v364_v61, %v8846_v25 }
 0x186   : > { %v629_v49 = vpop.f32.mrf.mxu0  ;;  %v802_v21 = vpop.f32.mrf.mxu1  ;;  %12737 = vst [vmem:[#allocation135_spill] sm:$0xff] %v8846_v25 }
 0x187   : > { %v1050_v46 = vpop.f32.mrf.mxu3  ;;  %v803_v24 = vadd.f32 %v802_v21, %v621_v35  ;;  %v926_v18 = vpop.f32.mrf.mxu2  ;;  %v1440_v35 = vsub.f32 %v8838_v60, %v8844_v53  ;;  %12738 = vst [vmem:[#allocation136_spill] sm:$0xff] %v8857_v40  ;;  %v368_v21 = vld [vmem:[%s7814_s12 + $0x1c8] sm:$0xff] }
 0x188   : > { %v372_v53 = vld [vmem:[%s7814_s12 + $0x1e8] sm:$0xff] }
 0x189   : > { %v927_v11 = vadd.f32 %v926_v18, %v803_v24  ;;  %1192 = vmatmul.f32.gmra.mxu0 %v8402_v36  ;;  %1285 = vmatmul.f32.gmra.mxu1 %v8369_v50  ;;  %v8860_v8 = vand.u32 4294901760, %v1440_v35 }
 0x18b   : > { %v8851_v27 = vadd.f32 %v1050_v46, %v927_v11  ;;  %12739 = vst [vmem:[#allocation137_spill] sm:$0xff] %v8860_v8  ;;  %v8863_v11 = vand.u32 4294901760, %v8857_v40  ;;  %v8865_v46 = vand.u32 4294901760, %v368_v21 }
 0x18c   : > { %1611 = vmatmul.f32.gmra.mxu3 %v8808_v52  ;;  %1434 = vmatmul.f32.gmra.mxu2 %v8841_v34 }
 0x18d   : > { %12740 = vst [vmem:[#allocation138_spill] sm:$0xff] %v8863_v11  ;;  %v8876_v35 = vsub.f32 %v368_v21, %v8865_v46 }
 0x18e   : > { %v637_v24 = vpop.f32.mrf.mxu0  ;;  %v806_v18 = vpop.f32.mrf.mxu1  ;;  %12741 = vst [vmem:[#allocation139_spill] sm:$0xff] %v8865_v46 }
 0x18f   : > { %v1056_v39 = vpop.f32.mrf.mxu3  ;;  %v807_v13 = vadd.f32 %v806_v18, %v629_v49  ;;  %v931_v50 = vpop.f32.mrf.mxu2  ;;  %v1448_v49 = vsub.f32 %v8857_v40, %v8863_v11  ;;  %12742 = vst [vmem:[#allocation140_spill] sm:$0xff] %v8876_v35  ;;  %v437_v18 = vld [vmem:[%s7821_s14 + $0x1f0] sm:$0xff]  ;;  %v8890_v21 = vand.u32 4294901760, %v8876_v35  ;;  %v8892_v11 = vand.u32 4294901760, %v372_v53 }
 0x190   : > { %v8880_v60 = vand.u32 4294901760, %v437_v18 }
 0x191   : > { %v932_v34 = vadd.f32 %v931_v50, %v807_v13  ;;  %1196 = vmatmul.f32.gmra.mxu0 %v8434_v12  ;;  %1289 = vmatmul.f32.gmra.mxu1 %v8402_v36  ;;  %12745 = vst [vmem:[#allocation143_spill] sm:$0xff] %v8890_v21 }
 0x192   : > { %12743 = vst [vmem:[#allocation141_spill] sm:$0xff] %v8880_v60  ;;  %v8883_v36 = vsub.f32 %v437_v18, %v8880_v60  ;;  %2116 = vmatpush.xpose.msrb.mxu0 %v8880_v60  ;;  %2567 = vmatpush.xpose.msrb.mxu3 %v8880_v60 }
 0x193   : > { %v8870_v61 = vadd.f32 %v1056_v39, %v932_v34  ;;  %12746 = vst [vmem:[#allocation144_spill] sm:$0xff] %v8892_v11 }
 0x194   : > { %1615 = vmatmul.f32.gmra.mxu3 %v8827_v19  ;;  %1442 = vmatmul.f32.gmra.mxu2 %v8860_v8  ;;  %v8887_v8 = vand.u32 4294901760, %v1448_v49  ;;  %v12222_v18 = vand.u32 4294901760, %v8883_v36  ;;  %v8905_v49 = vsub.f32 %v372_v53, %v8892_v11 }
 0x195   : > { %2439 = vmatpush.xpose.msrb.mxu2 %v8883_v36 }
 0x196   : > { %v645_v13 = vpop.f32.mrf.mxu0  ;;  %v810_v52 = vpop.f32.mrf.mxu1  ;;  %12744 = vst [vmem:[#allocation142_spill] sm:$0xff] %v8887_v8 }
 0x197   : > { %v1062_v50 = vpop.f32.mrf.mxu3  ;;  %v811_v34 = vadd.f32 %v810_v52, %v637_v24  ;;  %v936_v39 = vpop.f32.mrf.mxu2  ;;  %v1456_v24 = vsub.f32 %v8876_v35, %v8890_v21  ;;  %12747 = vst [vmem:[#allocation145_spill] sm:$0xff] %v8905_v49 }
 0x199   : > { %v937_v40 = vadd.f32 %v936_v39, %v811_v34  ;;  %1200 = vmatmul.f32.gmra.mxu0 %v8466_v2  ;;  %1293 = vmatmul.f32.gmra.mxu1 %v8434_v12  ;;  %v2279_v34 = vsub.f32 %v8883_v36, %v12222_v18  ;;  %v433_v39 = vld [vmem:[%s7821_s14 + $0x1d0] sm:$0xff]  ;;  %v8918_v21 = vand.u32 4294901760, %v1456_v24  ;;  %v8921_v18 = vand.u32 4294901760, %v8905_v49 }
 0x19a   : > { %v8911_v12 = vand.u32 4294901760, %v433_v39 }
 0x19b   : > { %v8899_v52 = vadd.f32 %v1062_v50, %v937_v40  ;;  %v2280_v19 = vand.u32 4294901760, %v2279_v34  ;;  %12749 = vst [vmem:[#allocation147_spill] sm:$0xff] %v8918_v21 }
 0x19c   : > { %1619 = vmatmul.f32.gmra.mxu3 %v8846_v25  ;;  %1450 = vmatmul.f32.gmra.mxu2 %v8887_v8  ;;  %12748 = vst [vmem:[#allocation146_spill] sm:$0xff] %v8911_v12  ;;  %v8914_v50 = vsub.f32 %v433_v39, %v8911_v12 }
 0x19d   : > { %2118 = vmatpush.xpose.msrb.mxu0 %v8911_v12  ;;  %2569 = vmatpush.xpose.msrb.mxu3 %v8911_v12  ;;  %12750 = vst [vmem:[#allocation148_spill] sm:$0xff] %v8921_v18 }
 0x19e   : > { %v653_v25 = vpop.f32.mrf.mxu0  ;;  %v814_v40 = vpop.f32.mrf.mxu1  ;;  %2281 = vmatpush.xpose.msrb.mxu1 %v2280_v19  ;;  %2442 = vmatpush.xpose.msrb.mxu2 %v8914_v50  ;;  %v12231_v39 = vand.u32 4294901760, %v8914_v50 }
 0x19f   : > { %v1068_v60 = vpop.f32.mrf.mxu3  ;;  %v815_v53 = vadd.f32 %v814_v40, %v645_v13  ;;  %v941_v8 = vpop.f32.mrf.mxu2  ;;  %v1464_v13 = vsub.f32 %v8905_v49, %v8921_v18 }
 0x1a0   : > { %v2285_v19 = vsub.f32 %v8914_v50, %v12231_v39 }
 0x1a1   : > { %v942_v34 = vadd.f32 %v941_v8, %v815_v53  ;;  %1204 = vmatmul.f32.gmra.mxu0 %v8502_v54  ;;  %1297 = vmatmul.f32.gmra.mxu1 %v8466_v2  ;;  %v429_v8 = vld [vmem:[%s7821_s14 + $0x1b0] sm:$0xff] }
 0x1a2   : > { %v8937_v24 = vand.u32 4294901760, %v429_v8  ;;  %v2286_v53 = vand.u32 4294901760, %v2285_v19 }
 0x1a3   : > { %v8928_v35 = vadd.f32 %v1068_v60, %v942_v34 }
 0x1a4   : > { %1623 = vmatmul.f32.gmra.mxu3 %v8865_v46  ;;  %1458 = vmatmul.f32.gmra.mxu2 %v8918_v21  ;;  %v8940_v46 = vsub.f32 %v429_v8, %v8937_v24  ;;  %v8944_v21 = vand.u32 4294901760, %v1464_v13 }
 0x1a5   : > { %2120 = vmatpush.xpose.msrb.mxu0 %v8937_v24  ;;  %2571 = vmatpush.xpose.msrb.mxu3 %v8937_v24 }
 0x1a6   : > { %v661_v2 = vpop.f32.mrf.mxu0  ;;  %v818_v12 = vpop.f32.mrf.mxu1  ;;  %12751 = vst [vmem:[#allocation149_spill] sm:$0xff] %v8944_v21  ;;  %2287 = vmatpush.xpose.msrb.mxu1 %v2286_v53  ;;  %2445 = vmatpush.xpose.msrb.mxu2 %v8940_v46  ;;  %v12236_v19 = vand.u32 4294901760, %v8940_v46 }
 0x1a7   : > { %v1074_v40 = vpop.f32.mrf.mxu3  ;;  %v819_v60 = vadd.f32 %v818_v12, %v653_v25  ;;  %v946_v34 = vpop.f32.mrf.mxu2  ;;  %v425_v25 = vld [vmem:[%s7821_s14 + $0x190] sm:$0xff] }
 0x1a8   : > { %v2291_v12 = vsub.f32 %v8940_v46, %v12236_v19  ;;  %v8958_v13 = vand.u32 4294901760, %v425_v25 }
 0x1a9   : > { %v947_v39 = vadd.f32 %v946_v34, %v819_v60  ;;  %1208 = vmatmul.f32.gmra.mxu0 %v8531_v55  ;;  %1301 = vmatmul.f32.gmra.mxu1 %v8502_v54 }
 0x1aa   : > { %v2292_v60 = vand.u32 4294901760, %v2291_v12  ;;  %v8961_v54 = vsub.f32 %v425_v25, %v8958_v13  ;;  %2122 = vmatpush.xpose.msrb.mxu0 %v8958_v13  ;;  %2573 = vmatpush.xpose.msrb.mxu3 %v8958_v13 }
 0x1ab   : > { %v8951_v8 = vadd.f32 %v1074_v40, %v947_v39 }
 0x1ac   : > { %1627 = vmatmul.f32.gmra.mxu3 %v8892_v11  ;;  %1466 = vmatmul.f32.gmra.mxu2 %v8944_v21  ;;  %v12243_v12 = vand.u32 4294901760, %v8961_v54 }
 0x1ad   : > { %2293 = vmatpush.xpose.msrb.mxu1 %v2292_v60  ;;  %2448 = vmatpush.xpose.msrb.mxu2 %v8961_v54  ;;  %v421_v60 = vld [vmem:[%s7821_s14 + $0x170] sm:$0xff] }
 0x1ae   : > { %v822_v34 = vpop.f32.mrf.mxu1  ;;  %v1149_v18 = vpop.f32.mrf.mxu0 }
 0x1af   : > { %v1080_v53 = vpop.f32.mrf.mxu3  ;;  %v823_v39 = vadd.f32 %v822_v34, %v661_v2  ;;  %v951_v40 = vpop.f32.mrf.mxu2  ;;  %v2297_v2 = vsub.f32 %v8961_v54, %v12243_v12  ;;  %v8977_v34 = vand.u32 4294901760, %v421_v60 }
 0x1b1   : > { %v952_v19 = vadd.f32 %v951_v40, %v823_v39  ;;  %1305 = vmatmul.f32.gmra.mxu1 %v8531_v55  ;;  %1681 = vmatmul.f32.vlgmr.msra.gmra.mxu0 %v8574_v20  ;;  %v1150_v39 = vadd.f32 %v1149_v18, %v8646_v26  ;;  %v2298_v21 = vand.u32 4294901760, %v2297_v2  ;;  %v8981_v11 = vsub.f32 %v421_v60, %v8977_v34 }
 0x1b2   : > { %2124 = vmatpush.xpose.msrb.mxu0 %v8977_v34  ;;  %2575 = vmatpush.xpose.msrb.mxu3 %v8977_v34 }
 0x1b3   : > { %v8970_v25 = vadd.f32 %v1080_v53, %v952_v19  ;;  %2299 = vmatpush.xpose.msrb.mxu1 %v2298_v21  ;;  %2451 = vmatpush.xpose.msrb.mxu2 %v8981_v11  ;;  %v12246_v26 = vand.u32 4294901760, %v8981_v11  ;;  %v417_v21 = vld [vmem:[%s7821_s14 + $0x150] sm:$0xff] }
 0x1b4   : > { %2051 = vmatmul.f32.vlgmr.msra.gmra.mxu3 %v8560_v57  ;;  %1954 = vmatmul.f32.vlgmr.msra.gmra.mxu2 %v8560_v57  ;;  %v8997_v2 = vand.u32 4294901760, %v417_v21 }
 0x1b6   : > { %v1153_v20 = vpop.f32.mrf.mxu0  ;;  %v1246_v55 = vpop.f32.mrf.mxu1  ;;  %2126 = vmatpush.xpose.msrb.mxu0 %v8997_v2  ;;  %2577 = vmatpush.xpose.msrb.mxu3 %v8997_v2 }
 0x1b7   : > { %v1568_v40 = vpop.f32.mrf.mxu3  ;;  %v1247_v19 = vadd.f32 %v1246_v55, %v1150_v39  ;;  %v1347_v53 = vpop.f32.mrf.mxu2  ;;  %v2303_v55 = vsub.f32 %v8981_v11, %v12246_v26  ;;  %v1154_v60 = vadd.f32 %v1153_v20, %v8671_v4 }
 0x1b9   : > { %v1348_v12 = vadd.f32 %v1347_v53, %v1247_v19  ;;  %1686 = vmatmul.f32.gmra.mxu0 %v8601_v31  ;;  %1795 = vmatmul.f32.vlgmr.msra.gmra.mxu1 %v8585_v5  ;;  %v2304_v19 = vand.u32 4294901760, %v2303_v55  ;;  %v9001_v31 = vsub.f32 %v417_v21, %v8997_v2  ;;  %v413_v55 = vld [vmem:[%s7821_s14 + $0x130] sm:$0xff] }
 0x1ba   : > { %v9017_v21 = vand.u32 4294901760, %v413_v55 }
 0x1bb   : > { %v8990_v18 = vadd.f32 %v1568_v40, %v1348_v12  ;;  %2305 = vmatpush.xpose.msrb.mxu1 %v2304_v19  ;;  %2454 = vmatpush.xpose.msrb.mxu2 %v9001_v31  ;;  %v12249_v20 = vand.u32 4294901760, %v9001_v31 }
 0x1bc   : > { %2055 = vmatmul.f32.gmra.mxu3 %v8587_v41  ;;  %1958 = vmatmul.f32.gmra.mxu2 %v8587_v41 }
 0x1bd   : > { %2128 = vmatpush.xpose.msrb.mxu0 %v9017_v21  ;;  %2579 = vmatpush.xpose.msrb.mxu3 %v9017_v21 }
 0x1be   : > { %v1157_v53 = vpop.f32.mrf.mxu0  ;;  %v1250_v5 = vpop.f32.mrf.mxu1 }
 0x1bf   : > { %v1572_v39 = vpop.f32.mrf.mxu3  ;;  %v1251_v12 = vadd.f32 %v1250_v5, %v1154_v60  ;;  %v1355_v40 = vpop.f32.mrf.mxu2  ;;  %v2309_v5 = vsub.f32 %v9001_v31, %v12249_v20  ;;  %v1158_v60 = vadd.f32 %v1157_v53, %v8696_v15 }
 0x1c1   : > { %v1356_v26 = vadd.f32 %v1355_v40, %v1251_v12  ;;  %1691 = vmatmul.f32.gmra.mxu0 %v8627_v17  ;;  %1801 = vmatmul.f32.gmra.mxu1 %v8612_v30  ;;  %v2310_v12 = vand.u32 4294901760, %v2309_v5  ;;  %v9021_v17 = vsub.f32 %v413_v55, %v9017_v21  ;;  %v409_v5 = vld [vmem:[%s7821_s14 + $0x110] sm:$0xff] }
 0x1c2   : > { %v9037_v55 = vand.u32 4294901760, %v409_v5 }
 0x1c3   : > { %v9010_v4 = vadd.f32 %v1572_v39, %v1356_v26  ;;  %2311 = vmatpush.xpose.msrb.mxu1 %v2310_v12  ;;  %2457 = vmatpush.xpose.msrb.mxu2 %v9021_v17  ;;  %v12252_v15 = vand.u32 4294901760, %v9021_v17 }
 0x1c4   : > { %2059 = vmatmul.f32.gmra.mxu3 %v8614_v33  ;;  %1962 = vmatmul.f32.gmra.mxu2 %v8614_v33 }
 0x1c5   : > { %2130 = vmatpush.xpose.msrb.mxu0 %v9037_v55  ;;  %2581 = vmatpush.xpose.msrb.mxu3 %v9037_v55 }
 0x1c6   : > { %v1161_v40 = vpop.f32.mrf.mxu0  ;;  %v1254_v30 = vpop.f32.mrf.mxu1 }
 0x1c7   : > { %v1576_v19 = vpop.f32.mrf.mxu3  ;;  %v1255_v26 = vadd.f32 %v1254_v30, %v1158_v60  ;;  %v1363_v39 = vpop.f32.mrf.mxu2  ;;  %v2315_v30 = vsub.f32 %v9021_v17, %v12252_v15  ;;  %v1162_v60 = vadd.f32 %v1161_v40, %v8717_v28 }
 0x1c9   : > { %v1364_v20 = vadd.f32 %v1363_v39, %v1255_v26  ;;  %1696 = vmatmul.f32.gmra.mxu0 %v8652_v42  ;;  %1807 = vmatmul.f32.gmra.mxu1 %v8636_v9  ;;  %v2316_v26 = vand.u32 4294901760, %v2315_v30  ;;  %v9041_v42 = vsub.f32 %v409_v5, %v9037_v55  ;;  %v405_v30 = vld [vmem:[%s7821_s14 + $0xf0] sm:$0xff] }
 0x1ca   : > { %v9057_v5 = vand.u32 4294901760, %v405_v30 }
 0x1cb   : > { %v9030_v53 = vadd.f32 %v1576_v19, %v1364_v20  ;;  %2317 = vmatpush.xpose.msrb.mxu1 %v2316_v26  ;;  %2460 = vmatpush.xpose.msrb.mxu2 %v9041_v42  ;;  %v12255_v28 = vand.u32 4294901760, %v9041_v42 }
 0x1cc   : > { %2063 = vmatmul.f32.gmra.mxu3 %v8638_v47  ;;  %1966 = vmatmul.f32.gmra.mxu2 %v8638_v47  ;;  %v12767_v47 = vld [vmem:[#allocation135_spill] sm:$0xff] }
 0x1cd   : > { %2132 = vmatpush.xpose.msrb.mxu0 %v9057_v5  ;;  %2583 = vmatpush.xpose.msrb.mxu3 %v9057_v5 }
 0x1ce   : > { %v1165_v39 = vpop.f32.mrf.mxu0  ;;  %v1258_v9 = vpop.f32.mrf.mxu1 }
 0x1cf   : > { %v1580_v12 = vpop.f32.mrf.mxu3  ;;  %v1259_v20 = vadd.f32 %v1258_v9, %v1162_v60  ;;  %v1371_v19 = vpop.f32.mrf.mxu2  ;;  %v2321_v9 = vsub.f32 %v9041_v42, %v12255_v28  ;;  %v1166_v60 = vadd.f32 %v1165_v39, %v8737_v38 }
 0x1d1   : > { %v1372_v15 = vadd.f32 %v1371_v19, %v1259_v20  ;;  %1701 = vmatmul.f32.gmra.mxu0 %v8677_v63  ;;  %1813 = vmatmul.f32.gmra.mxu1 %v8661_v58  ;;  %v2322_v20 = vand.u32 4294901760, %v2321_v9  ;;  %v9061_v63 = vsub.f32 %v405_v30, %v9057_v5  ;;  %v401_v9 = vld [vmem:[%s7821_s14 + $0xd0] sm:$0xff] }
 0x1d2   : > { %v9077_v30 = vand.u32 4294901760, %v401_v9 }
 0x1d3   : > { %v9050_v40 = vadd.f32 %v1580_v12, %v1372_v15  ;;  %2323 = vmatpush.xpose.msrb.mxu1 %v2322_v20  ;;  %2463 = vmatpush.xpose.msrb.mxu2 %v9061_v63  ;;  %v12258_v38 = vand.u32 4294901760, %v9061_v63 }
 0x1d4   : > { %2067 = vmatmul.f32.gmra.mxu3 %v8663_v29  ;;  %1970 = vmatmul.f32.gmra.mxu2 %v8663_v29 }
 0x1d5   : > { %2134 = vmatpush.xpose.msrb.mxu0 %v9077_v30  ;;  %2585 = vmatpush.xpose.msrb.mxu3 %v9077_v30 }
 0x1d6   : > { %v1169_v19 = vpop.f32.mrf.mxu0  ;;  %v1262_v58 = vpop.f32.mrf.mxu1 }
 0x1d7   : > { %v1584_v26 = vpop.f32.mrf.mxu3  ;;  %v1263_v15 = vadd.f32 %v1262_v58, %v1166_v60  ;;  %v1379_v12 = vpop.f32.mrf.mxu2  ;;  %v2327_v58 = vsub.f32 %v9061_v63, %v12258_v38  ;;  %v1170_v60 = vadd.f32 %v1169_v19, %v8756_v7 }
 0x1d9   : > { %v1380_v28 = vadd.f32 %v1379_v12, %v1263_v15  ;;  %1706 = vmatmul.f32.gmra.mxu0 %v8702_v22  ;;  %1819 = vmatmul.f32.gmra.mxu1 %v8686_v43  ;;  %v2328_v15 = vand.u32 4294901760, %v2327_v58  ;;  %v9081_v22 = vsub.f32 %v401_v9, %v9077_v30  ;;  %v397_v58 = vld [vmem:[%s7821_s14 + $0xb0] sm:$0xff] }
 0x1da   : > { %v9097_v9 = vand.u32 4294901760, %v397_v58 }
 0x1db   : > { %v9070_v39 = vadd.f32 %v1584_v26, %v1380_v28  ;;  %2329 = vmatpush.xpose.msrb.mxu1 %v2328_v15  ;;  %2466 = vmatpush.xpose.msrb.mxu2 %v9081_v22  ;;  %v12261_v7 = vand.u32 4294901760, %v9081_v22 }
 0x1dc   : > { %2071 = vmatmul.f32.gmra.mxu3 %v8688_v32  ;;  %1974 = vmatmul.f32.gmra.mxu2 %v8688_v32 }
 0x1dd   : > { %2136 = vmatpush.xpose.msrb.mxu0 %v9097_v9  ;;  %2587 = vmatpush.xpose.msrb.mxu3 %v9097_v9 }
 0x1de   : > { %v1173_v12 = vpop.f32.mrf.mxu0  ;;  %v1266_v43 = vpop.f32.mrf.mxu1 }
 0x1df   : > { %v1588_v20 = vpop.f32.mrf.mxu3  ;;  %v1267_v28 = vadd.f32 %v1266_v43, %v1170_v60  ;;  %v1387_v26 = vpop.f32.mrf.mxu2  ;;  %v2333_v43 = vsub.f32 %v9081_v22, %v12261_v7  ;;  %v1174_v60 = vadd.f32 %v1173_v12, %v8775_v48 }
 0x1e1   : > { %v1388_v38 = vadd.f32 %v1387_v26, %v1267_v28  ;;  %1711 = vmatmul.f32.gmra.mxu0 %v8723_v51  ;;  %1825 = vmatmul.f32.gmra.mxu1 %v8709_v37  ;;  %v2334_v28 = vand.u32 4294901760, %v2333_v43  ;;  %v9101_v51 = vsub.f32 %v397_v58, %v9097_v9  ;;  %v393_v43 = vld [vmem:[%s7821_s14 + $0x90] sm:$0xff] }
 0x1e2   : > { %v9117_v58 = vand.u32 4294901760, %v393_v43 }
 0x1e3   : > { %v9090_v19 = vadd.f32 %v1588_v20, %v1388_v38  ;;  %2335 = vmatpush.xpose.msrb.mxu1 %v2334_v28  ;;  %2469 = vmatpush.xpose.msrb.mxu2 %v9101_v51  ;;  %v12264_v48 = vand.u32 4294901760, %v9101_v51 }
 0x1e4   : > { %2075 = vmatmul.f32.gmra.mxu3 %v8711_v56  ;;  %1978 = vmatmul.f32.gmra.mxu2 %v8711_v56 }
 0x1e5   : > { %2138 = vmatpush.xpose.msrb.mxu0 %v9117_v58  ;;  %2589 = vmatpush.xpose.msrb.mxu3 %v9117_v58 }
 0x1e6   : > { %v1177_v26 = vpop.f32.mrf.mxu0  ;;  %v1270_v37 = vpop.f32.mrf.mxu1 }
 0x1e7   : > { %v1592_v15 = vpop.f32.mrf.mxu3  ;;  %v1271_v38 = vadd.f32 %v1270_v37, %v1174_v60  ;;  %v1395_v20 = vpop.f32.mrf.mxu2  ;;  %v2339_v37 = vsub.f32 %v9101_v51, %v12264_v48  ;;  %v1178_v60 = vadd.f32 %v1177_v26, %v8794_v14 }
 0x1e9   : > { %v1396_v7 = vadd.f32 %v1395_v20, %v1271_v38  ;;  %1716 = vmatmul.f32.gmra.mxu0 %v8743_v10  ;;  %1831 = vmatmul.f32.gmra.mxu1 %v8730_v23  ;;  %v2340_v38 = vand.u32 4294901760, %v2339_v37  ;;  %v9121_v10 = vsub.f32 %v393_v43, %v9117_v58  ;;  %v389_v37 = vld [vmem:[%s7821_s14 + $0x70] sm:$0xff] }
 0x1ea   : > { %v9137_v43 = vand.u32 4294901760, %v389_v37 }
 0x1eb   : > { %v9110_v12 = vadd.f32 %v1592_v15, %v1396_v7  ;;  %2341 = vmatpush.xpose.msrb.mxu1 %v2340_v38  ;;  %2472 = vmatpush.xpose.msrb.mxu2 %v9121_v10  ;;  %v12267_v14 = vand.u32 4294901760, %v9121_v10 }
 0x1ec   : > { %2079 = vmatmul.f32.gmra.mxu3 %v8732_v44  ;;  %1982 = vmatmul.f32.gmra.mxu2 %v8732_v44 }
 0x1ed   : > { %2140 = vmatpush.xpose.msrb.mxu0 %v9137_v43  ;;  %2591 = vmatpush.xpose.msrb.mxu3 %v9137_v43 }
 0x1ee   : > { %v1181_v20 = vpop.f32.mrf.mxu0  ;;  %v1274_v23 = vpop.f32.mrf.mxu1 }
 0x1ef   : > { %v1596_v28 = vpop.f32.mrf.mxu3  ;;  %v1275_v7 = vadd.f32 %v1274_v23, %v1178_v60  ;;  %v1403_v15 = vpop.f32.mrf.mxu2  ;;  %v2345_v23 = vsub.f32 %v9121_v10, %v12267_v14  ;;  %v1182_v60 = vadd.f32 %v1181_v20, %v8813_v3 }
 0x1f1   : > { %v1404_v48 = vadd.f32 %v1403_v15, %v1275_v7  ;;  %1721 = vmatmul.f32.gmra.mxu0 %v8762_v45  ;;  %1837 = vmatmul.f32.gmra.mxu1 %v8749_v6  ;;  %v2346_v7 = vand.u32 4294901760, %v2345_v23  ;;  %v9141_v45 = vsub.f32 %v389_v37, %v9137_v43  ;;  %v385_v23 = vld [vmem:[%s7821_s14 + $0x50] sm:$0xff] }
 0x1f2   : > { %v9157_v37 = vand.u32 4294901760, %v385_v23 }
 0x1f3   : > { %v9130_v26 = vadd.f32 %v1596_v28, %v1404_v48  ;;  %2347 = vmatpush.xpose.msrb.mxu1 %v2346_v7  ;;  %2475 = vmatpush.xpose.msrb.mxu2 %v9141_v45  ;;  %v12270_v3 = vand.u32 4294901760, %v9141_v45 }
 0x1f4   : > { %2083 = vmatmul.f32.gmra.mxu3 %v8751_v59  ;;  %1986 = vmatmul.f32.gmra.mxu2 %v8751_v59 }
 0x1f5   : > { %2142 = vmatpush.xpose.msrb.mxu0 %v9157_v37  ;;  %2593 = vmatpush.xpose.msrb.mxu3 %v9157_v37 }
 0x1f6   : > { %v1185_v15 = vpop.f32.mrf.mxu0  ;;  %v1278_v6 = vpop.f32.mrf.mxu1 }
 0x1f7   : > { %v1600_v38 = vpop.f32.mrf.mxu3  ;;  %v1279_v48 = vadd.f32 %v1278_v6, %v1182_v60  ;;  %v1411_v28 = vpop.f32.mrf.mxu2  ;;  %v2351_v6 = vsub.f32 %v9141_v45, %v12270_v3  ;;  %v1186_v60 = vadd.f32 %v1185_v15, %v8832_v1  ;;  %v12753_v1 = vld [vmem:[#allocation122_spill] sm:$0xff] }
 0x1f9   : > { %v1412_v14 = vadd.f32 %v1411_v28, %v1279_v48  ;;  %1726 = vmatmul.f32.gmra.mxu0 %v8781_v16  ;;  %1843 = vmatmul.f32.gmra.mxu1 %v8768_v0  ;;  %v2352_v48 = vand.u32 4294901760, %v2351_v6  ;;  %v9161_v16 = vsub.f32 %v385_v23, %v9157_v37  ;;  %v12754_v6 = vld [vmem:[#allocation123_spill] sm:$0xff] }
 0x1fb   : > { %v9150_v20 = vadd.f32 %v1600_v38, %v1412_v14  ;;  %2353 = vmatpush.xpose.msrb.mxu1 %v2352_v48  ;;  %2478 = vmatpush.xpose.msrb.mxu2 %v9161_v16  ;;  %v12277_v15 = vand.u32 4294901760, %v9161_v16 }
 0x1fc   : > { %2087 = vmatmul.f32.gmra.mxu3 %v8770_v62  ;;  %1990 = vmatmul.f32.gmra.mxu2 %v8770_v62  ;;  %v12752_v62 = vld [vmem:[#allocation124_spill] sm:$0xff] }
 0x1fe   : > { %v1189_v28 = vpop.f32.mrf.mxu0  ;;  %v1282_v0 = vpop.f32.mrf.mxu1 }
 0x1ff   : > { %v1604_v7 = vpop.f32.mrf.mxu3  ;;  %v1283_v14 = vadd.f32 %v1282_v0, %v1186_v60  ;;  %v1419_v38 = vpop.f32.mrf.mxu2  ;;  %v2357_v0 = vsub.f32 %v9161_v16, %v12277_v15  ;;  %v381_v60 = vld [vmem:[%s7821_s14 + $0x30] sm:$0xff] }
 0x200   : > { %v9177_v48 = vand.u32 4294901760, %v381_v60 }
 0x201   : > { %v1420_v3 = vadd.f32 %v1419_v38, %v1283_v14  ;;  %1731 = vmatmul.f32.gmra.mxu0 %v12752_v62  ;;  %1849 = vmatmul.f32.gmra.mxu1 %v12753_v1  ;;  %v1190_v14 = vadd.f32 %v1189_v28, %v8851_v27  ;;  %v2358_v62 = vand.u32 4294901760, %v2357_v0  ;;  %v12756_v27 = vld [vmem:[#allocation126_spill] sm:$0xff]  ;;  %v12757_v0 = vld [vmem:[#allocation127_spill] sm:$0xff] }
 0x202   : > { %v9181_v44 = vsub.f32 %v381_v60, %v9177_v48  ;;  %2144 = vmatpush.xpose.msrb.mxu0 %v9177_v48  ;;  %2595 = vmatpush.xpose.msrb.mxu3 %v9177_v48 }
 0x203   : > { %v9170_v23 = vadd.f32 %v1604_v7, %v1420_v3  ;;  %2359 = vmatpush.xpose.msrb.mxu1 %v2358_v62  ;;  %v377_v62 = vld [vmem:[%s7821_s14 + $0x10] sm:$0xff] }
 0x204   : > { %2091 = vmatmul.f32.gmra.mxu3 %v12754_v6  ;;  %1994 = vmatmul.f32.gmra.mxu2 %v12754_v6  ;;  %v12755_v6 = vld [vmem:[#allocation128_spill] sm:$0xff]  ;;  %v12283_v28 = vand.u32 4294901760, %v9181_v44 }
 0x205   : > { %2481 = vmatpush.xpose.msrb.mxu2 %v9181_v44 }
 0x206   : > { %v1193_v1 = vpop.f32.mrf.mxu0  ;;  %v1286_v59 = vpop.f32.mrf.mxu1 }
 0x207   : > { %v1608_v38 = vpop.f32.mrf.mxu3  ;;  %v1287_v3 = vadd.f32 %v1286_v59, %v1190_v14  ;;  %v1427_v7 = vpop.f32.mrf.mxu2  ;;  %v2363_v59 = vsub.f32 %v9181_v44, %v12283_v28  ;;  %v9197_v14 = vand.u32 4294901760, %v377_v62  ;;  %v12758_v28 = vand.u32 4294901760, %v8883_v36  ;;  %v438_v36 = vld [vmem:[%s7821_s14 + $0x1f8] sm:$0xff] }
 0x209   : > { %v1428_v15 = vadd.f32 %v1427_v7, %v1287_v3  ;;  %1736 = vmatmul.f32.gmra.mxu0 %v12755_v6  ;;  %1855 = vmatmul.f32.gmra.mxu1 %v12756_v27  ;;  %v1194_v3 = vadd.f32 %v1193_v1, %v8870_v61  ;;  %v2364_v6 = vand.u32 4294901760, %v2363_v59  ;;  %v9201_v32 = vsub.f32 %v377_v62, %v9197_v14  ;;  %v12759_v59 = vld [vmem:[#allocation132_spill] sm:$0xff]  ;;  %v12760_v62 = vld [vmem:[#allocation130_spill] sm:$0xff] }
 0x20a   : > { %2146 = vmatpush.xpose.msrb.mxu0 %v9197_v14  ;;  %2597 = vmatpush.xpose.msrb.mxu3 %v9197_v14 }
 0x20b   : > { %v9190_v60 = vadd.f32 %v1608_v38, %v1428_v15  ;;  %2365 = vmatpush.xpose.msrb.mxu1 %v2364_v6  ;;  %2484 = vmatpush.xpose.msrb.mxu2 %v9201_v32  ;;  %v12287_v61 = vand.u32 4294901760, %v9201_v32  ;;  %v12762_v6 = vand.u32 4294901760, %v8914_v50  ;;  %v12763_v50 = vld [vmem:[#allocation141_spill] sm:$0xff] }
 0x20c   : > { %2095 = vmatmul.f32.gmra.mxu3 %v12757_v0  ;;  %1998 = vmatmul.f32.gmra.mxu2 %v12757_v0  ;;  %v12761_v0 = vld [vmem:[#allocation131_spill] sm:$0xff] }
 0x20e   : > { %v1197_v27 = vpop.f32.mrf.mxu0  ;;  %v1290_v56 = vpop.f32.mrf.mxu1  ;;  %2698 = vmatpush.xpose.msra.mxu0 %v12758_v28 }
 0x20f   : > { %v1612_v7 = vpop.f32.mrf.mxu3  ;;  %v1291_v15 = vadd.f32 %v1290_v56, %v1194_v3  ;;  %v1435_v38 = vpop.f32.mrf.mxu2  ;;  %v2369_v56 = vsub.f32 %v9201_v32, %v12287_v61 }
 0x211   : > { %v1436_v1 = vadd.f32 %v1435_v38, %v1291_v15  ;;  %1741 = vmatmul.f32.gmra.mxu0 %v12759_v59  ;;  %1861 = vmatmul.f32.gmra.mxu1 %v12760_v62  ;;  %v2370_v28 = vand.u32 4294901760, %v2369_v56  ;;  %v9221_v15 = vand.u32 4294901760, %v438_v36  ;;  %v1198_v38 = vadd.f32 %v1197_v27, %v8899_v52  ;;  %v12765_v27 = vld [vmem:[#allocation136_spill] sm:$0xff] }
 0x212   : > { %2702 = vmatpush.xpose.msra.mxu0 %v12762_v6  ;;  %v12764_v56 = vand.u32 4294901760, %v8940_v46  ;;  %v434_v46 = vld [vmem:[%s7821_s14 + $0x1d8] sm:$0xff] }
 0x213   : > { %v9215_v3 = vadd.f32 %v1612_v7, %v1436_v1  ;;  %2371 = vmatpush.xpose.msrb.mxu1 %v2370_v28  ;;  %2922 = vmatpush.xpose.msra.mxu2 %v9221_v15  ;;  %v9226_v7 = vsub.f32 %v438_v36, %v9221_v15  ;;  %v313_v28 = vld [vmem:[%s7814_s12 + $0x10] sm:$0xff] }
 0x214   : > { %2099 = vmatmul.f32.gmra.mxu3 %v12761_v0  ;;  %2002 = vmatmul.f32.gmra.mxu2 %v12761_v0  ;;  %v12766_v0 = vld [vmem:[#allocation134_spill] sm:$0xff] }
 0x215   : > { %v12291_v6 = vand.u32 4294901760, %v9226_v7 }
 0x216   : > { %v1201_v59 = vpop.f32.mrf.mxu0  ;;  %v1294_v29 = vpop.f32.mrf.mxu1  ;;  %2706 = vmatpush.xpose.msra.mxu0 %v12764_v56  ;;  %v12770_v56 = vand.u32 4294901760, %v8961_v54 }
 0x217   : > { %v1616_v62 = vpop.f32.mrf.mxu3  ;;  %v1295_v1 = vadd.f32 %v1294_v29, %v1198_v38  ;;  %v1443_v61 = vpop.f32.mrf.mxu2  ;;  %2825 = vmatpush.xpose.msra.mxu1 %v12763_v50  ;;  %v3085_v29 = vsub.f32 %v9226_v7, %v12291_v6  ;;  %v12768_v38 = vld [vmem:[#allocation146_spill] sm:$0xff]  ;;  %v9244_v50 = vand.u32 4294901760, %v313_v28 }
 0x219   : > { %v1444_v52 = vadd.f32 %v1443_v61, %v1295_v1  ;;  %1746 = vmatmul.f32.gmra.mxu0 %v12765_v27  ;;  %1867 = vmatmul.f32.gmra.mxu1 %v12766_v0  ;;  %12769 = vst [vmem:[#allocation141_spill] sm:$0xff] %v9244_v50  ;;  %v3086_v61 = vand.u32 4294901760, %v3085_v29  ;;  %v9246_v1 = vand.u32 4294901760, %v434_v46  ;;  %v1202_v0 = vadd.f32 %v1201_v59, %v8928_v35  ;;  %v12773_v29 = vld [vmem:[#allocation140_spill] sm:$0xff] }
 0x21a   : > { %2710 = vmatpush.xpose.msra.mxu0 %v12770_v56  ;;  %v9257_v54 = vsub.f32 %v313_v28, %v9244_v50  ;;  %v12772_v35 = vand.u32 4294901760, %v8981_v11  ;;  %v430_v11 = vld [vmem:[%s7821_s14 + $0x1b8] sm:$0xff] }
 0x21b   : > { %v9239_v36 = vadd.f32 %v1616_v62, %v1444_v52  ;;  %2827 = vmatpush.xpose.msra.mxu1 %v12768_v38  ;;  %3087 = vmatpush.xpose.msra.mxu3 %v3086_v61  ;;  %v12774_v61 = vld [vmem:[#allocation138_spill] sm:$0xff] }
 0x21c   : > { %2103 = vmatmul.f32.gmra.mxu3 %v12767_v47  ;;  %2006 = vmatmul.f32.gmra.mxu2 %v12767_v47  ;;  %v9253_v47 = vsub.f32 %v434_v46, %v9246_v1  ;;  %12771 = vst [vmem:[#allocation146_spill] sm:$0xff] %v9257_v54  ;;  %v9275_v28 = vand.u32 4294901760, %v9257_v54 }
 0x21d   : > { %2924 = vmatpush.xpose.msra.mxu2 %v9246_v1 }
 0x21e   : > { %v1205_v6 = vpop.f32.mrf.mxu0  ;;  %v1298_v62 = vpop.f32.mrf.mxu1  ;;  %2714 = vmatpush.xpose.msra.mxu0 %v12772_v35  ;;  %v12293_v56 = vand.u32 4294901760, %v9253_v47  ;;  %12776 = vst [vmem:[#allocation150_spill] sm:$0xff] %v9275_v28 }
 0x21f   : > { %v1620_v27 = vpop.f32.mrf.mxu3  ;;  %v1299_v52 = vadd.f32 %v1298_v62, %v1202_v0  ;;  %v1451_v38 = vpop.f32.mrf.mxu2  ;;  %2829 = vmatpush.xpose.msra.mxu1 %v8937_v24  ;;  %v12775_v0 = vld [vmem:[#allocation139_spill] sm:$0xff]  ;;  %v317_v62 = vld [vmem:[%s7814_s12 + $0x30] sm:$0xff] }
 0x220   : > { %v3091_v24 = vsub.f32 %v9253_v47, %v12293_v56 }
 0x221   : > { %v1452_v59 = vadd.f32 %v1451_v38, %v1299_v52  ;;  %1751 = vmatmul.f32.gmra.mxu0 %v12773_v29  ;;  %1873 = vmatmul.f32.gmra.mxu1 %v12774_v61  ;;  %v9277_v52 = vand.u32 4294901760, %v430_v11  ;;  %v12777_v38 = vand.u32 4294901760, %v9001_v31  ;;  %v2150_v31 = vsub.f32 %v9257_v54, %v9275_v28 }
 0x222   : > { %v3092_v61 = vand.u32 4294901760, %v3091_v24  ;;  %v12780_v24 = vld [vmem:[#allocation143_spill] sm:$0xff] }
 0x223   : > { %v9266_v46 = vadd.f32 %v1620_v27, %v1452_v59  ;;  %2831 = vmatpush.xpose.msra.mxu1 %v8958_v13  ;;  %2718 = vmatpush.xpose.msra.mxu0 %v12777_v38  ;;  %v1206_v27 = vadd.f32 %v1205_v6, %v8951_v8  ;;  %v9282_v59 = vand.u32 4294901760, %v317_v62  ;;  %v9286_v33 = vsub.f32 %v430_v11, %v9277_v52  ;;  %v12782_v11 = vld [vmem:[#allocation144_spill] sm:$0xff]  ;;  %v321_v38 = vld [vmem:[%s7814_s12 + $0x50] sm:$0xff] }
 0x224   : > { %2107 = vmatmul.f32.gmra.mxu3 %v12775_v0  ;;  %2010 = vmatmul.f32.gmra.mxu2 %v12775_v0  ;;  %v12779_v8 = vand.u32 4294901760, %v9021_v17 }
 0x225   : > { %12778 = vst [vmem:[#allocation151_spill] sm:$0xff] %v9282_v59  ;;  %2926 = vmatpush.xpose.msra.mxu2 %v9277_v52  ;;  %3093 = vmatpush.xpose.msra.mxu3 %v3092_v61  ;;  %v12297_v61 = vand.u32 4294901760, %v9286_v33 }
 0x226   : > { %v1209_v29 = vpop.f32.mrf.mxu0  ;;  %v1302_v56 = vpop.f32.mrf.mxu1 }
 0x227   : > { %v1624_v35 = vpop.f32.mrf.mxu3  ;;  %v1303_v13 = vadd.f32 %v1302_v56, %v1206_v27  ;;  %v1459_v0 = vpop.f32.mrf.mxu2  ;;  %2833 = vmatpush.xpose.msra.mxu1 %v8977_v34  ;;  %2722 = vmatpush.xpose.msra.mxu0 %v12779_v8  ;;  %v9296_v56 = vsub.f32 %v317_v62, %v9282_v59  ;;  %v3097_v17 = vsub.f32 %v9286_v33, %v12297_v61  ;;  %v9309_v27 = vand.u32 4294901760, %v2150_v31 }
 0x228   : > { %v1210_v8 = vadd.f32 %v1209_v29, %v8970_v25  ;;  %v12787_v25 = vand.u32 4294901760, %v9061_v63 }
 0x229   : > { %v1460_v6 = vadd.f32 %v1459_v0, %v1303_v13  ;;  %1756 = vmatmul.f32.gmra.mxu0 %v8905_v49  ;;  %1879 = vmatmul.f32.gmra.mxu1 %v12780_v24  ;;  %12781 = vst [vmem:[#allocation152_spill] sm:$0xff] %v9296_v56  ;;  %v426_v0 = vld [vmem:[%s7821_s14 + $0x198] sm:$0xff]  ;;  %v12784_v13 = vand.u32 4294901760, %v9041_v42  ;;  %v9319_v24 = vand.u32 4294901760, %v321_v38  ;;  %v3098_v61 = vand.u32 4294901760, %v3097_v17 }
 0x22a   : > { %12783 = vst [vmem:[#allocation153_spill] sm:$0xff] %v9309_v27  ;;  %v9311_v62 = vand.u32 4294901760, %v426_v0 }
 0x22b   : > { %v9301_v34 = vadd.f32 %v1624_v35, %v1460_v6  ;;  %2835 = vmatpush.xpose.msra.mxu1 %v8997_v2  ;;  %2726 = vmatpush.xpose.msra.mxu0 %v12784_v13  ;;  %v9317_v6 = vand.u32 4294901760, %v9296_v56  ;;  %12786 = vst [vmem:[#allocation155_spill] sm:$0xff] %v9319_v24  ;;  %v12788_v13 = vld [vmem:[#allocation148_spill] sm:$0xff] }
 0x22c   : > { %2111 = vmatmul.f32.gmra.mxu3 %v12782_v11  ;;  %2014 = vmatmul.f32.gmra.mxu2 %v12782_v11  ;;  %v9323_v42 = vsub.f32 %v426_v0, %v9311_v62 }
 0x22d   : > { %12785 = vst [vmem:[#allocation154_spill] sm:$0xff] %v9317_v6  ;;  %2928 = vmatpush.xpose.msra.mxu2 %v9311_v62  ;;  %3099 = vmatpush.xpose.msra.mxu3 %v3098_v61  ;;  %v2158_v17 = vsub.f32 %v9296_v56, %v9317_v6  ;;  %v325_v61 = vld [vmem:[%s7814_s12 + $0x70] sm:$0xff] }
 0x22e   : > { %v1306_v49 = vpop.f32.mrf.mxu1  ;;  %v1682_v11 = vpop.f32.mrf.mxu0  ;;  %v12302_v0 = vand.u32 4294901760, %v9323_v42 }
 0x22f   : > { %v1628_v35 = vpop.f32.mrf.mxu3  ;;  %v1307_v2 = vadd.f32 %v1306_v49, %v1210_v8  ;;  %v1467_v31 = vpop.f32.mrf.mxu2  ;;  %2837 = vmatpush.xpose.msra.mxu1 %v9017_v21  ;;  %2730 = vmatpush.xpose.msra.mxu0 %v12787_v25  ;;  %v9333_v49 = vsub.f32 %v321_v38, %v9319_v24  ;;  %v422_v8 = vld [vmem:[%s7821_s14 + $0x178] sm:$0xff]  ;;  %v1683_v25 = vadd.f32 %v1682_v11, %v8990_v18  ;;  %v12795_v11 = vand.u32 4294901760, %v9101_v51 }
 0x230   : > { %v3103_v63 = vsub.f32 %v9323_v42, %v12302_v0  ;;  %v9348_v38 = vand.u32 4294901760, %v422_v8 }
 0x231   : > { %v1468_v29 = vadd.f32 %v1467_v31, %v1307_v2  ;;  %1885 = vmatmul.f32.gmra.mxu1 %v12788_v13  ;;  %2152 = vmatmul.f32.vlgmr.msrb.gmra.mxu0 %v9309_v27  ;;  %12789 = vst [vmem:[#allocation156_spill] sm:$0xff] %v9333_v49  ;;  %v9346_v2 = vand.u32 4294901760, %v325_v61  ;;  %v12791_v31 = vand.u32 4294901760, %v9081_v22 }
 0x232   : > { %2930 = vmatpush.xpose.msra.mxu2 %v9348_v38  ;;  %v9360_v22 = vsub.f32 %v422_v8, %v9348_v38 }
 0x233   : > { %v9338_v21 = vadd.f32 %v1628_v35, %v1468_v29  ;;  %2839 = vmatpush.xpose.msra.mxu1 %v9037_v55  ;;  %12790 = vst [vmem:[#allocation157_spill] sm:$0xff] %v9346_v2  ;;  %2734 = vmatpush.xpose.msra.mxu0 %v12791_v31  ;;  %v9353_v35 = vand.u32 4294901760, %v2158_v17  ;;  %v9364_v18 = vsub.f32 %v325_v61, %v9346_v2  ;;  %v12797_v31 = vand.u32 4294901760, %v9121_v10 }
 0x234   : > { %2601 = vmatmul.f32.vlgmr.msrb.gmra.mxu3 %v9275_v28  ;;  %2487 = vmatmul.f32.vlgmr.msrb.gmra.mxu2 %v9257_v54  ;;  %v9356_v54 = vand.u32 4294901760, %v9333_v49  ;;  %v3104_v28 = vand.u32 4294901760, %v3103_v63  ;;  %v329_v63 = vld [vmem:[%s7814_s12 + $0x90] sm:$0xff] }
 0x235   : > { %12792 = vst [vmem:[#allocation158_spill] sm:$0xff] %v9353_v35  ;;  %v9384_v61 = vand.u32 4294901760, %v9364_v18 }
 0x236   : > { %12793 = vst [vmem:[#allocation159_spill] sm:$0xff] %v9356_v54  ;;  %v1687_v0 = vpop.f32.mrf.mxu0  ;;  %v1796_v27 = vpop.f32.mrf.mxu1  ;;  %3105 = vmatpush.xpose.msra.mxu3 %v3104_v28  ;;  %v12304_v28 = vand.u32 4294901760, %v9360_v22 }
 0x237   : > { %v2052_v29 = vpop.f32.mrf.mxu3  ;;  %v1797_v55 = vadd.f32 %v1796_v27, %v1683_v25  ;;  %v1955_v13 = vpop.f32.mrf.mxu2  ;;  %2841 = vmatpush.xpose.msra.mxu1 %v9057_v5  ;;  %12794 = vst [vmem:[#allocation160_spill] sm:$0xff] %v9364_v18  ;;  %2738 = vmatpush.xpose.msra.mxu0 %v12795_v11  ;;  %v2166_v27 = vsub.f32 %v9333_v49, %v9356_v54  ;;  %v9393_v11 = vand.u32 4294901760, %v329_v63 }
 0x238   : > { %v3109_v51 = vsub.f32 %v9360_v22, %v12304_v28  ;;  %12796 = vst [vmem:[#allocation161_spill] sm:$0xff] %v9384_v61  ;;  %v1688_v25 = vadd.f32 %v1687_v0, %v9010_v4  ;;  %v2174_v4 = vsub.f32 %v9364_v18, %v9384_v61  ;;  %v12800_v0 = vand.u32 4294901760, %v9141_v45 }
 0x239   : > { %v1956_v17 = vadd.f32 %v1955_v13, %v1797_v55  ;;  %2160 = vmatmul.f32.gmra.mxu0 %v9353_v35  ;;  %2373 = vmatmul.f32.vlgmr.msrb.gmra.mxu1 %v9244_v50  ;;  %v418_v13 = vld [vmem:[%s7821_s14 + $0x158] sm:$0xff]  ;;  %12799 = vst [vmem:[#allocation163_spill] sm:$0xff] %v9393_v11 }
 0x23a   : > { %v9386_v8 = vand.u32 4294901760, %v418_v13 }
 0x23b   : > { %v9375_v5 = vadd.f32 %v2052_v29, %v1956_v17  ;;  %2843 = vmatpush.xpose.msra.mxu1 %v9077_v30  ;;  %2742 = vmatpush.xpose.msra.mxu0 %v12797_v31  ;;  %v9391_v29 = vand.u32 4294901760, %v2166_v27  ;;  %v3110_v17 = vand.u32 4294901760, %v3109_v51  ;;  %v9420_v31 = vand.u32 4294901760, %v2174_v4 }
 0x23c   : > { %2607 = vmatmul.f32.gmra.mxu3 %v9317_v6  ;;  %2492 = vmatmul.f32.gmra.mxu2 %v9296_v56  ;;  %v9397_v10 = vsub.f32 %v418_v13, %v9386_v8  ;;  %v333_v13 = vld [vmem:[%s7814_s12 + $0xb0] sm:$0xff] }
 0x23d   : > { %12798 = vst [vmem:[#allocation162_spill] sm:$0xff] %v9391_v29  ;;  %2932 = vmatpush.xpose.msra.mxu2 %v9386_v8  ;;  %3111 = vmatpush.xpose.msra.mxu3 %v3110_v17 }
 0x23e   : > { %v1692_v28 = vpop.f32.mrf.mxu0  ;;  %v1802_v56 = vpop.f32.mrf.mxu1  ;;  %v12307_v51 = vand.u32 4294901760, %v9397_v10  ;;  %12802 = vst [vmem:[#allocation165_spill] sm:$0xff] %v9420_v31 }
 0x23f   : > { %v2056_v55 = vpop.f32.mrf.mxu3  ;;  %v1803_v30 = vadd.f32 %v1802_v56, %v1688_v25  ;;  %v1959_v6 = vpop.f32.mrf.mxu2  ;;  %2845 = vmatpush.xpose.msra.mxu1 %v9097_v9  ;;  %2746 = vmatpush.xpose.msra.mxu0 %v12800_v0  ;;  %v9407_v56 = vsub.f32 %v329_v63, %v9393_v11  ;;  %v12803_v25 = vand.u32 4294901760, %v9161_v16  ;;  %v1693_v17 = vadd.f32 %v1692_v28, %v9030_v53 }
 0x240   : > { %v3115_v45 = vsub.f32 %v9397_v10, %v12307_v51  ;;  %v9430_v0 = vand.u32 4294901760, %v333_v13  ;;  %v12806_v53 = vand.u32 4294901760, %v9181_v44 }
 0x241   : > { %v1960_v27 = vadd.f32 %v1959_v6, %v1803_v30  ;;  %2168 = vmatmul.f32.gmra.mxu0 %v9391_v29  ;;  %2377 = vmatmul.f32.gmra.mxu1 %v9282_v59  ;;  %12801 = vst [vmem:[#allocation164_spill] sm:$0xff] %v9407_v56  ;;  %v414_v6 = vld [vmem:[%s7821_s14 + $0x138] sm:$0xff]  ;;  %v9428_v30 = vand.u32 4294901760, %v9407_v56 }
 0x242   : > { %v9422_v63 = vand.u32 4294901760, %v414_v6  ;;  %12805 = vst [vmem:[#allocation167_spill] sm:$0xff] %v9430_v0 }
 0x243   : > { %v9412_v9 = vadd.f32 %v2056_v55, %v1960_v27  ;;  %2847 = vmatpush.xpose.msra.mxu1 %v9117_v58  ;;  %2750 = vmatpush.xpose.msra.mxu0 %v12803_v25  ;;  %12804 = vst [vmem:[#allocation166_spill] sm:$0xff] %v9428_v30  ;;  %v3116_v27 = vand.u32 4294901760, %v3115_v45  ;;  %v2182_v45 = vsub.f32 %v9407_v56, %v9428_v30  ;;  %v337_v25 = vld [vmem:[%s7814_s12 + $0xd0] sm:$0xff] }
 0x244   : > { %2613 = vmatmul.f32.gmra.mxu3 %v9356_v54  ;;  %2497 = vmatmul.f32.gmra.mxu2 %v9333_v49  ;;  %v9434_v16 = vsub.f32 %v414_v6, %v9422_v63 }
 0x245   : > { %2934 = vmatpush.xpose.msra.mxu2 %v9422_v63  ;;  %3117 = vmatpush.xpose.msra.mxu3 %v3116_v27  ;;  %v9457_v27 = vand.u32 4294901760, %v337_v25 }
 0x246   : > { %v1697_v51 = vpop.f32.mrf.mxu0  ;;  %v1808_v49 = vpop.f32.mrf.mxu1  ;;  %v12310_v6 = vand.u32 4294901760, %v9434_v16 }
 0x247   : > { %v2060_v55 = vpop.f32.mrf.mxu3  ;;  %v1809_v58 = vadd.f32 %v1808_v49, %v1693_v17  ;;  %v1963_v4 = vpop.f32.mrf.mxu2  ;;  %2849 = vmatpush.xpose.msra.mxu1 %v9137_v43  ;;  %2754 = vmatpush.xpose.msra.mxu0 %v12806_v53  ;;  %v9444_v49 = vsub.f32 %v333_v13, %v9430_v0  ;;  %v410_v17 = vld [vmem:[%s7821_s14 + $0x118] sm:$0xff]  ;;  %12808 = vst [vmem:[#allocation169_spill] sm:$0xff] %v9457_v27 }
 0x248   : > { %v3121_v44 = vsub.f32 %v9434_v16, %v12310_v6  ;;  %v9459_v13 = vand.u32 4294901760, %v410_v17 }
 0x249   : > { %v1964_v28 = vadd.f32 %v1963_v4, %v1809_v58  ;;  %2176 = vmatmul.f32.gmra.mxu0 %v9420_v31  ;;  %2381 = vmatmul.f32.gmra.mxu1 %v9319_v24  ;;  %12807 = vst [vmem:[#allocation168_spill] sm:$0xff] %v9444_v49  ;;  %v12809_v58 = vand.u32 4294901760, %v9201_v32  ;;  %v1698_v4 = vadd.f32 %v1697_v51, %v9050_v40 }
 0x24a   : > { %2936 = vmatpush.xpose.msra.mxu2 %v9459_v13  ;;  %v9472_v32 = vsub.f32 %v410_v17, %v9459_v13  ;;  %v9476_v40 = vsub.f32 %v337_v25, %v9457_v27 }
 0x24b   : > { %v9449_v43 = vadd.f32 %v2060_v55, %v1964_v28  ;;  %2851 = vmatpush.xpose.msra.mxu1 %v9157_v37  ;;  %2758 = vmatpush.xpose.msra.mxu0 %v12809_v58  ;;  %v9464_v55 = vand.u32 4294901760, %v2182_v45  ;;  %v9467_v28 = vand.u32 4294901760, %v9444_v49 }
 0x24c   : > { %2619 = vmatmul.f32.gmra.mxu3 %v9384_v61  ;;  %2502 = vmatmul.f32.gmra.mxu2 %v9364_v18  ;;  %v3122_v18 = vand.u32 4294901760, %v3121_v44  ;;  %12812 = vst [vmem:[#allocation172_spill] sm:$0xff] %v9476_v40 }
 0x24d   : > { %12810 = vst [vmem:[#allocation170_spill] sm:$0xff] %v9464_v55  ;;  %v2190_v45 = vsub.f32 %v9444_v49, %v9467_v28 }
 0x24e   : > { %12811 = vst [vmem:[#allocation171_spill] sm:$0xff] %v9467_v28  ;;  %v1702_v37 = vpop.f32.mrf.mxu0  ;;  %v1814_v6 = vpop.f32.mrf.mxu1  ;;  %3123 = vmatpush.xpose.msra.mxu3 %v3122_v18  ;;  %v341_v18 = vld [vmem:[%s7814_s12 + $0xf0] sm:$0xff] }
 0x24f   : > { %v2064_v53 = vpop.f32.mrf.mxu3  ;;  %3245 = vmatpush.xpose.msrb.mxu0 %v9226_v7  ;;  %v1815_v61 = vadd.f32 %v1814_v6, %v1698_v4  ;;  %v1967_v31 = vpop.f32.mrf.mxu2  ;;  %2853 = vmatpush.xpose.msra.mxu1 %v9177_v48  ;;  %v12314_v6 = vand.u32 4294901760, %v9472_v32  ;;  %v1703_v17 = vadd.f32 %v1702_v37, %v9070_v39  ;;  %v9501_v58 = vand.u32 4294901760, %v2190_v45 }
 0x251   : > { %v1968_v51 = vadd.f32 %v1967_v31, %v1815_v61  ;;  %2184 = vmatmul.f32.gmra.mxu0 %v9464_v55  ;;  %2385 = vmatmul.f32.gmra.mxu1 %v9346_v2  ;;  %v3127_v48 = vsub.f32 %v9472_v32, %v12314_v6  ;;  %v406_v61 = vld [vmem:[%s7821_s14 + $0xf8] sm:$0xff]  ;;  %v9495_v31 = vand.u32 4294901760, %v9476_v40  ;;  %12815 = vst [vmem:[#allocation175_spill] sm:$0xff] %v9501_v58 }
 0x252   : > { %v9497_v25 = vand.u32 4294901760, %v406_v61 }
 0x253   : > { %3248 = vmatpush.xpose.msrb.mxu0 %v9253_v47  ;;  %v9486_v44 = vadd.f32 %v2064_v53, %v1968_v51  ;;  %2855 = vmatpush.xpose.msra.mxu1 %v9197_v14  ;;  %12814 = vst [vmem:[#allocation174_spill] sm:$0xff] %v9495_v31  ;;  %v9503_v53 = vand.u32 4294901760, %v341_v18  ;;  %v3128_v51 = vand.u32 4294901760, %v3127_v48  ;;  %v2198_v39 = vsub.f32 %v9476_v40, %v9495_v31  ;;  %v345_v48 = vld [vmem:[%s7814_s12 + $0x110] sm:$0xff] }
 0x254   : > { %2625 = vmatmul.f32.gmra.mxu3 %v9428_v30  ;;  %2507 = vmatmul.f32.gmra.mxu2 %v9407_v56  ;;  %v9508_v55 = vsub.f32 %v406_v61, %v9497_v25 }
 0x255   : > { %12813 = vst [vmem:[#allocation173_spill] sm:$0xff] %v9486_v44  ;;  %2938 = vmatpush.xpose.msra.mxu2 %v9497_v25  ;;  %3129 = vmatpush.xpose.msra.mxu3 %v3128_v51  ;;  %v9516_v45 = vsub.f32 %v341_v18, %v9503_v53  ;;  %v9529_v51 = vand.u32 4294901760, %v2198_v39 }
 0x256   : > { %12816 = vst [vmem:[#allocation176_spill] sm:$0xff] %v9503_v53  ;;  %v1707_v56 = vpop.f32.mrf.mxu0  ;;  %v1820_v6 = vpop.f32.mrf.mxu1 }
 0x257   : > { %3373 = vmatpush.xpose.msrb.mxu1 %v9221_v15  ;;  %v2068_v4 = vpop.f32.mrf.mxu3  ;;  %3251 = vmatpush.xpose.msrb.mxu0 %v9286_v33  ;;  %v1821_v14 = vadd.f32 %v1820_v6, %v1703_v17  ;;  %v1971_v30 = vpop.f32.mrf.mxu2  ;;  %12817 = vst [vmem:[#allocation177_spill] sm:$0xff] %v9516_v45  ;;  %v12321_v6 = vand.u32 4294901760, %v9508_v55  ;;  %v402_v17 = vld [vmem:[%s7821_s14 + $0xd8] sm:$0xff] }
 0x258   : > { %12819 = vst [vmem:[#allocation179_spill] sm:$0xff] %v9529_v51  ;;  %v9531_v18 = vand.u32 4294901760, %v402_v17 }
 0x259   : > { %v1972_v37 = vadd.f32 %v1971_v30, %v1821_v14  ;;  %2192 = vmatmul.f32.gmra.mxu0 %v9501_v58  ;;  %2389 = vmatmul.f32.gmra.mxu1 %v9393_v11  ;;  %v3133_v30 = vsub.f32 %v9508_v55, %v12321_v6  ;;  %v1708_v14 = vadd.f32 %v1707_v56, %v9090_v19  ;;  %v9536_v58 = vand.u32 4294901760, %v9516_v45 }
 0x25a   : > { %2940 = vmatpush.xpose.msra.mxu2 %v9531_v18  ;;  %v9543_v19 = vsub.f32 %v402_v17, %v9531_v18 }
 0x25b   : > { %3375 = vmatpush.xpose.msrb.mxu1 %v9246_v1  ;;  %3254 = vmatpush.xpose.msrb.mxu0 %v9323_v42  ;;  %v9522_v61 = vadd.f32 %v2068_v4, %v1972_v37  ;;  %12820 = vst [vmem:[#allocation180_spill] sm:$0xff] %v9536_v58  ;;  %v9538_v4 = vand.u32 4294901760, %v345_v48  ;;  %v3134_v37 = vand.u32 4294901760, %v3133_v30  ;;  %v2206_v30 = vsub.f32 %v9516_v45, %v9536_v58 }
 0x25c   : > { %2631 = vmatmul.f32.gmra.mxu3 %v9467_v28  ;;  %2512 = vmatmul.f32.gmra.mxu2 %v9444_v49 }
 0x25d   : > { %12818 = vst [vmem:[#allocation178_spill] sm:$0xff] %v9522_v61  ;;  %3135 = vmatpush.xpose.msra.mxu3 %v3134_v37  ;;  %v9551_v29 = vsub.f32 %v345_v48, %v9538_v4  ;;  %v398_v37 = vld [vmem:[%s7821_s14 + $0xb8] sm:$0xff] }
 0x25e   : > { %12821 = vst [vmem:[#allocation181_spill] sm:$0xff] %v9538_v4  ;;  %v1712_v49 = vpop.f32.mrf.mxu0  ;;  %v1826_v54 = vpop.f32.mrf.mxu1  ;;  %v9566_v48 = vand.u32 4294901760, %v398_v37 }
 0x25f   : > { %3377 = vmatpush.xpose.msrb.mxu1 %v9277_v52  ;;  %v2072_v28 = vpop.f32.mrf.mxu3  ;;  %3257 = vmatpush.xpose.msrb.mxu0 %v9360_v22  ;;  %v1827_v39 = vadd.f32 %v1826_v54, %v1708_v14  ;;  %v1975_v6 = vpop.f32.mrf.mxu2  ;;  %12822 = vst [vmem:[#allocation182_spill] sm:$0xff] %v9551_v29  ;;  %v349_v54 = vld [vmem:[%s7814_s12 + $0x130] sm:$0xff]  ;;  %v12329_v14 = vand.u32 4294901760, %v9543_v19 }
 0x260   : > { %2942 = vmatpush.xpose.msra.mxu2 %v9566_v48 }
 0x261   : > { %v1976_v56 = vadd.f32 %v1975_v6, %v1827_v39  ;;  %2200 = vmatmul.f32.gmra.mxu0 %v9529_v51  ;;  %2393 = vmatmul.f32.gmra.mxu1 %v9430_v0  ;;  %v3139_v6 = vsub.f32 %v9543_v19, %v12329_v14  ;;  %v9564_v39 = vand.u32 4294901760, %v349_v54  ;;  %v1713_v51 = vadd.f32 %v1712_v49, %v9110_v12 }
 0x262   : > { %v9578_v12 = vsub.f32 %v398_v37, %v9566_v48 }
 0x263   : > { %3379 = vmatpush.xpose.msrb.mxu1 %v9311_v62  ;;  %3260 = vmatpush.xpose.msrb.mxu0 %v9397_v10  ;;  %v9557_v17 = vadd.f32 %v2072_v28, %v1976_v56  ;;  %12824 = vst [vmem:[#allocation184_spill] sm:$0xff] %v9564_v39  ;;  %v9573_v28 = vand.u32 4294901760, %v9551_v29  ;;  %v3140_v56 = vand.u32 4294901760, %v3139_v6  ;;  %v9581_v49 = vsub.f32 %v349_v54, %v9564_v39  ;;  %v394_v54 = vld [vmem:[%s7821_s14 + $0x98] sm:$0xff] }
 0x264   : > { %2637 = vmatmul.f32.gmra.mxu3 %v9495_v31  ;;  %2517 = vmatmul.f32.gmra.mxu2 %v9476_v40  ;;  %v9570_v31 = vand.u32 4294901760, %v2206_v30 }
 0x265   : > { %12823 = vst [vmem:[#allocation183_spill] sm:$0xff] %v9557_v17  ;;  %3141 = vmatpush.xpose.msra.mxu3 %v3140_v56  ;;  %v2214_v6 = vsub.f32 %v9551_v29, %v9573_v28  ;;  %v9602_v56 = vand.u32 4294901760, %v394_v54 }
 0x266   : > { %12825 = vst [vmem:[#allocation185_spill] sm:$0xff] %v9570_v31  ;;  %v1717_v40 = vpop.f32.mrf.mxu0  ;;  %v1832_v41 = vpop.f32.mrf.mxu1 }
 0x267   : > { %3381 = vmatpush.xpose.msrb.mxu1 %v9348_v38  ;;  %v2076_v35 = vpop.f32.mrf.mxu3  ;;  %12826 = vst [vmem:[#allocation186_spill] sm:$0xff] %v9573_v28  ;;  %3263 = vmatpush.xpose.msrb.mxu0 %v9434_v16  ;;  %v1833_v14 = vadd.f32 %v1832_v41, %v1713_v51  ;;  %v1979_v57 = vpop.f32.mrf.mxu2  ;;  %v12337_v41 = vand.u32 4294901760, %v9578_v12  ;;  %v353_v51 = vld [vmem:[%s7814_s12 + $0x150] sm:$0xff]  ;;  %v9613_v0 = vsub.f32 %v394_v54, %v9602_v56 }
 0x268   : > { %12827 = vst [vmem:[#allocation187_spill] sm:$0xff] %v9581_v49  ;;  %2944 = vmatpush.xpose.msra.mxu2 %v9602_v56 }
 0x269   : > { %v1980_v30 = vadd.f32 %v1979_v57, %v1833_v14  ;;  %2208 = vmatmul.f32.gmra.mxu0 %v9570_v31  ;;  %2397 = vmatmul.f32.gmra.mxu1 %v9457_v27  ;;  %v3145_v57 = vsub.f32 %v9578_v12, %v12337_v41  ;;  %v9600_v14 = vand.u32 4294901760, %v9581_v49  ;;  %v9606_v31 = vand.u32 4294901760, %v2214_v6 }
 0x26b   : > { %3383 = vmatpush.xpose.msrb.mxu1 %v9386_v8  ;;  %3266 = vmatpush.xpose.msrb.mxu0 %v9472_v32  ;;  %v9592_v37 = vadd.f32 %v2076_v35, %v1980_v30  ;;  %12829 = vst [vmem:[#allocation189_spill] sm:$0xff] %v9600_v14  ;;  %v9608_v30 = vand.u32 4294901760, %v353_v51 }
 0x26c   : > { %2643 = vmatmul.f32.gmra.mxu3 %v9536_v58  ;;  %2522 = vmatmul.f32.gmra.mxu2 %v9516_v45  ;;  %v1718_v58 = vadd.f32 %v1717_v40, %v9130_v26  ;;  %12830 = vst [vmem:[#allocation190_spill] sm:$0xff] %v9606_v31  ;;  %v3146_v45 = vand.u32 4294901760, %v3145_v57  ;;  %v2222_v26 = vsub.f32 %v9581_v49, %v9600_v14 }
 0x26d   : > { %12828 = vst [vmem:[#allocation188_spill] sm:$0xff] %v9592_v37  ;;  %v9621_v6 = vsub.f32 %v353_v51, %v9608_v30 }
 0x26e   : > { %12831 = vst [vmem:[#allocation191_spill] sm:$0xff] %v9608_v30  ;;  %v1722_v37 = vpop.f32.mrf.mxu0  ;;  %v1838_v27 = vpop.f32.mrf.mxu1  ;;  %3147 = vmatpush.xpose.msra.mxu3 %v3146_v45  ;;  %v9634_v57 = vand.u32 4294901760, %v2222_v26 }
 0x26f   : > { %3385 = vmatpush.xpose.msrb.mxu1 %v9422_v63  ;;  %v2080_v35 = vpop.f32.mrf.mxu3  ;;  %3269 = vmatpush.xpose.msrb.mxu0 %v9508_v55  ;;  %v1839_v41 = vadd.f32 %v1838_v27, %v1718_v58  ;;  %v1983_v17 = vpop.f32.mrf.mxu2  ;;  %12832 = vst [vmem:[#allocation192_spill] sm:$0xff] %v9621_v6  ;;  %v12343_v27 = vand.u32 4294901760, %v9613_v0  ;;  %v357_v58 = vld [vmem:[%s7814_s12 + $0x170] sm:$0xff]  ;;  %v1723_v54 = vadd.f32 %v1722_v37, %v9150_v20 }
 0x270   : > { %12834 = vst [vmem:[#allocation194_spill] sm:$0xff] %v9634_v57 }
 0x271   : > { %v1984_v40 = vadd.f32 %v1983_v17, %v1839_v41  ;;  %2216 = vmatmul.f32.gmra.mxu0 %v9606_v31  ;;  %2401 = vmatmul.f32.gmra.mxu1 %v9503_v53  ;;  %v3151_v17 = vsub.f32 %v9613_v0, %v12343_v27  ;;  %v390_v41 = vld [vmem:[%s7821_s14 + $0x78] sm:$0xff]  ;;  %v9641_v31 = vand.u32 4294901760, %v9621_v6 }
 0x272   : > { %v9636_v51 = vand.u32 4294901760, %v390_v41 }
 0x273   : > { %3387 = vmatpush.xpose.msrb.mxu1 %v9459_v13  ;;  %3272 = vmatpush.xpose.msrb.mxu0 %v9543_v19  ;;  %v9627_v45 = vadd.f32 %v2080_v35, %v1984_v40  ;;  %12835 = vst [vmem:[#allocation195_spill] sm:$0xff] %v9641_v31  ;;  %v9643_v35 = vand.u32 4294901760, %v357_v58  ;;  %v3152_v40 = vand.u32 4294901760, %v3151_v17  ;;  %v2230_v17 = vsub.f32 %v9621_v6, %v9641_v31 }
 0x274   : > { %2649 = vmatmul.f32.gmra.mxu3 %v9573_v28  ;;  %2527 = vmatmul.f32.gmra.mxu2 %v9551_v29  ;;  %v9648_v20 = vsub.f32 %v390_v41, %v9636_v51 }
 0x275   : > { %12833 = vst [vmem:[#allocation193_spill] sm:$0xff] %v9627_v45  ;;  %2946 = vmatpush.xpose.msra.mxu2 %v9636_v51  ;;  %3153 = vmatpush.xpose.msra.mxu3 %v3152_v40  ;;  %v9656_v53 = vsub.f32 %v357_v58, %v9643_v35  ;;  %v386_v40 = vld [vmem:[%s7821_s14 + $0x58] sm:$0xff] }
 0x276   : > { %12836 = vst [vmem:[#allocation196_spill] sm:$0xff] %v9643_v35  ;;  %v1727_v29 = vpop.f32.mrf.mxu0  ;;  %v1844_v45 = vpop.f32.mrf.mxu1  ;;  %v9671_v58 = vand.u32 4294901760, %v386_v40 }
 0x277   : > { %3389 = vmatpush.xpose.msrb.mxu1 %v9497_v25  ;;  %v2084_v28 = vpop.f32.mrf.mxu3  ;;  %3275 = vmatpush.xpose.msrb.mxu0 %v9578_v12  ;;  %v1845_v26 = vadd.f32 %v1844_v45, %v1723_v54  ;;  %v1987_v27 = vpop.f32.mrf.mxu2  ;;  %12837 = vst [vmem:[#allocation197_spill] sm:$0xff] %v9656_v53  ;;  %v361_v45 = vld [vmem:[%s7814_s12 + $0x190] sm:$0xff]  ;;  %v12351_v54 = vand.u32 4294901760, %v9648_v20 }
 0x279   : > { %v1988_v37 = vadd.f32 %v1987_v27, %v1845_v26  ;;  %2224 = vmatmul.f32.gmra.mxu0 %v9634_v57  ;;  %2405 = vmatmul.f32.gmra.mxu1 %v9538_v4  ;;  %v3157_v27 = vsub.f32 %v9648_v20, %v12351_v54  ;;  %v9669_v26 = vand.u32 4294901760, %v361_v45  ;;  %v1728_v57 = vadd.f32 %v1727_v29, %v9170_v23 }
 0x27a   : > { %2948 = vmatpush.xpose.msra.mxu2 %v9671_v58  ;;  %v9683_v23 = vsub.f32 %v386_v40, %v9671_v58 }
 0x27b   : > { %3391 = vmatpush.xpose.msrb.mxu1 %v9531_v18  ;;  %3278 = vmatpush.xpose.msrb.mxu0 %v9613_v0  ;;  %v9662_v41 = vadd.f32 %v2084_v28, %v1988_v37  ;;  %12839 = vst [vmem:[#allocation199_spill] sm:$0xff] %v9669_v26  ;;  %v9678_v28 = vand.u32 4294901760, %v9656_v53  ;;  %v3158_v37 = vand.u32 4294901760, %v3157_v27  ;;  %v9686_v29 = vsub.f32 %v361_v45, %v9669_v26  ;;  %v382_v45 = vld [vmem:[%s7821_s14 + $0x38] sm:$0xff] }
 0x27c   : > { %2655 = vmatmul.f32.gmra.mxu3 %v9600_v14  ;;  %2532 = vmatmul.f32.gmra.mxu2 %v9581_v49  ;;  %v9675_v14 = vand.u32 4294901760, %v2230_v17 }
 0x27d   : > { %12838 = vst [vmem:[#allocation198_spill] sm:$0xff] %v9662_v41  ;;  %3159 = vmatpush.xpose.msra.mxu3 %v3158_v37  ;;  %v2238_v27 = vsub.f32 %v9656_v53, %v9678_v28  ;;  %v9707_v37 = vand.u32 4294901760, %v382_v45 }
 0x27e   : > { %12840 = vst [vmem:[#allocation200_spill] sm:$0xff] %v9675_v14  ;;  %v1732_v49 = vpop.f32.mrf.mxu0  ;;  %v1850_v41 = vpop.f32.mrf.mxu1 }
 0x27f   : > { %3393 = vmatpush.xpose.msrb.mxu1 %v9566_v48  ;;  %v2088_v4 = vpop.f32.mrf.mxu3  ;;  %12841 = vst [vmem:[#allocation201_spill] sm:$0xff] %v9678_v28  ;;  %3281 = vmatpush.xpose.msrb.mxu0 %v9648_v20  ;;  %v1851_v54 = vadd.f32 %v1850_v41, %v1728_v57  ;;  %v1991_v61 = vpop.f32.mrf.mxu2  ;;  %v12355_v57 = vand.u32 4294901760, %v9683_v23  ;;  %v365_v41 = vld [vmem:[%s7814_s12 + $0x1b0] sm:$0xff]  ;;  %v9717_v44 = vsub.f32 %v382_v45, %v9707_v37 }
 0x280   : > { %12842 = vst [vmem:[#allocation202_spill] sm:$0xff] %v9686_v29  ;;  %2950 = vmatpush.xpose.msra.mxu2 %v9707_v37 }
 0x281   : > { %v1992_v17 = vadd.f32 %v1991_v61, %v1851_v54  ;;  %2232 = vmatmul.f32.gmra.mxu0 %v9675_v14  ;;  %2409 = vmatmul.f32.gmra.mxu1 %v9564_v39  ;;  %v3163_v61 = vsub.f32 %v9683_v23, %v12355_v57  ;;  %v9705_v54 = vand.u32 4294901760, %v9686_v29  ;;  %12845 = vst [vmem:[#allocation205_spill] sm:$0xff] %v9707_v37  ;;  %v9711_v14 = vand.u32 4294901760, %v2238_v27 }
 0x283   : > { %3395 = vmatpush.xpose.msrb.mxu1 %v9602_v56  ;;  %3284 = vmatpush.xpose.msrb.mxu0 %v9683_v23  ;;  %v9697_v40 = vadd.f32 %v2088_v4, %v1992_v17  ;;  %12844 = vst [vmem:[#allocation204_spill] sm:$0xff] %v9705_v54  ;;  %v9713_v17 = vand.u32 4294901760, %v365_v41 }
 0x284   : > { %2661 = vmatmul.f32.gmra.mxu3 %v9641_v31  ;;  %2537 = vmatmul.f32.gmra.mxu2 %v9621_v6  ;;  %v1733_v31 = vadd.f32 %v1732_v49, %v9190_v60  ;;  %12846 = vst [vmem:[#allocation206_spill] sm:$0xff] %v9711_v14  ;;  %v3164_v6 = vand.u32 4294901760, %v3163_v61  ;;  %v2246_v60 = vsub.f32 %v9686_v29, %v9705_v54 }
 0x285   : > { %12843 = vst [vmem:[#allocation203_spill] sm:$0xff] %v9697_v40  ;;  %v9725_v27 = vsub.f32 %v365_v41, %v9713_v17 }
 0x286   : > { %12847 = vst [vmem:[#allocation207_spill] sm:$0xff] %v9713_v17  ;;  %v1737_v40 = vpop.f32.mrf.mxu0  ;;  %v1856_v57 = vpop.f32.mrf.mxu1  ;;  %3165 = vmatpush.xpose.msra.mxu3 %v3164_v6  ;;  %v369_v6 = vld [vmem:[%s7814_s12 + $0x1d0] sm:$0xff] }
 0x287   : > { %3397 = vmatpush.xpose.msrb.mxu1 %v9636_v51  ;;  %v2092_v4 = vpop.f32.mrf.mxu3  ;;  %v1857_v39 = vadd.f32 %v1856_v57, %v1733_v31  ;;  %v1995_v11 = vpop.f32.mrf.mxu2  ;;  %12848 = vst [vmem:[#allocation208_spill] sm:$0xff] %v9725_v27  ;;  %v12363_v31 = vand.u32 4294901760, %v9717_v44  ;;  %v378_v57 = vld [vmem:[%s7821_s14 + $0x18] sm:$0xff]  ;;  %3287 = vmatpush.xpose.msrb.mxu0 %v9717_v44 }
 0x288   : > { %v9731_v61 = vand.u32 4294901760, %v378_v57 }
 0x289   : > { %v1996_v49 = vadd.f32 %v1995_v11, %v1857_v39  ;;  %2240 = vmatmul.f32.gmra.mxu0 %v9711_v14  ;;  %2413 = vmatmul.f32.gmra.mxu1 %v9608_v30  ;;  %v3169_v11 = vsub.f32 %v9717_v44, %v12363_v31  ;;  %v9740_v39 = vand.u32 4294901760, %v2246_v60  ;;  %v12853_v31 = vand.u32 4294901760, %v9226_v7 }
 0x28a   : > { %2952 = vmatpush.xpose.msra.mxu2 %v9731_v61  ;;  %v9744_v41 = vsub.f32 %v378_v57, %v9731_v61 }
 0x28b   : > { %3399 = vmatpush.xpose.msrb.mxu1 %v9671_v58  ;;  %v9734_v45 = vadd.f32 %v2092_v4, %v1996_v49  ;;  %12850 = vst [vmem:[#allocation210_spill] sm:$0xff] %v9740_v39  ;;  %v9749_v4 = vand.u32 4294901760, %v9725_v27  ;;  %v9751_v49 = vand.u32 4294901760, %v369_v6 }
 0x28c   : > { %2667 = vmatmul.f32.gmra.mxu3 %v9678_v28  ;;  %2542 = vmatmul.f32.gmra.mxu2 %v9656_v53  ;;  %v1738_v28 = vadd.f32 %v1737_v40, %v9215_v3  ;;  %v3170_v53 = vand.u32 4294901760, %v3169_v11  ;;  %v12367_v57 = vand.u32 4294901760, %v9744_v41 }
 0x28d   : > { %12849 = vst [vmem:[#allocation209_spill] sm:$0xff] %v9734_v45  ;;  %3290 = vmatpush.xpose.msrb.mxu0 %v9744_v41  ;;  %v2254_v7 = vsub.f32 %v9725_v27, %v9749_v4 }
 0x28e   : > { %12851 = vst [vmem:[#allocation211_spill] sm:$0xff] %v9749_v4  ;;  %3504 = vmatpush.xpose.msrb.mxu2 %v12853_v31  ;;  %v1742_v60 = vpop.f32.mrf.mxu0  ;;  %v1862_v45 = vpop.f32.mrf.mxu1  ;;  %3171 = vmatpush.xpose.msra.mxu3 %v3170_v53  ;;  %v3175_v3 = vsub.f32 %v9744_v41, %v12367_v57  ;;  %v9766_v31 = vsub.f32 %v369_v6, %v9751_v49  ;;  %v373_v53 = vld [vmem:[%s7814_s12 + $0x1f0] sm:$0xff] }
 0x28f   : > { %3401 = vmatpush.xpose.msrb.mxu1 %v9707_v37  ;;  %v2096_v14 = vpop.f32.mrf.mxu3  ;;  %12852 = vst [vmem:[#allocation212_spill] sm:$0xff] %v9751_v49  ;;  %v1863_v30 = vadd.f32 %v1862_v45, %v1738_v28  ;;  %v1999_v37 = vpop.f32.mrf.mxu2  ;;  %v12855_v45 = vand.u32 4294901760, %v9253_v47 }
 0x290   : > { %12854 = vst [vmem:[#allocation213_spill] sm:$0xff] %v9766_v31  ;;  %v3176_v28 = vand.u32 4294901760, %v3175_v3  ;;  %v9779_v6 = vand.u32 4294901760, %v9766_v31 }
 0x291   : > { %v2000_v40 = vadd.f32 %v1999_v37, %v1863_v30  ;;  %2248 = vmatmul.f32.gmra.mxu0 %v9740_v39  ;;  %2417 = vmatmul.f32.gmra.mxu1 %v9643_v35  ;;  %v1743_v30 = vadd.f32 %v1742_v60, %v9239_v36  ;;  %v9776_v37 = vand.u32 4294901760, %v2254_v7  ;;  %v9781_v39 = vand.u32 4294901760, %v373_v53  ;;  %v314_v7 = vld [vmem:[%s7814_s12 + $0x18] sm:$0xff] }
 0x292   : > { %3508 = vmatpush.xpose.msrb.mxu2 %v12855_v45  ;;  %3177 = vmatpush.xpose.msra.mxu3 %v3176_v28  ;;  %12857 = vst [vmem:[#allocation215_spill] sm:$0xff] %v9779_v6  ;;  %v2262_v36 = vsub.f32 %v9766_v31, %v9779_v6 }
 0x293   : > { %3403 = vmatpush.xpose.msrb.mxu1 %v9731_v61  ;;  %v9772_v11 = vadd.f32 %v2096_v14, %v2000_v40  ;;  %12856 = vst [vmem:[#allocation214_spill] sm:$0xff] %v9776_v37  ;;  %v12859_v14 = vand.u32 4294901760, %v9286_v33  ;;  %v9791_v60 = vsub.f32 %v373_v53, %v9781_v39 }
 0x294   : > { %2673 = vmatmul.f32.gmra.mxu3 %v9705_v54  ;;  %2547 = vmatmul.f32.gmra.mxu2 %v9686_v29  ;;  %12858 = vst [vmem:[#allocation216_spill] sm:$0xff] %v9781_v39 }
 0x295   : > { %12860 = vst [vmem:[#allocation217_spill] sm:$0xff] %v9791_v60  ;;  %v9805_v53 = vand.u32 4294901760, %v9791_v60 }
 0x296   : > { %3631 = vmatpush.xpose.msrb.mxu3 %v9221_v15  ;;  %v1747_v47 = vpop.f32.mrf.mxu0  ;;  %v1868_v3 = vpop.f32.mrf.mxu1  ;;  %3512 = vmatpush.xpose.msrb.mxu2 %v12859_v14  ;;  %v12861_v15 = vand.u32 4294901760, %v9323_v42  ;;  %v12864_v42 = vand.u32 4294901760, %v9360_v22  ;;  %v12866_v22 = vand.u32 4294901760, %v9397_v10  ;;  %v12869_v10 = vand.u32 4294901760, %v9434_v16 }
 0x297   : > { %v2100_v57 = vpop.f32.mrf.mxu3  ;;  %v1869_v40 = vadd.f32 %v1868_v3, %v1743_v30  ;;  %v2003_v28 = vpop.f32.mrf.mxu2  ;;  %v1748_v30 = vadd.f32 %v1747_v47, %v9266_v46  ;;  %v9802_v3 = vand.u32 4294901760, %v2262_v36  ;;  %12863 = vst [vmem:[#allocation219_spill] sm:$0xff] %v9805_v53  ;;  %v2270_v46 = vsub.f32 %v9791_v60, %v9805_v53 }
 0x299   : > { %v2004_v45 = vadd.f32 %v2003_v28, %v1869_v40  ;;  %2256 = vmatmul.f32.gmra.mxu0 %v9776_v37  ;;  %2421 = vmatmul.f32.gmra.mxu1 %v9669_v26  ;;  %12862 = vst [vmem:[#allocation218_spill] sm:$0xff] %v9802_v3 }
 0x29a   : > { %3516 = vmatpush.xpose.msrb.mxu2 %v12861_v15  ;;  %3633 = vmatpush.xpose.msrb.mxu3 %v9246_v1  ;;  %v9809_v15 = vand.u32 4294901760, %v314_v7 }
 0x29b   : > { %v9796_v33 = vadd.f32 %v2100_v57, %v2004_v45 }
 0x29c   : > { %2679 = vmatmul.f32.gmra.mxu3 %v9749_v4  ;;  %2552 = vmatmul.f32.gmra.mxu2 %v9725_v27  ;;  %12865 = vst [vmem:[#allocation220_spill] sm:$0xff] %v9809_v15  ;;  %v9823_v36 = vsub.f32 %v314_v7, %v9809_v15  ;;  %v12915_v27 = vld [vmem:[#allocation169_spill] sm:$0xff] }
 0x29e   : > { %v1752_v40 = vpop.f32.mrf.mxu0  ;;  %v1874_v28 = vpop.f32.mrf.mxu1  ;;  %3520 = vmatpush.xpose.msrb.mxu2 %v12864_v42  ;;  %3635 = vmatpush.xpose.msrb.mxu3 %v9277_v52  ;;  %12867 = vst [vmem:[#allocation221_spill] sm:$0xff] %v9823_v36  ;;  %v318_v52 = vld [vmem:[%s7814_s12 + $0x38] sm:$0xff] }
 0x29f   : > { %v2104_v14 = vpop.f32.mrf.mxu3  ;;  %v1875_v57 = vadd.f32 %v1874_v28, %v1748_v30  ;;  %v2007_v45 = vpop.f32.mrf.mxu2  ;;  %v1753_v30 = vadd.f32 %v1752_v40, %v9301_v34  ;;  %v9828_v28 = vand.u32 4294901760, %v2270_v46  ;;  %v9835_v7 = vand.u32 4294901760, %v318_v52 }
 0x2a0   : > { %v12872_v34 = vand.u32 4294901760, %v9472_v32  ;;  %v12874_v32 = vand.u32 4294901760, %v9508_v55 }
 0x2a1   : > { %v2008_v1 = vadd.f32 %v2007_v45, %v1875_v57  ;;  %2264 = vmatmul.f32.gmra.mxu0 %v9802_v3  ;;  %2425 = vmatmul.f32.gmra.mxu1 %v9713_v17  ;;  %12868 = vst [vmem:[#allocation222_spill] sm:$0xff] %v9828_v28  ;;  %v9849_v46 = vsub.f32 %v318_v52, %v9835_v7 }
 0x2a2   : > { %3524 = vmatpush.xpose.msrb.mxu2 %v12866_v22  ;;  %3637 = vmatpush.xpose.msrb.mxu3 %v9311_v62  ;;  %v9833_v22 = vand.u32 4294901760, %v9823_v36  ;;  %12871 = vst [vmem:[#allocation224_spill] sm:$0xff] %v9835_v7 }
 0x2a3   : > { %v9819_v47 = vadd.f32 %v2104_v14, %v2008_v1  ;;  %12873 = vst [vmem:[#allocation225_spill] sm:$0xff] %v9849_v46 }
 0x2a4   : > { %2685 = vmatmul.f32.gmra.mxu3 %v9779_v6  ;;  %2557 = vmatmul.f32.gmra.mxu2 %v9766_v31  ;;  %12870 = vst [vmem:[#allocation223_spill] sm:$0xff] %v9833_v22  ;;  %v2956_v40 = vsub.f32 %v9823_v36, %v9833_v22 }
 0x2a6   : > { %v1757_v57 = vpop.f32.mrf.mxu0  ;;  %v1880_v45 = vpop.f32.mrf.mxu1  ;;  %3528 = vmatpush.xpose.msrb.mxu2 %v12869_v10  ;;  %3639 = vmatpush.xpose.msrb.mxu3 %v9348_v38  ;;  %v322_v38 = vld [vmem:[%s7814_s12 + $0x58] sm:$0xff] }
 0x2a7   : > { %v2108_v42 = vpop.f32.mrf.mxu3  ;;  %v1881_v14 = vadd.f32 %v1880_v45, %v1753_v30  ;;  %v2011_v1 = vpop.f32.mrf.mxu2  ;;  %v1758_v30 = vadd.f32 %v1757_v57, %v9338_v21  ;;  %v9861_v52 = vand.u32 4294901760, %v322_v38  ;;  %v12878_v21 = vand.u32 4294901760, %v9543_v19 }
 0x2a8   : > { %v12880_v19 = vand.u32 4294901760, %v9578_v12 }
 0x2a9   : > { %v2012_v62 = vadd.f32 %v2011_v1, %v1881_v14  ;;  %2272 = vmatmul.f32.gmra.mxu0 %v9828_v28  ;;  %2429 = vmatmul.f32.gmra.mxu1 %v9751_v49  ;;  %12877 = vst [vmem:[#allocation228_spill] sm:$0xff] %v9861_v52 }
 0x2aa   : > { %3532 = vmatpush.xpose.msrb.mxu2 %v12872_v34  ;;  %3641 = vmatpush.xpose.msrb.mxu3 %v9386_v8  ;;  %v9859_v34 = vand.u32 4294901760, %v9849_v46 }
 0x2ab   : > { %v9843_v16 = vadd.f32 %v2108_v42, %v2012_v62  ;;  %v9856_v62 = vand.u32 4294901760, %v2956_v40  ;;  %v9875_v40 = vsub.f32 %v322_v38, %v9861_v52 }
 0x2ac   : > { %2691 = vmatmul.f32.gmra.mxu3 %v9805_v53  ;;  %2562 = vmatmul.f32.gmra.mxu2 %v9791_v60  ;;  %12876 = vst [vmem:[#allocation227_spill] sm:$0xff] %v9859_v34  ;;  %v2964_v57 = vsub.f32 %v9849_v46, %v9859_v34  ;;  %v12909_v53 = vld [vmem:[#allocation167_spill] sm:$0xff] }
 0x2ad   : > { %12875 = vst [vmem:[#allocation226_spill] sm:$0xff] %v9856_v62 }
 0x2ae   : > { %v1886_v10 = vpop.f32.mrf.mxu1  ;;  %v2153_v14 = vpop.f32.mrf.mxu0  ;;  %3536 = vmatpush.xpose.msrb.mxu2 %v12874_v32  ;;  %3643 = vmatpush.xpose.msrb.mxu3 %v9422_v63  ;;  %12879 = vst [vmem:[#allocation229_spill] sm:$0xff] %v9875_v40  ;;  %v326_v63 = vld [vmem:[%s7814_s12 + $0x78] sm:$0xff] }
 0x2af   : > { %v2112_v45 = vpop.f32.mrf.mxu3  ;;  %v1887_v42 = vadd.f32 %v1886_v10, %v1758_v30  ;;  %v2015_v1 = vpop.f32.mrf.mxu2  ;;  %v2154_v30 = vadd.f32 %v2153_v14, %v9375_v5  ;;  %v9887_v38 = vand.u32 4294901760, %v326_v63  ;;  %v12884_v5 = vand.u32 4294901760, %v9613_v0 }
 0x2b0   : > { %v12886_v0 = vand.u32 4294901760, %v9648_v20 }
 0x2b1   : > { %v2016_v8 = vadd.f32 %v2015_v1, %v1887_v42  ;;  %2433 = vmatmul.f32.gmra.mxu1 %v9781_v39  ;;  %2760 = vmatmul.f32.vlgmr.msra.gmra.mxu0 %v9244_v50  ;;  %12883 = vst [vmem:[#allocation232_spill] sm:$0xff] %v9887_v38 }
 0x2b2   : > { %3540 = vmatpush.xpose.msrb.mxu2 %v12878_v21  ;;  %3645 = vmatpush.xpose.msrb.mxu3 %v9459_v13  ;;  %v9885_v21 = vand.u32 4294901760, %v9875_v40 }
 0x2b3   : > { %v9869_v55 = vadd.f32 %v2112_v45, %v2016_v8  ;;  %v9882_v8 = vand.u32 4294901760, %v2964_v57  ;;  %v9901_v57 = vsub.f32 %v326_v63, %v9887_v38 }
 0x2b4   : > { %3179 = vmatmul.f32.vlgmr.msra.gmra.mxu3 %v9809_v15  ;;  %2958 = vmatmul.f32.vlgmr.msra.gmra.mxu2 %v9856_v62  ;;  %12882 = vst [vmem:[#allocation231_spill] sm:$0xff] %v9885_v21  ;;  %v2972_v14 = vsub.f32 %v9875_v40, %v9885_v21 }
 0x2b5   : > { %12881 = vst [vmem:[#allocation230_spill] sm:$0xff] %v9882_v8 }
 0x2b6   : > { %v2161_v32 = vpop.f32.mrf.mxu0  ;;  %v2374_v42 = vpop.f32.mrf.mxu1  ;;  %3544 = vmatpush.xpose.msrb.mxu2 %v12880_v19  ;;  %3647 = vmatpush.xpose.msrb.mxu3 %v9497_v25  ;;  %12885 = vst [vmem:[#allocation233_spill] sm:$0xff] %v9901_v57  ;;  %v330_v25 = vld [vmem:[%s7814_s12 + $0x98] sm:$0xff] }
 0x2b7   : > { %v2602_v10 = vpop.f32.mrf.mxu3  ;;  %v2375_v45 = vadd.f32 %v2374_v42, %v2154_v30  ;;  %v2488_v1 = vpop.f32.mrf.mxu2  ;;  %v2162_v30 = vadd.f32 %v2161_v32, %v9412_v9  ;;  %v9913_v63 = vand.u32 4294901760, %v330_v25  ;;  %v12890_v9 = vand.u32 4294901760, %v9683_v23 }
 0x2b8   : > { %v12892_v23 = vand.u32 4294901760, %v9717_v44 }
 0x2b9   : > { %v2489_v13 = vadd.f32 %v2488_v1, %v2375_v45  ;;  %2764 = vmatmul.f32.gmra.mxu0 %v9282_v59  ;;  %2857 = vmatmul.f32.vlgmr.msra.gmra.mxu1 %v9244_v50  ;;  %12889 = vst [vmem:[#allocation236_spill] sm:$0xff] %v9913_v63 }
 0x2ba   : > { %3548 = vmatpush.xpose.msrb.mxu2 %v12884_v5  ;;  %3649 = vmatpush.xpose.msrb.mxu3 %v9531_v18  ;;  %v9911_v5 = vand.u32 4294901760, %v9901_v57 }
 0x2bb   : > { %v9895_v12 = vadd.f32 %v2602_v10, %v2489_v13  ;;  %v9908_v13 = vand.u32 4294901760, %v2972_v14  ;;  %v9927_v14 = vsub.f32 %v330_v25, %v9913_v63 }
 0x2bc   : > { %3183 = vmatmul.f32.gmra.mxu3 %v9835_v7  ;;  %2966 = vmatmul.f32.gmra.mxu2 %v9882_v8  ;;  %12888 = vst [vmem:[#allocation235_spill] sm:$0xff] %v9911_v5  ;;  %v2980_v32 = vsub.f32 %v9901_v57, %v9911_v5 }
 0x2bd   : > { %12887 = vst [vmem:[#allocation234_spill] sm:$0xff] %v9908_v13 }
 0x2be   : > { %v2169_v19 = vpop.f32.mrf.mxu0  ;;  %v2378_v45 = vpop.f32.mrf.mxu1  ;;  %3552 = vmatpush.xpose.msrb.mxu2 %v12886_v0  ;;  %3651 = vmatpush.xpose.msrb.mxu3 %v9566_v48  ;;  %12891 = vst [vmem:[#allocation237_spill] sm:$0xff] %v9927_v14  ;;  %v334_v48 = vld [vmem:[%s7814_s12 + $0xb8] sm:$0xff] }
 0x2bf   : > { %v2608_v42 = vpop.f32.mrf.mxu3  ;;  %v2379_v10 = vadd.f32 %v2378_v45, %v2162_v30  ;;  %v2493_v1 = vpop.f32.mrf.mxu2  ;;  %v2170_v30 = vadd.f32 %v2169_v19, %v9449_v43  ;;  %v9939_v25 = vand.u32 4294901760, %v334_v48  ;;  %v12896_v43 = vand.u32 4294901760, %v9744_v41 }
 0x2c1   : > { %v2494_v18 = vadd.f32 %v2493_v1, %v2379_v10  ;;  %2768 = vmatmul.f32.gmra.mxu0 %v9319_v24  ;;  %2861 = vmatmul.f32.gmra.mxu1 %v9282_v59  ;;  %12895 = vst [vmem:[#allocation240_spill] sm:$0xff] %v9939_v25  ;;  %v12927_v59 = vld [vmem:[#allocation181_spill] sm:$0xff] }
 0x2c2   : > { %3556 = vmatpush.xpose.msrb.mxu2 %v12890_v9  ;;  %3653 = vmatpush.xpose.msrb.mxu3 %v9602_v56  ;;  %v9937_v9 = vand.u32 4294901760, %v9927_v14 }
 0x2c3   : > { %v9921_v20 = vadd.f32 %v2608_v42, %v2494_v18  ;;  %v9934_v18 = vand.u32 4294901760, %v2980_v32  ;;  %v9953_v32 = vsub.f32 %v334_v48, %v9939_v25  ;;  %v12902_v48 = vld [vmem:[#allocation205_spill] sm:$0xff] }
 0x2c4   : > { %3187 = vmatmul.f32.gmra.mxu3 %v9861_v52  ;;  %2974 = vmatmul.f32.gmra.mxu2 %v9908_v13  ;;  %12894 = vst [vmem:[#allocation239_spill] sm:$0xff] %v9937_v9  ;;  %v2988_v19 = vsub.f32 %v9927_v14, %v9937_v9 }
 0x2c5   : > { %12893 = vst [vmem:[#allocation238_spill] sm:$0xff] %v9934_v18 }
 0x2c6   : > { %v2177_v0 = vpop.f32.mrf.mxu0  ;;  %v2382_v10 = vpop.f32.mrf.mxu1  ;;  %3560 = vmatpush.xpose.msrb.mxu2 %v12892_v23  ;;  %3655 = vmatpush.xpose.msrb.mxu3 %v9636_v51  ;;  %12897 = vst [vmem:[#allocation241_spill] sm:$0xff] %v9953_v32  ;;  %v338_v51 = vld [vmem:[%s7814_s12 + $0xd8] sm:$0xff] }
 0x2c7   : > { %v2614_v45 = vpop.f32.mrf.mxu3  ;;  %v2383_v42 = vadd.f32 %v2382_v10, %v2170_v30  ;;  %v2498_v1 = vpop.f32.mrf.mxu2  ;;  %v12898_v30 = vld [vmem:[#allocation173_spill] sm:$0xff] }
 0x2c8   : > { %v2178_v10 = vadd.f32 %v2177_v0, %v12898_v30 }
 0x2c9   : > { %v2499_v56 = vadd.f32 %v2498_v1, %v2383_v42  ;;  %2772 = vmatmul.f32.gmra.mxu0 %v9346_v2  ;;  %2865 = vmatmul.f32.gmra.mxu1 %v9319_v24 }
 0x2ca   : > { %3564 = vmatpush.xpose.msrb.mxu2 %v12896_v43  ;;  %3657 = vmatpush.xpose.msrb.mxu3 %v9671_v58  ;;  %v9961_v43 = vand.u32 4294901760, %v9953_v32  ;;  %v12903_v58 = vld [vmem:[#allocation163_spill] sm:$0xff] }
 0x2cb   : > { %v9947_v44 = vadd.f32 %v2614_v45, %v2499_v56  ;;  %v9958_v56 = vand.u32 4294901760, %v2988_v19 }
 0x2cc   : > { %3191 = vmatmul.f32.gmra.mxu3 %v9887_v38  ;;  %2982 = vmatmul.f32.gmra.mxu2 %v9934_v18  ;;  %12900 = vst [vmem:[#allocation242_spill] sm:$0xff] %v9961_v43  ;;  %v9963_v18 = vand.u32 4294901760, %v338_v51  ;;  %v2996_v19 = vsub.f32 %v9953_v32, %v9961_v43 }
 0x2cd   : > { %12899 = vst [vmem:[#allocation173_spill] sm:$0xff] %v9958_v56 }
 0x2ce   : > { %v2185_v42 = vpop.f32.mrf.mxu0  ;;  %v2386_v1 = vpop.f32.mrf.mxu1  ;;  %12901 = vst [vmem:[#allocation243_spill] sm:$0xff] %v9963_v18  ;;  %3659 = vmatpush.xpose.msrb.mxu3 %v12902_v48  ;;  %v9975_v30 = vsub.f32 %v338_v51, %v9963_v18 }
 0x2cf   : > { %v2620_v23 = vpop.f32.mrf.mxu3  ;;  %v2387_v41 = vadd.f32 %v2386_v1, %v2178_v10  ;;  %v2503_v45 = vpop.f32.mrf.mxu2  ;;  %v342_v10 = vld [vmem:[%s7814_s12 + $0xf8] sm:$0xff]  ;;  %v12905_v1 = vld [vmem:[#allocation178_spill] sm:$0xff] }
 0x2d0   : > { %12904 = vst [vmem:[#allocation205_spill] sm:$0xff] %v9975_v30  ;;  %v9985_v60 = vand.u32 4294901760, %v342_v10 }
 0x2d1   : > { %v2504_v13 = vadd.f32 %v2503_v45, %v2387_v41  ;;  %2776 = vmatmul.f32.gmra.mxu0 %v12903_v58  ;;  %2869 = vmatmul.f32.gmra.mxu1 %v9346_v2  ;;  %v2186_v41 = vadd.f32 %v2185_v42, %v12905_v1  ;;  %v12911_v1 = vld [vmem:[#allocation183_spill] sm:$0xff] }
 0x2d2   : > { %3661 = vmatpush.xpose.msrb.mxu3 %v9731_v61  ;;  %12908 = vst [vmem:[#allocation245_spill] sm:$0xff] %v9985_v60  ;;  %v9996_v42 = vsub.f32 %v342_v10, %v9985_v60 }
 0x2d3   : > { %v9969_v0 = vadd.f32 %v2620_v23, %v2504_v13  ;;  %v9980_v23 = vand.u32 4294901760, %v2996_v19  ;;  %v346_v19 = vld [vmem:[%s7814_s12 + $0x118] sm:$0xff] }
 0x2d4   : > { %3195 = vmatmul.f32.gmra.mxu3 %v9913_v63  ;;  %2990 = vmatmul.f32.gmra.mxu2 %v9958_v56  ;;  %v9983_v56 = vand.u32 4294901760, %v9975_v30  ;;  %12910 = vst [vmem:[#allocation246_spill] sm:$0xff] %v9996_v42 }
 0x2d5   : > { %12906 = vst [vmem:[#allocation178_spill] sm:$0xff] %v9980_v23 }
 0x2d6   : > { %v2193_v48 = vpop.f32.mrf.mxu0  ;;  %v2390_v8 = vpop.f32.mrf.mxu1  ;;  %12907 = vst [vmem:[#allocation244_spill] sm:$0xff] %v9983_v56 }
 0x2d7   : > { %v2626_v45 = vpop.f32.mrf.mxu3  ;;  %v2391_v62 = vadd.f32 %v2390_v8, %v2186_v41  ;;  %v2508_v13 = vpop.f32.mrf.mxu2  ;;  %v3004_v8 = vsub.f32 %v9975_v30, %v9983_v56  ;;  %v2194_v41 = vadd.f32 %v2193_v48, %v12911_v1  ;;  %v12917_v1 = vld [vmem:[#allocation188_spill] sm:$0xff] }
 0x2d9   : > { %v2509_v51 = vadd.f32 %v2508_v13, %v2391_v62  ;;  %2780 = vmatmul.f32.gmra.mxu0 %v12909_v53  ;;  %2873 = vmatmul.f32.gmra.mxu1 %v12903_v58  ;;  %v10000_v3 = vand.u32 4294901760, %v3004_v8  ;;  %v350_v8 = vld [vmem:[%s7814_s12 + $0x138] sm:$0xff] }
 0x2db   : > { %v9990_v61 = vadd.f32 %v2626_v45, %v2509_v51  ;;  %12912 = vst [vmem:[#allocation183_spill] sm:$0xff] %v10000_v3  ;;  %v10003_v45 = vand.u32 4294901760, %v9996_v42  ;;  %v10005_v51 = vand.u32 4294901760, %v346_v19 }
 0x2dc   : > { %3199 = vmatmul.f32.gmra.mxu3 %v9939_v25  ;;  %2998 = vmatmul.f32.gmra.mxu2 %v9980_v23 }
 0x2dd   : > { %12913 = vst [vmem:[#allocation247_spill] sm:$0xff] %v10003_v45  ;;  %v10016_v48 = vsub.f32 %v346_v19, %v10005_v51 }
 0x2de   : > { %v2201_v13 = vpop.f32.mrf.mxu0  ;;  %v2394_v28 = vpop.f32.mrf.mxu1  ;;  %12914 = vst [vmem:[#allocation248_spill] sm:$0xff] %v10005_v51 }
 0x2df   : > { %v2632_v62 = vpop.f32.mrf.mxu3  ;;  %v2395_v31 = vadd.f32 %v2394_v28, %v2194_v41  ;;  %v2513_v6 = vpop.f32.mrf.mxu2  ;;  %v3012_v28 = vsub.f32 %v9996_v42, %v10003_v45  ;;  %12916 = vst [vmem:[#allocation249_spill] sm:$0xff] %v10016_v48  ;;  %v2202_v41 = vadd.f32 %v2201_v13, %v12917_v1  ;;  %v12923_v1 = vld [vmem:[#allocation193_spill] sm:$0xff] }
 0x2e1   : > { %v2514_v23 = vadd.f32 %v2513_v6, %v2395_v31  ;;  %2784 = vmatmul.f32.gmra.mxu0 %v12915_v27  ;;  %2877 = vmatmul.f32.gmra.mxu1 %v12909_v53  ;;  %v10020_v54 = vand.u32 4294901760, %v3012_v28  ;;  %v12921_v53 = vld [vmem:[#allocation176_spill] sm:$0xff]  ;;  %v354_v28 = vld [vmem:[%s7814_s12 + $0x158] sm:$0xff] }
 0x2e3   : > { %v10010_v10 = vadd.f32 %v2632_v62, %v2514_v23  ;;  %12918 = vst [vmem:[#allocation188_spill] sm:$0xff] %v10020_v54  ;;  %v10023_v23 = vand.u32 4294901760, %v10016_v48  ;;  %v10025_v62 = vand.u32 4294901760, %v350_v8 }
 0x2e4   : > { %3203 = vmatmul.f32.gmra.mxu3 %v9963_v18  ;;  %3006 = vmatmul.f32.gmra.mxu2 %v10000_v3 }
 0x2e5   : > { %12919 = vst [vmem:[#allocation250_spill] sm:$0xff] %v10023_v23  ;;  %v10036_v13 = vsub.f32 %v350_v8, %v10025_v62 }
 0x2e6   : > { %v2209_v6 = vpop.f32.mrf.mxu0  ;;  %v2398_v4 = vpop.f32.mrf.mxu1  ;;  %12920 = vst [vmem:[#allocation251_spill] sm:$0xff] %v10025_v62 }
 0x2e7   : > { %v2638_v31 = vpop.f32.mrf.mxu3  ;;  %v2399_v37 = vadd.f32 %v2398_v4, %v2202_v41  ;;  %v2518_v29 = vpop.f32.mrf.mxu2  ;;  %v3020_v4 = vsub.f32 %v10016_v48, %v10023_v23  ;;  %12922 = vst [vmem:[#allocation252_spill] sm:$0xff] %v10036_v13  ;;  %v2210_v41 = vadd.f32 %v2209_v6, %v12923_v1  ;;  %v12929_v1 = vld [vmem:[#allocation198_spill] sm:$0xff] }
 0x2e9   : > { %v2519_v3 = vadd.f32 %v2518_v29, %v2399_v37  ;;  %2788 = vmatmul.f32.gmra.mxu0 %v12921_v53  ;;  %2881 = vmatmul.f32.gmra.mxu1 %v12915_v27  ;;  %v10040_v24 = vand.u32 4294901760, %v3020_v4  ;;  %v358_v4 = vld [vmem:[%s7814_s12 + $0x178] sm:$0xff] }
 0x2eb   : > { %v10030_v19 = vadd.f32 %v2638_v31, %v2519_v3  ;;  %12924 = vst [vmem:[#allocation193_spill] sm:$0xff] %v10040_v24  ;;  %v10043_v3 = vand.u32 4294901760, %v10036_v13  ;;  %v10045_v31 = vand.u32 4294901760, %v354_v28 }
 0x2ec   : > { %3207 = vmatmul.f32.gmra.mxu3 %v9985_v60  ;;  %3014 = vmatmul.f32.gmra.mxu2 %v10020_v54 }
 0x2ed   : > { %12925 = vst [vmem:[#allocation253_spill] sm:$0xff] %v10043_v3  ;;  %v10056_v6 = vsub.f32 %v354_v28, %v10045_v31 }
 0x2ee   : > { %v2217_v37 = vpop.f32.mrf.mxu0  ;;  %v2402_v58 = vpop.f32.mrf.mxu1  ;;  %12926 = vst [vmem:[#allocation254_spill] sm:$0xff] %v10045_v31 }
 0x2ef   : > { %v2644_v29 = vpop.f32.mrf.mxu3  ;;  %v2403_v27 = vadd.f32 %v2402_v58, %v2210_v41  ;;  %v2523_v2 = vpop.f32.mrf.mxu2  ;;  %v3028_v58 = vsub.f32 %v10036_v13, %v10043_v3  ;;  %12928 = vst [vmem:[#allocation255_spill] sm:$0xff] %v10056_v6  ;;  %v2218_v41 = vadd.f32 %v2217_v37, %v12929_v1  ;;  %v12933_v3 = vld [vmem:[#allocation184_spill] sm:$0xff]  ;;  %v12936_v1 = vld [vmem:[#allocation203_spill] sm:$0xff] }
 0x2f1   : > { %v2524_v54 = vadd.f32 %v2523_v2, %v2403_v27  ;;  %2792 = vmatmul.f32.gmra.mxu0 %v12927_v59  ;;  %2885 = vmatmul.f32.gmra.mxu1 %v12921_v53 }
 0x2f3   : > { %v10050_v8 = vadd.f32 %v2644_v29, %v2524_v54  ;;  %v10063_v54 = vand.u32 4294901760, %v10056_v6  ;;  %v10065_v29 = vand.u32 4294901760, %v358_v4 }
 0x2f4   : > { %3211 = vmatmul.f32.gmra.mxu3 %v10005_v51  ;;  %3022 = vmatmul.f32.gmra.mxu2 %v10040_v24  ;;  %v10060_v51 = vand.u32 4294901760, %v3028_v58  ;;  %v362_v58 = vld [vmem:[%s7814_s12 + $0x198] sm:$0xff] }
 0x2f5   : > { %12931 = vst [vmem:[#allocation256_spill] sm:$0xff] %v10063_v54  ;;  %v10076_v37 = vsub.f32 %v358_v4, %v10065_v29 }
 0x2f6   : > { %v2225_v27 = vpop.f32.mrf.mxu0  ;;  %v2406_v50 = vpop.f32.mrf.mxu1  ;;  %12930 = vst [vmem:[#allocation198_spill] sm:$0xff] %v10060_v51 }
 0x2f7   : > { %v2650_v2 = vpop.f32.mrf.mxu3  ;;  %v2407_v53 = vadd.f32 %v2406_v50, %v2218_v41  ;;  %v2528_v23 = vpop.f32.mrf.mxu2  ;;  %12932 = vst [vmem:[#allocation257_spill] sm:$0xff] %v10065_v29  ;;  %v3036_v50 = vsub.f32 %v10056_v6, %v10063_v54  ;;  %v2226_v41 = vadd.f32 %v2225_v27, %v12936_v1  ;;  %v12940_v54 = vld [vmem:[#allocation191_spill] sm:$0xff]  ;;  %v12942_v1 = vld [vmem:[#allocation209_spill] sm:$0xff] }
 0x2f8   : > { %12935 = vst [vmem:[#allocation259_spill] sm:$0xff] %v10076_v37 }
 0x2f9   : > { %v2529_v24 = vadd.f32 %v2528_v23, %v2407_v53  ;;  %2796 = vmatmul.f32.gmra.mxu0 %v12933_v3  ;;  %2889 = vmatmul.f32.gmra.mxu1 %v12927_v59 }
 0x2fb   : > { %v10070_v28 = vadd.f32 %v2650_v2, %v2529_v24  ;;  %v10083_v24 = vand.u32 4294901760, %v10076_v37  ;;  %v10085_v2 = vand.u32 4294901760, %v362_v58 }
 0x2fc   : > { %3215 = vmatmul.f32.gmra.mxu3 %v10025_v62  ;;  %3030 = vmatmul.f32.gmra.mxu2 %v10060_v51  ;;  %v10080_v62 = vand.u32 4294901760, %v3036_v50  ;;  %v366_v50 = vld [vmem:[%s7814_s12 + $0x1b8] sm:$0xff] }
 0x2fd   : > { %12934 = vst [vmem:[#allocation258_spill] sm:$0xff] %v10070_v28  ;;  %v10096_v27 = vsub.f32 %v362_v58, %v10085_v2 }
 0x2fe   : > { %v2233_v23 = vpop.f32.mrf.mxu0  ;;  %v2410_v13 = vpop.f32.mrf.mxu1  ;;  %12937 = vst [vmem:[#allocation203_spill] sm:$0xff] %v10080_v62 }
 0x2ff   : > { %v2656_v53 = vpop.f32.mrf.mxu3  ;;  %v2411_v59 = vadd.f32 %v2410_v13, %v2226_v41  ;;  %v2533_v45 = vpop.f32.mrf.mxu2  ;;  %12938 = vst [vmem:[#allocation260_spill] sm:$0xff] %v10083_v24  ;;  %v3044_v13 = vsub.f32 %v10076_v37, %v10083_v24  ;;  %v2234_v41 = vadd.f32 %v2233_v23, %v12942_v1 }
 0x300   : > { %12939 = vst [vmem:[#allocation261_spill] sm:$0xff] %v10085_v2 }
 0x301   : > { %v2534_v51 = vadd.f32 %v2533_v45, %v2411_v59  ;;  %2800 = vmatmul.f32.gmra.mxu0 %v12940_v54  ;;  %2893 = vmatmul.f32.gmra.mxu1 %v12933_v3  ;;  %12941 = vst [vmem:[#allocation262_spill] sm:$0xff] %v10096_v27 }
 0x303   : > { %v10090_v4 = vadd.f32 %v2656_v53, %v2534_v51  ;;  %v10103_v51 = vand.u32 4294901760, %v10096_v27  ;;  %v10105_v53 = vand.u32 4294901760, %v366_v50 }
 0x304   : > { %3219 = vmatmul.f32.gmra.mxu3 %v10045_v31  ;;  %3038 = vmatmul.f32.gmra.mxu2 %v10080_v62  ;;  %v10100_v31 = vand.u32 4294901760, %v3044_v13  ;;  %v370_v13 = vld [vmem:[%s7814_s12 + $0x1d8] sm:$0xff] }
 0x305   : > { %12944 = vst [vmem:[#allocation263_spill] sm:$0xff] %v10103_v51  ;;  %v10116_v23 = vsub.f32 %v366_v50, %v10105_v53 }
 0x306   : > { %v2241_v45 = vpop.f32.mrf.mxu0  ;;  %v2414_v6 = vpop.f32.mrf.mxu1  ;;  %12943 = vst [vmem:[#allocation209_spill] sm:$0xff] %v10100_v31 }
 0x307   : > { %v2662_v59 = vpop.f32.mrf.mxu3  ;;  %v2415_v3 = vadd.f32 %v2414_v6, %v2234_v41  ;;  %v2538_v28 = vpop.f32.mrf.mxu2  ;;  %12945 = vst [vmem:[#allocation264_spill] sm:$0xff] %v10105_v53  ;;  %v3052_v6 = vsub.f32 %v10096_v27, %v10103_v51  ;;  %v2242_v1 = vadd.f32 %v2241_v45, %v9772_v11 }
 0x308   : > { %12946 = vst [vmem:[#allocation265_spill] sm:$0xff] %v10116_v23 }
 0x309   : > { %v2539_v62 = vadd.f32 %v2538_v28, %v2415_v3  ;;  %2804 = vmatmul.f32.gmra.mxu0 %v9643_v35  ;;  %2897 = vmatmul.f32.gmra.mxu1 %v12940_v54 }
 0x30b   : > { %v10110_v58 = vadd.f32 %v2662_v59, %v2539_v62  ;;  %v10120_v62 = vand.u32 4294901760, %v3052_v6  ;;  %v10123_v59 = vand.u32 4294901760, %v10116_v23  ;;  %v499_v6 = vld [vmem:[%s7821_s14 + $0x3e0] sm:$0xff] }
 0x30c   : > { %3223 = vmatmul.f32.gmra.mxu3 %v10065_v29  ;;  %3046 = vmatmul.f32.gmra.mxu2 %v10100_v31  ;;  %v10125_v31 = vand.u32 4294901760, %v370_v13 }
 0x30d   : > { %12947 = vst [vmem:[#allocation266_spill] sm:$0xff] %v10120_v62  ;;  %v3060_v50 = vsub.f32 %v10116_v23, %v10123_v59 }
 0x30e   : > { %v2249_v28 = vpop.f32.mrf.mxu0  ;;  %v2418_v41 = vpop.f32.mrf.mxu1  ;;  %12948 = vst [vmem:[#allocation267_spill] sm:$0xff] %v10123_v59  ;;  %v10136_v45 = vsub.f32 %v370_v13, %v10125_v31 }
 0x30f   : > { %v2668_v3 = vpop.f32.mrf.mxu3  ;;  %v2419_v54 = vadd.f32 %v2418_v41, %v2242_v1  ;;  %v2543_v24 = vpop.f32.mrf.mxu2  ;;  %12949 = vst [vmem:[#allocation268_spill] sm:$0xff] %v10125_v31  ;;  %v374_v1 = vld [vmem:[%s7814_s12 + $0x1f8] sm:$0xff]  ;;  %v10140_v41 = vand.u32 4294901760, %v499_v6 }
 0x310   : > { %12950 = vst [vmem:[#allocation269_spill] sm:$0xff] %v10136_v45  ;;  %v10151_v59 = vand.u32 4294901760, %v10136_v45  ;;  %v10153_v23 = vand.u32 4294901760, %v374_v1 }
 0x311   : > { %v2544_v51 = vadd.f32 %v2543_v24, %v2419_v54  ;;  %2808 = vmatmul.f32.gmra.mxu0 %v9669_v26  ;;  %2901 = vmatmul.f32.gmra.mxu1 %v9643_v35  ;;  %12951 = vst [vmem:[#allocation270_spill] sm:$0xff] %v10140_v41  ;;  %v2250_v54 = vadd.f32 %v2249_v28, %v9796_v33 }
 0x312   : > { %3728 = vmatpush.xpose.msra.mxu0 %v10140_v41  ;;  %4179 = vmatpush.xpose.msra.mxu3 %v10140_v41  ;;  %12953 = vst [vmem:[#allocation272_spill] sm:$0xff] %v10151_v59 }
 0x313   : > { %v10130_v11 = vadd.f32 %v2668_v3, %v2544_v51  ;;  %v10144_v51 = vsub.f32 %v499_v6, %v10140_v41  ;;  %12954 = vst [vmem:[#allocation273_spill] sm:$0xff] %v10153_v23  ;;  %v10166_v6 = vsub.f32 %v374_v1, %v10153_v23 }
 0x314   : > { %3227 = vmatmul.f32.gmra.mxu3 %v10085_v2  ;;  %3054 = vmatmul.f32.gmra.mxu2 %v10120_v62  ;;  %v10148_v62 = vand.u32 4294901760, %v3060_v50  ;;  %v3068_v50 = vsub.f32 %v10136_v45, %v10151_v59 }
 0x315   : > { %4051 = vmatpush.xpose.msra.mxu2 %v10144_v51  ;;  %v12446_v28 = vand.u32 4294901760, %v10144_v51  ;;  %12955 = vst [vmem:[#allocation274_spill] sm:$0xff] %v10166_v6  ;;  %v10183_v45 = vand.u32 4294901760, %v10166_v6 }
 0x316   : > { %v2257_v35 = vpop.f32.mrf.mxu0  ;;  %v2422_v27 = vpop.f32.mrf.mxu1  ;;  %12952 = vst [vmem:[#allocation271_spill] sm:$0xff] %v10148_v62 }
 0x317   : > { %v2674_v24 = vpop.f32.mrf.mxu3  ;;  %v2423_v3 = vadd.f32 %v2422_v27, %v2250_v54  ;;  %v2548_v13 = vpop.f32.mrf.mxu2  ;;  %v3891_v54 = vsub.f32 %v10144_v51, %v12446_v28  ;;  %v10180_v28 = vand.u32 4294901760, %v3068_v50  ;;  %12957 = vst [vmem:[#allocation276_spill] sm:$0xff] %v10183_v45 }
 0x319   : > { %v2549_v33 = vadd.f32 %v2548_v13, %v2423_v3  ;;  %2812 = vmatmul.f32.gmra.mxu0 %v9713_v17  ;;  %2905 = vmatmul.f32.gmra.mxu1 %v9669_v26  ;;  %v495_v3 = vld [vmem:[%s7821_s14 + $0x3c0] sm:$0xff]  ;;  %v2258_v26 = vadd.f32 %v2257_v35, %v9819_v47  ;;  %12956 = vst [vmem:[#allocation275_spill] sm:$0xff] %v10180_v28 }
 0x31a   : > { %v10172_v13 = vand.u32 4294901760, %v495_v3 }
 0x31b   : > { %v10160_v27 = vadd.f32 %v2674_v24, %v2549_v33  ;;  %v3892_v24 = vand.u32 4294901760, %v3891_v54 }
 0x31c   : > { %3231 = vmatmul.f32.gmra.mxu3 %v10105_v53  ;;  %3062 = vmatmul.f32.gmra.mxu2 %v10148_v62  ;;  %v10176_v62 = vsub.f32 %v495_v3, %v10172_v13 }
 0x31d   : > { %3730 = vmatpush.xpose.msra.mxu0 %v10172_v13  ;;  %4181 = vmatpush.xpose.msra.mxu3 %v10172_v13 }
 0x31e   : > { %v2265_v33 = vpop.f32.mrf.mxu0  ;;  %v2426_v41 = vpop.f32.mrf.mxu1  ;;  %3893 = vmatpush.xpose.msra.mxu1 %v3892_v24  ;;  %4054 = vmatpush.xpose.msra.mxu2 %v10176_v62  ;;  %v12454_v47 = vand.u32 4294901760, %v10176_v62 }
 0x31f   : > { %v2680_v53 = vpop.f32.mrf.mxu3  ;;  %v2427_v1 = vadd.f32 %v2426_v41, %v2258_v26  ;;  %v2553_v59 = vpop.f32.mrf.mxu2  ;;  %v3076_v26 = vsub.f32 %v10166_v6, %v10183_v45  ;;  %v2266_v3 = vadd.f32 %v2265_v33, %v9843_v16 }
 0x320   : > { %v3897_v41 = vsub.f32 %v10176_v62, %v12454_v47 }
 0x321   : > { %v2554_v35 = vadd.f32 %v2553_v59, %v2427_v1  ;;  %2816 = vmatmul.f32.gmra.mxu0 %v9751_v49  ;;  %2909 = vmatmul.f32.gmra.mxu1 %v9713_v17  ;;  %v491_v59 = vld [vmem:[%s7821_s14 + $0x3a0] sm:$0xff]  ;;  %v10207_v47 = vand.u32 4294901760, %v3076_v26 }
 0x322   : > { %v10199_v50 = vand.u32 4294901760, %v491_v59  ;;  %v3898_v1 = vand.u32 4294901760, %v3897_v41  ;;  %v487_v26 = vld [vmem:[%s7821_s14 + $0x380] sm:$0xff] }
 0x323   : > { %v10190_v54 = vadd.f32 %v2680_v53, %v2554_v35  ;;  %12958 = vst [vmem:[#allocation277_spill] sm:$0xff] %v10207_v47 }
 0x324   : > { %3235 = vmatmul.f32.gmra.mxu3 %v10125_v31  ;;  %3070 = vmatmul.f32.gmra.mxu2 %v10180_v28  ;;  %v10203_v53 = vsub.f32 %v491_v59, %v10199_v50  ;;  %v10221_v59 = vand.u32 4294901760, %v487_v26 }
 0x325   : > { %3732 = vmatpush.xpose.msra.mxu0 %v10199_v50  ;;  %4183 = vmatpush.xpose.msra.mxu3 %v10199_v50 }
 0x326   : > { %v2273_v17 = vpop.f32.mrf.mxu0  ;;  %v2430_v31 = vpop.f32.mrf.mxu1  ;;  %3899 = vmatpush.xpose.msra.mxu1 %v3898_v1  ;;  %4057 = vmatpush.xpose.msra.mxu2 %v10203_v53  ;;  %v12459_v33 = vand.u32 4294901760, %v10203_v53  ;;  %v10225_v45 = vsub.f32 %v487_v26, %v10221_v59  ;;  %v483_v26 = vld [vmem:[%s7821_s14 + $0x360] sm:$0xff] }
 0x327   : > { %v2686_v24 = vpop.f32.mrf.mxu3  ;;  %v2431_v35 = vadd.f32 %v2430_v31, %v2266_v3  ;;  %v2558_v28 = vpop.f32.mrf.mxu2 }
 0x328   : > { %v3903_v31 = vsub.f32 %v10203_v53, %v12459_v33 }
 0x329   : > { %v2559_v16 = vadd.f32 %v2558_v28, %v2431_v35  ;;  %2820 = vmatmul.f32.gmra.mxu0 %v9781_v39  ;;  %2913 = vmatmul.f32.gmra.mxu1 %v9751_v49  ;;  %v2274_v28 = vadd.f32 %v2273_v17, %v9869_v55  ;;  %v12462_v17 = vand.u32 4294901760, %v10225_v45 }
 0x32a   : > { %v3904_v1 = vand.u32 4294901760, %v3903_v31  ;;  %3734 = vmatpush.xpose.msra.mxu0 %v10221_v59  ;;  %4185 = vmatpush.xpose.msra.mxu3 %v10221_v59 }
 0x32b   : > { %v10214_v41 = vadd.f32 %v2686_v24, %v2559_v16  ;;  %4060 = vmatpush.xpose.msra.mxu2 %v10225_v45  ;;  %v3909_v31 = vsub.f32 %v10225_v45, %v12462_v17 }
 0x32c   : > { %3239 = vmatmul.f32.gmra.mxu3 %v10153_v23  ;;  %3078 = vmatmul.f32.gmra.mxu2 %v10207_v47 }
 0x32d   : > { %3905 = vmatpush.xpose.msra.mxu1 %v3904_v1 }
 0x32e   : > { %v2434_v35 = vpop.f32.mrf.mxu1  ;;  %v2761_v49 = vpop.f32.mrf.mxu0 }
 0x32f   : > { %v2692_v3 = vpop.f32.mrf.mxu3  ;;  %v2435_v24 = vadd.f32 %v2434_v35, %v2274_v28  ;;  %v2563_v16 = vpop.f32.mrf.mxu2  ;;  %v10241_v28 = vand.u32 4294901760, %v483_v26  ;;  %v2762_v1 = vadd.f32 %v2761_v49, %v9895_v12 }
 0x331   : > { %v2564_v33 = vadd.f32 %v2563_v16, %v2435_v24  ;;  %2917 = vmatmul.f32.gmra.mxu1 %v9781_v39  ;;  %3293 = vmatmul.f32.vlgmr.msrb.gmra.mxu0 %v9823_v36  ;;  %v3910_v24 = vand.u32 4294901760, %v3909_v31  ;;  %v10245_v47 = vsub.f32 %v483_v26, %v10241_v28  ;;  %v479_v31 = vld [vmem:[%s7821_s14 + $0x340] sm:$0xff] }
 0x332   : > { %3736 = vmatpush.xpose.msra.mxu0 %v10241_v28  ;;  %4187 = vmatpush.xpose.msra.mxu3 %v10241_v28  ;;  %v10261_v26 = vand.u32 4294901760, %v479_v31 }
 0x333   : > { %v10234_v55 = vadd.f32 %v2692_v3, %v2564_v33  ;;  %3911 = vmatpush.xpose.msra.mxu1 %v3910_v24  ;;  %4063 = vmatpush.xpose.msra.mxu2 %v10245_v47  ;;  %v12465_v49 = vand.u32 4294901760, %v10245_v47 }
 0x334   : > { %3663 = vmatmul.f32.vlgmr.msrb.gmra.mxu3 %v9809_v15  ;;  %3566 = vmatmul.f32.vlgmr.msrb.gmra.mxu2 %v9809_v15  ;;  %v496_v15 = vld [vmem:[%s7821_s14 + $0x3c8] sm:$0xff] }
 0x336   : > { %v2765_v16 = vpop.f32.mrf.mxu0  ;;  %v2858_v36 = vpop.f32.mrf.mxu1  ;;  %3738 = vmatpush.xpose.msra.mxu0 %v10261_v26  ;;  %4189 = vmatpush.xpose.msra.mxu3 %v10261_v26 }
 0x337   : > { %v3180_v35 = vpop.f32.mrf.mxu3  ;;  %v2859_v33 = vadd.f32 %v2858_v36, %v2762_v1  ;;  %v2959_v3 = vpop.f32.mrf.mxu2  ;;  %v3915_v36 = vsub.f32 %v10245_v47, %v12465_v49  ;;  %v2766_v1 = vadd.f32 %v2765_v16, %v9921_v20 }
 0x339   : > { %v2960_v17 = vadd.f32 %v2959_v3, %v2859_v33  ;;  %3298 = vmatmul.f32.gmra.mxu0 %v9849_v46  ;;  %3407 = vmatmul.f32.vlgmr.msrb.gmra.mxu1 %v9833_v22  ;;  %v3916_v33 = vand.u32 4294901760, %v3915_v36  ;;  %v10265_v46 = vsub.f32 %v479_v31, %v10261_v26  ;;  %v475_v36 = vld [vmem:[%s7821_s14 + $0x320] sm:$0xff] }
 0x33a   : > { %v10281_v31 = vand.u32 4294901760, %v475_v36 }
 0x33b   : > { %v10254_v12 = vadd.f32 %v3180_v35, %v2960_v17  ;;  %3917 = vmatpush.xpose.msra.mxu1 %v3916_v33  ;;  %4066 = vmatpush.xpose.msra.mxu2 %v10265_v46  ;;  %v12468_v20 = vand.u32 4294901760, %v10265_v46 }
 0x33c   : > { %3667 = vmatmul.f32.gmra.mxu3 %v9835_v7  ;;  %3570 = vmatmul.f32.gmra.mxu2 %v9835_v7 }
 0x33d   : > { %3740 = vmatpush.xpose.msra.mxu0 %v10281_v31  ;;  %4191 = vmatpush.xpose.msra.mxu3 %v10281_v31 }
 0x33e   : > { %v2769_v3 = vpop.f32.mrf.mxu0  ;;  %v2862_v22 = vpop.f32.mrf.mxu1 }
 0x33f   : > { %v3184_v24 = vpop.f32.mrf.mxu3  ;;  %v2863_v17 = vadd.f32 %v2862_v22, %v2766_v1  ;;  %v2967_v35 = vpop.f32.mrf.mxu2  ;;  %v3921_v22 = vsub.f32 %v10265_v46, %v12468_v20  ;;  %v2770_v1 = vadd.f32 %v2769_v3, %v9947_v44 }
 0x341   : > { %v2968_v49 = vadd.f32 %v2967_v35, %v2863_v17  ;;  %3303 = vmatmul.f32.gmra.mxu0 %v9875_v40  ;;  %3413 = vmatmul.f32.gmra.mxu1 %v9859_v34  ;;  %v3922_v17 = vand.u32 4294901760, %v3921_v22  ;;  %v10285_v40 = vsub.f32 %v475_v36, %v10281_v31  ;;  %v471_v22 = vld [vmem:[%s7821_s14 + $0x300] sm:$0xff] }
 0x342   : > { %v10301_v36 = vand.u32 4294901760, %v471_v22 }
 0x343   : > { %v10274_v16 = vadd.f32 %v3184_v24, %v2968_v49  ;;  %3923 = vmatpush.xpose.msra.mxu1 %v3922_v17  ;;  %4069 = vmatpush.xpose.msra.mxu2 %v10285_v40  ;;  %v12471_v44 = vand.u32 4294901760, %v10285_v40 }
 0x344   : > { %3671 = vmatmul.f32.gmra.mxu3 %v9861_v52  ;;  %3574 = vmatmul.f32.gmra.mxu2 %v9861_v52 }
 0x345   : > { %3742 = vmatpush.xpose.msra.mxu0 %v10301_v36  ;;  %4193 = vmatpush.xpose.msra.mxu3 %v10301_v36 }
 0x346   : > { %v2773_v35 = vpop.f32.mrf.mxu0  ;;  %v2866_v34 = vpop.f32.mrf.mxu1 }
 0x347   : > { %v3188_v33 = vpop.f32.mrf.mxu3  ;;  %v2867_v49 = vadd.f32 %v2866_v34, %v2770_v1  ;;  %v2975_v24 = vpop.f32.mrf.mxu2  ;;  %v3927_v34 = vsub.f32 %v10285_v40, %v12471_v44  ;;  %v2774_v1 = vadd.f32 %v2773_v35, %v9969_v0 }
 0x349   : > { %v2976_v20 = vadd.f32 %v2975_v24, %v2867_v49  ;;  %3308 = vmatmul.f32.gmra.mxu0 %v9901_v57  ;;  %3419 = vmatmul.f32.gmra.mxu1 %v9885_v21  ;;  %v3928_v49 = vand.u32 4294901760, %v3927_v34  ;;  %v10305_v57 = vsub.f32 %v471_v22, %v10301_v36  ;;  %v467_v34 = vld [vmem:[%s7821_s14 + $0x2e0] sm:$0xff] }
 0x34a   : > { %v10321_v22 = vand.u32 4294901760, %v467_v34 }
 0x34b   : > { %v10294_v3 = vadd.f32 %v3188_v33, %v2976_v20  ;;  %3929 = vmatpush.xpose.msra.mxu1 %v3928_v49  ;;  %4072 = vmatpush.xpose.msra.mxu2 %v10305_v57  ;;  %v12474_v0 = vand.u32 4294901760, %v10305_v57 }
 0x34c   : > { %3675 = vmatmul.f32.gmra.mxu3 %v9887_v38  ;;  %3578 = vmatmul.f32.gmra.mxu2 %v9887_v38 }
 0x34d   : > { %3744 = vmatpush.xpose.msra.mxu0 %v10321_v22  ;;  %4195 = vmatpush.xpose.msra.mxu3 %v10321_v22 }
 0x34e   : > { %v2777_v24 = vpop.f32.mrf.mxu0  ;;  %v2870_v21 = vpop.f32.mrf.mxu1 }
 0x34f   : > { %v3192_v17 = vpop.f32.mrf.mxu3  ;;  %v2871_v20 = vadd.f32 %v2870_v21, %v2774_v1  ;;  %v2983_v33 = vpop.f32.mrf.mxu2  ;;  %v3933_v21 = vsub.f32 %v10305_v57, %v12474_v0  ;;  %v2778_v1 = vadd.f32 %v2777_v24, %v9990_v61 }
 0x351   : > { %v2984_v44 = vadd.f32 %v2983_v33, %v2871_v20  ;;  %3313 = vmatmul.f32.gmra.mxu0 %v9927_v14  ;;  %3425 = vmatmul.f32.gmra.mxu1 %v9911_v5  ;;  %v3934_v20 = vand.u32 4294901760, %v3933_v21  ;;  %v10325_v14 = vsub.f32 %v467_v34, %v10321_v22  ;;  %v463_v21 = vld [vmem:[%s7821_s14 + $0x2c0] sm:$0xff] }
 0x352   : > { %v10341_v34 = vand.u32 4294901760, %v463_v21 }
 0x353   : > { %v10314_v35 = vadd.f32 %v3192_v17, %v2984_v44  ;;  %3935 = vmatpush.xpose.msra.mxu1 %v3934_v20  ;;  %4075 = vmatpush.xpose.msra.mxu2 %v10325_v14  ;;  %v12477_v61 = vand.u32 4294901760, %v10325_v14 }
 0x354   : > { %3679 = vmatmul.f32.gmra.mxu3 %v9913_v63  ;;  %3582 = vmatmul.f32.gmra.mxu2 %v9913_v63 }
 0x355   : > { %3746 = vmatpush.xpose.msra.mxu0 %v10341_v34  ;;  %4197 = vmatpush.xpose.msra.mxu3 %v10341_v34 }
 0x356   : > { %v2781_v33 = vpop.f32.mrf.mxu0  ;;  %v2874_v5 = vpop.f32.mrf.mxu1 }
 0x357   : > { %v3196_v49 = vpop.f32.mrf.mxu3  ;;  %v2875_v44 = vadd.f32 %v2874_v5, %v2778_v1  ;;  %v2991_v17 = vpop.f32.mrf.mxu2  ;;  %v3939_v5 = vsub.f32 %v10325_v14, %v12477_v61  ;;  %v2782_v1 = vadd.f32 %v2781_v33, %v10010_v10 }
 0x359   : > { %v2992_v0 = vadd.f32 %v2991_v17, %v2875_v44  ;;  %3318 = vmatmul.f32.gmra.mxu0 %v9953_v32  ;;  %3431 = vmatmul.f32.gmra.mxu1 %v9937_v9  ;;  %v3940_v44 = vand.u32 4294901760, %v3939_v5  ;;  %v10345_v32 = vsub.f32 %v463_v21, %v10341_v34  ;;  %v459_v5 = vld [vmem:[%s7821_s14 + $0x2a0] sm:$0xff] }
 0x35a   : > { %v10361_v21 = vand.u32 4294901760, %v459_v5 }
 0x35b   : > { %v10334_v24 = vadd.f32 %v3196_v49, %v2992_v0  ;;  %3941 = vmatpush.xpose.msra.mxu1 %v3940_v44  ;;  %4078 = vmatpush.xpose.msra.mxu2 %v10345_v32  ;;  %v12480_v10 = vand.u32 4294901760, %v10345_v32 }
 0x35c   : > { %3683 = vmatmul.f32.gmra.mxu3 %v9939_v25  ;;  %3586 = vmatmul.f32.gmra.mxu2 %v9939_v25 }
 0x35d   : > { %3748 = vmatpush.xpose.msra.mxu0 %v10361_v21  ;;  %4199 = vmatpush.xpose.msra.mxu3 %v10361_v21 }
 0x35e   : > { %v2785_v17 = vpop.f32.mrf.mxu0  ;;  %v2878_v9 = vpop.f32.mrf.mxu1 }
 0x35f   : > { %v3200_v20 = vpop.f32.mrf.mxu3  ;;  %v2879_v0 = vadd.f32 %v2878_v9, %v2782_v1  ;;  %v2999_v49 = vpop.f32.mrf.mxu2  ;;  %v3945_v9 = vsub.f32 %v10345_v32, %v12480_v10  ;;  %v2786_v1 = vadd.f32 %v2785_v17, %v10030_v19 }
 0x361   : > { %v3000_v61 = vadd.f32 %v2999_v49, %v2879_v0  ;;  %3323 = vmatmul.f32.gmra.mxu0 %v9975_v30  ;;  %3437 = vmatmul.f32.gmra.mxu1 %v9961_v43  ;;  %v3946_v0 = vand.u32 4294901760, %v3945_v9  ;;  %v10365_v30 = vsub.f32 %v459_v5, %v10361_v21  ;;  %v455_v9 = vld [vmem:[%s7821_s14 + $0x280] sm:$0xff] }
 0x362   : > { %v10381_v5 = vand.u32 4294901760, %v455_v9 }
 0x363   : > { %v10354_v33 = vadd.f32 %v3200_v20, %v3000_v61  ;;  %3947 = vmatpush.xpose.msra.mxu1 %v3946_v0  ;;  %4081 = vmatpush.xpose.msra.mxu2 %v10365_v30  ;;  %v12483_v19 = vand.u32 4294901760, %v10365_v30 }
 0x364   : > { %3687 = vmatmul.f32.gmra.mxu3 %v9963_v18  ;;  %3590 = vmatmul.f32.gmra.mxu2 %v9963_v18 }
 0x365   : > { %3750 = vmatpush.xpose.msra.mxu0 %v10381_v5  ;;  %4201 = vmatpush.xpose.msra.mxu3 %v10381_v5 }
 0x366   : > { %v2789_v49 = vpop.f32.mrf.mxu0  ;;  %v2882_v43 = vpop.f32.mrf.mxu1 }
 0x367   : > { %v3204_v44 = vpop.f32.mrf.mxu3  ;;  %v2883_v61 = vadd.f32 %v2882_v43, %v2786_v1  ;;  %v3007_v20 = vpop.f32.mrf.mxu2  ;;  %v3951_v43 = vsub.f32 %v10365_v30, %v12483_v19  ;;  %v2790_v1 = vadd.f32 %v2789_v49, %v10050_v8  ;;  %v12959_v8 = vld [vmem:[#allocation247_spill] sm:$0xff] }
 0x369   : > { %v3008_v10 = vadd.f32 %v3007_v20, %v2883_v61  ;;  %3328 = vmatmul.f32.gmra.mxu0 %v9996_v42  ;;  %3443 = vmatmul.f32.gmra.mxu1 %v9983_v56  ;;  %v3952_v61 = vand.u32 4294901760, %v3951_v43  ;;  %v10385_v42 = vsub.f32 %v455_v9, %v10381_v5  ;;  %v12960_v43 = vld [vmem:[#allocation248_spill] sm:$0xff] }
 0x36b   : > { %v10374_v17 = vadd.f32 %v3204_v44, %v3008_v10  ;;  %3953 = vmatpush.xpose.msra.mxu1 %v3952_v61  ;;  %4084 = vmatpush.xpose.msra.mxu2 %v10385_v42  ;;  %v12491_v49 = vand.u32 4294901760, %v10385_v42 }
 0x36c   : > { %3691 = vmatmul.f32.gmra.mxu3 %v9985_v60  ;;  %3594 = vmatmul.f32.gmra.mxu2 %v9985_v60 }
 0x36e   : > { %v2793_v20 = vpop.f32.mrf.mxu0  ;;  %v2886_v56 = vpop.f32.mrf.mxu1 }
 0x36f   : > { %v3208_v0 = vpop.f32.mrf.mxu3  ;;  %v2887_v10 = vadd.f32 %v2886_v56, %v2790_v1  ;;  %v3015_v44 = vpop.f32.mrf.mxu2  ;;  %v3957_v56 = vsub.f32 %v10385_v42, %v12491_v49  ;;  %v451_v1 = vld [vmem:[%s7821_s14 + $0x260] sm:$0xff] }
 0x370   : > { %v10401_v61 = vand.u32 4294901760, %v451_v1 }
 0x371   : > { %v3016_v19 = vadd.f32 %v3015_v44, %v2887_v10  ;;  %3333 = vmatmul.f32.gmra.mxu0 %v10016_v48  ;;  %3449 = vmatmul.f32.gmra.mxu1 %v12959_v8  ;;  %v12961_v10 = vld [vmem:[#allocation258_spill] sm:$0xff]  ;;  %v3958_v60 = vand.u32 4294901760, %v3957_v56 }
 0x372   : > { %v2794_v44 = vadd.f32 %v2793_v20, %v12961_v10  ;;  %v10405_v25 = vsub.f32 %v451_v1, %v10401_v61  ;;  %3752 = vmatpush.xpose.msra.mxu0 %v10401_v61  ;;  %4203 = vmatpush.xpose.msra.mxu3 %v10401_v61  ;;  %v12963_v20 = vld [vmem:[#allocation250_spill] sm:$0xff]  ;;  %v12964_v10 = vld [vmem:[#allocation251_spill] sm:$0xff] }
 0x373   : > { %v10394_v9 = vadd.f32 %v3208_v0, %v3016_v19  ;;  %3959 = vmatpush.xpose.msra.mxu1 %v3958_v60  ;;  %v447_v60 = vld [vmem:[%s7821_s14 + $0x240] sm:$0xff] }
 0x374   : > { %3695 = vmatmul.f32.gmra.mxu3 %v12960_v43  ;;  %3598 = vmatmul.f32.gmra.mxu2 %v12960_v43  ;;  %v12962_v43 = vld [vmem:[#allocation252_spill] sm:$0xff]  ;;  %v12497_v56 = vand.u32 4294901760, %v10405_v25 }
 0x375   : > { %4087 = vmatpush.xpose.msra.mxu2 %v10405_v25 }
 0x376   : > { %v2797_v8 = vpop.f32.mrf.mxu0  ;;  %v2890_v18 = vpop.f32.mrf.mxu1 }
 0x377   : > { %v3212_v48 = vpop.f32.mrf.mxu3  ;;  %v2891_v19 = vadd.f32 %v2890_v18, %v2794_v44  ;;  %v3023_v0 = vpop.f32.mrf.mxu2  ;;  %v3963_v18 = vsub.f32 %v10405_v25, %v12497_v56  ;;  %v10421_v44 = vand.u32 4294901760, %v447_v60 }
 0x379   : > { %v3024_v49 = vadd.f32 %v3023_v0, %v2891_v19  ;;  %3338 = vmatmul.f32.gmra.mxu0 %v12962_v43  ;;  %3455 = vmatmul.f32.gmra.mxu1 %v12963_v20  ;;  %v2798_v19 = vadd.f32 %v2797_v8, %v10090_v4  ;;  %v3964_v43 = vand.u32 4294901760, %v3963_v18  ;;  %v10425_v38 = vsub.f32 %v447_v60, %v10421_v44  ;;  %v12966_v4 = vld [vmem:[#allocation253_spill] sm:$0xff]  ;;  %v12967_v18 = vld [vmem:[#allocation254_spill] sm:$0xff] }
 0x37a   : > { %3754 = vmatpush.xpose.msra.mxu0 %v10421_v44  ;;  %4205 = vmatpush.xpose.msra.mxu3 %v10421_v44 }
 0x37b   : > { %v10414_v1 = vadd.f32 %v3212_v48, %v3024_v49  ;;  %3965 = vmatpush.xpose.msra.mxu1 %v3964_v43  ;;  %4090 = vmatpush.xpose.msra.mxu2 %v10425_v38  ;;  %v12503_v8 = vand.u32 4294901760, %v10425_v38  ;;  %v443_v43 = vld [vmem:[%s7821_s14 + $0x220] sm:$0xff] }
 0x37c   : > { %3699 = vmatmul.f32.gmra.mxu3 %v12964_v10  ;;  %3602 = vmatmul.f32.gmra.mxu2 %v12964_v10  ;;  %v12965_v10 = vld [vmem:[#allocation255_spill] sm:$0xff] }
 0x37e   : > { %v2801_v20 = vpop.f32.mrf.mxu0  ;;  %v2894_v63 = vpop.f32.mrf.mxu1 }
 0x37f   : > { %v3216_v0 = vpop.f32.mrf.mxu3  ;;  %v2895_v48 = vadd.f32 %v2894_v63, %v2798_v19  ;;  %v3031_v49 = vpop.f32.mrf.mxu2  ;;  %v3969_v63 = vsub.f32 %v10425_v38, %v12503_v8  ;;  %v10441_v19 = vand.u32 4294901760, %v443_v43 }
 0x381   : > { %v3032_v56 = vadd.f32 %v3031_v49, %v2895_v48  ;;  %3343 = vmatmul.f32.gmra.mxu0 %v12965_v10  ;;  %3461 = vmatmul.f32.gmra.mxu1 %v12966_v4  ;;  %v2802_v48 = vadd.f32 %v2801_v20, %v10110_v58  ;;  %v3970_v10 = vand.u32 4294901760, %v3969_v63  ;;  %v10445_v7 = vsub.f32 %v443_v43, %v10441_v19  ;;  %v12968_v58 = vld [vmem:[#allocation256_spill] sm:$0xff] }
 0x382   : > { %3756 = vmatpush.xpose.msra.mxu0 %v10441_v19  ;;  %4207 = vmatpush.xpose.msra.mxu3 %v10441_v19 }
 0x383   : > { %v10434_v60 = vadd.f32 %v3216_v0, %v3032_v56  ;;  %3971 = vmatpush.xpose.msra.mxu1 %v3970_v10  ;;  %4093 = vmatpush.xpose.msra.mxu2 %v10445_v7  ;;  %v12506_v20 = vand.u32 4294901760, %v10445_v7  ;;  %v439_v10 = vld [vmem:[%s7821_s14 + $0x200] sm:$0xff] }
 0x384   : > { %3703 = vmatmul.f32.gmra.mxu3 %v12967_v18  ;;  %3606 = vmatmul.f32.gmra.mxu2 %v12967_v18  ;;  %v10461_v43 = vand.u32 4294901760, %v439_v10 }
 0x386   : > { %v2805_v4 = vpop.f32.mrf.mxu0  ;;  %v2898_v52 = vpop.f32.mrf.mxu1  ;;  %v10465_v18 = vsub.f32 %v439_v10, %v10461_v43  ;;  %3758 = vmatpush.xpose.msra.mxu0 %v10461_v43  ;;  %4209 = vmatpush.xpose.msra.mxu3 %v10461_v43  ;;  %v12971_v10 = vld [vmem:[#allocation260_spill] sm:$0xff] }
 0x387   : > { %v3220_v49 = vpop.f32.mrf.mxu3  ;;  %v2899_v56 = vadd.f32 %v2898_v52, %v2802_v48  ;;  %v3039_v0 = vpop.f32.mrf.mxu2  ;;  %v3975_v52 = vsub.f32 %v10445_v7, %v12506_v20  ;;  %v2806_v48 = vadd.f32 %v2805_v4, %v10130_v11  ;;  %v12969_v20 = vand.u32 4294901760, %v10144_v51  ;;  %v500_v51 = vld [vmem:[%s7821_s14 + $0x3e8] sm:$0xff] }
 0x388   : > { %4096 = vmatpush.xpose.msra.mxu2 %v10465_v18  ;;  %v12509_v11 = vand.u32 4294901760, %v10465_v18 }
 0x389   : > { %v3040_v8 = vadd.f32 %v3039_v0, %v2899_v56  ;;  %3348 = vmatmul.f32.gmra.mxu0 %v10076_v37  ;;  %3467 = vmatmul.f32.gmra.mxu1 %v12968_v58  ;;  %v3976_v0 = vand.u32 4294901760, %v3975_v52  ;;  %v12970_v52 = vld [vmem:[#allocation262_spill] sm:$0xff] }
 0x38a   : > { %4310 = vmatpush.xpose.msrb.mxu0 %v12969_v20  ;;  %v12972_v20 = vand.u32 4294901760, %v10176_v62  ;;  %v12974_v62 = vand.u32 4294901760, %v10203_v53  ;;  %v12978_v53 = vand.u32 4294901760, %v10225_v45  ;;  %v12981_v45 = vld [vmem:[#allocation267_spill] sm:$0xff] }
 0x38b   : > { %v10454_v63 = vadd.f32 %v3220_v49, %v3040_v8  ;;  %3977 = vmatpush.xpose.msra.mxu1 %v3976_v0 }
 0x38c   : > { %3707 = vmatmul.f32.gmra.mxu3 %v10065_v29  ;;  %3610 = vmatmul.f32.gmra.mxu2 %v10065_v29 }
 0x38e   : > { %v2809_v58 = vpop.f32.mrf.mxu0  ;;  %v2902_v37 = vpop.f32.mrf.mxu1  ;;  %4314 = vmatpush.xpose.msrb.mxu0 %v12972_v20 }
 0x38f   : > { %v3224_v56 = vpop.f32.mrf.mxu3  ;;  %v2903_v8 = vadd.f32 %v2902_v37, %v2806_v48  ;;  %v3047_v49 = vpop.f32.mrf.mxu2  ;;  %v3981_v37 = vsub.f32 %v10465_v18, %v12509_v11 }
 0x391   : > { %v3048_v4 = vadd.f32 %v3047_v49, %v2903_v8  ;;  %3353 = vmatmul.f32.gmra.mxu0 %v12970_v52  ;;  %3473 = vmatmul.f32.gmra.mxu1 %v12971_v10  ;;  %v3982_v0 = vand.u32 4294901760, %v3981_v37  ;;  %v10485_v8 = vand.u32 4294901760, %v500_v51  ;;  %v2810_v49 = vadd.f32 %v2809_v58, %v10160_v27  ;;  %v12975_v27 = vld [vmem:[#allocation265_spill] sm:$0xff]  ;;  %v12976_v58 = vld [vmem:[#allocation263_spill] sm:$0xff] }
 0x392   : > { %4318 = vmatpush.xpose.msrb.mxu0 %v12974_v62 }
 0x393   : > { %v10479_v48 = vadd.f32 %v3224_v56, %v3048_v4  ;;  %3983 = vmatpush.xpose.msra.mxu1 %v3982_v0  ;;  %4534 = vmatpush.xpose.msrb.mxu2 %v10485_v8  ;;  %v10490_v56 = vsub.f32 %v500_v51, %v10485_v8  ;;  %v12977_v0 = vld [vmem:[#allocation264_spill] sm:$0xff] }
 0x394   : > { %3711 = vmatmul.f32.gmra.mxu3 %v10085_v2  ;;  %3614 = vmatmul.f32.gmra.mxu2 %v10085_v2  ;;  %v12973_v2 = vld [vmem:[#allocation270_spill] sm:$0xff] }
 0x395   : > { %v12524_v37 = vand.u32 4294901760, %v10490_v56 }
 0x396   : > { %v2813_v52 = vpop.f32.mrf.mxu0  ;;  %v2906_v29 = vpop.f32.mrf.mxu1  ;;  %4322 = vmatpush.xpose.msrb.mxu0 %v12978_v53 }
 0x397   : > { %v3228_v10 = vpop.f32.mrf.mxu3  ;;  %v2907_v4 = vadd.f32 %v2906_v29, %v2810_v49  ;;  %v3055_v11 = vpop.f32.mrf.mxu2  ;;  %4437 = vmatpush.xpose.msrb.mxu1 %v12973_v2  ;;  %v4697_v29 = vsub.f32 %v10490_v56, %v12524_v37 }
 0x399   : > { %v3056_v20 = vadd.f32 %v3055_v11, %v2907_v4  ;;  %3358 = vmatmul.f32.gmra.mxu0 %v12975_v27  ;;  %3479 = vmatmul.f32.gmra.mxu1 %v12976_v58  ;;  %v4698_v2 = vand.u32 4294901760, %v4697_v29  ;;  %v2814_v11 = vadd.f32 %v2813_v52, %v10190_v54  ;;  %v12980_v29 = vld [vmem:[#allocation269_spill] sm:$0xff]  ;;  %v12982_v54 = vld [vmem:[#allocation268_spill] sm:$0xff] }
 0x39b   : > { %v10502_v51 = vadd.f32 %v3228_v10, %v3056_v20  ;;  %4439 = vmatpush.xpose.msrb.mxu1 %v10172_v13  ;;  %4699 = vmatpush.xpose.msrb.mxu3 %v4698_v2  ;;  %v10511_v10 = vand.u32 4294901760, %v496_v15  ;;  %v12979_v20 = vand.u32 4294901760, %v10245_v47 }
 0x39c   : > { %3715 = vmatmul.f32.gmra.mxu3 %v12977_v0  ;;  %3618 = vmatmul.f32.gmra.mxu2 %v12977_v0 }
 0x39d   : > { %4326 = vmatpush.xpose.msrb.mxu0 %v12979_v20  ;;  %4536 = vmatpush.xpose.msrb.mxu2 %v10511_v10  ;;  %v10520_v52 = vsub.f32 %v496_v15, %v10511_v10  ;;  %v492_v20 = vld [vmem:[%s7821_s14 + $0x3a8] sm:$0xff] }
 0x39e   : > { %v2817_v4 = vpop.f32.mrf.mxu0  ;;  %v2910_v62 = vpop.f32.mrf.mxu1 }
 0x39f   : > { %v3232_v49 = vpop.f32.mrf.mxu3  ;;  %v2911_v58 = vadd.f32 %v2910_v62, %v2814_v11  ;;  %v3063_v27 = vpop.f32.mrf.mxu2  ;;  %4441 = vmatpush.xpose.msrb.mxu1 %v10199_v50  ;;  %v12514_v47 = vand.u32 4294901760, %v10520_v52  ;;  %v12983_v50 = vand.u32 4294901760, %v10265_v46  ;;  %v12984_v46 = vand.u32 4294901760, %v10285_v40 }
 0x3a1   : > { %v3064_v13 = vadd.f32 %v3063_v27, %v2911_v58  ;;  %3363 = vmatmul.f32.gmra.mxu0 %v12980_v29  ;;  %3485 = vmatmul.f32.gmra.mxu1 %v12981_v45  ;;  %v2818_v27 = vadd.f32 %v2817_v4, %v10214_v41  ;;  %v4703_v15 = vsub.f32 %v10520_v52, %v12514_v47  ;;  %v12985_v41 = vld [vmem:[#allocation272_spill] sm:$0xff]  ;;  %v440_v29 = vld [vmem:[%s7821_s14 + $0x208] sm:$0xff] }
 0x3a2   : > { %4330 = vmatpush.xpose.msrb.mxu0 %v12983_v50 }
 0x3a3   : > { %v10522_v2 = vadd.f32 %v3232_v49, %v3064_v13  ;;  %4443 = vmatpush.xpose.msrb.mxu1 %v10221_v59  ;;  %v4704_v59 = vand.u32 4294901760, %v4703_v15  ;;  %v10535_v13 = vand.u32 4294901760, %v492_v20 }
 0x3a4   : > { %3719 = vmatmul.f32.gmra.mxu3 %v12982_v54  ;;  %3622 = vmatmul.f32.gmra.mxu2 %v12982_v54 }
 0x3a5   : > { %4538 = vmatpush.xpose.msrb.mxu2 %v10535_v13  ;;  %v10544_v4 = vsub.f32 %v492_v20, %v10535_v13  ;;  %4705 = vmatpush.xpose.msrb.mxu3 %v4704_v59 }
 0x3a6   : > { %v2821_v53 = vpop.f32.mrf.mxu0  ;;  %v2914_v11 = vpop.f32.mrf.mxu1  ;;  %4334 = vmatpush.xpose.msrb.mxu0 %v12984_v46 }
 0x3a7   : > { %v3236_v58 = vpop.f32.mrf.mxu3  ;;  %v2915_v49 = vadd.f32 %v2914_v11, %v2818_v27  ;;  %v3071_v62 = vpop.f32.mrf.mxu2  ;;  %4445 = vmatpush.xpose.msrb.mxu1 %v10241_v28  ;;  %v12515_v40 = vand.u32 4294901760, %v10544_v4  ;;  %v12986_v27 = vand.u32 4294901760, %v10305_v57  ;;  %v2822_v11 = vadd.f32 %v2821_v53, %v10234_v55  ;;  %v12988_v55 = vld [vmem:[#allocation276_spill] sm:$0xff]  ;;  %v12989_v53 = vld [vmem:[#allocation25_spill] sm:$0xff] }
 0x3a8   : > { %v12987_v57 = vand.u32 4294901760, %v10325_v14 }
 0x3a9   : > { %v3072_v50 = vadd.f32 %v3071_v62, %v2915_v49  ;;  %3368 = vmatmul.f32.gmra.mxu0 %v10166_v6  ;;  %3491 = vmatmul.f32.gmra.mxu1 %v12985_v41  ;;  %v13037_v6 = vld [vmem:[#allocation62_spill] sm:$0xff] }
 0x3aa   : > { %4338 = vmatpush.xpose.msrb.mxu0 %v12986_v27  ;;  %v12990_v27 = vld [vmem:[#allocation22_spill] sm:$0xff] }
 0x3ab   : > { %v10546_v28 = vadd.f32 %v3236_v58, %v3072_v50  ;;  %4447 = vmatpush.xpose.msrb.mxu1 %v10261_v26  ;;  %v4709_v58 = vsub.f32 %v10544_v4, %v12515_v40  ;;  %v488_v50 = vld [vmem:[%s7821_s14 + $0x388] sm:$0xff]  ;;  %v12996_v40 = vld [vmem:[#allocation26_spill] sm:$0xff] }
 0x3ac   : > { %3723 = vmatmul.f32.gmra.mxu3 %v10153_v23  ;;  %3626 = vmatmul.f32.gmra.mxu2 %v10153_v23  ;;  %v10558_v47 = vand.u32 4294901760, %v488_v50  ;;  %v13041_v23 = vld [vmem:[#allocation66_spill] sm:$0xff] }
 0x3ad   : > { %v4710_v59 = vand.u32 4294901760, %v4709_v58  ;;  %v12991_v58 = vld [vmem:[#allocation21_spill] sm:$0xff] }
 0x3ae   : > { %v2918_v49 = vpop.f32.mrf.mxu1  ;;  %v3294_v62 = vpop.f32.mrf.mxu0  ;;  %4342 = vmatpush.xpose.msrb.mxu0 %v12987_v57  ;;  %4540 = vmatpush.xpose.msrb.mxu2 %v10558_v47 }
 0x3af   : > { %v3240_v15 = vpop.f32.mrf.mxu3  ;;  %v2919_v20 = vadd.f32 %v2918_v49, %v2822_v11  ;;  %v3079_v46 = vpop.f32.mrf.mxu2  ;;  %4449 = vmatpush.xpose.msrb.mxu1 %v10281_v31  ;;  %v10568_v11 = vsub.f32 %v488_v50, %v10558_v47  ;;  %4711 = vmatpush.xpose.msrb.mxu3 %v4710_v59  ;;  %v12992_v31 = vand.u32 4294901760, %v10345_v32  ;;  %v12993_v32 = vand.u32 4294901760, %v10365_v30 }
 0x3b1   : > { %v3080_v26 = vadd.f32 %v3079_v46, %v2919_v20  ;;  %3497 = vmatmul.f32.gmra.mxu1 %v12988_v55  ;;  %3764 = vmatmul.f32.vlgmr.msra.gmra.mxu0 %v12989_v53  ;;  %v12516_v14 = vand.u32 4294901760, %v10568_v11  ;;  %v3295_v20 = vadd.f32 %v3294_v62, %v10254_v12  ;;  %v12994_v12 = vld [vmem:[#allocation29_spill] sm:$0xff]  ;;  %v12995_v62 = vld [vmem:[#allocation20_spill] sm:$0xff]  ;;  %v13033_v55 = vld [vmem:[#allocation58_spill] sm:$0xff] }
 0x3b2   : > { %4346 = vmatpush.xpose.msrb.mxu0 %v12992_v31  ;;  %v279_v31 = vld [vmem:[#allocation2 + $0xb0] sm:$0xff] }
 0x3b3   : > { %v10570_v49 = vadd.f32 %v3240_v15, %v3080_v26  ;;  %4451 = vmatpush.xpose.msrb.mxu1 %v10301_v36  ;;  %v4715_v15 = vsub.f32 %v10568_v11, %v12516_v14 }
 0x3b4   : > { %4213 = vmatmul.f32.vlgmr.msra.gmra.mxu3 %v12990_v27  ;;  %4099 = vmatmul.f32.vlgmr.msra.gmra.mxu2 %v12991_v58  ;;  %v484_v27 = vld [vmem:[%s7821_s14 + $0x368] sm:$0xff] }
 0x3b5   : > { %v4716_v59 = vand.u32 4294901760, %v4715_v15  ;;  %v10582_v58 = vand.u32 4294901760, %v484_v27  ;;  %v12997_v15 = vld [vmem:[#allocation24_spill] sm:$0xff] }
 0x3b6   : > { %v3299_v57 = vpop.f32.mrf.mxu0  ;;  %v3408_v53 = vpop.f32.mrf.mxu1  ;;  %4350 = vmatpush.xpose.msrb.mxu0 %v12993_v32 }
 0x3b7   : > { %v3664_v46 = vpop.f32.mrf.mxu3  ;;  %v3409_v50 = vadd.f32 %v3408_v53, %v3295_v20  ;;  %v3567_v26 = vpop.f32.mrf.mxu2  ;;  %4453 = vmatpush.xpose.msrb.mxu1 %v10321_v22  ;;  %4542 = vmatpush.xpose.msrb.mxu2 %v10582_v58  ;;  %v10592_v20 = vsub.f32 %v484_v27, %v10582_v58  ;;  %v12998_v22 = vand.u32 4294901760, %v10385_v42  ;;  %v12999_v42 = vand.u32 4294901760, %v10405_v25 }
 0x3b8   : > { %4717 = vmatpush.xpose.msrb.mxu3 %v4716_v59 }
 0x3b9   : > { %v3568_v36 = vadd.f32 %v3567_v26, %v3409_v50  ;;  %3772 = vmatmul.f32.gmra.mxu0 %v12994_v12  ;;  %3985 = vmatmul.f32.vlgmr.msra.gmra.mxu1 %v12995_v62  ;;  %v12522_v30 = vand.u32 4294901760, %v10592_v20  ;;  %v3300_v50 = vadd.f32 %v3299_v57, %v10274_v16  ;;  %v13001_v57 = vld [vmem:[#allocation23_spill] sm:$0xff] }
 0x3ba   : > { %4354 = vmatpush.xpose.msrb.mxu0 %v12998_v22 }
 0x3bb   : > { %v3665_v53 = vadd.f32 %v3664_v46, %v3568_v36  ;;  %4455 = vmatpush.xpose.msrb.mxu1 %v10341_v34  ;;  %v4721_v46 = vsub.f32 %v10592_v20, %v12522_v30  ;;  %v480_v36 = vld [vmem:[%s7821_s14 + $0x348] sm:$0xff]  ;;  %v13029_v30 = vld [vmem:[#allocation54_spill] sm:$0xff] }
 0x3bc   : > { %4219 = vmatmul.f32.gmra.mxu3 %v12996_v40  ;;  %4104 = vmatmul.f32.gmra.mxu2 %v12997_v15  ;;  %v10604_v14 = vand.u32 4294901760, %v480_v36  ;;  %v13000_v34 = vld [vmem:[#allocation33_spill] sm:$0xff] }
 0x3bd   : > { %v6951_v40 = vadd.f32 %v3665_v53, %v279_v31  ;;  %v4722_v15 = vand.u32 4294901760, %v4721_v46  ;;  %v281_v31 = vld [vmem:[#allocation2 + $0xd8] sm:$0xff]  ;;  %v13002_v53 = vld [vmem:[#allocation30_spill] sm:$0xff] }
 0x3be   : > { %v3304_v32 = vpop.f32.mrf.mxu0  ;;  %v3414_v12 = vpop.f32.mrf.mxu1  ;;  %4358 = vmatpush.xpose.msrb.mxu0 %v12999_v42  ;;  %4544 = vmatpush.xpose.msrb.mxu2 %v10604_v14  ;;  %v10614_v22 = vsub.f32 %v480_v36, %v10604_v14 }
 0x3bf   : > { %v3668_v26 = vpop.f32.mrf.mxu3  ;;  %6983 = vst [vmem:[#allocation2 + $0xb0] sm:$0xff] %v6951_v40  ;;  %v3415_v27 = vadd.f32 %v3414_v12, %v3300_v50  ;;  %v3571_v59 = vpop.f32.mrf.mxu2  ;;  %4457 = vmatpush.xpose.msrb.mxu1 %v10361_v21  ;;  %v13003_v40 = vld [vmem:[#allocation28_spill] sm:$0xff]  ;;  %4723 = vmatpush.xpose.msrb.mxu3 %v4722_v15  ;;  %v13004_v21 = vand.u32 4294901760, %v10425_v38  ;;  %v3305_v12 = vadd.f32 %v3304_v32, %v10294_v3  ;;  %v13005_v38 = vand.u32 4294901760, %v10445_v7  ;;  %v13007_v32 = vld [vmem:[#allocation27_spill] sm:$0xff] }
 0x3c0   : > { %v12521_v25 = vand.u32 4294901760, %v10614_v22 }
 0x3c1   : > { %v3572_v16 = vadd.f32 %v3571_v59, %v3415_v27  ;;  %3780 = vmatmul.f32.gmra.mxu0 %v13000_v34  ;;  %3989 = vmatmul.f32.gmra.mxu1 %v13001_v57 }
 0x3c2   : > { %4362 = vmatpush.xpose.msrb.mxu0 %v13004_v21 }
 0x3c3   : > { %v3669_v50 = vadd.f32 %v3668_v26, %v3572_v16  ;;  %4459 = vmatpush.xpose.msrb.mxu1 %v10381_v5  ;;  %v4727_v26 = vsub.f32 %v10614_v22, %v12521_v25  ;;  %v476_v16 = vld [vmem:[%s7821_s14 + $0x328] sm:$0xff] }
 0x3c4   : > { %4225 = vmatmul.f32.gmra.mxu3 %v13002_v53  ;;  %4109 = vmatmul.f32.gmra.mxu2 %v13003_v40  ;;  %v10626_v53 = vand.u32 4294901760, %v476_v16  ;;  %v13006_v5 = vld [vmem:[#allocation37_spill] sm:$0xff] }
 0x3c5   : > { %v6953_v46 = vadd.f32 %v3669_v50, %v281_v31  ;;  %v4728_v34 = vand.u32 4294901760, %v4727_v26  ;;  %v283_v31 = vld [vmem:[#allocation2 + $0x50] sm:$0xff] }
 0x3c6   : > { %v3309_v59 = vpop.f32.mrf.mxu0  ;;  %v3420_v42 = vpop.f32.mrf.mxu1  ;;  %4366 = vmatpush.xpose.msrb.mxu0 %v13005_v38  ;;  %v13008_v50 = vld [vmem:[#allocation34_spill] sm:$0xff]  ;;  %4546 = vmatpush.xpose.msrb.mxu2 %v10626_v53  ;;  %v10636_v40 = vsub.f32 %v476_v16, %v10626_v53  ;;  %v472_v38 = vld [vmem:[%s7821_s14 + $0x308] sm:$0xff] }
 0x3c7   : > { %v3672_v27 = vpop.f32.mrf.mxu3  ;;  %6985 = vst [vmem:[#allocation2 + $0xd8] sm:$0xff] %v6953_v46  ;;  %v3421_v36 = vadd.f32 %v3420_v42, %v3305_v12  ;;  %v3575_v15 = vpop.f32.mrf.mxu2  ;;  %4461 = vmatpush.xpose.msrb.mxu1 %v10401_v61  ;;  %v13009_v12 = vld [vmem:[#allocation32_spill] sm:$0xff]  ;;  %4729 = vmatpush.xpose.msrb.mxu3 %v4728_v34  ;;  %v13010_v61 = vand.u32 4294901760, %v10465_v18  ;;  %v3310_v46 = vadd.f32 %v3309_v59, %v10314_v35  ;;  %v13011_v18 = vld [vmem:[#allocation41_spill] sm:$0xff]  ;;  %v13012_v59 = vld [vmem:[#allocation31_spill] sm:$0xff] }
 0x3c8   : > { %v12519_v7 = vand.u32 4294901760, %v10636_v40 }
 0x3c9   : > { %v3576_v3 = vadd.f32 %v3575_v15, %v3421_v36  ;;  %3788 = vmatmul.f32.gmra.mxu0 %v13006_v5  ;;  %3993 = vmatmul.f32.gmra.mxu1 %v13007_v32  ;;  %v285_v5 = vld [vmem:[#allocation2 + $0x30] sm:$0xff] }
 0x3ca   : > { %4370 = vmatpush.xpose.msrb.mxu0 %v13010_v61 }
 0x3cb   : > { %v3673_v21 = vadd.f32 %v3672_v27, %v3576_v3  ;;  %4463 = vmatpush.xpose.msrb.mxu1 %v10421_v44  ;;  %v4733_v27 = vsub.f32 %v10636_v40, %v12519_v7  ;;  %v10649_v3 = vand.u32 4294901760, %v472_v38  ;;  %v13025_v7 = vld [vmem:[#allocation50_spill] sm:$0xff] }
 0x3cc   : > { %4231 = vmatmul.f32.gmra.mxu3 %v13008_v50  ;;  %4114 = vmatmul.f32.gmra.mxu2 %v13009_v12  ;;  %v13014_v12 = vld [vmem:[#allocation36_spill] sm:$0xff] }
 0x3cd   : > { %v6955_v42 = vadd.f32 %v3673_v21, %v283_v31  ;;  %v4734_v44 = vand.u32 4294901760, %v4733_v27  ;;  %v13013_v31 = vld [vmem:[#allocation38_spill] sm:$0xff]  ;;  %4548 = vmatpush.xpose.msrb.mxu2 %v10649_v3  ;;  %v10657_v50 = vsub.f32 %v472_v38, %v10649_v3  ;;  %v468_v38 = vld [vmem:[%s7821_s14 + $0x2e8] sm:$0xff] }
 0x3ce   : > { %4857 = vmatpush.xpose.msra.mxu0 %v10490_v56  ;;  %v3314_v36 = vpop.f32.mrf.mxu0  ;;  %v3426_v15 = vpop.f32.mrf.mxu1 }
 0x3cf   : > { %v3676_v26 = vpop.f32.mrf.mxu3  ;;  %6987 = vst [vmem:[#allocation2 + $0x50] sm:$0xff] %v6955_v42  ;;  %v3427_v16 = vadd.f32 %v3426_v15, %v3310_v46  ;;  %v3579_v34 = vpop.f32.mrf.mxu2  ;;  %4465 = vmatpush.xpose.msrb.mxu1 %v10441_v19  ;;  %4735 = vmatpush.xpose.msrb.mxu3 %v4734_v44  ;;  %v12518_v19 = vand.u32 4294901760, %v10657_v50  ;;  %v3315_v61 = vadd.f32 %v3314_v36, %v10334_v24  ;;  %v13015_v36 = vld [vmem:[#allocation45_spill] sm:$0xff] }
 0x3d1   : > { %v3580_v35 = vadd.f32 %v3579_v34, %v3427_v16  ;;  %3796 = vmatmul.f32.gmra.mxu0 %v13011_v18  ;;  %3997 = vmatmul.f32.gmra.mxu1 %v13012_v59  ;;  %v287_v18 = vld [vmem:[#allocation2 + $0x80] sm:$0xff] }
 0x3d2   : > { %4860 = vmatpush.xpose.msra.mxu0 %v10520_v52 }
 0x3d3   : > { %v3677_v21 = vadd.f32 %v3676_v26, %v3580_v35  ;;  %4467 = vmatpush.xpose.msrb.mxu1 %v10461_v43  ;;  %v4739_v26 = vsub.f32 %v10657_v50, %v12518_v19  ;;  %v10669_v43 = vand.u32 4294901760, %v468_v38  ;;  %v13016_v35 = vld [vmem:[#allocation35_spill] sm:$0xff] }
 0x3d4   : > { %4237 = vmatmul.f32.gmra.mxu3 %v13013_v31  ;;  %4119 = vmatmul.f32.gmra.mxu2 %v13014_v12  ;;  %v13018_v12 = vld [vmem:[#allocation40_spill] sm:$0xff] }
 0x3d5   : > { %v6957_v46 = vadd.f32 %v3677_v21, %v285_v5  ;;  %v4740_v44 = vand.u32 4294901760, %v4739_v26  ;;  %v13017_v5 = vld [vmem:[#allocation42_spill] sm:$0xff]  ;;  %4550 = vmatpush.xpose.msrb.mxu2 %v10669_v43  ;;  %v10677_v31 = vsub.f32 %v468_v38, %v10669_v43 }
 0x3d6   : > { %v3319_v15 = vpop.f32.mrf.mxu0  ;;  %v3432_v27 = vpop.f32.mrf.mxu1  ;;  %4863 = vmatpush.xpose.msra.mxu0 %v10544_v4 }
 0x3d7   : > { %v3680_v42 = vpop.f32.mrf.mxu3  ;;  %4985 = vmatpush.xpose.msra.mxu1 %v10485_v8  ;;  %6989 = vst [vmem:[#allocation2 + $0x30] sm:$0xff] %v6957_v46  ;;  %v3433_v16 = vadd.f32 %v3432_v27, %v3315_v61  ;;  %v3583_v34 = vpop.f32.mrf.mxu2  ;;  %4741 = vmatpush.xpose.msrb.mxu3 %v4740_v44  ;;  %v12517_v61 = vand.u32 4294901760, %v10677_v31  ;;  %v3320_v46 = vadd.f32 %v3319_v15, %v10354_v33  ;;  %v464_v44 = vld [vmem:[%s7821_s14 + $0x2c8] sm:$0xff] }
 0x3d8   : > { %v13019_v15 = vld [vmem:[#allocation49_spill] sm:$0xff] }
 0x3d9   : > { %v3584_v24 = vadd.f32 %v3583_v34, %v3433_v16  ;;  %3804 = vmatmul.f32.gmra.mxu0 %v13015_v36  ;;  %4001 = vmatmul.f32.gmra.mxu1 %v13016_v35  ;;  %v4745_v38 = vsub.f32 %v10677_v31, %v12517_v61 }
 0x3da   : > { %4866 = vmatpush.xpose.msra.mxu0 %v10568_v11 }
 0x3db   : > { %v3681_v21 = vadd.f32 %v3680_v42, %v3584_v24  ;;  %4987 = vmatpush.xpose.msra.mxu1 %v10511_v10  ;;  %v4746_v36 = vand.u32 4294901760, %v4745_v38 }
 0x3dc   : > { %4243 = vmatmul.f32.gmra.mxu3 %v13017_v5  ;;  %4124 = vmatmul.f32.gmra.mxu2 %v13018_v12  ;;  %v10688_v5 = vand.u32 4294901760, %v464_v44  ;;  %v13021_v12 = vld [vmem:[#allocation46_spill] sm:$0xff] }
 0x3dd   : > { %v6959_v27 = vadd.f32 %v3681_v21, %v287_v18  ;;  %v13020_v18 = vld [vmem:[#allocation39_spill] sm:$0xff]  ;;  %v289_v21 = vld [vmem:[#allocation2 + $0xe8] sm:$0xff]  ;;  %4747 = vmatpush.xpose.msrb.mxu3 %v4746_v36 }
 0x3de   : > { %v3324_v16 = vpop.f32.mrf.mxu0  ;;  %v3438_v34 = vpop.f32.mrf.mxu1  ;;  %4869 = vmatpush.xpose.msra.mxu0 %v10592_v20  ;;  %4552 = vmatpush.xpose.msrb.mxu2 %v10688_v5  ;;  %v460_v36 = vld [vmem:[%s7821_s14 + $0x2a8] sm:$0xff] }
 0x3df   : > { %v3684_v26 = vpop.f32.mrf.mxu3  ;;  %6991 = vst [vmem:[#allocation2 + $0x80] sm:$0xff] %v6959_v27  ;;  %v3439_v42 = vadd.f32 %v3438_v34, %v3320_v46  ;;  %v3587_v24 = vpop.f32.mrf.mxu2  ;;  %4989 = vmatpush.xpose.msra.mxu1 %v10535_v13  ;;  %v10697_v46 = vsub.f32 %v464_v44, %v10688_v5  ;;  %v13022_v34 = vld [vmem:[#allocation44_spill] sm:$0xff]  ;;  %v10708_v19 = vand.u32 4294901760, %v460_v36 }
 0x3e1   : > { %v3588_v33 = vadd.f32 %v3587_v24, %v3439_v42  ;;  %3812 = vmatmul.f32.gmra.mxu0 %v13019_v15  ;;  %4005 = vmatmul.f32.gmra.mxu1 %v13020_v18  ;;  %v12520_v38 = vand.u32 4294901760, %v10697_v46  ;;  %v3325_v42 = vadd.f32 %v3324_v16, %v10374_v17  ;;  %v13023_v16 = vld [vmem:[#allocation53_spill] sm:$0xff] }
 0x3e2   : > { %4872 = vmatpush.xpose.msra.mxu0 %v10614_v22  ;;  %4554 = vmatpush.xpose.msrb.mxu2 %v10708_v19 }
 0x3e3   : > { %v3685_v27 = vadd.f32 %v3684_v26, %v3588_v33  ;;  %4991 = vmatpush.xpose.msra.mxu1 %v10558_v47  ;;  %v4751_v44 = vsub.f32 %v10697_v46, %v12520_v38 }
 0x3e4   : > { %4249 = vmatmul.f32.gmra.mxu3 %v13021_v12  ;;  %4129 = vmatmul.f32.gmra.mxu2 %v13022_v34 }
 0x3e5   : > { %v6961_v24 = vadd.f32 %v3685_v27, %v289_v21  ;;  %v4752_v34 = vand.u32 4294901760, %v4751_v44  ;;  %v13024_v21 = vld [vmem:[#allocation43_spill] sm:$0xff]  ;;  %v291_v27 = vld [vmem:[#allocation2 + $0x60] sm:$0xff] }
 0x3e6   : > { %v3329_v12 = vpop.f32.mrf.mxu0  ;;  %v3444_v61 = vpop.f32.mrf.mxu1  ;;  %4875 = vmatpush.xpose.msra.mxu0 %v10636_v40 }
 0x3e7   : > { %v3688_v15 = vpop.f32.mrf.mxu3  ;;  %6993 = vst [vmem:[#allocation2 + $0xe8] sm:$0xff] %v6961_v24  ;;  %v3445_v26 = vadd.f32 %v3444_v61, %v3325_v42  ;;  %v3591_v33 = vpop.f32.mrf.mxu2  ;;  %4993 = vmatpush.xpose.msra.mxu1 %v10582_v58  ;;  %v10717_v61 = vsub.f32 %v460_v36, %v10708_v19  ;;  %v13026_v24 = vld [vmem:[#allocation48_spill] sm:$0xff]  ;;  %4753 = vmatpush.xpose.msrb.mxu3 %v4752_v34  ;;  %v456_v34 = vld [vmem:[%s7821_s14 + $0x288] sm:$0xff] }
 0x3e8   : > { %v10728_v25 = vand.u32 4294901760, %v456_v34 }
 0x3e9   : > { %v3592_v17 = vadd.f32 %v3591_v33, %v3445_v26  ;;  %3820 = vmatmul.f32.gmra.mxu0 %v13023_v16  ;;  %4009 = vmatmul.f32.gmra.mxu1 %v13024_v21  ;;  %v12523_v44 = vand.u32 4294901760, %v10717_v61  ;;  %v3330_v26 = vadd.f32 %v3329_v12, %v10394_v9  ;;  %v13027_v12 = vld [vmem:[#allocation57_spill] sm:$0xff] }
 0x3ea   : > { %4878 = vmatpush.xpose.msra.mxu0 %v10657_v50  ;;  %4556 = vmatpush.xpose.msrb.mxu2 %v10728_v25 }
 0x3eb   : > { %v3689_v42 = vadd.f32 %v3688_v15, %v3592_v17  ;;  %4995 = vmatpush.xpose.msra.mxu1 %v10604_v14  ;;  %v4757_v36 = vsub.f32 %v10717_v61, %v12523_v44 }
 0x3ec   : > { %4255 = vmatmul.f32.gmra.mxu3 %v13025_v7  ;;  %4134 = vmatmul.f32.gmra.mxu2 %v13026_v24 }
 0x3ed   : > { %v6963_v33 = vadd.f32 %v3689_v42, %v291_v27  ;;  %v4758_v24 = vand.u32 4294901760, %v4757_v36  ;;  %v13028_v27 = vld [vmem:[#allocation47_spill] sm:$0xff]  ;;  %v293_v42 = vld [vmem:[#allocation2 + $0x8] sm:$0xff] }
 0x3ee   : > { %v3334_v16 = vpop.f32.mrf.mxu0  ;;  %v3450_v38 = vpop.f32.mrf.mxu1  ;;  %4881 = vmatpush.xpose.msra.mxu0 %v10677_v31 }
 0x3ef   : > { %v3692_v7 = vpop.f32.mrf.mxu3  ;;  %6995 = vst [vmem:[#allocation2 + $0x60] sm:$0xff] %v6963_v33  ;;  %v3451_v15 = vadd.f32 %v3450_v38, %v3330_v26  ;;  %v3595_v17 = vpop.f32.mrf.mxu2  ;;  %4997 = vmatpush.xpose.msra.mxu1 %v10626_v53  ;;  %v10737_v38 = vsub.f32 %v456_v34, %v10728_v25  ;;  %v13030_v33 = vld [vmem:[#allocation52_spill] sm:$0xff]  ;;  %4759 = vmatpush.xpose.msrb.mxu3 %v4758_v24  ;;  %v452_v24 = vld [vmem:[%s7821_s14 + $0x268] sm:$0xff] }
 0x3f0   : > { %v10748_v37 = vand.u32 4294901760, %v452_v24 }
 0x3f1   : > { %v3596_v9 = vadd.f32 %v3595_v17, %v3451_v15  ;;  %3828 = vmatmul.f32.gmra.mxu0 %v13027_v12  ;;  %4013 = vmatmul.f32.gmra.mxu1 %v13028_v27  ;;  %v12525_v36 = vand.u32 4294901760, %v10737_v38  ;;  %v3335_v15 = vadd.f32 %v3334_v16, %v10414_v1  ;;  %v13031_v16 = vld [vmem:[#allocation61_spill] sm:$0xff] }
 0x3f2   : > { %4884 = vmatpush.xpose.msra.mxu0 %v10697_v46  ;;  %4558 = vmatpush.xpose.msrb.mxu2 %v10748_v37 }
 0x3f3   : > { %v3693_v26 = vadd.f32 %v3692_v7, %v3596_v9  ;;  %4999 = vmatpush.xpose.msra.mxu1 %v10649_v3  ;;  %v4763_v34 = vsub.f32 %v10737_v38, %v12525_v36 }
 0x3f4   : > { %4261 = vmatmul.f32.gmra.mxu3 %v13029_v30  ;;  %4139 = vmatmul.f32.gmra.mxu2 %v13030_v33 }
 0x3f5   : > { %v6965_v17 = vadd.f32 %v3693_v26, %v293_v42  ;;  %v4764_v33 = vand.u32 4294901760, %v4763_v34  ;;  %v13032_v42 = vld [vmem:[#allocation51_spill] sm:$0xff] }
 0x3f6   : > { %v3339_v12 = vpop.f32.mrf.mxu0  ;;  %v3456_v44 = vpop.f32.mrf.mxu1  ;;  %4887 = vmatpush.xpose.msra.mxu0 %v10717_v61  ;;  %v295_v26 = vld [vmem:[#allocation2 + $0x38] sm:$0xff] }
 0x3f7   : > { %v3696_v30 = vpop.f32.mrf.mxu3  ;;  %6997 = vst [vmem:[#allocation2 + $0x8] sm:$0xff] %v6965_v17  ;;  %v3457_v7 = vadd.f32 %v3456_v44, %v3335_v15  ;;  %v3599_v9 = vpop.f32.mrf.mxu2  ;;  %5001 = vmatpush.xpose.msra.mxu1 %v10669_v43  ;;  %v10757_v44 = vsub.f32 %v452_v24, %v10748_v37  ;;  %v13034_v17 = vld [vmem:[#allocation56_spill] sm:$0xff]  ;;  %4765 = vmatpush.xpose.msrb.mxu3 %v4764_v33  ;;  %v448_v33 = vld [vmem:[%s7821_s14 + $0x248] sm:$0xff] }
 0x3f8   : > { %v10768_v41 = vand.u32 4294901760, %v448_v33 }
 0x3f9   : > { %v3600_v1 = vadd.f32 %v3599_v9, %v3457_v7  ;;  %3836 = vmatmul.f32.gmra.mxu0 %v13031_v16  ;;  %4017 = vmatmul.f32.gmra.mxu1 %v13032_v42  ;;  %v12527_v34 = vand.u32 4294901760, %v10757_v44  ;;  %v3340_v7 = vadd.f32 %v3339_v12, %v10434_v60  ;;  %v13035_v12 = vld [vmem:[#allocation65_spill] sm:$0xff] }
 0x3fa   : > { %4890 = vmatpush.xpose.msra.mxu0 %v10737_v38  ;;  %4560 = vmatpush.xpose.msrb.mxu2 %v10768_v41 }
 0x3fb   : > { %v3697_v15 = vadd.f32 %v3696_v30, %v3600_v1  ;;  %5003 = vmatpush.xpose.msra.mxu1 %v10688_v5  ;;  %v4769_v24 = vsub.f32 %v10757_v44, %v12527_v34 }
 0x3fc   : > { %4267 = vmatmul.f32.gmra.mxu3 %v13033_v55  ;;  %4144 = vmatmul.f32.gmra.mxu2 %v13034_v17 }
 0x3fd   : > { %v6967_v9 = vadd.f32 %v3697_v15, %v295_v26  ;;  %v4770_v17 = vand.u32 4294901760, %v4769_v24  ;;  %v13036_v26 = vld [vmem:[#allocation55_spill] sm:$0xff]  ;;  %v297_v15 = vld [vmem:[#allocation2 + $0x40] sm:$0xff] }
 0x3fe   : > { %v3344_v16 = vpop.f32.mrf.mxu0  ;;  %v3462_v36 = vpop.f32.mrf.mxu1  ;;  %4893 = vmatpush.xpose.msra.mxu0 %v10757_v44 }
 0x3ff   : > { %v3700_v55 = vpop.f32.mrf.mxu3  ;;  %6999 = vst [vmem:[#allocation2 + $0x38] sm:$0xff] %v6967_v9  ;;  %v3463_v30 = vadd.f32 %v3462_v36, %v3340_v7  ;;  %v3603_v1 = vpop.f32.mrf.mxu2  ;;  %5005 = vmatpush.xpose.msra.mxu1 %v10708_v19  ;;  %v10777_v36 = vsub.f32 %v448_v33, %v10768_v41  ;;  %v13038_v9 = vld [vmem:[#allocation60_spill] sm:$0xff]  ;;  %4771 = vmatpush.xpose.msrb.mxu3 %v4770_v17 }
 0x401   : > { %v3604_v60 = vadd.f32 %v3603_v1, %v3463_v30  ;;  %3844 = vmatmul.f32.gmra.mxu0 %v13035_v12  ;;  %4021 = vmatmul.f32.gmra.mxu1 %v13036_v26  ;;  %v12528_v24 = vand.u32 4294901760, %v10777_v36  ;;  %v3345_v30 = vadd.f32 %v3344_v16, %v10454_v63 }
 0x402   : > { %4896 = vmatpush.xpose.msra.mxu0 %v10777_v36 }
 0x403   : > { %v3701_v7 = vadd.f32 %v3700_v55, %v3604_v60  ;;  %5007 = vmatpush.xpose.msra.mxu1 %v10728_v25  ;;  %v4775_v55 = vsub.f32 %v10777_v36, %v12528_v24  ;;  %v299_v24 = vld [vmem:[#allocation2 + $0xe0] sm:$0xff] }
 0x404   : > { %4273 = vmatmul.f32.gmra.mxu3 %v13037_v6  ;;  %4149 = vmatmul.f32.gmra.mxu2 %v13038_v9  ;;  %v444_v6 = vld [vmem:[%s7821_s14 + $0x228] sm:$0xff] }
 0x405   : > { %v6969_v1 = vadd.f32 %v3701_v7, %v297_v15  ;;  %v10788_v33 = vand.u32 4294901760, %v444_v6  ;;  %v4776_v9 = vand.u32 4294901760, %v4775_v55  ;;  %v13039_v15 = vld [vmem:[#allocation69_spill] sm:$0xff]  ;;  %v13040_v7 = vld [vmem:[#allocation59_spill] sm:$0xff] }
 0x406   : > { %v3349_v34 = vpop.f32.mrf.mxu0  ;;  %v3468_v45 = vpop.f32.mrf.mxu1 }
 0x407   : > { %v3704_v12 = vpop.f32.mrf.mxu3  ;;  %7001 = vst [vmem:[#allocation2 + $0x40] sm:$0xff] %v6969_v1  ;;  %v3469_v17 = vadd.f32 %v3468_v45, %v3345_v30  ;;  %v3607_v60 = vpop.f32.mrf.mxu2  ;;  %4562 = vmatpush.xpose.msrb.mxu2 %v10788_v33  ;;  %v10792_v63 = vsub.f32 %v444_v6, %v10788_v33  ;;  %5009 = vmatpush.xpose.msra.mxu1 %v10748_v37  ;;  %v10800_v30 = vand.u32 4294901760, %v440_v29  ;;  %v13042_v6 = vld [vmem:[#allocation64_spill] sm:$0xff] }
 0x408   : > { %4777 = vmatpush.xpose.msrb.mxu3 %v4776_v9 }
 0x409   : > { %v3608_v16 = vadd.f32 %v3607_v60, %v3469_v17  ;;  %3852 = vmatmul.f32.gmra.mxu0 %v13039_v15  ;;  %4025 = vmatmul.f32.gmra.mxu1 %v13040_v7  ;;  %v12532_v45 = vand.u32 4294901760, %v10792_v63  ;;  %v10809_v17 = vsub.f32 %v440_v29, %v10800_v30 }
 0x40a   : > { %4899 = vmatpush.xpose.msra.mxu0 %v10792_v63 }
 0x40b   : > { %v3705_v1 = vadd.f32 %v3704_v12, %v3608_v16  ;;  %v4781_v55 = vsub.f32 %v10792_v63, %v12532_v45  ;;  %4564 = vmatpush.xpose.msrb.mxu2 %v10800_v30  ;;  %5011 = vmatpush.xpose.msra.mxu1 %v10768_v41  ;;  %v13043_v12 = vand.u32 4294901760, %v10490_v56  ;;  %v12533_v54 = vand.u32 4294901760, %v10809_v17  ;;  %v13044_v56 = vld [vmem:[#allocation73_spill] sm:$0xff] }
 0x40c   : > { %4279 = vmatmul.f32.gmra.mxu3 %v13041_v23  ;;  %4154 = vmatmul.f32.gmra.mxu2 %v13042_v6  ;;  %v3350_v23 = vadd.f32 %v3349_v34, %v10479_v48 }
 0x40d   : > { %v6971_v60 = vadd.f32 %v3705_v1, %v299_v24  ;;  %v4782_v6 = vand.u32 4294901760, %v4781_v55  ;;  %v4787_v48 = vsub.f32 %v10809_v17, %v12533_v54  ;;  %v13045_v24 = vld [vmem:[#allocation63_spill] sm:$0xff]  ;;  %v301_v1 = vld [vmem:[#allocation2 + $0x70] sm:$0xff] }
 0x40e   : > { %v3354_v16 = vpop.f32.mrf.mxu0  ;;  %v3474_v9 = vpop.f32.mrf.mxu1  ;;  %4902 = vmatpush.xpose.msra.mxu0 %v10809_v17  ;;  %v13046_v55 = vld [vmem:[#allocation70_spill] sm:$0xff] }
 0x40f   : > { %v3708_v15 = vpop.f32.mrf.mxu3  ;;  %5116 = vmatpush.xpose.msra.mxu2 %v13043_v12  ;;  %7003 = vst [vmem:[#allocation2 + $0xe0] sm:$0xff] %v6971_v60  ;;  %v3475_v45 = vadd.f32 %v3474_v9, %v3350_v23  ;;  %v3611_v29 = vpop.f32.mrf.mxu2  ;;  %4783 = vmatpush.xpose.msrb.mxu3 %v4782_v6  ;;  %v4788_v12 = vand.u32 4294901760, %v4787_v48  ;;  %v13047_v60 = vand.u32 4294901760, %v10520_v52  ;;  %v13048_v9 = vld [vmem:[#allocation68_spill] sm:$0xff]  ;;  %v3355_v6 = vadd.f32 %v3354_v16, %v10502_v51 }
 0x410   : > { %5013 = vmatpush.xpose.msra.mxu1 %v10788_v33  ;;  %v13053_v51 = vand.u32 4294901760, %v10568_v11  ;;  %v13054_v16 = vld [vmem:[#allocation72_spill] sm:$0xff] }
 0x411   : > { %v3612_v34 = vadd.f32 %v3611_v29, %v3475_v45  ;;  %3860 = vmatmul.f32.gmra.mxu0 %v13044_v56  ;;  %4029 = vmatmul.f32.gmra.mxu1 %v13045_v24 }
 0x413   : > { %5120 = vmatpush.xpose.msra.mxu2 %v13047_v60  ;;  %v3709_v23 = vadd.f32 %v3708_v15, %v3612_v34  ;;  %4789 = vmatpush.xpose.msrb.mxu3 %v4788_v12  ;;  %v13050_v34 = vld [vmem:[#allocation77_spill] sm:$0xff]  ;;  %v13051_v12 = vld [vmem:[#allocation67_spill] sm:$0xff] }
 0x414   : > { %4285 = vmatmul.f32.gmra.mxu3 %v13046_v55  ;;  %4159 = vmatmul.f32.gmra.mxu2 %v13048_v9  ;;  %v13049_v55 = vand.u32 4294901760, %v10544_v4  ;;  %v303_v60 = vld [vmem:[#allocation2 + $0xa8] sm:$0xff]  ;;  %v13052_v9 = vld [vmem:[#allocation74_spill] sm:$0xff] }
 0x415   : > { %5015 = vmatpush.xpose.msra.mxu1 %v10800_v30  ;;  %v6973_v45 = vadd.f32 %v3709_v23, %v301_v1 }
 0x416   : > { %v3359_v56 = vpop.f32.mrf.mxu0  ;;  %v3480_v54 = vpop.f32.mrf.mxu1 }
 0x417   : > { %v3712_v29 = vpop.f32.mrf.mxu3  ;;  %5243 = vmatpush.xpose.msra.mxu3 %v10485_v8  ;;  %5124 = vmatpush.xpose.msra.mxu2 %v13049_v55  ;;  %7005 = vst [vmem:[#allocation2 + $0x70] sm:$0xff] %v6973_v45  ;;  %v3481_v52 = vadd.f32 %v3480_v54, %v3355_v6  ;;  %v3615_v48 = vpop.f32.mrf.mxu2  ;;  %v3360_v4 = vadd.f32 %v3359_v56, %v10522_v2  ;;  %v13055_v45 = vand.u32 4294901760, %v10592_v20  ;;  %v13059_v2 = vand.u32 4294901760, %v10614_v22 }
 0x419   : > { %v3616_v15 = vadd.f32 %v3615_v48, %v3481_v52  ;;  %3868 = vmatmul.f32.gmra.mxu0 %v13050_v34  ;;  %4033 = vmatmul.f32.gmra.mxu1 %v13051_v12  ;;  %v13057_v48 = vld [vmem:[#allocation71_spill] sm:$0xff]  ;;  %v13060_v34 = vld [vmem:[#allocation76_spill] sm:$0xff] }
 0x41b   : > { %5128 = vmatpush.xpose.msra.mxu2 %v13053_v51  ;;  %v3713_v8 = vadd.f32 %v3712_v29, %v3616_v15  ;;  %5245 = vmatpush.xpose.msra.mxu3 %v10511_v10  ;;  %v13056_v29 = vld [vmem:[#allocation81_spill] sm:$0xff]  ;;  %v305_v10 = vld [vmem:[#allocation2 + $0x10] sm:$0xff] }
 0x41c   : > { %4291 = vmatmul.f32.gmra.mxu3 %v13052_v9  ;;  %4164 = vmatmul.f32.gmra.mxu2 %v13054_v16  ;;  %v13058_v15 = vld [vmem:[#allocation78_spill] sm:$0xff] }
 0x41d   : > { %v6975_v54 = vadd.f32 %v3713_v8, %v303_v60  ;;  %v13061_v8 = vand.u32 4294901760, %v10636_v40 }
 0x41e   : > { %v3364_v23 = vpop.f32.mrf.mxu0  ;;  %v3486_v6 = vpop.f32.mrf.mxu1 }
 0x41f   : > { %v3716_v1 = vpop.f32.mrf.mxu3  ;;  %5132 = vmatpush.xpose.msra.mxu2 %v13055_v45  ;;  %7007 = vst [vmem:[#allocation2 + $0xa8] sm:$0xff] %v6975_v54  ;;  %v3487_v55 = vadd.f32 %v3486_v6, %v3360_v4  ;;  %v3619_v52 = vpop.f32.mrf.mxu2  ;;  %5247 = vmatpush.xpose.msra.mxu3 %v10535_v13  ;;  %v3365_v20 = vadd.f32 %v3364_v23, %v10546_v28  ;;  %v13062_v54 = vld [vmem:[#allocation85_spill] sm:$0xff]  ;;  %v13064_v6 = vld [vmem:[#allocation82_spill] sm:$0xff]  ;;  %v13065_v28 = vand.u32 4294901760, %v10657_v50  ;;  %v13066_v45 = vld [vmem:[#allocation80_spill] sm:$0xff] }
 0x421   : > { %v3620_v11 = vadd.f32 %v3619_v52, %v3487_v55  ;;  %3876 = vmatmul.f32.gmra.mxu0 %v13056_v29  ;;  %4037 = vmatmul.f32.gmra.mxu1 %v13057_v48  ;;  %v13067_v29 = vand.u32 4294901760, %v10677_v31 }
 0x423   : > { %5136 = vmatpush.xpose.msra.mxu2 %v13059_v2  ;;  %v3717_v56 = vadd.f32 %v3716_v1, %v3620_v11  ;;  %5249 = vmatpush.xpose.msra.mxu3 %v10558_v47  ;;  %v13063_v1 = vld [vmem:[#allocation75_spill] sm:$0xff]  ;;  %v307_v47 = vld [vmem:[#allocation2 + $0xa0] sm:$0xff] }
 0x424   : > { %4297 = vmatmul.f32.gmra.mxu3 %v13058_v15  ;;  %4169 = vmatmul.f32.gmra.mxu2 %v13060_v34  ;;  %v13068_v2 = vld [vmem:[#allocation79_spill] sm:$0xff] }
 0x425   : > { %v6977_v60 = vadd.f32 %v3717_v56, %v305_v10  ;;  %v13069_v56 = vld [vmem:[#allocation83_spill] sm:$0xff] }
 0x426   : > { %v3369_v9 = vpop.f32.mrf.mxu0  ;;  %v3492_v51 = vpop.f32.mrf.mxu1 }
 0x427   : > { %v3720_v13 = vpop.f32.mrf.mxu3  ;;  %5140 = vmatpush.xpose.msra.mxu2 %v13061_v8  ;;  %7009 = vst [vmem:[#allocation2 + $0x10] sm:$0xff] %v6977_v60  ;;  %v3493_v16 = vadd.f32 %v3492_v51, %v3365_v20  ;;  %v3623_v4 = vpop.f32.mrf.mxu2  ;;  %5251 = vmatpush.xpose.msra.mxu3 %v10582_v58  ;;  %v3370_v40 = vadd.f32 %v3369_v9, %v10570_v49  ;;  %v13070_v49 = vand.u32 4294901760, %v10697_v46  ;;  %v13071_v20 = vld [vmem:[#allocation89_spill] sm:$0xff]  ;;  %v13072_v9 = vand.u32 4294901760, %v10717_v61  ;;  %v13073_v46 = vld [vmem:[#allocation87_spill] sm:$0xff] }
 0x429   : > { %v3624_v22 = vadd.f32 %v3623_v4, %v3493_v16  ;;  %3884 = vmatmul.f32.gmra.mxu0 %v13062_v54  ;;  %4041 = vmatmul.f32.gmra.mxu1 %v13063_v1 }
 0x42b   : > { %5144 = vmatpush.xpose.msra.mxu2 %v13065_v28  ;;  %v3721_v23 = vadd.f32 %v3720_v13, %v3624_v22  ;;  %5253 = vmatpush.xpose.msra.mxu3 %v10604_v14  ;;  %v309_v14 = vld [vmem:[#allocation2 + $0x20] sm:$0xff]  ;;  %v13075_v22 = vld [vmem:[#allocation93_spill] sm:$0xff] }
 0x42c   : > { %4303 = vmatmul.f32.gmra.mxu3 %v13064_v6  ;;  %4174 = vmatmul.f32.gmra.mxu2 %v13066_v45  ;;  %v13079_v45 = vld [vmem:[#allocation97_spill] sm:$0xff] }
 0x42d   : > { %v6979_v55 = vadd.f32 %v3721_v23, %v307_v47  ;;  %v13078_v23 = vand.u32 4294901760, %v10777_v36  ;;  %v13081_v36 = vld [vmem:[#allocation95_spill] sm:$0xff] }
 0x42e   : > { %v3498_v52 = vpop.f32.mrf.mxu1  ;;  %v3765_v11 = vpop.f32.mrf.mxu0 }
 0x42f   : > { %v3724_v58 = vpop.f32.mrf.mxu3  ;;  %5148 = vmatpush.xpose.msra.mxu2 %v13067_v29  ;;  %7011 = vst [vmem:[#allocation2 + $0xa0] sm:$0xff] %v6979_v55  ;;  %v3499_v10 = vadd.f32 %v3498_v52, %v3370_v40  ;;  %v3627_v15 = vpop.f32.mrf.mxu2  ;;  %5255 = vmatpush.xpose.msra.mxu3 %v10626_v53  ;;  %v13083_v29 = vld [vmem:[#allocation101_spill] sm:$0xff] }
 0x431   : > { %v3628_v50 = vadd.f32 %v3627_v15, %v3499_v10  ;;  %4045 = vmatmul.f32.gmra.mxu1 %v13068_v2  ;;  %4372 = vmatmul.f32.vlgmr.msrb.gmra.mxu0 %v12995_v62 }
 0x433   : > { %5152 = vmatpush.xpose.msra.mxu2 %v13070_v49  ;;  %v3725_v34 = vadd.f32 %v3724_v58, %v3628_v50  ;;  %5257 = vmatpush.xpose.msra.mxu3 %v10649_v3  ;;  %v13074_v3 = vand.u32 4294901760, %v10737_v38  ;;  %v13077_v38 = vld [vmem:[#allocation91_spill] sm:$0xff]  ;;  %v13085_v49 = vld [vmem:[#allocation105_spill] sm:$0xff] }
 0x434   : > { %4791 = vmatmul.f32.vlgmr.msrb.gmra.mxu3 %v13069_v56  ;;  %4570 = vmatmul.f32.vlgmr.msrb.gmra.mxu2 %v13071_v20 }
 0x435   : > { %v6981_v31 = vadd.f32 %v3725_v34, %v309_v14 }
 0x436   : > { %v3773_v13 = vpop.f32.mrf.mxu0  ;;  %v3986_v53 = vpop.f32.mrf.mxu1 }
 0x437   : > { %v4214_v60 = vpop.f32.mrf.mxu3  ;;  %5156 = vmatpush.xpose.msra.mxu2 %v13072_v9  ;;  %7013 = vst [vmem:[#allocation2 + $0x20] sm:$0xff] %v6981_v31  ;;  %v3987_v51 = vadd.f32 %v3986_v53, %v3765_v11  ;;  %v4100_v8 = vpop.f32.mrf.mxu2  ;;  %5259 = vmatpush.xpose.msra.mxu3 %v10669_v43  ;;  %v13076_v43 = vand.u32 4294901760, %v10757_v44  ;;  %v13082_v11 = vand.u32 4294901760, %v10809_v17  ;;  %v13087_v53 = vld [vmem:[#allocation109_spill] sm:$0xff] }
 0x439   : > { %v4101_v16 = vadd.f32 %v4100_v8, %v3987_v51  ;;  %4376 = vmatmul.f32.gmra.mxu0 %v13001_v57  ;;  %4469 = vmatmul.f32.vlgmr.msrb.gmra.mxu1 %v12995_v62 }
 0x43b   : > { %5160 = vmatpush.xpose.msra.mxu2 %v13074_v3  ;;  %v10880_v4 = vadd.f32 %v4214_v60, %v4101_v16  ;;  %5261 = vmatpush.xpose.msra.mxu3 %v10688_v5 }
 0x43c   : > { %4795 = vmatmul.f32.gmra.mxu3 %v13073_v46  ;;  %4578 = vmatmul.f32.gmra.mxu2 %v13075_v22  ;;  %v13088_v22 = vld [vmem:[#allocation107_spill] sm:$0xff] }
 0x43e   : > { %v3781_v54 = vpop.f32.mrf.mxu0  ;;  %v3990_v47 = vpop.f32.mrf.mxu1 }
 0x43f   : > { %v4220_v61 = vpop.f32.mrf.mxu3  ;;  %5164 = vmatpush.xpose.msra.mxu2 %v13076_v43  ;;  %v3991_v6 = vadd.f32 %v3990_v47, %v3773_v13  ;;  %v4105_v28 = vpop.f32.mrf.mxu2  ;;  %5263 = vmatpush.xpose.msra.mxu3 %v10708_v19  ;;  %v13080_v19 = vand.u32 4294901760, %v10792_v63 }
 0x441   : > { %v4106_v62 = vadd.f32 %v4105_v28, %v3991_v6  ;;  %4380 = vmatmul.f32.gmra.mxu0 %v13007_v32  ;;  %4473 = vmatmul.f32.gmra.mxu1 %v13001_v57 }
 0x443   : > { %5168 = vmatpush.xpose.msra.mxu2 %v13078_v23  ;;  %v10892_v5 = vadd.f32 %v4220_v61, %v4106_v62  ;;  %5265 = vmatpush.xpose.msra.mxu3 %v10728_v25  ;;  %v13090_v23 = vld [vmem:[#allocation111_spill] sm:$0xff] }
 0x444   : > { %4799 = vmatmul.f32.gmra.mxu3 %v13077_v38  ;;  %4586 = vmatmul.f32.gmra.mxu2 %v13079_v45 }
 0x446   : > { %v3789_v40 = vpop.f32.mrf.mxu0  ;;  %v3994_v55 = vpop.f32.mrf.mxu1 }
 0x447   : > { %v4226_v44 = vpop.f32.mrf.mxu3  ;;  %5172 = vmatpush.xpose.msra.mxu2 %v13080_v19  ;;  %v3995_v58 = vadd.f32 %v3994_v55, %v3781_v54  ;;  %v4110_v52 = vpop.f32.mrf.mxu2  ;;  %5267 = vmatpush.xpose.msra.mxu3 %v10748_v37 }
 0x449   : > { %v4111_v57 = vadd.f32 %v4110_v52, %v3995_v58  ;;  %4384 = vmatmul.f32.gmra.mxu0 %v13012_v59  ;;  %4477 = vmatmul.f32.gmra.mxu1 %v13007_v32  ;;  %v13084_v32 = vld [vmem:[#allocation99_spill] sm:$0xff] }
 0x44b   : > { %5176 = vmatpush.xpose.msra.mxu2 %v13082_v11  ;;  %v10904_v25 = vadd.f32 %v4226_v44, %v4111_v57  ;;  %5269 = vmatpush.xpose.msra.mxu3 %v10768_v41  ;;  %v13092_v57 = vld [vmem:[#allocation115_spill] sm:$0xff] }
 0x44c   : > { %4803 = vmatmul.f32.gmra.mxu3 %v13081_v36  ;;  %4594 = vmatmul.f32.gmra.mxu2 %v13083_v29 }
 0x44e   : > { %v3797_v10 = vpop.f32.mrf.mxu0  ;;  %v3998_v15 = vpop.f32.mrf.mxu1 }
 0x44f   : > { %v4232_v63 = vpop.f32.mrf.mxu3  ;;  %v3999_v37 = vadd.f32 %v3998_v15, %v3789_v40  ;;  %v4115_v50 = vpop.f32.mrf.mxu2  ;;  %5271 = vmatpush.xpose.msra.mxu3 %v10788_v33  ;;  %v13086_v33 = vld [vmem:[#allocation103_spill] sm:$0xff] }
 0x451   : > { %v4116_v14 = vadd.f32 %v4115_v50, %v3999_v37  ;;  %4388 = vmatmul.f32.gmra.mxu0 %v13016_v35  ;;  %4481 = vmatmul.f32.gmra.mxu1 %v13012_v59 }
 0x453   : > { %v10912_v17 = vadd.f32 %v4232_v63, %v4116_v14  ;;  %5273 = vmatpush.xpose.msra.mxu3 %v10800_v30  ;;  %v13094_v14 = vld [vmem:[#allocation119_spill] sm:$0xff] }
 0x454   : > { %4807 = vmatmul.f32.gmra.mxu3 %v13084_v32  ;;  %4602 = vmatmul.f32.gmra.mxu2 %v13085_v49 }
 0x456   : > { %v3805_v34 = vpop.f32.mrf.mxu0  ;;  %v4002_v20 = vpop.f32.mrf.mxu1 }
 0x457   : > { %v4238_v41 = vpop.f32.mrf.mxu3  ;;  %v4003_v31 = vadd.f32 %v4002_v20, %v3797_v10  ;;  %v4120_v60 = vpop.f32.mrf.mxu2 }
 0x459   : > { %v4121_v13 = vadd.f32 %v4120_v60, %v4003_v31  ;;  %4392 = vmatmul.f32.gmra.mxu0 %v13020_v18  ;;  %4485 = vmatmul.f32.gmra.mxu1 %v13016_v35  ;;  %v13089_v35 = vld [vmem:[#allocation113_spill] sm:$0xff] }
 0x45b   : > { %v10919_v59 = vadd.f32 %v4238_v41, %v4121_v13 }
 0x45c   : > { %4811 = vmatmul.f32.gmra.mxu3 %v13086_v33  ;;  %4610 = vmatmul.f32.gmra.mxu2 %v13087_v53  ;;  %v13096_v53 = vld [vmem:[#allocation123_spill] sm:$0xff] }
 0x45e   : > { %v3813_v51 = vpop.f32.mrf.mxu0  ;;  %v4006_v8 = vpop.f32.mrf.mxu1 }
 0x45f   : > { %v4244_v9 = vpop.f32.mrf.mxu3  ;;  %v4007_v30 = vadd.f32 %v4006_v8, %v3805_v34  ;;  %v4125_v16 = vpop.f32.mrf.mxu2 }
 0x461   : > { %v4126_v3 = vadd.f32 %v4125_v16, %v4007_v30  ;;  %4396 = vmatmul.f32.gmra.mxu0 %v13024_v21  ;;  %4489 = vmatmul.f32.gmra.mxu1 %v13020_v18  ;;  %v13091_v18 = vld [vmem:[#allocation117_spill] sm:$0xff] }
 0x463   : > { %v10925_v61 = vadd.f32 %v4244_v9, %v4126_v3 }
 0x464   : > { %4815 = vmatmul.f32.gmra.mxu3 %v13088_v22  ;;  %4618 = vmatmul.f32.gmra.mxu2 %v13089_v35 }
 0x466   : > { %v3821_v47 = vpop.f32.mrf.mxu0  ;;  %v4010_v43 = vpop.f32.mrf.mxu1 }
 0x467   : > { %v4250_v54 = vpop.f32.mrf.mxu3  ;;  %v4011_v6 = vadd.f32 %v4010_v43, %v3813_v51  ;;  %v4130_v28 = vpop.f32.mrf.mxu2 }
 0x469   : > { %v4131_v62 = vadd.f32 %v4130_v28, %v4011_v6  ;;  %4400 = vmatmul.f32.gmra.mxu0 %v13028_v27  ;;  %4493 = vmatmul.f32.gmra.mxu1 %v13024_v21  ;;  %v13093_v21 = vld [vmem:[#allocation121_spill] sm:$0xff] }
 0x46b   : > { %v10931_v45 = vadd.f32 %v4250_v54, %v4131_v62  ;;  %v13098_v54 = vld [vmem:[#allocation127_spill] sm:$0xff] }
 0x46c   : > { %4819 = vmatmul.f32.gmra.mxu3 %v13090_v23  ;;  %4626 = vmatmul.f32.gmra.mxu2 %v13091_v18 }
 0x46e   : > { %v3829_v40 = vpop.f32.mrf.mxu0  ;;  %v4014_v55 = vpop.f32.mrf.mxu1 }
 0x46f   : > { %v4256_v44 = vpop.f32.mrf.mxu3  ;;  %v4015_v19 = vadd.f32 %v4014_v55, %v3821_v47  ;;  %v4135_v58 = vpop.f32.mrf.mxu2  ;;  %v13099_v47 = vld [vmem:[#allocation133_spill] sm:$0xff] }
 0x471   : > { %v4136_v52 = vadd.f32 %v4135_v58, %v4015_v19  ;;  %4404 = vmatmul.f32.gmra.mxu0 %v13032_v42  ;;  %4497 = vmatmul.f32.gmra.mxu1 %v13028_v27  ;;  %v13095_v27 = vld [vmem:[#allocation125_spill] sm:$0xff]  ;;  %v501_v19 = vld [vmem:[%s7821_s14 + $0x3f0] sm:$0xff] }
 0x472   : > { %v10965_v58 = vand.u32 4294901760, %v501_v19 }
 0x473   : > { %v10937_v11 = vadd.f32 %v4256_v44, %v4136_v52 }
 0x474   : > { %4823 = vmatmul.f32.gmra.mxu3 %v13092_v57  ;;  %4634 = vmatmul.f32.gmra.mxu2 %v13093_v21 }
 0x475   : > { %5340 = vmatpush.xpose.msrb.mxu0 %v10965_v58  ;;  %5791 = vmatpush.xpose.msrb.mxu3 %v10965_v58 }
 0x476   : > { %v3837_v63 = vpop.f32.mrf.mxu0  ;;  %v4018_v10 = vpop.f32.mrf.mxu1 }
 0x477   : > { %v4262_v29 = vpop.f32.mrf.mxu3  ;;  %v4019_v15 = vadd.f32 %v4018_v10, %v3829_v40  ;;  %v4140_v37 = vpop.f32.mrf.mxu2  ;;  %v13100_v40 = vld [vmem:[#allocation131_spill] sm:$0xff] }
 0x479   : > { %v4141_v50 = vadd.f32 %v4140_v37, %v4019_v15  ;;  %4408 = vmatmul.f32.gmra.mxu0 %v13036_v26  ;;  %4501 = vmatmul.f32.gmra.mxu1 %v13032_v42  ;;  %v13097_v42 = vld [vmem:[#allocation129_spill] sm:$0xff] }
 0x47b   : > { %v10943_v49 = vadd.f32 %v4262_v29, %v4141_v50  ;;  %v13102_v50 = vld [vmem:[#allocation135_spill] sm:$0xff] }
 0x47c   : > { %4827 = vmatmul.f32.gmra.mxu3 %v13094_v14  ;;  %4642 = vmatmul.f32.gmra.mxu2 %v13095_v27 }
 0x47e   : > { %v3845_v34 = vpop.f32.mrf.mxu0  ;;  %v4022_v20 = vpop.f32.mrf.mxu1 }
 0x47f   : > { %v4268_v41 = vpop.f32.mrf.mxu3  ;;  %v4023_v31 = vadd.f32 %v4022_v20, %v3837_v63  ;;  %v4145_v60 = vpop.f32.mrf.mxu2  ;;  %v10968_v63 = vsub.f32 %v501_v19, %v10965_v58  ;;  %v497_v20 = vld [vmem:[%s7821_s14 + $0x3d0] sm:$0xff] }
 0x481   : > { %v4146_v13 = vadd.f32 %v4145_v60, %v4023_v31  ;;  %4412 = vmatmul.f32.gmra.mxu0 %v13040_v7  ;;  %4505 = vmatmul.f32.gmra.mxu1 %v13036_v26  ;;  %v12545_v37 = vand.u32 4294901760, %v10968_v63  ;;  %v10984_v31 = vand.u32 4294901760, %v497_v20 }
 0x482   : > { %5663 = vmatpush.xpose.msrb.mxu2 %v10968_v63 }
 0x483   : > { %v10949_v9 = vadd.f32 %v4268_v41, %v4146_v13  ;;  %v13103_v41 = vld [vmem:[#allocation142_spill] sm:$0xff]  ;;  %5342 = vmatpush.xpose.msrb.mxu0 %v10984_v31  ;;  %5793 = vmatpush.xpose.msrb.mxu3 %v10984_v31 }
 0x484   : > { %4831 = vmatmul.f32.gmra.mxu3 %v13096_v53  ;;  %4650 = vmatmul.f32.gmra.mxu2 %v13097_v42 }
 0x486   : > { %v3853_v8 = vpop.f32.mrf.mxu0  ;;  %v4026_v30 = vpop.f32.mrf.mxu1 }
 0x487   : > { %v4274_v51 = vpop.f32.mrf.mxu3  ;;  %v4027_v16 = vadd.f32 %v4026_v30, %v3845_v34  ;;  %v4150_v3 = vpop.f32.mrf.mxu2  ;;  %v5503_v34 = vsub.f32 %v10968_v63, %v12545_v37 }
 0x489   : > { %v4151_v35 = vadd.f32 %v4150_v3, %v4027_v16  ;;  %4416 = vmatmul.f32.gmra.mxu0 %v13045_v24  ;;  %4509 = vmatmul.f32.gmra.mxu1 %v13040_v7  ;;  %v13101_v7 = vld [vmem:[#allocation137_spill] sm:$0xff]  ;;  %v5504_v13 = vand.u32 4294901760, %v5503_v34 }
 0x48b   : > { %v10955_v26 = vadd.f32 %v4274_v51, %v4151_v35  ;;  %5505 = vmatpush.xpose.msrb.mxu1 %v5504_v13  ;;  %v13104_v35 = vld [vmem:[#allocation139_spill] sm:$0xff] }
 0x48c   : > { %4835 = vmatmul.f32.gmra.mxu3 %v13098_v54  ;;  %4658 = vmatmul.f32.gmra.mxu2 %v13099_v47 }
 0x48e   : > { %v3861_v6 = vpop.f32.mrf.mxu0  ;;  %v4030_v28 = vpop.f32.mrf.mxu1 }
 0x48f   : > { %v4280_v43 = vpop.f32.mrf.mxu3  ;;  %v4031_v62 = vadd.f32 %v4030_v28, %v3853_v8  ;;  %v4155_v18 = vpop.f32.mrf.mxu2  ;;  %v493_v28 = vld [vmem:[%s7821_s14 + $0x3b0] sm:$0xff] }
 0x491   : > { %v4156_v44 = vadd.f32 %v4155_v18, %v4031_v62  ;;  %4420 = vmatmul.f32.gmra.mxu0 %v13051_v12  ;;  %4513 = vmatmul.f32.gmra.mxu1 %v13045_v24  ;;  %v11003_v62 = vand.u32 4294901760, %v493_v28 }
 0x493   : > { %v10961_v55 = vadd.f32 %v4280_v43, %v4156_v44  ;;  %v13105_v43 = vld [vmem:[#allocation147_spill] sm:$0xff]  ;;  %5344 = vmatpush.xpose.msrb.mxu0 %v11003_v62  ;;  %5795 = vmatpush.xpose.msrb.mxu3 %v11003_v62 }
 0x494   : > { %4839 = vmatmul.f32.gmra.mxu3 %v13100_v40  ;;  %4666 = vmatmul.f32.gmra.mxu2 %v13101_v7 }
 0x496   : > { %v3869_v21 = vpop.f32.mrf.mxu0  ;;  %v4034_v29 = vpop.f32.mrf.mxu1 }
 0x497   : > { %v4286_v52 = vpop.f32.mrf.mxu3  ;;  %v4035_v24 = vadd.f32 %v4034_v29, %v3861_v6  ;;  %v4160_v10 = vpop.f32.mrf.mxu2 }
 0x499   : > { %v4161_v15 = vadd.f32 %v4160_v10, %v4035_v24  ;;  %4424 = vmatmul.f32.gmra.mxu0 %v13057_v48  ;;  %4517 = vmatmul.f32.gmra.mxu1 %v13051_v12  ;;  %v10987_v12 = vsub.f32 %v497_v20, %v10984_v31  ;;  %v13106_v10 = vld [vmem:[#allocation144_spill] sm:$0xff]  ;;  %v489_v20 = vld [vmem:[%s7821_s14 + $0x390] sm:$0xff] }
 0x49b   : > { %v10977_v27 = vadd.f32 %v4286_v52, %v4161_v15  ;;  %5666 = vmatpush.xpose.msrb.mxu2 %v10987_v12  ;;  %v12543_v3 = vand.u32 4294901760, %v10987_v12 }
 0x49c   : > { %4843 = vmatmul.f32.gmra.mxu3 %v13102_v50  ;;  %4674 = vmatmul.f32.gmra.mxu2 %v13103_v41  ;;  %v13107_v41 = vld [vmem:[#allocation149_spill] sm:$0xff] }
 0x49d   : > { %v5509_v6 = vsub.f32 %v10987_v12, %v12543_v3 }
 0x49e   : > { %v3877_v42 = vpop.f32.mrf.mxu0  ;;  %v4038_v51 = vpop.f32.mrf.mxu1 }
 0x49f   : > { %v4292_v60 = vpop.f32.mrf.mxu3  ;;  %v4039_v8 = vadd.f32 %v4038_v51, %v3869_v21  ;;  %v4165_v30 = vpop.f32.mrf.mxu2  ;;  %v5510_v44 = vand.u32 4294901760, %v5509_v6  ;;  %v13108_v6 = vld [vmem:[#allocation84_spill] sm:$0xff] }
 0x4a1   : > { %v4166_v16 = vadd.f32 %v4165_v30, %v4039_v8  ;;  %4428 = vmatmul.f32.gmra.mxu0 %v13063_v1  ;;  %4521 = vmatmul.f32.gmra.mxu1 %v13057_v48  ;;  %v11006_v48 = vsub.f32 %v493_v28, %v11003_v62 }
 0x4a2   : > { %5511 = vmatpush.xpose.msrb.mxu1 %v5510_v44 }
 0x4a3   : > { %v10996_v47 = vadd.f32 %v4292_v60, %v4166_v16  ;;  %5669 = vmatpush.xpose.msrb.mxu2 %v11006_v48  ;;  %v12541_v24 = vand.u32 4294901760, %v11006_v48  ;;  %v11022_v60 = vand.u32 4294901760, %v489_v20 }
 0x4a4   : > { %4847 = vmatmul.f32.gmra.mxu3 %v13104_v35  ;;  %4682 = vmatmul.f32.gmra.mxu2 %v13105_v43 }
 0x4a5   : > { %v5515_v34 = vsub.f32 %v11006_v48, %v12541_v24  ;;  %5346 = vmatpush.xpose.msrb.mxu0 %v11022_v60  ;;  %5797 = vmatpush.xpose.msrb.mxu3 %v11022_v60 }
 0x4a6   : > { %v3885_v7 = vpop.f32.mrf.mxu0  ;;  %v4042_v19 = vpop.f32.mrf.mxu1 }
 0x4a7   : > { %v4298_v18 = vpop.f32.mrf.mxu3  ;;  %v4043_v52 = vadd.f32 %v4042_v19, %v3877_v42  ;;  %v4170_v21 = vpop.f32.mrf.mxu2  ;;  %v5516_v42 = vand.u32 4294901760, %v5515_v34 }
 0x4a9   : > { %v4171_v29 = vadd.f32 %v4170_v21, %v4043_v52  ;;  %4432 = vmatmul.f32.gmra.mxu0 %v13068_v2  ;;  %4525 = vmatmul.f32.gmra.mxu1 %v13063_v1  ;;  %v11025_v1 = vsub.f32 %v489_v20, %v11022_v60 }
 0x4aa   : > { %5517 = vmatpush.xpose.msrb.mxu1 %v5516_v42  ;;  %v13109_v42 = vld [vmem:[#allocation88_spill] sm:$0xff] }
 0x4ab   : > { %v11015_v15 = vadd.f32 %v4298_v18, %v4171_v29  ;;  %5672 = vmatpush.xpose.msrb.mxu2 %v11025_v1  ;;  %v12539_v28 = vand.u32 4294901760, %v11025_v1 }
 0x4ac   : > { %4851 = vmatmul.f32.gmra.mxu3 %v13106_v10  ;;  %4690 = vmatmul.f32.gmra.mxu2 %v13107_v41 }
 0x4ad   : > { %v5521_v44 = vsub.f32 %v11025_v1, %v12539_v28 }
 0x4ae   : > { %v4046_v51 = vpop.f32.mrf.mxu1  ;;  %v4373_v8 = vpop.f32.mrf.mxu0 }
 0x4af   : > { %v4304_v13 = vpop.f32.mrf.mxu3  ;;  %v4047_v30 = vadd.f32 %v4046_v51, %v3885_v7  ;;  %v4175_v16 = vpop.f32.mrf.mxu2  ;;  %v485_v7 = vld [vmem:[%s7821_s14 + $0x370] sm:$0xff]  ;;  %v4374_v52 = vadd.f32 %v4373_v8, %v10880_v4  ;;  %v5522_v21 = vand.u32 4294901760, %v5521_v44 }
 0x4b0   : > { %v11041_v19 = vand.u32 4294901760, %v485_v7  ;;  %v13110_v4 = vld [vmem:[#allocation86_spill] sm:$0xff] }
 0x4b1   : > { %v4176_v43 = vadd.f32 %v4175_v16, %v4047_v30  ;;  %4529 = vmatmul.f32.gmra.mxu1 %v13068_v2  ;;  %4905 = vmatmul.f32.vlgmr.msra.gmra.mxu0 %v13108_v6  ;;  %v481_v16 = vld [vmem:[%s7821_s14 + $0x350] sm:$0xff] }
 0x4b2   : > { %v11045_v34 = vsub.f32 %v485_v7, %v11041_v19  ;;  %5348 = vmatpush.xpose.msrb.mxu0 %v11041_v19  ;;  %5799 = vmatpush.xpose.msrb.mxu3 %v11041_v19 }
 0x4b3   : > { %v11034_v18 = vadd.f32 %v4304_v13, %v4176_v43  ;;  %5523 = vmatpush.xpose.msrb.mxu1 %v5522_v21  ;;  %v11061_v43 = vand.u32 4294901760, %v481_v16 }
 0x4b4   : > { %5275 = vmatmul.f32.vlgmr.msra.gmra.mxu3 %v13069_v56  ;;  %5178 = vmatmul.f32.vlgmr.msra.gmra.mxu2 %v13069_v56  ;;  %v12537_v51 = vand.u32 4294901760, %v11045_v34 }
 0x4b5   : > { %5675 = vmatpush.xpose.msrb.mxu2 %v11045_v34 }
 0x4b6   : > { %v4377_v29 = vpop.f32.mrf.mxu0  ;;  %v4470_v41 = vpop.f32.mrf.mxu1  ;;  %v5527_v30 = vsub.f32 %v11045_v34, %v12537_v51  ;;  %5350 = vmatpush.xpose.msrb.mxu0 %v11061_v43  ;;  %5801 = vmatpush.xpose.msrb.mxu3 %v11061_v43 }
 0x4b7   : > { %v4792_v2 = vpop.f32.mrf.mxu3  ;;  %v4471_v56 = vadd.f32 %v4470_v41, %v4374_v52  ;;  %v4571_v20 = vpop.f32.mrf.mxu2  ;;  %v4378_v6 = vadd.f32 %v4377_v29, %v10892_v5  ;;  %v11065_v41 = vsub.f32 %v481_v16, %v11061_v43  ;;  %v13112_v5 = vld [vmem:[#allocation90_spill] sm:$0xff] }
 0x4b8   : > { %v5528_v7 = vand.u32 4294901760, %v5527_v30 }
 0x4b9   : > { %v4572_v13 = vadd.f32 %v4571_v20, %v4471_v56  ;;  %4910 = vmatmul.f32.gmra.mxu0 %v13109_v42  ;;  %5019 = vmatmul.f32.vlgmr.msra.gmra.mxu1 %v13110_v4  ;;  %v13111_v20 = vld [vmem:[#allocation92_spill] sm:$0xff]  ;;  %v12535_v29 = vand.u32 4294901760, %v11065_v41  ;;  %v477_v4 = vld [vmem:[%s7821_s14 + $0x330] sm:$0xff] }
 0x4ba   : > { %5529 = vmatpush.xpose.msrb.mxu1 %v5528_v7  ;;  %5678 = vmatpush.xpose.msrb.mxu2 %v11065_v41  ;;  %v11081_v30 = vand.u32 4294901760, %v477_v4 }
 0x4bb   : > { %v11054_v8 = vadd.f32 %v4792_v2, %v4572_v13  ;;  %v5533_v42 = vsub.f32 %v11065_v41, %v12535_v29 }
 0x4bc   : > { %5279 = vmatmul.f32.gmra.mxu3 %v13073_v46  ;;  %5182 = vmatmul.f32.gmra.mxu2 %v13073_v46 }
 0x4bd   : > { %v5534_v7 = vand.u32 4294901760, %v5533_v42  ;;  %5352 = vmatpush.xpose.msrb.mxu0 %v11081_v30  ;;  %5803 = vmatpush.xpose.msrb.mxu3 %v11081_v30 }
 0x4be   : > { %v4381_v52 = vpop.f32.mrf.mxu0  ;;  %v4474_v21 = vpop.f32.mrf.mxu1 }
 0x4bf   : > { %v4796_v44 = vpop.f32.mrf.mxu3  ;;  %v4475_v46 = vadd.f32 %v4474_v21, %v4378_v6  ;;  %v4579_v2 = vpop.f32.mrf.mxu2  ;;  %v4382_v16 = vadd.f32 %v4381_v52, %v10904_v25  ;;  %5535 = vmatpush.xpose.msrb.mxu1 %v5534_v7  ;;  %v13114_v25 = vld [vmem:[#allocation94_spill] sm:$0xff] }
 0x4c1   : > { %v4580_v56 = vadd.f32 %v4579_v2, %v4475_v46  ;;  %4915 = vmatmul.f32.gmra.mxu0 %v13111_v20  ;;  %5025 = vmatmul.f32.gmra.mxu1 %v13112_v5  ;;  %v11085_v2 = vsub.f32 %v477_v4, %v11081_v30  ;;  %v13113_v20 = vld [vmem:[#allocation96_spill] sm:$0xff]  ;;  %v473_v4 = vld [vmem:[%s7821_s14 + $0x310] sm:$0xff] }
 0x4c3   : > { %v11074_v13 = vadd.f32 %v4796_v44, %v4580_v56  ;;  %5681 = vmatpush.xpose.msrb.mxu2 %v11085_v2  ;;  %v12534_v52 = vand.u32 4294901760, %v11085_v2 }
 0x4c4   : > { %5283 = vmatmul.f32.gmra.mxu3 %v13077_v38  ;;  %5186 = vmatmul.f32.gmra.mxu2 %v13077_v38 }
 0x4c5   : > { %v5539_v42 = vsub.f32 %v11085_v2, %v12534_v52  ;;  %v13115_v52 = vld [vmem:[#allocation100_spill] sm:$0xff] }
 0x4c6   : > { %v4385_v21 = vpop.f32.mrf.mxu0  ;;  %v4478_v46 = vpop.f32.mrf.mxu1 }
 0x4c7   : > { %v4800_v6 = vpop.f32.mrf.mxu3  ;;  %v4479_v38 = vadd.f32 %v4478_v46, %v4382_v16  ;;  %v4587_v44 = vpop.f32.mrf.mxu2  ;;  %v11101_v16 = vand.u32 4294901760, %v473_v4  ;;  %v4386_v7 = vadd.f32 %v4385_v21, %v10912_v17  ;;  %v13116_v17 = vld [vmem:[#allocation98_spill] sm:$0xff] }
 0x4c9   : > { %v4588_v56 = vadd.f32 %v4587_v44, %v4479_v38  ;;  %4920 = vmatmul.f32.gmra.mxu0 %v13113_v20  ;;  %5031 = vmatmul.f32.gmra.mxu1 %v13114_v25  ;;  %v5540_v38 = vand.u32 4294901760, %v5539_v42  ;;  %v11105_v25 = vsub.f32 %v473_v4, %v11101_v16 }
 0x4ca   : > { %5354 = vmatpush.xpose.msrb.mxu0 %v11101_v16  ;;  %5805 = vmatpush.xpose.msrb.mxu3 %v11101_v16 }
 0x4cb   : > { %v11094_v5 = vadd.f32 %v4800_v6, %v4588_v56  ;;  %5541 = vmatpush.xpose.msrb.mxu1 %v5540_v38  ;;  %5684 = vmatpush.xpose.msrb.mxu2 %v11105_v25  ;;  %v12536_v21 = vand.u32 4294901760, %v11105_v25 }
 0x4cc   : > { %5287 = vmatmul.f32.gmra.mxu3 %v13081_v36  ;;  %5190 = vmatmul.f32.gmra.mxu2 %v13081_v36 }
 0x4cd   : > { %v5545_v4 = vsub.f32 %v11105_v25, %v12536_v21  ;;  %v13117_v21 = vld [vmem:[#allocation104_spill] sm:$0xff] }
 0x4ce   : > { %v4389_v44 = vpop.f32.mrf.mxu0  ;;  %v4482_v20 = vpop.f32.mrf.mxu1 }
 0x4cf   : > { %v4804_v46 = vpop.f32.mrf.mxu3  ;;  %v4483_v36 = vadd.f32 %v4482_v20, %v4386_v7  ;;  %v4595_v6 = vpop.f32.mrf.mxu2  ;;  %v469_v7 = vld [vmem:[%s7821_s14 + $0x2f0] sm:$0xff]  ;;  %v4390_v20 = vadd.f32 %v4389_v44, %v10919_v59 }
 0x4d0   : > { %v11121_v38 = vand.u32 4294901760, %v469_v7  ;;  %v13118_v59 = vld [vmem:[#allocation102_spill] sm:$0xff] }
 0x4d1   : > { %v4596_v56 = vadd.f32 %v4595_v6, %v4483_v36  ;;  %4925 = vmatmul.f32.gmra.mxu0 %v13115_v52  ;;  %5037 = vmatmul.f32.gmra.mxu1 %v13116_v17  ;;  %v5546_v36 = vand.u32 4294901760, %v5545_v4 }
 0x4d2   : > { %v11125_v29 = vsub.f32 %v469_v7, %v11121_v38  ;;  %5356 = vmatpush.xpose.msrb.mxu0 %v11121_v38  ;;  %5807 = vmatpush.xpose.msrb.mxu3 %v11121_v38 }
 0x4d3   : > { %v11114_v42 = vadd.f32 %v4804_v46, %v4596_v56  ;;  %5547 = vmatpush.xpose.msrb.mxu1 %v5546_v36 }
 0x4d4   : > { %5291 = vmatmul.f32.gmra.mxu3 %v13084_v32  ;;  %5194 = vmatmul.f32.gmra.mxu2 %v13084_v32  ;;  %v12538_v44 = vand.u32 4294901760, %v11125_v29 }
 0x4d5   : > { %5687 = vmatpush.xpose.msrb.mxu2 %v11125_v29 }
 0x4d6   : > { %v4393_v6 = vpop.f32.mrf.mxu0  ;;  %v4486_v17 = vpop.f32.mrf.mxu1  ;;  %v5551_v7 = vsub.f32 %v11125_v29, %v12538_v44  ;;  %v13119_v44 = vld [vmem:[#allocation108_spill] sm:$0xff] }
 0x4d7   : > { %v4808_v52 = vpop.f32.mrf.mxu3  ;;  %v4487_v32 = vadd.f32 %v4486_v17, %v4390_v20  ;;  %v4603_v46 = vpop.f32.mrf.mxu2  ;;  %v465_v20 = vld [vmem:[%s7821_s14 + $0x2d0] sm:$0xff]  ;;  %v4394_v17 = vadd.f32 %v4393_v6, %v10925_v61 }
 0x4d8   : > { %v11141_v36 = vand.u32 4294901760, %v465_v20  ;;  %v13120_v61 = vld [vmem:[#allocation106_spill] sm:$0xff] }
 0x4d9   : > { %v4604_v56 = vadd.f32 %v4603_v46, %v4487_v32  ;;  %4930 = vmatmul.f32.gmra.mxu0 %v13117_v21  ;;  %5043 = vmatmul.f32.gmra.mxu1 %v13118_v59  ;;  %v5552_v32 = vand.u32 4294901760, %v5551_v7 }
 0x4da   : > { %v11145_v51 = vsub.f32 %v465_v20, %v11141_v36  ;;  %5358 = vmatpush.xpose.msrb.mxu0 %v11141_v36  ;;  %5809 = vmatpush.xpose.msrb.mxu3 %v11141_v36 }
 0x4db   : > { %v11134_v4 = vadd.f32 %v4808_v52, %v4604_v56  ;;  %5553 = vmatpush.xpose.msrb.mxu1 %v5552_v32 }
 0x4dc   : > { %5295 = vmatmul.f32.gmra.mxu3 %v13086_v33  ;;  %5198 = vmatmul.f32.gmra.mxu2 %v13086_v33  ;;  %v12540_v6 = vand.u32 4294901760, %v11145_v51 }
 0x4dd   : > { %5690 = vmatpush.xpose.msrb.mxu2 %v11145_v51 }
 0x4de   : > { %v4397_v46 = vpop.f32.mrf.mxu0  ;;  %v4490_v59 = vpop.f32.mrf.mxu1  ;;  %v5557_v20 = vsub.f32 %v11145_v51, %v12540_v6  ;;  %v13121_v6 = vld [vmem:[#allocation112_spill] sm:$0xff] }
 0x4df   : > { %v4812_v21 = vpop.f32.mrf.mxu3  ;;  %v4491_v33 = vadd.f32 %v4490_v59, %v4394_v17  ;;  %v4611_v52 = vpop.f32.mrf.mxu2  ;;  %v461_v17 = vld [vmem:[%s7821_s14 + $0x2b0] sm:$0xff]  ;;  %v4398_v59 = vadd.f32 %v4397_v46, %v10931_v45 }
 0x4e0   : > { %v11161_v32 = vand.u32 4294901760, %v461_v17  ;;  %v13122_v45 = vld [vmem:[#allocation110_spill] sm:$0xff] }
 0x4e1   : > { %v4612_v56 = vadd.f32 %v4611_v52, %v4491_v33  ;;  %4935 = vmatmul.f32.gmra.mxu0 %v13119_v44  ;;  %5049 = vmatmul.f32.gmra.mxu1 %v13120_v61  ;;  %v5558_v33 = vand.u32 4294901760, %v5557_v20 }
 0x4e2   : > { %v11165_v28 = vsub.f32 %v461_v17, %v11161_v32  ;;  %5360 = vmatpush.xpose.msrb.mxu0 %v11161_v32  ;;  %5811 = vmatpush.xpose.msrb.mxu3 %v11161_v32 }
 0x4e3   : > { %v11154_v7 = vadd.f32 %v4812_v21, %v4612_v56  ;;  %5559 = vmatpush.xpose.msrb.mxu1 %v5558_v33 }
 0x4e4   : > { %5299 = vmatmul.f32.gmra.mxu3 %v13088_v22  ;;  %5202 = vmatmul.f32.gmra.mxu2 %v13088_v22  ;;  %v12542_v46 = vand.u32 4294901760, %v11165_v28 }
 0x4e5   : > { %5693 = vmatpush.xpose.msrb.mxu2 %v11165_v28 }
 0x4e6   : > { %v4401_v52 = vpop.f32.mrf.mxu0  ;;  %v4494_v61 = vpop.f32.mrf.mxu1  ;;  %v5563_v17 = vsub.f32 %v11165_v28, %v12542_v46  ;;  %v13123_v46 = vld [vmem:[#allocation116_spill] sm:$0xff] }
 0x4e7   : > { %v4816_v44 = vpop.f32.mrf.mxu3  ;;  %v4495_v22 = vadd.f32 %v4494_v61, %v4398_v59  ;;  %v4619_v21 = vpop.f32.mrf.mxu2  ;;  %v457_v59 = vld [vmem:[%s7821_s14 + $0x290] sm:$0xff]  ;;  %v4402_v61 = vadd.f32 %v4401_v52, %v10937_v11 }
 0x4e8   : > { %v11181_v33 = vand.u32 4294901760, %v457_v59  ;;  %v13124_v11 = vld [vmem:[#allocation114_spill] sm:$0xff] }
 0x4e9   : > { %v4620_v56 = vadd.f32 %v4619_v21, %v4495_v22  ;;  %4940 = vmatmul.f32.gmra.mxu0 %v13121_v6  ;;  %5055 = vmatmul.f32.gmra.mxu1 %v13122_v45  ;;  %v5564_v22 = vand.u32 4294901760, %v5563_v17 }
 0x4ea   : > { %v11185_v24 = vsub.f32 %v457_v59, %v11181_v33  ;;  %5362 = vmatpush.xpose.msrb.mxu0 %v11181_v33  ;;  %5813 = vmatpush.xpose.msrb.mxu3 %v11181_v33 }
 0x4eb   : > { %v11174_v20 = vadd.f32 %v4816_v44, %v4620_v56  ;;  %5565 = vmatpush.xpose.msrb.mxu1 %v5564_v22 }
 0x4ec   : > { %5303 = vmatmul.f32.gmra.mxu3 %v13090_v23  ;;  %5206 = vmatmul.f32.gmra.mxu2 %v13090_v23  ;;  %v12544_v52 = vand.u32 4294901760, %v11185_v24 }
 0x4ed   : > { %5696 = vmatpush.xpose.msrb.mxu2 %v11185_v24 }
 0x4ee   : > { %v4405_v21 = vpop.f32.mrf.mxu0  ;;  %v4498_v45 = vpop.f32.mrf.mxu1  ;;  %v5569_v59 = vsub.f32 %v11185_v24, %v12544_v52  ;;  %v13125_v52 = vld [vmem:[#allocation120_spill] sm:$0xff] }
 0x4ef   : > { %v4820_v6 = vpop.f32.mrf.mxu3  ;;  %v4499_v23 = vadd.f32 %v4498_v45, %v4402_v61  ;;  %v4627_v44 = vpop.f32.mrf.mxu2  ;;  %v453_v61 = vld [vmem:[%s7821_s14 + $0x270] sm:$0xff]  ;;  %v4406_v45 = vadd.f32 %v4405_v21, %v10943_v49 }
 0x4f0   : > { %v11201_v22 = vand.u32 4294901760, %v453_v61  ;;  %v13126_v49 = vld [vmem:[#allocation118_spill] sm:$0xff] }
 0x4f1   : > { %v4628_v56 = vadd.f32 %v4627_v44, %v4499_v23  ;;  %4945 = vmatmul.f32.gmra.mxu0 %v13123_v46  ;;  %5061 = vmatmul.f32.gmra.mxu1 %v13124_v11  ;;  %v5570_v23 = vand.u32 4294901760, %v5569_v59 }
 0x4f2   : > { %v11205_v3 = vsub.f32 %v453_v61, %v11201_v22  ;;  %5364 = vmatpush.xpose.msrb.mxu0 %v11201_v22  ;;  %5815 = vmatpush.xpose.msrb.mxu3 %v11201_v22 }
 0x4f3   : > { %v11194_v17 = vadd.f32 %v4820_v6, %v4628_v56  ;;  %5571 = vmatpush.xpose.msrb.mxu1 %v5570_v23 }
 0x4f4   : > { %5307 = vmatmul.f32.gmra.mxu3 %v13092_v57  ;;  %5210 = vmatmul.f32.gmra.mxu2 %v13092_v57  ;;  %v12546_v21 = vand.u32 4294901760, %v11205_v3 }
 0x4f5   : > { %5699 = vmatpush.xpose.msrb.mxu2 %v11205_v3 }
 0x4f6   : > { %v4409_v44 = vpop.f32.mrf.mxu0  ;;  %v4502_v11 = vpop.f32.mrf.mxu1  ;;  %v5575_v61 = vsub.f32 %v11205_v3, %v12546_v21  ;;  %v13127_v21 = vld [vmem:[#allocation124_spill] sm:$0xff] }
 0x4f7   : > { %v4824_v46 = vpop.f32.mrf.mxu3  ;;  %v4503_v57 = vadd.f32 %v4502_v11, %v4406_v45  ;;  %v4635_v6 = vpop.f32.mrf.mxu2  ;;  %v449_v45 = vld [vmem:[%s7821_s14 + $0x250] sm:$0xff]  ;;  %v4410_v11 = vadd.f32 %v4409_v44, %v10949_v9 }
 0x4f8   : > { %v11221_v23 = vand.u32 4294901760, %v449_v45  ;;  %v13128_v9 = vld [vmem:[#allocation122_spill] sm:$0xff] }
 0x4f9   : > { %v4636_v56 = vadd.f32 %v4635_v6, %v4503_v57  ;;  %4950 = vmatmul.f32.gmra.mxu0 %v13125_v52  ;;  %5067 = vmatmul.f32.gmra.mxu1 %v13126_v49  ;;  %v5576_v57 = vand.u32 4294901760, %v5575_v61 }
 0x4fa   : > { %v11225_v37 = vsub.f32 %v449_v45, %v11221_v23  ;;  %5366 = vmatpush.xpose.msrb.mxu0 %v11221_v23  ;;  %5817 = vmatpush.xpose.msrb.mxu3 %v11221_v23 }
 0x4fb   : > { %v11214_v59 = vadd.f32 %v4824_v46, %v4636_v56  ;;  %5577 = vmatpush.xpose.msrb.mxu1 %v5576_v57 }
 0x4fc   : > { %5311 = vmatmul.f32.gmra.mxu3 %v13094_v14  ;;  %5214 = vmatmul.f32.gmra.mxu2 %v13094_v14  ;;  %v12548_v44 = vand.u32 4294901760, %v11225_v37 }
 0x4fd   : > { %5702 = vmatpush.xpose.msrb.mxu2 %v11225_v37 }
 0x4fe   : > { %v4413_v6 = vpop.f32.mrf.mxu0  ;;  %v4506_v49 = vpop.f32.mrf.mxu1  ;;  %v5581_v45 = vsub.f32 %v11225_v37, %v12548_v44  ;;  %v13129_v44 = vld [vmem:[#allocation128_spill] sm:$0xff] }
 0x4ff   : > { %v4828_v52 = vpop.f32.mrf.mxu3  ;;  %v4507_v14 = vadd.f32 %v4506_v49, %v4410_v11  ;;  %v4643_v46 = vpop.f32.mrf.mxu2  ;;  %v445_v11 = vld [vmem:[%s7821_s14 + $0x230] sm:$0xff]  ;;  %v4414_v49 = vadd.f32 %v4413_v6, %v10955_v26 }
 0x500   : > { %v11241_v57 = vand.u32 4294901760, %v445_v11  ;;  %v13130_v26 = vld [vmem:[#allocation126_spill] sm:$0xff] }
 0x501   : > { %v4644_v56 = vadd.f32 %v4643_v46, %v4507_v14  ;;  %4955 = vmatmul.f32.gmra.mxu0 %v13127_v21  ;;  %5073 = vmatmul.f32.gmra.mxu1 %v13128_v9  ;;  %v5582_v14 = vand.u32 4294901760, %v5581_v45 }
 0x502   : > { %v11245_v0 = vsub.f32 %v445_v11, %v11241_v57  ;;  %5368 = vmatpush.xpose.msrb.mxu0 %v11241_v57  ;;  %5819 = vmatpush.xpose.msrb.mxu3 %v11241_v57 }
 0x503   : > { %v11234_v61 = vadd.f32 %v4828_v52, %v4644_v56  ;;  %5583 = vmatpush.xpose.msrb.mxu1 %v5582_v14 }
 0x504   : > { %5315 = vmatmul.f32.gmra.mxu3 %v13096_v53  ;;  %5218 = vmatmul.f32.gmra.mxu2 %v13096_v53  ;;  %v12551_v6 = vand.u32 4294901760, %v11245_v0 }
 0x505   : > { %5705 = vmatpush.xpose.msrb.mxu2 %v11245_v0 }
 0x506   : > { %v4417_v46 = vpop.f32.mrf.mxu0  ;;  %v4510_v9 = vpop.f32.mrf.mxu1  ;;  %v5587_v11 = vsub.f32 %v11245_v0, %v12551_v6 }
 0x507   : > { %v4832_v21 = vpop.f32.mrf.mxu3  ;;  %v4511_v53 = vadd.f32 %v4510_v9, %v4414_v49  ;;  %v4651_v52 = vpop.f32.mrf.mxu2  ;;  %v441_v49 = vld [vmem:[%s7821_s14 + $0x210] sm:$0xff]  ;;  %v4418_v9 = vadd.f32 %v4417_v46, %v10961_v55 }
 0x508   : > { %v11261_v14 = vand.u32 4294901760, %v441_v49 }
 0x509   : > { %v4652_v56 = vadd.f32 %v4651_v52, %v4511_v53  ;;  %4960 = vmatmul.f32.gmra.mxu0 %v13129_v44  ;;  %5079 = vmatmul.f32.gmra.mxu1 %v13130_v26  ;;  %v5588_v53 = vand.u32 4294901760, %v5587_v11  ;;  %v13132_v11 = vld [vmem:[#allocation132_spill] sm:$0xff] }
 0x50a   : > { %v11265_v39 = vsub.f32 %v441_v49, %v11261_v14  ;;  %5370 = vmatpush.xpose.msrb.mxu0 %v11261_v14  ;;  %5821 = vmatpush.xpose.msrb.mxu3 %v11261_v14  ;;  %v13133_v49 = vld [vmem:[#allocation130_spill] sm:$0xff] }
 0x50b   : > { %v11254_v45 = vadd.f32 %v4832_v21, %v4652_v56  ;;  %5589 = vmatpush.xpose.msrb.mxu1 %v5588_v53  ;;  %v13131_v56 = vand.u32 4294901760, %v10968_v63  ;;  %v502_v63 = vld [vmem:[%s7821_s14 + $0x3f8] sm:$0xff]  ;;  %v13134_v53 = vand.u32 4294901760, %v10987_v12  ;;  %v13135_v12 = vand.u32 4294901760, %v11006_v48 }
 0x50c   : > { %5319 = vmatmul.f32.gmra.mxu3 %v13098_v54  ;;  %5222 = vmatmul.f32.gmra.mxu2 %v13098_v54  ;;  %v5592_v55 = vand.u32 4294901760, %v11265_v39 }
 0x50d   : > { %5708 = vmatpush.xpose.msrb.mxu2 %v11265_v39 }
 0x50e   : > { %v4421_v52 = vpop.f32.mrf.mxu0  ;;  %v4514_v26 = vpop.f32.mrf.mxu1  ;;  %5922 = vmatpush.xpose.msra.mxu0 %v13131_v56 }
 0x50f   : > { %v4836_v44 = vpop.f32.mrf.mxu3  ;;  %v4515_v54 = vadd.f32 %v4514_v26, %v4418_v9  ;;  %v4659_v21 = vpop.f32.mrf.mxu2  ;;  %v5593_v9 = vsub.f32 %v11265_v39, %v5592_v55 }
 0x511   : > { %v4660_v46 = vadd.f32 %v4659_v21, %v4515_v54  ;;  %4965 = vmatmul.f32.gmra.mxu0 %v13132_v11  ;;  %5085 = vmatmul.f32.gmra.mxu1 %v13133_v49  ;;  %v5594_v56 = vand.u32 4294901760, %v5593_v9  ;;  %v11285_v54 = vand.u32 4294901760, %v502_v63  ;;  %v4422_v21 = vadd.f32 %v4421_v52, %v10977_v27  ;;  %v13136_v52 = vld [vmem:[#allocation136_spill] sm:$0xff] }
 0x512   : > { %5926 = vmatpush.xpose.msra.mxu0 %v13134_v53  ;;  %v13137_v53 = vld [vmem:[#allocation134_spill] sm:$0xff] }
 0x513   : > { %v11279_v26 = vadd.f32 %v4836_v44, %v4660_v46  ;;  %5595 = vmatpush.xpose.msrb.mxu1 %v5594_v56  ;;  %6146 = vmatpush.xpose.msra.mxu2 %v11285_v54  ;;  %v11290_v44 = vsub.f32 %v502_v63, %v11285_v54 }
 0x514   : > { %5323 = vmatmul.f32.gmra.mxu3 %v13100_v40  ;;  %5226 = vmatmul.f32.gmra.mxu2 %v13100_v40 }
 0x515   : > { %v12563_v9 = vand.u32 4294901760, %v11290_v44 }
 0x516   : > { %v4425_v49 = vpop.f32.mrf.mxu0  ;;  %v4518_v6 = vpop.f32.mrf.mxu1  ;;  %5930 = vmatpush.xpose.msra.mxu0 %v13135_v12 }
 0x517   : > { %v4840_v11 = vpop.f32.mrf.mxu3  ;;  %v4519_v40 = vadd.f32 %v4518_v6, %v4422_v21  ;;  %v4667_v46 = vpop.f32.mrf.mxu2  ;;  %6049 = vmatpush.xpose.msra.mxu1 %v10965_v58  ;;  %v6309_v63 = vsub.f32 %v11290_v44, %v12563_v9  ;;  %v498_v58 = vld [vmem:[%s7821_s14 + $0x3d8] sm:$0xff]  ;;  %v13138_v21 = vand.u32 4294901760, %v11025_v1 }
 0x518   : > { %v11307_v56 = vand.u32 4294901760, %v498_v58 }
 0x519   : > { %v4668_v27 = vadd.f32 %v4667_v46, %v4519_v40  ;;  %4970 = vmatmul.f32.gmra.mxu0 %v13136_v52  ;;  %5091 = vmatmul.f32.gmra.mxu1 %v13137_v53  ;;  %v6310_v48 = vand.u32 4294901760, %v6309_v63  ;;  %v4426_v40 = vadd.f32 %v4425_v49, %v10996_v47  ;;  %v13140_v53 = vld [vmem:[#allocation140_spill] sm:$0xff]  ;;  %v13141_v47 = vld [vmem:[#allocation138_spill] sm:$0xff] }
 0x51a   : > { %5934 = vmatpush.xpose.msra.mxu0 %v13138_v21  ;;  %6148 = vmatpush.xpose.msra.mxu2 %v11307_v56 }
 0x51b   : > { %v11302_v6 = vadd.f32 %v4840_v11, %v4668_v27  ;;  %6051 = vmatpush.xpose.msra.mxu1 %v10984_v31  ;;  %6311 = vmatpush.xpose.msra.mxu3 %v6310_v48  ;;  %v11314_v27 = vsub.f32 %v498_v58, %v11307_v56  ;;  %v13139_v31 = vand.u32 4294901760, %v11045_v34  ;;  %v494_v58 = vld [vmem:[%s7821_s14 + $0x3b8] sm:$0xff]  ;;  %v13142_v48 = vand.u32 4294901760, %v11065_v41 }
 0x51c   : > { %5327 = vmatmul.f32.gmra.mxu3 %v13102_v50  ;;  %5230 = vmatmul.f32.gmra.mxu2 %v13102_v50  ;;  %v11331_v34 = vand.u32 4294901760, %v494_v58 }
 0x51d   : > { %v12562_v49 = vand.u32 4294901760, %v11314_v27 }
 0x51e   : > { %v4429_v12 = vpop.f32.mrf.mxu0  ;;  %v4522_v52 = vpop.f32.mrf.mxu1  ;;  %5938 = vmatpush.xpose.msra.mxu0 %v13139_v31  ;;  %6150 = vmatpush.xpose.msra.mxu2 %v11331_v34  ;;  %v11338_v31 = vsub.f32 %v494_v58, %v11331_v34 }
 0x51f   : > { %v4844_v46 = vpop.f32.mrf.mxu3  ;;  %v4523_v11 = vadd.f32 %v4522_v52, %v4426_v40  ;;  %v4675_v50 = vpop.f32.mrf.mxu2  ;;  %6053 = vmatpush.xpose.msra.mxu1 %v11003_v62  ;;  %v6315_v62 = vsub.f32 %v11314_v27, %v12562_v49  ;;  %v4430_v21 = vadd.f32 %v4429_v12, %v11015_v15  ;;  %v13144_v15 = vld [vmem:[#allocation145_spill] sm:$0xff]  ;;  %v13145_v12 = vld [vmem:[#allocation143_spill] sm:$0xff] }
 0x521   : > { %v4676_v1 = vadd.f32 %v4675_v50, %v4523_v11  ;;  %4975 = vmatmul.f32.gmra.mxu0 %v13140_v53  ;;  %5097 = vmatmul.f32.gmra.mxu1 %v13141_v47  ;;  %v6316_v52 = vand.u32 4294901760, %v6315_v62  ;;  %v490_v47 = vld [vmem:[%s7821_s14 + $0x398] sm:$0xff]  ;;  %v13146_v62 = vand.u32 4294901760, %v11105_v25 }
 0x522   : > { %5942 = vmatpush.xpose.msra.mxu0 %v13142_v48 }
 0x523   : > { %v11323_v63 = vadd.f32 %v4844_v46, %v4676_v1  ;;  %6055 = vmatpush.xpose.msra.mxu1 %v11022_v60  ;;  %6317 = vmatpush.xpose.msra.mxu3 %v6316_v52  ;;  %v13143_v60 = vand.u32 4294901760, %v11085_v2  ;;  %v12561_v1 = vand.u32 4294901760, %v11338_v31  ;;  %v11355_v2 = vand.u32 4294901760, %v490_v47 }
 0x524   : > { %5331 = vmatmul.f32.gmra.mxu3 %v13104_v35  ;;  %5234 = vmatmul.f32.gmra.mxu2 %v13104_v35 }
 0x525   : > { %6152 = vmatpush.xpose.msra.mxu2 %v11355_v2 }
 0x526   : > { %v4433_v46 = vpop.f32.mrf.mxu0  ;;  %v4526_v11 = vpop.f32.mrf.mxu1  ;;  %5946 = vmatpush.xpose.msra.mxu0 %v13143_v60  ;;  %v13150_v60 = vld [vmem:[#allocation150_spill] sm:$0xff] }
 0x527   : > { %v4848_v40 = vpop.f32.mrf.mxu3  ;;  %v4527_v35 = vadd.f32 %v4526_v11, %v4430_v21  ;;  %v4683_v50 = vpop.f32.mrf.mxu2  ;;  %6057 = vmatpush.xpose.msra.mxu1 %v11041_v19  ;;  %v6321_v19 = vsub.f32 %v11338_v31, %v12561_v1  ;;  %v4434_v58 = vadd.f32 %v4433_v46, %v11034_v18  ;;  %v13148_v18 = vld [vmem:[#allocation148_spill] sm:$0xff]  ;;  %v13149_v46 = vld [vmem:[#allocation153_spill] sm:$0xff]  ;;  %v13191_v1 = vld [vmem:[#allocation194_spill] sm:$0xff] }
 0x529   : > { %v4684_v41 = vadd.f32 %v4683_v50, %v4527_v35  ;;  %4980 = vmatmul.f32.gmra.mxu0 %v13144_v15  ;;  %5103 = vmatmul.f32.gmra.mxu1 %v13145_v12  ;;  %v6322_v21 = vand.u32 4294901760, %v6321_v19  ;;  %v11362_v35 = vsub.f32 %v490_v47, %v11355_v2  ;;  %v13151_v15 = vld [vmem:[#allocation146_spill] sm:$0xff]  ;;  %v486_v12 = vld [vmem:[%s7821_s14 + $0x378] sm:$0xff]  ;;  %v13152_v19 = vand.u32 4294901760, %v11145_v51 }
 0x52a   : > { %5950 = vmatpush.xpose.msra.mxu0 %v13146_v62  ;;  %v13153_v51 = vand.u32 4294901760, %v11165_v28 }
 0x52b   : > { %v11347_v53 = vadd.f32 %v4848_v40, %v4684_v41  ;;  %6059 = vmatpush.xpose.msra.mxu1 %v11061_v43  ;;  %6323 = vmatpush.xpose.msra.mxu3 %v6322_v21  ;;  %v13147_v43 = vand.u32 4294901760, %v11125_v29  ;;  %v12559_v50 = vand.u32 4294901760, %v11362_v35  ;;  %v11379_v29 = vand.u32 4294901760, %v486_v12 }
 0x52c   : > { %5335 = vmatmul.f32.gmra.mxu3 %v13106_v10  ;;  %5238 = vmatmul.f32.gmra.mxu2 %v13106_v10 }
 0x52d   : > { %6154 = vmatpush.xpose.msra.mxu2 %v11379_v29 }
 0x52e   : > { %v4530_v40 = vpop.f32.mrf.mxu1  ;;  %v4906_v52 = vpop.f32.mrf.mxu0  ;;  %5954 = vmatpush.xpose.msra.mxu0 %v13147_v43 }
 0x52f   : > { %v4852_v48 = vpop.f32.mrf.mxu3  ;;  %v4531_v10 = vadd.f32 %v4530_v40, %v4434_v58  ;;  %v4691_v11 = vpop.f32.mrf.mxu2  ;;  %6061 = vmatpush.xpose.msra.mxu1 %v11081_v30  ;;  %v6327_v30 = vsub.f32 %v11362_v35, %v12559_v50  ;;  %v4907_v47 = vadd.f32 %v4906_v52, %v11054_v8  ;;  %v13154_v8 = vld [vmem:[#allocation158_spill] sm:$0xff]  ;;  %v13155_v52 = vld [vmem:[#allocation141_spill] sm:$0xff] }
 0x531   : > { %v4692_v25 = vadd.f32 %v4691_v11, %v4531_v10  ;;  %5109 = vmatmul.f32.gmra.mxu1 %v13148_v18  ;;  %5376 = vmatmul.f32.vlgmr.msrb.gmra.mxu0 %v13149_v46  ;;  %v6328_v58 = vand.u32 4294901760, %v6327_v30  ;;  %v11386_v11 = vsub.f32 %v486_v12, %v11379_v29  ;;  %v13157_v46 = vld [vmem:[#allocation152_spill] sm:$0xff] }
 0x532   : > { %5958 = vmatpush.xpose.msra.mxu0 %v13152_v19 }
 0x533   : > { %v11371_v41 = vadd.f32 %v4852_v48, %v4692_v25  ;;  %6063 = vmatpush.xpose.msra.mxu1 %v11101_v16  ;;  %6329 = vmatpush.xpose.msra.mxu3 %v6328_v58  ;;  %v12558_v43 = vand.u32 4294901760, %v11386_v11  ;;  %v13156_v25 = vld [vmem:[#allocation154_spill] sm:$0xff] }
 0x534   : > { %5825 = vmatmul.f32.vlgmr.msrb.gmra.mxu3 %v13150_v60  ;;  %5711 = vmatmul.f32.vlgmr.msrb.gmra.mxu2 %v13151_v15  ;;  %v482_v60 = vld [vmem:[%s7821_s14 + $0x358] sm:$0xff]  ;;  %v13158_v15 = vand.u32 4294901760, %v11185_v24  ;;  %v13159_v24 = vand.u32 4294901760, %v11205_v3 }
 0x535   : > { %v11403_v28 = vand.u32 4294901760, %v482_v60 }
 0x536   : > { %v4911_v48 = vpop.f32.mrf.mxu0  ;;  %v5020_v21 = vpop.f32.mrf.mxu1  ;;  %5962 = vmatpush.xpose.msra.mxu0 %v13153_v51  ;;  %v13162_v51 = vld [vmem:[#allocation159_spill] sm:$0xff] }
 0x537   : > { %v5276_v62 = vpop.f32.mrf.mxu3  ;;  %v5021_v40 = vadd.f32 %v5020_v21, %v4907_v47  ;;  %v5179_v10 = vpop.f32.mrf.mxu2  ;;  %6065 = vmatpush.xpose.msra.mxu1 %v11121_v38  ;;  %v6333_v38 = vsub.f32 %v11386_v11, %v12558_v43  ;;  %v4912_v30 = vadd.f32 %v4911_v48, %v11074_v13  ;;  %6156 = vmatpush.xpose.msra.mxu2 %v11403_v28  ;;  %v13160_v13 = vld [vmem:[#allocation162_spill] sm:$0xff]  ;;  %v13161_v48 = vld [vmem:[#allocation151_spill] sm:$0xff] }
 0x539   : > { %v5180_v16 = vadd.f32 %v5179_v10, %v5021_v40  ;;  %5384 = vmatmul.f32.gmra.mxu0 %v13154_v8  ;;  %5597 = vmatmul.f32.vlgmr.msrb.gmra.mxu1 %v13155_v52  ;;  %v6334_v19 = vand.u32 4294901760, %v6333_v38  ;;  %v11410_v40 = vsub.f32 %v482_v60, %v11403_v28  ;;  %v13163_v8 = vld [vmem:[#allocation156_spill] sm:$0xff] }
 0x53a   : > { %5966 = vmatpush.xpose.msra.mxu0 %v13158_v15 }
 0x53b   : > { %v11395_v18 = vadd.f32 %v5276_v62, %v5180_v16  ;;  %6067 = vmatpush.xpose.msra.mxu1 %v11141_v36  ;;  %6335 = vmatpush.xpose.msra.mxu3 %v6334_v19  ;;  %v12557_v10 = vand.u32 4294901760, %v11410_v40 }
 0x53c   : > { %5831 = vmatmul.f32.gmra.mxu3 %v13156_v25  ;;  %5716 = vmatmul.f32.gmra.mxu2 %v13157_v46  ;;  %v478_v25 = vld [vmem:[%s7821_s14 + $0x338] sm:$0xff]  ;;  %v13164_v46 = vand.u32 4294901760, %v11225_v37  ;;  %v13165_v37 = vand.u32 4294901760, %v11245_v0 }
 0x53d   : > { %v11427_v3 = vand.u32 4294901760, %v478_v25 }
 0x53e   : > { %v4916_v47 = vpop.f32.mrf.mxu0  ;;  %v5026_v62 = vpop.f32.mrf.mxu1  ;;  %5970 = vmatpush.xpose.msra.mxu0 %v13159_v24  ;;  %v13168_v24 = vld [vmem:[#allocation161_spill] sm:$0xff] }
 0x53f   : > { %v5280_v12 = vpop.f32.mrf.mxu3  ;;  %v5027_v58 = vadd.f32 %v5026_v62, %v4912_v30  ;;  %v5183_v21 = vpop.f32.mrf.mxu2  ;;  %6069 = vmatpush.xpose.msra.mxu1 %v11161_v32  ;;  %v6339_v32 = vsub.f32 %v11410_v40, %v12557_v10  ;;  %v4917_v38 = vadd.f32 %v4916_v47, %v11094_v5  ;;  %6158 = vmatpush.xpose.msra.mxu2 %v11427_v3  ;;  %v13166_v5 = vld [vmem:[#allocation165_spill] sm:$0xff]  ;;  %v13167_v47 = vld [vmem:[#allocation155_spill] sm:$0xff]  ;;  %v13186_v10 = vld [vmem:[#allocation190_spill] sm:$0xff] }
 0x541   : > { %v5184_v36 = vadd.f32 %v5183_v21, %v5027_v58  ;;  %5392 = vmatmul.f32.gmra.mxu0 %v13160_v13  ;;  %5601 = vmatmul.f32.gmra.mxu1 %v13161_v48  ;;  %v6340_v15 = vand.u32 4294901760, %v6339_v32  ;;  %v11434_v58 = vsub.f32 %v478_v25, %v11427_v3  ;;  %v13169_v13 = vld [vmem:[#allocation160_spill] sm:$0xff] }
 0x542   : > { %5974 = vmatpush.xpose.msra.mxu0 %v13164_v46 }
 0x543   : > { %v11419_v16 = vadd.f32 %v5280_v12, %v5184_v36  ;;  %6071 = vmatpush.xpose.msra.mxu1 %v11181_v33  ;;  %6341 = vmatpush.xpose.msra.mxu3 %v6340_v15  ;;  %v12555_v21 = vand.u32 4294901760, %v11434_v58 }
 0x544   : > { %5837 = vmatmul.f32.gmra.mxu3 %v13162_v51  ;;  %5721 = vmatmul.f32.gmra.mxu2 %v13163_v8  ;;  %v474_v51 = vld [vmem:[%s7821_s14 + $0x318] sm:$0xff] }
 0x545   : > { %v11451_v0 = vand.u32 4294901760, %v474_v51 }
 0x546   : > { %v4921_v30 = vpop.f32.mrf.mxu0  ;;  %v5032_v12 = vpop.f32.mrf.mxu1  ;;  %5978 = vmatpush.xpose.msra.mxu0 %v13165_v37 }
 0x547   : > { %v5284_v60 = vpop.f32.mrf.mxu3  ;;  %v5033_v19 = vadd.f32 %v5032_v12, %v4917_v38  ;;  %v5187_v62 = vpop.f32.mrf.mxu2  ;;  %6073 = vmatpush.xpose.msra.mxu1 %v11201_v22  ;;  %v6345_v22 = vsub.f32 %v11434_v58, %v12555_v21  ;;  %v4922_v8 = vadd.f32 %v4921_v30, %v11114_v42  ;;  %6160 = vmatpush.xpose.msra.mxu2 %v11451_v0  ;;  %v13171_v42 = vld [vmem:[#allocation157_spill] sm:$0xff]  ;;  %v13172_v12 = vld [vmem:[#allocation166_spill] sm:$0xff] }
 0x549   : > { %v5188_v33 = vadd.f32 %v5187_v62, %v5033_v19  ;;  %5400 = vmatmul.f32.gmra.mxu0 %v13166_v5  ;;  %5605 = vmatmul.f32.gmra.mxu1 %v13167_v47  ;;  %v6346_v25 = vand.u32 4294901760, %v6345_v22  ;;  %v13173_v62 = vld [vmem:[#allocation164_spill] sm:$0xff] }
 0x54a   : > { %5982 = vmatpush.xpose.msra.mxu0 %v5592_v55  ;;  %v13170_v55 = vld [vmem:[#allocation170_spill] sm:$0xff] }
 0x54b   : > { %v11443_v36 = vadd.f32 %v5284_v60, %v5188_v33  ;;  %6075 = vmatpush.xpose.msra.mxu1 %v11221_v23  ;;  %6347 = vmatpush.xpose.msra.mxu3 %v6346_v25  ;;  %v11459_v23 = vsub.f32 %v474_v51, %v11451_v0 }
 0x54c   : > { %5843 = vmatmul.f32.gmra.mxu3 %v13168_v24  ;;  %5726 = vmatmul.f32.gmra.mxu2 %v13169_v13 }
 0x54d   : > { %v12554_v30 = vand.u32 4294901760, %v11459_v23 }
 0x54e   : > { %6469 = vmatpush.xpose.msrb.mxu0 %v11290_v44  ;;  %v4926_v46 = vpop.f32.mrf.mxu0  ;;  %v5038_v38 = vpop.f32.mrf.mxu1 }
 0x54f   : > { %v5288_v32 = vpop.f32.mrf.mxu3  ;;  %v5039_v60 = vadd.f32 %v5038_v38, %v4922_v8  ;;  %v5191_v15 = vpop.f32.mrf.mxu2  ;;  %6077 = vmatpush.xpose.msra.mxu1 %v11241_v57  ;;  %v6351_v37 = vsub.f32 %v11459_v23, %v12554_v30  ;;  %v470_v57 = vld [vmem:[%s7821_s14 + $0x2f8] sm:$0xff]  ;;  %v4927_v5 = vadd.f32 %v4926_v46, %v11134_v4 }
 0x550   : > { %v11475_v33 = vand.u32 4294901760, %v470_v57  ;;  %v13174_v38 = vld [vmem:[#allocation175_spill] sm:$0xff] }
 0x551   : > { %v5192_v39 = vadd.f32 %v5191_v15, %v5039_v60  ;;  %5408 = vmatmul.f32.gmra.mxu0 %v13170_v55  ;;  %5609 = vmatmul.f32.gmra.mxu1 %v13171_v42  ;;  %v6352_v13 = vand.u32 4294901760, %v6351_v37  ;;  %v13175_v4 = vld [vmem:[#allocation163_spill] sm:$0xff] }
 0x552   : > { %6472 = vmatpush.xpose.msrb.mxu0 %v11314_v27  ;;  %6162 = vmatpush.xpose.msra.mxu2 %v11475_v33  ;;  %v13176_v60 = vld [vmem:[#allocation171_spill] sm:$0xff] }
 0x553   : > { %v11467_v19 = vadd.f32 %v5288_v32, %v5192_v39  ;;  %6079 = vmatpush.xpose.msra.mxu1 %v11261_v14  ;;  %6353 = vmatpush.xpose.msra.mxu3 %v6352_v13  ;;  %v11482_v14 = vsub.f32 %v470_v57, %v11475_v33  ;;  %v13177_v39 = vld [vmem:[#allocation168_spill] sm:$0xff] }
 0x554   : > { %5849 = vmatmul.f32.gmra.mxu3 %v13172_v12  ;;  %5731 = vmatmul.f32.gmra.mxu2 %v13173_v62  ;;  %v466_v12 = vld [vmem:[%s7821_s14 + $0x2d8] sm:$0xff] }
 0x555   : > { %v12553_v46 = vand.u32 4294901760, %v11482_v14  ;;  %v11497_v62 = vand.u32 4294901760, %v466_v12 }
 0x556   : > { %v4931_v22 = vpop.f32.mrf.mxu0  ;;  %v5044_v51 = vpop.f32.mrf.mxu1  ;;  %6475 = vmatpush.xpose.msrb.mxu0 %v11338_v31 }
 0x557   : > { %6597 = vmatpush.xpose.msrb.mxu1 %v11285_v54  ;;  %v5292_v24 = vpop.f32.mrf.mxu3  ;;  %v5045_v8 = vadd.f32 %v5044_v51, %v4927_v5  ;;  %v5195_v32 = vpop.f32.mrf.mxu2  ;;  %v6357_v55 = vsub.f32 %v11482_v14, %v12553_v46  ;;  %v4932_v37 = vadd.f32 %v4931_v22, %v11154_v7  ;;  %6164 = vmatpush.xpose.msra.mxu2 %v11497_v62  ;;  %v13179_v7 = vld [vmem:[#allocation167_spill] sm:$0xff]  ;;  %v13182_v46 = vld [vmem:[#allocation185_spill] sm:$0xff] }
 0x559   : > { %v5196_v25 = vadd.f32 %v5195_v32, %v5045_v8  ;;  %5416 = vmatmul.f32.gmra.mxu0 %v13174_v38  ;;  %5613 = vmatmul.f32.gmra.mxu1 %v13175_v4  ;;  %v6358_v5 = vand.u32 4294901760, %v6357_v55  ;;  %v11504_v32 = vsub.f32 %v466_v12, %v11497_v62  ;;  %v13178_v38 = vld [vmem:[#allocation179_spill] sm:$0xff]  ;;  %v13181_v55 = vld [vmem:[#allocation172_spill] sm:$0xff] }
 0x55a   : > { %6478 = vmatpush.xpose.msrb.mxu0 %v11362_v35 }
 0x55b   : > { %6599 = vmatpush.xpose.msrb.mxu1 %v11307_v56  ;;  %v11490_v15 = vadd.f32 %v5292_v24, %v5196_v25  ;;  %6359 = vmatpush.xpose.msra.mxu3 %v6358_v5  ;;  %v12552_v22 = vand.u32 4294901760, %v11504_v32 }
 0x55c   : > { %5855 = vmatmul.f32.gmra.mxu3 %v13176_v60  ;;  %5736 = vmatmul.f32.gmra.mxu2 %v13177_v39  ;;  %v13180_v60 = vld [vmem:[#allocation174_spill] sm:$0xff] }
 0x55d   : > { %v6363_v12 = vsub.f32 %v11504_v32, %v12552_v22 }
 0x55e   : > { %v4936_v13 = vpop.f32.mrf.mxu0  ;;  %v5050_v51 = vpop.f32.mrf.mxu1  ;;  %6481 = vmatpush.xpose.msrb.mxu0 %v11386_v11 }
 0x55f   : > { %6601 = vmatpush.xpose.msrb.mxu1 %v11331_v34  ;;  %v5296_v57 = vpop.f32.mrf.mxu3  ;;  %v5051_v24 = vadd.f32 %v5050_v51, %v4932_v37  ;;  %v5199_v8 = vpop.f32.mrf.mxu2  ;;  %v462_v37 = vld [vmem:[%s7821_s14 + $0x2b8] sm:$0xff]  ;;  %v4937_v51 = vadd.f32 %v4936_v13, %v11174_v20  ;;  %v13183_v20 = vld [vmem:[#allocation169_spill] sm:$0xff] }
 0x560   : > { %v11519_v5 = vand.u32 4294901760, %v462_v37 }
 0x561   : > { %v5200_v25 = vadd.f32 %v5199_v8, %v5051_v24  ;;  %5424 = vmatmul.f32.gmra.mxu0 %v13178_v38  ;;  %5617 = vmatmul.f32.gmra.mxu1 %v13179_v7  ;;  %v6364_v8 = vand.u32 4294901760, %v6363_v12  ;;  %v13184_v12 = vld [vmem:[#allocation180_spill] sm:$0xff] }
 0x562   : > { %6484 = vmatpush.xpose.msrb.mxu0 %v11410_v40  ;;  %6166 = vmatpush.xpose.msra.mxu2 %v11519_v5 }
 0x563   : > { %6603 = vmatpush.xpose.msrb.mxu1 %v11355_v2  ;;  %v11512_v39 = vadd.f32 %v5296_v57, %v5200_v25  ;;  %6365 = vmatpush.xpose.msra.mxu3 %v6364_v8  ;;  %v458_v8 = vld [vmem:[%s7821_s14 + $0x298] sm:$0xff] }
 0x564   : > { %5861 = vmatmul.f32.gmra.mxu3 %v13180_v60  ;;  %5741 = vmatmul.f32.gmra.mxu2 %v13181_v55  ;;  %v11526_v55 = vsub.f32 %v462_v37, %v11519_v5 }
 0x566   : > { %v4941_v38 = vpop.f32.mrf.mxu0  ;;  %v5056_v60 = vpop.f32.mrf.mxu1  ;;  %6487 = vmatpush.xpose.msrb.mxu0 %v11434_v58  ;;  %v12556_v13 = vand.u32 4294901760, %v11526_v55 }
 0x567   : > { %6605 = vmatpush.xpose.msrb.mxu1 %v11379_v29  ;;  %v5300_v24 = vpop.f32.mrf.mxu3  ;;  %v5057_v57 = vadd.f32 %v5056_v60, %v4937_v51  ;;  %v5203_v25 = vpop.f32.mrf.mxu2  ;;  %v13185_v51 = vld [vmem:[#allocation177_spill] sm:$0xff]  ;;  %v11541_v60 = vand.u32 4294901760, %v458_v8 }
 0x568   : > { %v6369_v37 = vsub.f32 %v11526_v55, %v12556_v13 }
 0x569   : > { %v5204_v22 = vadd.f32 %v5203_v25, %v5057_v57  ;;  %5432 = vmatmul.f32.gmra.mxu0 %v13182_v46  ;;  %5621 = vmatmul.f32.gmra.mxu1 %v13183_v20  ;;  %v4942_v46 = vadd.f32 %v4941_v38, %v11194_v17  ;;  %v13187_v17 = vld [vmem:[#allocation176_spill] sm:$0xff] }
 0x56a   : > { %6490 = vmatpush.xpose.msrb.mxu0 %v11459_v23  ;;  %v6370_v25 = vand.u32 4294901760, %v6369_v37  ;;  %6168 = vmatpush.xpose.msra.mxu2 %v11541_v60  ;;  %v13188_v37 = vld [vmem:[#allocation186_spill] sm:$0xff] }
 0x56b   : > { %6607 = vmatpush.xpose.msrb.mxu1 %v11403_v28  ;;  %v11534_v30 = vadd.f32 %v5300_v24, %v5204_v22 }
 0x56c   : > { %5867 = vmatmul.f32.gmra.mxu3 %v13184_v12  ;;  %5746 = vmatmul.f32.gmra.mxu2 %v13185_v51  ;;  %v11548_v51 = vsub.f32 %v458_v8, %v11541_v60 }
 0x56d   : > { %6371 = vmatpush.xpose.msra.mxu3 %v6370_v25 }
 0x56e   : > { %v4946_v12 = vpop.f32.mrf.mxu0  ;;  %v5062_v21 = vpop.f32.mrf.mxu1  ;;  %6493 = vmatpush.xpose.msrb.mxu0 %v11482_v14  ;;  %v12560_v38 = vand.u32 4294901760, %v11548_v51 }
 0x56f   : > { %6609 = vmatpush.xpose.msrb.mxu1 %v11427_v3  ;;  %v5304_v57 = vpop.f32.mrf.mxu3  ;;  %v5063_v22 = vadd.f32 %v5062_v21, %v4942_v46  ;;  %v5207_v24 = vpop.f32.mrf.mxu2  ;;  %v13190_v21 = vld [vmem:[#allocation182_spill] sm:$0xff]  ;;  %v454_v46 = vld [vmem:[%s7821_s14 + $0x278] sm:$0xff] }
 0x570   : > { %v6375_v8 = vsub.f32 %v11548_v51, %v12560_v38  ;;  %v11563_v25 = vand.u32 4294901760, %v454_v46 }
 0x571   : > { %v5208_v13 = vadd.f32 %v5207_v24, %v5063_v22  ;;  %5440 = vmatmul.f32.gmra.mxu0 %v13186_v10  ;;  %5625 = vmatmul.f32.gmra.mxu1 %v13187_v17  ;;  %v4947_v10 = vadd.f32 %v4946_v12, %v11214_v59  ;;  %v13192_v59 = vld [vmem:[#allocation181_spill] sm:$0xff] }
 0x572   : > { %6496 = vmatpush.xpose.msrb.mxu0 %v11504_v32  ;;  %v6376_v24 = vand.u32 4294901760, %v6375_v8  ;;  %6170 = vmatpush.xpose.msra.mxu2 %v11563_v25  ;;  %v13193_v8 = vld [vmem:[#allocation189_spill] sm:$0xff] }
 0x573   : > { %6611 = vmatpush.xpose.msrb.mxu1 %v11451_v0  ;;  %v11556_v43 = vadd.f32 %v5304_v57, %v5208_v13 }
 0x574   : > { %5873 = vmatmul.f32.gmra.mxu3 %v13188_v37  ;;  %5751 = vmatmul.f32.gmra.mxu2 %v13190_v21  ;;  %v11570_v21 = vsub.f32 %v454_v46, %v11563_v25 }
 0x575   : > { %13189 = vst [vmem:[#allocation258_spill] sm:$0xff] %v11556_v43  ;;  %6377 = vmatpush.xpose.msra.mxu3 %v6376_v24  ;;  %v13202_v43 = vld [vmem:[#allocation191_spill] sm:$0xff] }
 0x576   : > { %v4951_v37 = vpop.f32.mrf.mxu0  ;;  %v5068_v50 = vpop.f32.mrf.mxu1  ;;  %6499 = vmatpush.xpose.msrb.mxu0 %v11526_v55  ;;  %v12564_v12 = vand.u32 4294901760, %v11570_v21 }
 0x577   : > { %6613 = vmatpush.xpose.msrb.mxu1 %v11475_v33  ;;  %v5308_v22 = vpop.f32.mrf.mxu3  ;;  %v5069_v13 = vadd.f32 %v5068_v50, %v4947_v10  ;;  %v5211_v57 = vpop.f32.mrf.mxu2  ;;  %v13195_v50 = vld [vmem:[#allocation187_spill] sm:$0xff] }
 0x578   : > { %v6381_v46 = vsub.f32 %v11570_v21, %v12564_v12  ;;  %v450_v10 = vld [vmem:[%s7821_s14 + $0x258] sm:$0xff] }
 0x579   : > { %v5212_v38 = vadd.f32 %v5211_v57, %v5069_v13  ;;  %5448 = vmatmul.f32.gmra.mxu0 %v13191_v1  ;;  %5629 = vmatmul.f32.gmra.mxu1 %v13192_v59  ;;  %v11585_v24 = vand.u32 4294901760, %v450_v10  ;;  %v4952_v1 = vadd.f32 %v4951_v37, %v11234_v61  ;;  %v13197_v61 = vld [vmem:[#allocation184_spill] sm:$0xff] }
 0x57a   : > { %6502 = vmatpush.xpose.msrb.mxu0 %v11548_v51  ;;  %v6382_v57 = vand.u32 4294901760, %v6381_v46  ;;  %v13198_v46 = vld [vmem:[#allocation195_spill] sm:$0xff] }
 0x57b   : > { %6615 = vmatpush.xpose.msrb.mxu1 %v11497_v62  ;;  %v11578_v49 = vadd.f32 %v5308_v22, %v5212_v38  ;;  %6172 = vmatpush.xpose.msra.mxu2 %v11585_v24 }
 0x57c   : > { %5879 = vmatmul.f32.gmra.mxu3 %v13193_v8  ;;  %5756 = vmatmul.f32.gmra.mxu2 %v13195_v50  ;;  %v11592_v50 = vsub.f32 %v450_v10, %v11585_v24 }
 0x57d   : > { %13194 = vst [vmem:[#allocation270_spill] sm:$0xff] %v11578_v49  ;;  %6383 = vmatpush.xpose.msra.mxu3 %v6382_v57  ;;  %v13196_v49 = vld [vmem:[#allocation200_spill] sm:$0xff] }
 0x57e   : > { %v4956_v8 = vpop.f32.mrf.mxu0  ;;  %v5074_v9 = vpop.f32.mrf.mxu1  ;;  %6505 = vmatpush.xpose.msrb.mxu0 %v11570_v21  ;;  %v12565_v37 = vand.u32 4294901760, %v11592_v50 }
 0x57f   : > { %6617 = vmatpush.xpose.msrb.mxu1 %v11519_v5  ;;  %v5312_v13 = vpop.f32.mrf.mxu3  ;;  %v5075_v38 = vadd.f32 %v5074_v9, %v4952_v1  ;;  %v5215_v22 = vpop.f32.mrf.mxu2  ;;  %v13200_v9 = vld [vmem:[#allocation192_spill] sm:$0xff]  ;;  %v446_v1 = vld [vmem:[%s7821_s14 + $0x238] sm:$0xff] }
 0x580   : > { %v6387_v10 = vsub.f32 %v11592_v50, %v12565_v37  ;;  %v11607_v57 = vand.u32 4294901760, %v446_v1 }
 0x581   : > { %v5216_v12 = vadd.f32 %v5215_v22, %v5075_v38  ;;  %5456 = vmatmul.f32.gmra.mxu0 %v13196_v49  ;;  %5633 = vmatmul.f32.gmra.mxu1 %v13197_v61  ;;  %v4957_v49 = vadd.f32 %v4956_v8, %v11254_v45  ;;  %v442_v8 = vld [vmem:[%s7821_s14 + $0x218] sm:$0xff] }
 0x582   : > { %6508 = vmatpush.xpose.msrb.mxu0 %v11592_v50  ;;  %v6388_v22 = vand.u32 4294901760, %v6387_v10  ;;  %6174 = vmatpush.xpose.msra.mxu2 %v11607_v57  ;;  %v13203_v10 = vld [vmem:[#allocation201_spill] sm:$0xff]  ;;  %v11621_v17 = vand.u32 4294901760, %v442_v8 }
 0x583   : > { %6619 = vmatpush.xpose.msrb.mxu1 %v11541_v60  ;;  %v11600_v59 = vadd.f32 %v5312_v13, %v5216_v12 }
 0x584   : > { %5885 = vmatmul.f32.gmra.mxu3 %v13198_v46  ;;  %5761 = vmatmul.f32.gmra.mxu2 %v13200_v9  ;;  %v11613_v9 = vsub.f32 %v446_v1, %v11607_v57  ;;  %v13205_v1 = vld [vmem:[#allocation197_spill] sm:$0xff] }
 0x585   : > { %13199 = vst [vmem:[#allocation25_spill] sm:$0xff] %v11600_v59  ;;  %6389 = vmatpush.xpose.msra.mxu3 %v6388_v22  ;;  %v13201_v59 = vld [vmem:[#allocation206_spill] sm:$0xff] }
 0x586   : > { %v4961_v46 = vpop.f32.mrf.mxu0  ;;  %v5080_v61 = vpop.f32.mrf.mxu1  ;;  %v12566_v45 = vand.u32 4294901760, %v11613_v9  ;;  %6511 = vmatpush.xpose.msrb.mxu0 %v11613_v9  ;;  %6176 = vmatpush.xpose.msra.mxu2 %v11621_v17 }
 0x587   : > { %6621 = vmatpush.xpose.msrb.mxu1 %v11563_v25  ;;  %v5316_v38 = vpop.f32.mrf.mxu3  ;;  %v5081_v12 = vadd.f32 %v5080_v61, %v4957_v49  ;;  %v5219_v13 = vpop.f32.mrf.mxu2  ;;  %v4962_v22 = vadd.f32 %v4961_v46, %v11279_v26  ;;  %v13207_v46 = vld [vmem:[#allocation210_spill] sm:$0xff] }
 0x588   : > { %v6393_v49 = vsub.f32 %v11613_v9, %v12566_v45 }
 0x589   : > { %v5220_v37 = vadd.f32 %v5219_v13, %v5081_v12  ;;  %5464 = vmatmul.f32.gmra.mxu0 %v13201_v59  ;;  %5637 = vmatmul.f32.gmra.mxu1 %v13202_v43  ;;  %v11632_v59 = vsub.f32 %v442_v8, %v11621_v17  ;;  %v13210_v43 = vand.u32 4294901760, %v11314_v27  ;;  %v13213_v27 = vld [vmem:[#allocation214_spill] sm:$0xff] }
 0x58a   : > { %v6394_v13 = vand.u32 4294901760, %v6393_v49  ;;  %v13209_v49 = vld [vmem:[#allocation204_spill] sm:$0xff] }
 0x58b   : > { %6623 = vmatpush.xpose.msrb.mxu1 %v11585_v24  ;;  %v11624_v61 = vadd.f32 %v5316_v38, %v5220_v37  ;;  %v13206_v37 = vand.u32 4294901760, %v11290_v44  ;;  %6514 = vmatpush.xpose.msrb.mxu0 %v11632_v59  ;;  %v13208_v44 = vld [vmem:[#allocation196_spill] sm:$0xff] }
 0x58c   : > { %5891 = vmatmul.f32.gmra.mxu3 %v13203_v10  ;;  %5766 = vmatmul.f32.gmra.mxu2 %v13205_v1  ;;  %v12567_v1 = vand.u32 4294901760, %v11632_v59 }
 0x58d   : > { %13204 = vst [vmem:[#allocation22_spill] sm:$0xff] %v11624_v61  ;;  %6728 = vmatpush.xpose.msrb.mxu2 %v13206_v37  ;;  %6395 = vmatpush.xpose.msra.mxu3 %v6394_v13  ;;  %v13211_v13 = vld [vmem:[#allocation202_spill] sm:$0xff] }
 0x58e   : > { %v4966_v38 = vpop.f32.mrf.mxu0  ;;  %v5086_v10 = vpop.f32.mrf.mxu1  ;;  %v6399_v8 = vsub.f32 %v11632_v59, %v12567_v1 }
 0x58f   : > { %6625 = vmatpush.xpose.msrb.mxu1 %v11607_v57  ;;  %v5320_v12 = vpop.f32.mrf.mxu3  ;;  %v5087_v45 = vadd.f32 %v5086_v10, %v4962_v22  ;;  %v5223_v61 = vpop.f32.mrf.mxu2  ;;  %v4967_v10 = vadd.f32 %v4966_v38, %v11302_v6 }
 0x590   : > { %v6400_v37 = vand.u32 4294901760, %v6399_v8 }
 0x591   : > { %v5224_v26 = vadd.f32 %v5223_v61, %v5087_v45  ;;  %5472 = vmatmul.f32.gmra.mxu0 %v13207_v46  ;;  %5641 = vmatmul.f32.gmra.mxu1 %v13208_v44  ;;  %v13212_v46 = vand.u32 4294901760, %v11338_v31 }
 0x592   : > { %6732 = vmatpush.xpose.msrb.mxu2 %v13210_v43  ;;  %6401 = vmatpush.xpose.msra.mxu3 %v6400_v37  ;;  %v13214_v43 = vld [vmem:[#allocation199_spill] sm:$0xff] }
 0x593   : > { %6627 = vmatpush.xpose.msrb.mxu1 %v11621_v17  ;;  %v11649_v22 = vadd.f32 %v5320_v12, %v5224_v26  ;;  %v13215_v12 = vld [vmem:[#allocation211_spill] sm:$0xff]  ;;  %v13216_v26 = vand.u32 4294901760, %v11362_v35 }
 0x594   : > { %5897 = vmatmul.f32.gmra.mxu3 %v13209_v49  ;;  %5771 = vmatmul.f32.gmra.mxu2 %v13211_v13 }
 0x596   : > { %6855 = vmatpush.xpose.msrb.mxu3 %v11285_v54  ;;  %v4971_v45 = vpop.f32.mrf.mxu0  ;;  %v5092_v61 = vpop.f32.mrf.mxu1  ;;  %6736 = vmatpush.xpose.msrb.mxu2 %v13212_v46  ;;  %v13217_v54 = vld [vmem:[#allocation208_spill] sm:$0xff] }
 0x597   : > { %v5324_v1 = vpop.f32.mrf.mxu3  ;;  %v5093_v49 = vadd.f32 %v5092_v61, %v4967_v10  ;;  %v5227_v8 = vpop.f32.mrf.mxu2  ;;  %v4972_v31 = vadd.f32 %v4971_v45, %v11323_v63  ;;  %v13218_v10 = vand.u32 4294901760, %v11386_v11  ;;  %v13223_v45 = vld [vmem:[#allocation213_spill] sm:$0xff] }
 0x599   : > { %v5228_v44 = vadd.f32 %v5227_v8, %v5093_v49  ;;  %5480 = vmatmul.f32.gmra.mxu0 %v13213_v27  ;;  %5645 = vmatmul.f32.gmra.mxu1 %v13214_v43  ;;  %v13219_v49 = vld [vmem:[#allocation218_spill] sm:$0xff] }
 0x59a   : > { %6740 = vmatpush.xpose.msrb.mxu2 %v13216_v26  ;;  %6857 = vmatpush.xpose.msrb.mxu3 %v11307_v56  ;;  %v13222_v56 = vand.u32 4294901760, %v11410_v40 }
 0x59b   : > { %v11661_v6 = vadd.f32 %v5324_v1, %v5228_v44  ;;  %v13220_v1 = vld [vmem:[#allocation207_spill] sm:$0xff] }
 0x59c   : > { %5903 = vmatmul.f32.gmra.mxu3 %v13215_v12  ;;  %5776 = vmatmul.f32.gmra.mxu2 %v13217_v54  ;;  %v13221_v44 = vld [vmem:[#allocation215_spill] sm:$0xff]  ;;  %v13224_v12 = vand.u32 4294901760, %v11434_v58 }
 0x59e   : > { %v4976_v37 = vpop.f32.mrf.mxu0  ;;  %v5098_v13 = vpop.f32.mrf.mxu1  ;;  %6744 = vmatpush.xpose.msrb.mxu2 %v13218_v10  ;;  %6859 = vmatpush.xpose.msrb.mxu3 %v11331_v34 }
 0x59f   : > { %v5328_v38 = vpop.f32.mrf.mxu3  ;;  %v5099_v61 = vadd.f32 %v5098_v13, %v4972_v31  ;;  %v5231_v46 = vpop.f32.mrf.mxu2  ;;  %v4977_v11 = vadd.f32 %v4976_v37, %v11347_v53  ;;  %v13225_v31 = vld [vmem:[#allocation222_spill] sm:$0xff]  ;;  %v13227_v13 = vld [vmem:[#allocation219_spill] sm:$0xff]  ;;  %v13229_v37 = vld [vmem:[#allocation217_spill] sm:$0xff] }
 0x5a1   : > { %v5232_v35 = vadd.f32 %v5231_v46, %v5099_v61  ;;  %5488 = vmatmul.f32.gmra.mxu0 %v13219_v49  ;;  %5649 = vmatmul.f32.gmra.mxu1 %v13220_v1  ;;  %v13230_v46 = vand.u32 4294901760, %v11482_v14 }
 0x5a2   : > { %6748 = vmatpush.xpose.msrb.mxu2 %v13222_v56  ;;  %6861 = vmatpush.xpose.msrb.mxu3 %v11355_v2  ;;  %v13228_v2 = vand.u32 4294901760, %v11459_v23  ;;  %v13232_v56 = vld [vmem:[#allocation220_spill] sm:$0xff] }
 0x5a3   : > { %v11674_v63 = vadd.f32 %v5328_v38, %v5232_v35  ;;  %v13226_v38 = vld [vmem:[#allocation212_spill] sm:$0xff] }
 0x5a4   : > { %5909 = vmatmul.f32.gmra.mxu3 %v13221_v44  ;;  %5781 = vmatmul.f32.gmra.mxu2 %v13223_v45  ;;  %v13231_v44 = vld [vmem:[#allocation216_spill] sm:$0xff]  ;;  %v13234_v45 = vld [vmem:[#allocation226_spill] sm:$0xff] }
 0x5a6   : > { %v4981_v34 = vpop.f32.mrf.mxu0  ;;  %v5104_v27 = vpop.f32.mrf.mxu1  ;;  %6752 = vmatpush.xpose.msrb.mxu2 %v13224_v12  ;;  %6863 = vmatpush.xpose.msrb.mxu3 %v11379_v29 }
 0x5a7   : > { %v5332_v8 = vpop.f32.mrf.mxu3  ;;  %v5105_v26 = vadd.f32 %v5104_v27, %v4977_v11  ;;  %v5235_v54 = vpop.f32.mrf.mxu2  ;;  %v4982_v58 = vadd.f32 %v4981_v34, %v11371_v41  ;;  %v13235_v34 = vand.u32 4294901760, %v11526_v55 }
 0x5a9   : > { %v5236_v40 = vadd.f32 %v5235_v54, %v5105_v26  ;;  %5496 = vmatmul.f32.gmra.mxu0 %v13225_v31  ;;  %5653 = vmatmul.f32.gmra.mxu1 %v13226_v38  ;;  %v13236_v26 = vld [vmem:[#allocation224_spill] sm:$0xff]  ;;  %v13238_v54 = vld [vmem:[#allocation230_spill] sm:$0xff] }
 0x5aa   : > { %6756 = vmatpush.xpose.msrb.mxu2 %v13228_v2  ;;  %6865 = vmatpush.xpose.msrb.mxu3 %v11403_v28  ;;  %v13233_v28 = vand.u32 4294901760, %v11504_v32 }
 0x5ab   : > { %v11687_v53 = vadd.f32 %v5332_v8, %v5236_v40 }
 0x5ac   : > { %5915 = vmatmul.f32.gmra.mxu3 %v13227_v13  ;;  %5786 = vmatmul.f32.gmra.mxu2 %v13229_v37  ;;  %v13239_v13 = vand.u32 4294901760, %v11570_v21  ;;  %v13240_v37 = vld [vmem:[#allocation228_spill] sm:$0xff] }
 0x5ae   : > { %v5110_v29 = vpop.f32.mrf.mxu1  ;;  %v5377_v61 = vpop.f32.mrf.mxu0  ;;  %6760 = vmatpush.xpose.msrb.mxu2 %v13230_v46  ;;  %6867 = vmatpush.xpose.msrb.mxu3 %v11427_v3 }
 0x5af   : > { %v5336_v10 = vpop.f32.mrf.mxu3  ;;  %v5111_v35 = vadd.f32 %v5110_v29, %v4982_v58  ;;  %v5239_v49 = vpop.f32.mrf.mxu2  ;;  %v5378_v14 = vadd.f32 %v5377_v61, %v11395_v18  ;;  %v13242_v58 = vld [vmem:[#allocation234_spill] sm:$0xff]  ;;  %v13243_v61 = vand.u32 4294901760, %v11613_v9 }
 0x5b1   : > { %v5240_v23 = vadd.f32 %v5239_v49, %v5111_v35  ;;  %5657 = vmatmul.f32.gmra.mxu1 %v13231_v44  ;;  %5984 = vmatmul.f32.vlgmr.msra.gmra.mxu0 %v13155_v52  ;;  %v13244_v35 = vld [vmem:[#allocation232_spill] sm:$0xff]  ;;  %v13246_v49 = vld [vmem:[#allocation238_spill] sm:$0xff] }
 0x5b2   : > { %6764 = vmatpush.xpose.msrb.mxu2 %v13233_v28  ;;  %6869 = vmatpush.xpose.msrb.mxu3 %v11451_v0  ;;  %v13237_v0 = vand.u32 4294901760, %v11548_v51 }
 0x5b3   : > { %v11700_v41 = vadd.f32 %v5336_v10, %v5240_v23 }
 0x5b4   : > { %6403 = vmatmul.f32.vlgmr.msra.gmra.mxu3 %v13232_v56  ;;  %6182 = vmatmul.f32.vlgmr.msra.gmra.mxu2 %v13234_v45 }
 0x5b6   : > { %v5385_v3 = vpop.f32.mrf.mxu0  ;;  %v5598_v8 = vpop.f32.mrf.mxu1  ;;  %6768 = vmatpush.xpose.msrb.mxu2 %v13235_v34  ;;  %6871 = vmatpush.xpose.msrb.mxu3 %v11475_v33 }
 0x5b7   : > { %v5826_v11 = vpop.f32.mrf.mxu3  ;;  %v5599_v27 = vadd.f32 %v5598_v8, %v5378_v14  ;;  %v5712_v12 = vpop.f32.mrf.mxu2  ;;  %v5386_v55 = vadd.f32 %v5385_v3, %v11419_v16  ;;  %v13248_v3 = vld [vmem:[#allocation173_spill] sm:$0xff] }
 0x5b9   : > { %v5713_v32 = vadd.f32 %v5712_v12, %v5599_v27  ;;  %5988 = vmatmul.f32.gmra.mxu0 %v13161_v48  ;;  %6081 = vmatmul.f32.vlgmr.msra.gmra.mxu1 %v13155_v52 }
 0x5ba   : > { %6772 = vmatpush.xpose.msrb.mxu2 %v13237_v0  ;;  %6873 = vmatpush.xpose.msrb.mxu3 %v11497_v62  ;;  %v13241_v62 = vand.u32 4294901760, %v11592_v50  ;;  %v13250_v0 = vld [vmem:[#allocation178_spill] sm:$0xff] }
 0x5bb   : > { %v11713_v18 = vadd.f32 %v5826_v11, %v5713_v32 }
 0x5bc   : > { %6407 = vmatmul.f32.gmra.mxu3 %v13236_v26  ;;  %6190 = vmatmul.f32.gmra.mxu2 %v13238_v54 }
 0x5be   : > { %v5393_v33 = vpop.f32.mrf.mxu0  ;;  %v5602_v31 = vpop.f32.mrf.mxu1  ;;  %6776 = vmatpush.xpose.msrb.mxu2 %v13239_v13  ;;  %6875 = vmatpush.xpose.msrb.mxu3 %v11519_v5  ;;  %v13251_v13 = vld [vmem:[#allocation243_spill] sm:$0xff] }
 0x5bf   : > { %v5832_v40 = vpop.f32.mrf.mxu3  ;;  %v5603_v52 = vadd.f32 %v5602_v31, %v5386_v55  ;;  %v5717_v2 = vpop.f32.mrf.mxu2  ;;  %v5394_v21 = vadd.f32 %v5393_v33, %v11443_v36 }
 0x5c1   : > { %v5718_v51 = vadd.f32 %v5717_v2, %v5603_v52  ;;  %5992 = vmatmul.f32.gmra.mxu0 %v13167_v47  ;;  %6085 = vmatmul.f32.gmra.mxu1 %v13161_v48  ;;  %v13252_v52 = vld [vmem:[#allocation183_spill] sm:$0xff] }
 0x5c2   : > { %6780 = vmatpush.xpose.msrb.mxu2 %v13241_v62  ;;  %6877 = vmatpush.xpose.msrb.mxu3 %v11541_v60  ;;  %v13245_v60 = vand.u32 4294901760, %v11632_v59  ;;  %v13247_v59 = vld [vmem:[#allocation236_spill] sm:$0xff] }
 0x5c3   : > { %v11726_v16 = vadd.f32 %v5832_v40, %v5718_v51 }
 0x5c4   : > { %6411 = vmatmul.f32.gmra.mxu3 %v13240_v37  ;;  %6198 = vmatmul.f32.gmra.mxu2 %v13242_v58 }
 0x5c6   : > { %v5401_v5 = vpop.f32.mrf.mxu0  ;;  %v5606_v29 = vpop.f32.mrf.mxu1  ;;  %6784 = vmatpush.xpose.msrb.mxu2 %v13243_v61  ;;  %6879 = vmatpush.xpose.msrb.mxu3 %v11563_v25  ;;  %v13255_v61 = vld [vmem:[#allocation188_spill] sm:$0xff] }
 0x5c7   : > { %v5838_v10 = vpop.f32.mrf.mxu3  ;;  %v5607_v48 = vadd.f32 %v5606_v29, %v5394_v21  ;;  %v5722_v46 = vpop.f32.mrf.mxu2  ;;  %v5402_v9 = vadd.f32 %v5401_v5, %v11467_v19  ;;  %v13253_v5 = vld [vmem:[#allocation176_spill] sm:$0xff]  ;;  %v13254_v29 = vld [vmem:[#allocation245_spill] sm:$0xff] }
 0x5c9   : > { %v5723_v50 = vadd.f32 %v5722_v46, %v5607_v48  ;;  %5996 = vmatmul.f32.gmra.mxu0 %v13171_v42  ;;  %6089 = vmatmul.f32.gmra.mxu1 %v13167_v47  ;;  %v13256_v48 = vld [vmem:[#allocation258_spill] sm:$0xff] }
 0x5ca   : > { %6788 = vmatpush.xpose.msrb.mxu2 %v13245_v60  ;;  %6881 = vmatpush.xpose.msrb.mxu3 %v11585_v24 }
 0x5cb   : > { %v11739_v36 = vadd.f32 %v5838_v10, %v5723_v50 }
 0x5cc   : > { %6415 = vmatmul.f32.gmra.mxu3 %v13244_v35  ;;  %6206 = vmatmul.f32.gmra.mxu2 %v13246_v49 }
 0x5ce   : > { %v5409_v25 = vpop.f32.mrf.mxu0  ;;  %v5610_v28 = vpop.f32.mrf.mxu1  ;;  %6883 = vmatpush.xpose.msrb.mxu3 %v11607_v57 }
 0x5cf   : > { %v5844_v23 = vpop.f32.mrf.mxu3  ;;  %v5611_v45 = vadd.f32 %v5610_v28, %v5402_v9  ;;  %v5727_v14 = vpop.f32.mrf.mxu2  ;;  %v5410_v19 = vadd.f32 %v5409_v25, %v11490_v15  ;;  %v13257_v25 = vld [vmem:[#allocation181_spill] sm:$0xff]  ;;  %v13258_v28 = vld [vmem:[#allocation248_spill] sm:$0xff] }
 0x5d1   : > { %v5728_v47 = vadd.f32 %v5727_v14, %v5611_v45  ;;  %6000 = vmatmul.f32.gmra.mxu0 %v13175_v4  ;;  %6093 = vmatmul.f32.gmra.mxu1 %v13171_v42  ;;  %v13249_v42 = vld [vmem:[#allocation240_spill] sm:$0xff]  ;;  %v13259_v45 = vld [vmem:[#allocation193_spill] sm:$0xff]  ;;  %v13260_v14 = vld [vmem:[#allocation270_spill] sm:$0xff] }
 0x5d2   : > { %6885 = vmatpush.xpose.msrb.mxu3 %v11621_v17 }
 0x5d3   : > { %v11748_v11 = vadd.f32 %v5844_v23, %v5728_v47 }
 0x5d4   : > { %6419 = vmatmul.f32.gmra.mxu3 %v13247_v59  ;;  %6214 = vmatmul.f32.gmra.mxu2 %v13248_v3 }
 0x5d6   : > { %v5417_v8 = vpop.f32.mrf.mxu0  ;;  %v5614_v34 = vpop.f32.mrf.mxu1 }
 0x5d7   : > { %v5850_v24 = vpop.f32.mrf.mxu3  ;;  %v5615_v27 = vadd.f32 %v5614_v34, %v5410_v19  ;;  %v5732_v57 = vpop.f32.mrf.mxu2  ;;  %v5418_v17 = vadd.f32 %v5417_v8, %v11512_v39 }
 0x5d9   : > { %v5733_v12 = vadd.f32 %v5732_v57, %v5615_v27  ;;  %6004 = vmatmul.f32.gmra.mxu0 %v13179_v7  ;;  %6097 = vmatmul.f32.gmra.mxu1 %v13175_v4  ;;  %v13261_v57 = vld [vmem:[#allocation184_spill] sm:$0xff] }
 0x5db   : > { %v11756_v32 = vadd.f32 %v5850_v24, %v5733_v12  ;;  %v13262_v12 = vld [vmem:[#allocation251_spill] sm:$0xff] }
 0x5dc   : > { %6423 = vmatmul.f32.gmra.mxu3 %v13249_v42  ;;  %6222 = vmatmul.f32.gmra.mxu2 %v13250_v0 }
 0x5de   : > { %v5425_v15 = vpop.f32.mrf.mxu0  ;;  %v5618_v55 = vpop.f32.mrf.mxu1 }
 0x5df   : > { %v5856_v54 = vpop.f32.mrf.mxu3  ;;  %v5619_v40 = vadd.f32 %v5618_v55, %v5418_v17  ;;  %v5737_v33 = vpop.f32.mrf.mxu2  ;;  %v5426_v2 = vadd.f32 %v5425_v15, %v11534_v30  ;;  %v13263_v17 = vld [vmem:[#allocation198_spill] sm:$0xff] }
 0x5e1   : > { %v5738_v31 = vadd.f32 %v5737_v33, %v5619_v40  ;;  %6008 = vmatmul.f32.gmra.mxu0 %v13183_v20  ;;  %6101 = vmatmul.f32.gmra.mxu1 %v13179_v7 }
 0x5e3   : > { %v11763_v4 = vadd.f32 %v5856_v54, %v5738_v31  ;;  %v13264_v54 = vld [vmem:[#allocation25_spill] sm:$0xff] }
 0x5e4   : > { %6427 = vmatmul.f32.gmra.mxu3 %v13251_v13  ;;  %6230 = vmatmul.f32.gmra.mxu2 %v13252_v52 }
 0x5e6   : > { %v5433_v39 = vpop.f32.mrf.mxu0  ;;  %v5622_v62 = vpop.f32.mrf.mxu1 }
 0x5e7   : > { %v5862_v51 = vpop.f32.mrf.mxu3  ;;  %v5623_v58 = vadd.f32 %v5622_v62, %v5426_v2  ;;  %v5742_v21 = vpop.f32.mrf.mxu2  ;;  %v5434_v46 = vadd.f32 %v5433_v39, %v13256_v48  ;;  %v13266_v39 = vld [vmem:[#allocation254_spill] sm:$0xff] }
 0x5e9   : > { %v5743_v10 = vadd.f32 %v5742_v21, %v5623_v58  ;;  %6012 = vmatmul.f32.gmra.mxu0 %v13253_v5  ;;  %6105 = vmatmul.f32.gmra.mxu1 %v13183_v20  ;;  %v13267_v58 = vld [vmem:[#allocation203_spill] sm:$0xff]  ;;  %v13268_v21 = vld [vmem:[#allocation22_spill] sm:$0xff] }
 0x5eb   : > { %v11770_v7 = vadd.f32 %v5862_v51, %v5743_v10  ;;  %v13265_v51 = vld [vmem:[#allocation191_spill] sm:$0xff] }
 0x5ec   : > { %6431 = vmatmul.f32.gmra.mxu3 %v13254_v29  ;;  %6238 = vmatmul.f32.gmra.mxu2 %v13255_v61 }
 0x5ee   : > { %v5441_v30 = vpop.f32.mrf.mxu0  ;;  %v5626_v60 = vpop.f32.mrf.mxu1 }
 0x5ef   : > { %v5868_v50 = vpop.f32.mrf.mxu3  ;;  %v5627_v49 = vadd.f32 %v5626_v60, %v5434_v46  ;;  %v5747_v9 = vpop.f32.mrf.mxu2  ;;  %v5442_v47 = vadd.f32 %v5441_v30, %v13260_v14  ;;  %v13269_v60 = vld [vmem:[#allocation196_spill] sm:$0xff] }
 0x5f1   : > { %v5748_v23 = vadd.f32 %v5747_v9, %v5627_v49  ;;  %6016 = vmatmul.f32.gmra.mxu0 %v13257_v25  ;;  %6109 = vmatmul.f32.gmra.mxu1 %v13253_v5  ;;  %v13270_v49 = vld [vmem:[#allocation257_spill] sm:$0xff] }
 0x5f3   : > { %v11777_v20 = vadd.f32 %v5868_v50, %v5748_v23  ;;  %v13271_v23 = vld [vmem:[#allocation209_spill] sm:$0xff] }
 0x5f4   : > { %6435 = vmatmul.f32.gmra.mxu3 %v13258_v28  ;;  %6246 = vmatmul.f32.gmra.mxu2 %v13259_v45 }
 0x5f6   : > { %v5449_v19 = vpop.f32.mrf.mxu0  ;;  %v5630_v24 = vpop.f32.mrf.mxu1 }
 0x5f7   : > { %v5874_v3 = vpop.f32.mrf.mxu3  ;;  %v5631_v8 = vadd.f32 %v5630_v24, %v5442_v47  ;;  %v5752_v34 = vpop.f32.mrf.mxu2  ;;  %v5450_v15 = vadd.f32 %v5449_v19, %v13264_v54 }
 0x5f9   : > { %v5753_v27 = vadd.f32 %v5752_v34, %v5631_v8  ;;  %6020 = vmatmul.f32.gmra.mxu0 %v13261_v57  ;;  %6113 = vmatmul.f32.gmra.mxu1 %v13257_v25  ;;  %v13272_v8 = vld [vmem:[#allocation261_spill] sm:$0xff] }
 0x5fb   : > { %v11784_v0 = vadd.f32 %v5874_v3, %v5753_v27  ;;  %v13273_v27 = vld [vmem:[#allocation266_spill] sm:$0xff] }
 0x5fc   : > { %6439 = vmatmul.f32.gmra.mxu3 %v13262_v12  ;;  %6254 = vmatmul.f32.gmra.mxu2 %v13263_v17 }
 0x5fe   : > { %v5457_v40 = vpop.f32.mrf.mxu0  ;;  %v5634_v33 = vpop.f32.mrf.mxu1 }
 0x5ff   : > { %v5880_v55 = vpop.f32.mrf.mxu3  ;;  %v5635_v31 = vadd.f32 %v5634_v33, %v5450_v15  ;;  %v5757_v52 = vpop.f32.mrf.mxu2  ;;  %v5458_v10 = vadd.f32 %v5457_v40, %v13268_v21  ;;  %v13274_v33 = vld [vmem:[#allocation264_spill] sm:$0xff] }
 0x601   : > { %v5758_v2 = vadd.f32 %v5757_v52, %v5635_v31  ;;  %6024 = vmatmul.f32.gmra.mxu0 %v13265_v51  ;;  %6117 = vmatmul.f32.gmra.mxu1 %v13261_v57  ;;  %v13275_v52 = vld [vmem:[#allocation271_spill] sm:$0xff] }
 0x603   : > { %v11791_v62 = vadd.f32 %v5880_v55, %v5758_v2 }
 0x604   : > { %6443 = vmatmul.f32.gmra.mxu3 %v13266_v39  ;;  %6262 = vmatmul.f32.gmra.mxu2 %v13267_v58 }
 0x606   : > { %v5465_v61 = vpop.f32.mrf.mxu0  ;;  %v5638_v48 = vpop.f32.mrf.mxu1 }
 0x607   : > { %v5886_v5 = vpop.f32.mrf.mxu3  ;;  %v5639_v46 = vadd.f32 %v5638_v48, %v5458_v10  ;;  %v5762_v50 = vpop.f32.mrf.mxu2  ;;  %v5466_v25 = vadd.f32 %v5465_v61, %v11649_v22  ;;  %v13276_v61 = vld [vmem:[#allocation268_spill] sm:$0xff]  ;;  %v13277_v48 = vld [vmem:[#allocation275_spill] sm:$0xff] }
 0x609   : > { %v5763_v30 = vadd.f32 %v5762_v50, %v5639_v46  ;;  %6028 = vmatmul.f32.gmra.mxu0 %v13269_v60  ;;  %6121 = vmatmul.f32.gmra.mxu1 %v13265_v51 }
 0x60b   : > { %v11798_v9 = vadd.f32 %v5886_v5, %v5763_v30 }
 0x60c   : > { %6447 = vmatmul.f32.gmra.mxu3 %v13270_v49  ;;  %6270 = vmatmul.f32.gmra.mxu2 %v13271_v23 }
 0x60e   : > { %v5473_v14 = vpop.f32.mrf.mxu0  ;;  %v5642_v47 = vpop.f32.mrf.mxu1 }
 0x60f   : > { %v5892_v45 = vpop.f32.mrf.mxu3  ;;  %v5643_v3 = vadd.f32 %v5642_v47, %v5466_v25  ;;  %v5767_v19 = vpop.f32.mrf.mxu2  ;;  %v5474_v57 = vadd.f32 %v5473_v14, %v11661_v6  ;;  %v13279_v14 = vld [vmem:[#allocation277_spill] sm:$0xff] }
 0x611   : > { %v5768_v24 = vadd.f32 %v5767_v19, %v5643_v3  ;;  %6032 = vmatmul.f32.gmra.mxu0 %v13214_v43  ;;  %6125 = vmatmul.f32.gmra.mxu1 %v13269_v60 }
 0x613   : > { %v11805_v34 = vadd.f32 %v5892_v45, %v5768_v24  ;;  %v13278_v45 = vld [vmem:[#allocation273_spill] sm:$0xff] }
 0x614   : > { %6451 = vmatmul.f32.gmra.mxu3 %v13272_v8  ;;  %6278 = vmatmul.f32.gmra.mxu2 %v13273_v27 }
 0x616   : > { %v5481_v22 = vpop.f32.mrf.mxu0  ;;  %v5646_v54 = vpop.f32.mrf.mxu1 }
 0x617   : > { %v5898_v17 = vpop.f32.mrf.mxu3  ;;  %v5647_v15 = vadd.f32 %v5646_v54, %v5474_v57  ;;  %v5772_v55 = vpop.f32.mrf.mxu2  ;;  %v5482_v2 = vadd.f32 %v5481_v22, %v11674_v63 }
 0x619   : > { %v5773_v40 = vadd.f32 %v5772_v55, %v5647_v15  ;;  %6036 = vmatmul.f32.gmra.mxu0 %v13220_v1  ;;  %6129 = vmatmul.f32.gmra.mxu1 %v13214_v43 }
 0x61b   : > { %v11812_v31 = vadd.f32 %v5898_v17, %v5773_v40  ;;  %v13280_v17 = vld [vmem:[#allocation221_spill] sm:$0xff] }
 0x61c   : > { %6455 = vmatmul.f32.gmra.mxu3 %v13274_v33  ;;  %6286 = vmatmul.f32.gmra.mxu2 %v13275_v52 }
 0x61e   : > { %v5489_v6 = vpop.f32.mrf.mxu0  ;;  %v5650_v58 = vpop.f32.mrf.mxu1 }
 0x61f   : > { %v5904_v51 = vpop.f32.mrf.mxu3  ;;  %v5651_v21 = vadd.f32 %v5650_v58, %v5482_v2  ;;  %v5777_v10 = vpop.f32.mrf.mxu2  ;;  %v5490_v46 = vadd.f32 %v5489_v6, %v11687_v53  ;;  %v13281_v2 = vld [vmem:[#allocation225_spill] sm:$0xff] }
 0x621   : > { %v5778_v5 = vadd.f32 %v5777_v10, %v5651_v21  ;;  %6040 = vmatmul.f32.gmra.mxu0 %v13226_v38  ;;  %6133 = vmatmul.f32.gmra.mxu1 %v13220_v1 }
 0x623   : > { %v11819_v43 = vadd.f32 %v5904_v51, %v5778_v5  ;;  %v13282_v51 = vld [vmem:[#allocation223_spill] sm:$0xff] }
 0x624   : > { %6459 = vmatmul.f32.gmra.mxu3 %v13276_v61  ;;  %6294 = vmatmul.f32.gmra.mxu2 %v13277_v48  ;;  %v13283_v48 = vld [vmem:[#allocation229_spill] sm:$0xff] }
 0x626   : > { %v5497_v63 = vpop.f32.mrf.mxu0  ;;  %v5654_v30 = vpop.f32.mrf.mxu1 }
 0x627   : > { %v5910_v50 = vpop.f32.mrf.mxu3  ;;  %v5655_v60 = vadd.f32 %v5654_v30, %v5490_v46  ;;  %v5782_v23 = vpop.f32.mrf.mxu2  ;;  %v5498_v47 = vadd.f32 %v5497_v63, %v11700_v41  ;;  %v13284_v46 = vld [vmem:[#allocation227_spill] sm:$0xff] }
 0x629   : > { %v5783_v25 = vadd.f32 %v5782_v23, %v5655_v60  ;;  %6044 = vmatmul.f32.gmra.mxu0 %v13231_v44  ;;  %6137 = vmatmul.f32.gmra.mxu1 %v13226_v38 }
 0x62b   : > { %v11826_v1 = vadd.f32 %v5910_v50, %v5783_v25 }
 0x62c   : > { %6463 = vmatmul.f32.gmra.mxu3 %v13278_v45  ;;  %6302 = vmatmul.f32.gmra.mxu2 %v13279_v14  ;;  %v13285_v14 = vld [vmem:[#allocation233_spill] sm:$0xff] }
 0x62e   : > { %v5658_v53 = vpop.f32.mrf.mxu1  ;;  %v5985_v19 = vpop.f32.mrf.mxu0 }
 0x62f   : > { %v5916_v3 = vpop.f32.mrf.mxu3  ;;  %v5659_v24 = vadd.f32 %v5658_v53, %v5498_v47  ;;  %v5787_v27 = vpop.f32.mrf.mxu2  ;;  %v5986_v22 = vadd.f32 %v5985_v19, %v11713_v18  ;;  %v13286_v47 = vld [vmem:[#allocation231_spill] sm:$0xff] }
 0x631   : > { %v5788_v57 = vadd.f32 %v5787_v27, %v5659_v24  ;;  %6141 = vmatmul.f32.gmra.mxu1 %v13231_v44  ;;  %6517 = vmatmul.f32.vlgmr.msrb.gmra.mxu0 %v13280_v17  ;;  %v13287_v17 = vld [vmem:[#allocation237_spill] sm:$0xff] }
 0x633   : > { %v11833_v38 = vadd.f32 %v5916_v3, %v5788_v57 }
 0x634   : > { %6887 = vmatmul.f32.vlgmr.msrb.gmra.mxu3 %v13232_v56  ;;  %6790 = vmatmul.f32.vlgmr.msrb.gmra.mxu2 %v13232_v56 }
 0x636   : > { %v5989_v41 = vpop.f32.mrf.mxu0  ;;  %v6082_v15 = vpop.f32.mrf.mxu1 }
 0x637   : > { %v6404_v54 = vpop.f32.mrf.mxu3  ;;  %v6083_v55 = vadd.f32 %v6082_v15, %v5986_v22  ;;  %v6183_v40 = vpop.f32.mrf.mxu2  ;;  %v5990_v56 = vadd.f32 %v5989_v41, %v11726_v16  ;;  %v13288_v22 = vld [vmem:[#allocation235_spill] sm:$0xff] }
 0x639   : > { %v6184_v52 = vadd.f32 %v6183_v40, %v6083_v55  ;;  %6522 = vmatmul.f32.gmra.mxu0 %v13281_v2  ;;  %6631 = vmatmul.f32.vlgmr.msrb.gmra.mxu1 %v13282_v51  ;;  %v13289_v2 = vld [vmem:[#allocation241_spill] sm:$0xff]  ;;  %v13290_v51 = vld [vmem:[#allocation239_spill] sm:$0xff] }
 0x63b   : > { %v11840_v44 = vadd.f32 %v6404_v54, %v6184_v52 }
 0x63c   : > { %6891 = vmatmul.f32.gmra.mxu3 %v13236_v26  ;;  %6794 = vmatmul.f32.gmra.mxu2 %v13236_v26 }
 0x63e   : > { %v5993_v18 = vpop.f32.mrf.mxu0  ;;  %v6086_v58 = vpop.f32.mrf.mxu1 }
 0x63f   : > { %v6408_v6 = vpop.f32.mrf.mxu3  ;;  %v6087_v21 = vadd.f32 %v6086_v58, %v5990_v56  ;;  %v6191_v10 = vpop.f32.mrf.mxu2  ;;  %v5994_v26 = vadd.f32 %v5993_v18, %v11739_v36 }
 0x641   : > { %v6192_v5 = vadd.f32 %v6191_v10, %v6087_v21  ;;  %6527 = vmatmul.f32.gmra.mxu0 %v13283_v48  ;;  %6637 = vmatmul.f32.gmra.mxu1 %v13284_v46  ;;  %v13292_v48 = vld [vmem:[#allocation242_spill] sm:$0xff] }
 0x643   : > { %v11847_v50 = vadd.f32 %v6408_v6, %v6192_v5  ;;  %v13291_v5 = vld [vmem:[#allocation205_spill] sm:$0xff] }
 0x644   : > { %6895 = vmatmul.f32.gmra.mxu3 %v13240_v37  ;;  %6798 = vmatmul.f32.gmra.mxu2 %v13240_v37 }
 0x646   : > { %v5997_v16 = vpop.f32.mrf.mxu0  ;;  %v6090_v30 = vpop.f32.mrf.mxu1 }
 0x647   : > { %v6412_v63 = vpop.f32.mrf.mxu3  ;;  %v6091_v60 = vadd.f32 %v6090_v30, %v5994_v26  ;;  %v6199_v23 = vpop.f32.mrf.mxu2  ;;  %v5998_v37 = vadd.f32 %v5997_v16, %v11748_v11 }
 0x649   : > { %v6200_v25 = vadd.f32 %v6199_v23, %v6091_v60  ;;  %6532 = vmatmul.f32.gmra.mxu0 %v13285_v14  ;;  %6643 = vmatmul.f32.gmra.mxu1 %v13286_v47  ;;  %v13293_v23 = vld [vmem:[#allocation246_spill] sm:$0xff] }
 0x64b   : > { %v11854_v3 = vadd.f32 %v6412_v63, %v6200_v25  ;;  %v13294_v25 = vld [vmem:[#allocation244_spill] sm:$0xff] }
 0x64c   : > { %6899 = vmatmul.f32.gmra.mxu3 %v13244_v35  ;;  %6802 = vmatmul.f32.gmra.mxu2 %v13244_v35 }
 0x64e   : > { %v6001_v36 = vpop.f32.mrf.mxu0  ;;  %v6094_v19 = vpop.f32.mrf.mxu1 }
 0x64f   : > { %v6416_v53 = vpop.f32.mrf.mxu3  ;;  %v6095_v24 = vadd.f32 %v6094_v19, %v5998_v37  ;;  %v6207_v27 = vpop.f32.mrf.mxu2  ;;  %v6002_v35 = vadd.f32 %v6001_v36, %v11756_v32 }
 0x651   : > { %v6208_v57 = vadd.f32 %v6207_v27, %v6095_v24  ;;  %6537 = vmatmul.f32.gmra.mxu0 %v13287_v17  ;;  %6649 = vmatmul.f32.gmra.mxu1 %v13288_v22  ;;  %v13295_v27 = vld [vmem:[#allocation249_spill] sm:$0xff] }
 0x653   : > { %v11861_v54 = vadd.f32 %v6416_v53, %v6208_v57  ;;  %v13296_v57 = vld [vmem:[#allocation247_spill] sm:$0xff] }
 0x654   : > { %6903 = vmatmul.f32.gmra.mxu3 %v13247_v59  ;;  %6806 = vmatmul.f32.gmra.mxu2 %v13247_v59 }
 0x656   : > { %v6005_v11 = vpop.f32.mrf.mxu0  ;;  %v6098_v15 = vpop.f32.mrf.mxu1 }
 0x657   : > { %v6420_v41 = vpop.f32.mrf.mxu3  ;;  %v6099_v55 = vadd.f32 %v6098_v15, %v6002_v35  ;;  %v6215_v40 = vpop.f32.mrf.mxu2  ;;  %v6006_v59 = vadd.f32 %v6005_v11, %v11763_v4  ;;  %v13297_v15 = vld [vmem:[#allocation252_spill] sm:$0xff] }
 0x659   : > { %v6216_v52 = vadd.f32 %v6215_v40, %v6099_v55  ;;  %6542 = vmatmul.f32.gmra.mxu0 %v13289_v2  ;;  %6655 = vmatmul.f32.gmra.mxu1 %v13290_v51  ;;  %v13298_v55 = vld [vmem:[#allocation250_spill] sm:$0xff] }
 0x65b   : > { %v11868_v56 = vadd.f32 %v6420_v41, %v6216_v52 }
 0x65c   : > { %6907 = vmatmul.f32.gmra.mxu3 %v13249_v42  ;;  %6810 = vmatmul.f32.gmra.mxu2 %v13249_v42 }
 0x65e   : > { %v6009_v32 = vpop.f32.mrf.mxu0  ;;  %v6102_v18 = vpop.f32.mrf.mxu1 }
 0x65f   : > { %v6424_v6 = vpop.f32.mrf.mxu3  ;;  %v6103_v58 = vadd.f32 %v6102_v18, %v6006_v59  ;;  %v6223_v21 = vpop.f32.mrf.mxu2  ;;  %v6010_v42 = vadd.f32 %v6009_v32, %v11770_v7  ;;  %v13299_v32 = vld [vmem:[#allocation255_spill] sm:$0xff]  ;;  %v13300_v18 = vld [vmem:[#allocation253_spill] sm:$0xff] }
 0x661   : > { %v6224_v10 = vadd.f32 %v6223_v21, %v6103_v58  ;;  %6547 = vmatmul.f32.gmra.mxu0 %v13291_v5  ;;  %6661 = vmatmul.f32.gmra.mxu1 %v13292_v48 }
 0x663   : > { %v11875_v46 = vadd.f32 %v6424_v6, %v6224_v10 }
 0x664   : > { %6911 = vmatmul.f32.gmra.mxu3 %v13251_v13  ;;  %6814 = vmatmul.f32.gmra.mxu2 %v13251_v13 }
 0x666   : > { %v6013_v4 = vpop.f32.mrf.mxu0  ;;  %v6106_v63 = vpop.f32.mrf.mxu1 }
 0x667   : > { %v6428_v26 = vpop.f32.mrf.mxu3  ;;  %v6107_v16 = vadd.f32 %v6106_v63, %v6010_v42  ;;  %v6231_v30 = vpop.f32.mrf.mxu2  ;;  %v6014_v13 = vadd.f32 %v6013_v4, %v11777_v20  ;;  %v13302_v4 = vld [vmem:[#allocation256_spill] sm:$0xff] }
 0x669   : > { %v6232_v60 = vadd.f32 %v6231_v30, %v6107_v16  ;;  %6552 = vmatmul.f32.gmra.mxu0 %v13293_v23  ;;  %6667 = vmatmul.f32.gmra.mxu1 %v13294_v25 }
 0x66b   : > { %v11882_v14 = vadd.f32 %v6428_v26, %v6232_v60  ;;  %v13301_v26 = vld [vmem:[#allocation259_spill] sm:$0xff] }
 0x66c   : > { %6915 = vmatmul.f32.gmra.mxu3 %v13254_v29  ;;  %6818 = vmatmul.f32.gmra.mxu2 %v13254_v29 }
 0x66e   : > { %v6017_v7 = vpop.f32.mrf.mxu0  ;;  %v6110_v37 = vpop.f32.mrf.mxu1 }
 0x66f   : > { %v6432_v47 = vpop.f32.mrf.mxu3  ;;  %v6018_v53 = vadd.f32 %v6017_v7, %v11784_v0  ;;  %v6111_v36 = vadd.f32 %v6110_v37, %v6014_v13  ;;  %v6239_v19 = vpop.f32.mrf.mxu2  ;;  %v13303_v13 = vld [vmem:[#allocation262_spill] sm:$0xff] }
 0x671   : > { %v6240_v24 = vadd.f32 %v6239_v19, %v6111_v36  ;;  %6557 = vmatmul.f32.gmra.mxu0 %v13295_v27  ;;  %6673 = vmatmul.f32.gmra.mxu1 %v13296_v57  ;;  %v13305_v27 = vld [vmem:[#allocation265_spill] sm:$0xff]  ;;  %v13306_v57 = vld [vmem:[#allocation263_spill] sm:$0xff] }
 0x673   : > { %v11890_v17 = vadd.f32 %v6432_v47, %v6240_v24  ;;  %v13304_v47 = vld [vmem:[#allocation260_spill] sm:$0xff] }
 0x674   : > { %6919 = vmatmul.f32.gmra.mxu3 %v13258_v28  ;;  %6822 = vmatmul.f32.gmra.mxu2 %v13258_v28 }
 0x676   : > { %v6021_v20 = vpop.f32.mrf.mxu0  ;;  %v6114_v22 = vpop.f32.mrf.mxu1 }
 0x677   : > { %v6436_v29 = vpop.f32.mrf.mxu3  ;;  %v6022_v35 = vadd.f32 %v6021_v20, %v11791_v62  ;;  %v6115_v41 = vadd.f32 %v6114_v22, %v6018_v53  ;;  %v6247_v0 = vpop.f32.mrf.mxu2 }
 0x679   : > { %v6248_v11 = vadd.f32 %v6247_v0, %v6115_v41  ;;  %6562 = vmatmul.f32.gmra.mxu0 %v13297_v15  ;;  %6679 = vmatmul.f32.gmra.mxu1 %v13298_v55  ;;  %v13308_v15 = vld [vmem:[#allocation267_spill] sm:$0xff] }
 0x67b   : > { %v11897_v40 = vadd.f32 %v6436_v29, %v6248_v11  ;;  %v13307_v11 = vld [vmem:[#allocation269_spill] sm:$0xff] }
 0x67c   : > { %6923 = vmatmul.f32.gmra.mxu3 %v13262_v12  ;;  %6826 = vmatmul.f32.gmra.mxu2 %v13262_v12 }
 0x67e   : > { %v6025_v28 = vpop.f32.mrf.mxu0  ;;  %v6118_v2 = vpop.f32.mrf.mxu1 }
 0x67f   : > { %v6440_v52 = vpop.f32.mrf.mxu3  ;;  %v6026_v51 = vadd.f32 %v6025_v28, %v11798_v9  ;;  %v6119_v59 = vadd.f32 %v6118_v2, %v6022_v35  ;;  %v6255_v62 = vpop.f32.mrf.mxu2 }
 0x681   : > { %v6256_v6 = vadd.f32 %v6255_v62, %v6119_v59  ;;  %6567 = vmatmul.f32.gmra.mxu0 %v13299_v32  ;;  %6685 = vmatmul.f32.gmra.mxu1 %v13300_v18  ;;  %v13309_v62 = vld [vmem:[#allocation274_spill] sm:$0xff] }
 0x683   : > { %v11904_v58 = vadd.f32 %v6440_v52, %v6256_v6  ;;  %v13310_v6 = vld [vmem:[#allocation272_spill] sm:$0xff] }
 0x684   : > { %6927 = vmatmul.f32.gmra.mxu3 %v13266_v39  ;;  %6830 = vmatmul.f32.gmra.mxu2 %v13266_v39 }
 0x686   : > { %v6029_v12 = vpop.f32.mrf.mxu0  ;;  %v6122_v10 = vpop.f32.mrf.mxu1 }
 0x687   : > { %v6444_v21 = vpop.f32.mrf.mxu3  ;;  %v6030_v5 = vadd.f32 %v6029_v12, %v11805_v34  ;;  %v6123_v48 = vadd.f32 %v6122_v10, %v6026_v51  ;;  %v6263_v9 = vpop.f32.mrf.mxu2 }
 0x689   : > { %v6264_v42 = vadd.f32 %v6263_v9, %v6123_v48  ;;  %6572 = vmatmul.f32.gmra.mxu0 %v13301_v26  ;;  %6691 = vmatmul.f32.gmra.mxu1 %v13302_v4 }
 0x68b   : > { %v11911_v63 = vadd.f32 %v6444_v21, %v6264_v42 }
 0x68c   : > { %6931 = vmatmul.f32.gmra.mxu3 %v13270_v49  ;;  %6834 = vmatmul.f32.gmra.mxu2 %v13270_v49 }
 0x68e   : > { %v6033_v39 = vpop.f32.mrf.mxu0  ;;  %v6126_v30 = vpop.f32.mrf.mxu1 }
 0x68f   : > { %v6448_v16 = vpop.f32.mrf.mxu3  ;;  %v6034_v60 = vadd.f32 %v6033_v39, %v11812_v31  ;;  %v6127_v23 = vadd.f32 %v6126_v30, %v6030_v5  ;;  %v6271_v34 = vpop.f32.mrf.mxu2 }
 0x691   : > { %v6272_v25 = vadd.f32 %v6271_v34, %v6127_v23  ;;  %6577 = vmatmul.f32.gmra.mxu0 %v13303_v13  ;;  %6697 = vmatmul.f32.gmra.mxu1 %v13304_v47 }
 0x693   : > { %v11918_v7 = vadd.f32 %v6448_v16, %v6272_v25 }
 0x694   : > { %6935 = vmatmul.f32.gmra.mxu3 %v13272_v8  ;;  %6838 = vmatmul.f32.gmra.mxu2 %v13272_v8 }
 0x696   : > { %v6037_v49 = vpop.f32.mrf.mxu0  ;;  %v6130_v53 = vpop.f32.mrf.mxu1 }
 0x697   : > { %v6452_v37 = vpop.f32.mrf.mxu3  ;;  %v6038_v36 = vadd.f32 %v6037_v49, %v11819_v43  ;;  %v6131_v19 = vadd.f32 %v6130_v53, %v6034_v60  ;;  %v6279_v31 = vpop.f32.mrf.mxu2  ;;  %v280_v60 = vld [vmem:[#allocation2] sm:$0xff] }
 0x699   : > { %v6280_v24 = vadd.f32 %v6279_v31, %v6131_v19  ;;  %6582 = vmatmul.f32.gmra.mxu0 %v13305_v27  ;;  %6703 = vmatmul.f32.gmra.mxu1 %v13306_v57 }
 0x69b   : > { %v11925_v29 = vadd.f32 %v6452_v37, %v6280_v24 }
 0x69c   : > { %6939 = vmatmul.f32.gmra.mxu3 %v13274_v33  ;;  %6842 = vmatmul.f32.gmra.mxu2 %v13274_v33 }
 0x69e   : > { %v6041_v8 = vpop.f32.mrf.mxu0  ;;  %v6134_v22 = vpop.f32.mrf.mxu1 }
 0x69f   : > { %v6456_v20 = vpop.f32.mrf.mxu3  ;;  %v6042_v35 = vadd.f32 %v6041_v8, %v11826_v1  ;;  %v6135_v41 = vadd.f32 %v6134_v22, %v6038_v36  ;;  %v6287_v43 = vpop.f32.mrf.mxu2  ;;  %v282_v36 = vld [vmem:[#allocation2 + $0x18] sm:$0xff]  ;;  %v284_v22 = vld [vmem:[#allocation2 + $0x68] sm:$0xff] }
 0x6a1   : > { %v6288_v0 = vadd.f32 %v6287_v43, %v6135_v41  ;;  %6587 = vmatmul.f32.gmra.mxu0 %v13307_v11  ;;  %6709 = vmatmul.f32.gmra.mxu1 %v13308_v15 }
 0x6a3   : > { %v11932_v55 = vadd.f32 %v6456_v20, %v6288_v0 }
 0x6a4   : > { %6943 = vmatmul.f32.gmra.mxu3 %v13276_v61  ;;  %6846 = vmatmul.f32.gmra.mxu2 %v13276_v61 }
 0x6a6   : > { %v6045_v33 = vpop.f32.mrf.mxu0  ;;  %v6138_v28 = vpop.f32.mrf.mxu1 }
 0x6a7   : > { %v6460_v52 = vpop.f32.mrf.mxu3  ;;  %v6046_v2 = vadd.f32 %v6045_v33, %v11833_v38  ;;  %v6139_v51 = vadd.f32 %v6138_v28, %v6042_v35  ;;  %v6295_v1 = vpop.f32.mrf.mxu2  ;;  %v13311_v38 = vld [vmem:[#allocation276_spill] sm:$0xff]  ;;  %v286_v28 = vld [vmem:[#allocation2 + $0x48] sm:$0xff] }
 0x6a9   : > { %v6296_v59 = vadd.f32 %v6295_v1, %v6139_v51  ;;  %6592 = vmatmul.f32.gmra.mxu0 %v13309_v62  ;;  %6715 = vmatmul.f32.gmra.mxu1 %v13310_v6 }
 0x6ab   : > { %v11939_v32 = vadd.f32 %v6460_v52, %v6296_v59 }
 0x6ac   : > { %6947 = vmatmul.f32.gmra.mxu3 %v13278_v45  ;;  %6850 = vmatmul.f32.gmra.mxu2 %v13278_v45 }
 0x6ae   : > { %v6142_v61 = vpop.f32.mrf.mxu1  ;;  %v6518_v21 = vpop.f32.mrf.mxu0 }
 0x6af   : > { %v6464_v18 = vpop.f32.mrf.mxu3  ;;  %v6143_v12 = vadd.f32 %v6142_v61, %v6046_v2  ;;  %v6303_v10 = vpop.f32.mrf.mxu2  ;;  %v6519_v9 = vadd.f32 %v6518_v21, %v11840_v44  ;;  %v288_v21 = vld [vmem:[#allocation2 + $0x88] sm:$0xff] }
 0x6b1   : > { %v6304_v5 = vadd.f32 %v6303_v10, %v6143_v12  ;;  %6721 = vmatmul.f32.gmra.mxu1 %v13311_v38 }
 0x6b3   : > { %v11943_v48 = vadd.f32 %v6464_v18, %v6304_v5 }
 0x6b6   : > { %v6523_v26 = vpop.f32.mrf.mxu0  ;;  %v6632_v4 = vpop.f32.mrf.mxu1 }
 0x6b7   : > { %v6888_v42 = vpop.f32.mrf.mxu3  ;;  %v6633_v16 = vadd.f32 %v6632_v4, %v6519_v9  ;;  %v6791_v39 = vpop.f32.mrf.mxu2  ;;  %v6524_v23 = vadd.f32 %v6523_v26, %v11847_v50 }
 0x6b9   : > { %v6792_v30 = vadd.f32 %v6791_v39, %v6633_v16  ;;  %v290_v16 = vld [vmem:[#allocation2 + $0xb8] sm:$0xff] }
 0x6bb   : > { %v6889_v45 = vadd.f32 %v6888_v42, %v6792_v30 }
 0x6bd   : > { %v6952_v34 = vadd.f32 %v6889_v45, %v280_v60 }
 0x6be   : > { %v6528_v13 = vpop.f32.mrf.mxu0  ;;  %v6638_v47 = vpop.f32.mrf.mxu1 }
 0x6bf   : > { %v6892_v25 = vpop.f32.mrf.mxu3  ;;  %6984 = vst [vmem:[#allocation2] sm:$0xff] %v6952_v34  ;;  %v6639_v37 = vadd.f32 %v6638_v47, %v6524_v23  ;;  %v6795_v49 = vpop.f32.mrf.mxu2  ;;  %v6529_v19 = vadd.f32 %v6528_v13, %v11854_v3  ;;  %v292_v47 = vld [vmem:[#allocation2 + $0xf0] sm:$0xff] }
 0x6c1   : > { %v6796_v53 = vadd.f32 %v6795_v49, %v6639_v37 }
 0x6c3   : > { %v6893_v44 = vadd.f32 %v6892_v25, %v6796_v53 }
 0x6c5   : > { %v6954_v31 = vadd.f32 %v6893_v44, %v282_v36 }
 0x6c6   : > { %v6533_v27 = vpop.f32.mrf.mxu0  ;;  %v6644_v57 = vpop.f32.mrf.mxu1 }
 0x6c7   : > { %v6896_v24 = vpop.f32.mrf.mxu3  ;;  %6986 = vst [vmem:[#allocation2 + $0x18] sm:$0xff] %v6954_v31  ;;  %v6645_v20 = vadd.f32 %v6644_v57, %v6529_v19  ;;  %v6799_v8 = vpop.f32.mrf.mxu2  ;;  %v6534_v41 = vadd.f32 %v6533_v27, %v11861_v54  ;;  %v294_v27 = vld [vmem:[#allocation2 + $0x78] sm:$0xff] }
 0x6c9   : > { %v6800_v50 = vadd.f32 %v6799_v8, %v6645_v20 }
 0x6cb   : > { %v6897_v35 = vadd.f32 %v6896_v24, %v6800_v50 }
 0x6cd   : > { %v6956_v43 = vadd.f32 %v6897_v35, %v284_v22 }
 0x6ce   : > { %v6538_v11 = vpop.f32.mrf.mxu0  ;;  %v6650_v15 = vpop.f32.mrf.mxu1 }
 0x6cf   : > { %v6900_v0 = vpop.f32.mrf.mxu3  ;;  %6988 = vst [vmem:[#allocation2 + $0x68] sm:$0xff] %v6956_v43  ;;  %v6651_v52 = vadd.f32 %v6650_v15, %v6534_v41  ;;  %v6803_v33 = vpop.f32.mrf.mxu2  ;;  %v6539_v51 = vadd.f32 %v6538_v11, %v11868_v56 }
 0x6d1   : > { %v6804_v3 = vadd.f32 %v6803_v33, %v6651_v52 }
 0x6d3   : > { %v6901_v2 = vadd.f32 %v6900_v0, %v6804_v3  ;;  %v296_v0 = vld [vmem:[#allocation2 + $0x58] sm:$0xff] }
 0x6d5   : > { %v6958_v1 = vadd.f32 %v6901_v2, %v286_v28 }
 0x6d6   : > { %v6543_v62 = vpop.f32.mrf.mxu0  ;;  %v6656_v6 = vpop.f32.mrf.mxu1 }
 0x6d7   : > { %v6904_v59 = vpop.f32.mrf.mxu3  ;;  %6990 = vst [vmem:[#allocation2 + $0x48] sm:$0xff] %v6958_v1  ;;  %v6657_v18 = vadd.f32 %v6656_v6, %v6539_v51  ;;  %v6807_v61 = vpop.f32.mrf.mxu2  ;;  %v6544_v10 = vadd.f32 %v6543_v62, %v11875_v46  ;;  %v298_v1 = vld [vmem:[#allocation2 + $0xc8] sm:$0xff] }
 0x6d9   : > { %v6808_v54 = vadd.f32 %v6807_v61, %v6657_v18 }
 0x6db   : > { %v6905_v12 = vadd.f32 %v6904_v59, %v6808_v54 }
 0x6dd   : > { %v6960_v5 = vadd.f32 %v6905_v12, %v288_v21 }
 0x6de   : > { %v6548_v9 = vpop.f32.mrf.mxu0  ;;  %v6662_v42 = vpop.f32.mrf.mxu1 }
 0x6df   : > { %v6908_v38 = vpop.f32.mrf.mxu3  ;;  %6992 = vst [vmem:[#allocation2 + $0x88] sm:$0xff] %v6960_v5  ;;  %v6663_v26 = vadd.f32 %v6662_v42, %v6544_v10  ;;  %v6811_v4 = vpop.f32.mrf.mxu2  ;;  %v6549_v30 = vadd.f32 %v6548_v9, %v11882_v14  ;;  %v300_v10 = vld [vmem:[#allocation2 + $0x90] sm:$0xff] }
 0x6e1   : > { %v6812_v56 = vadd.f32 %v6811_v4, %v6663_v26 }
 0x6e3   : > { %v6909_v39 = vadd.f32 %v6908_v38, %v6812_v56 }
 0x6e5   : > { %v6962_v60 = vadd.f32 %v6909_v39, %v290_v16  ;;  %v302_v39 = vld [vmem:[#allocation2 + $0xc0] sm:$0xff] }
 0x6e6   : > { %v6553_v23 = vpop.f32.mrf.mxu0  ;;  %v6668_v34 = vpop.f32.mrf.mxu1 }
 0x6e7   : > { %v6912_v45 = vpop.f32.mrf.mxu3  ;;  %6994 = vst [vmem:[#allocation2 + $0xb8] sm:$0xff] %v6962_v60  ;;  %v6669_v25 = vadd.f32 %v6668_v34, %v6549_v30  ;;  %v6815_v13 = vpop.f32.mrf.mxu2  ;;  %v6554_v49 = vadd.f32 %v6553_v23, %v11890_v17 }
 0x6e9   : > { %v6816_v46 = vadd.f32 %v6815_v13, %v6669_v25 }
 0x6eb   : > { %v6913_v37 = vadd.f32 %v6912_v45, %v6816_v46 }
 0x6ed   : > { %v6964_v53 = vadd.f32 %v6913_v37, %v292_v47  ;;  %v304_v47 = vld [vmem:[#allocation2 + $0xd0] sm:$0xff] }
 0x6ee   : > { %v6558_v44 = vpop.f32.mrf.mxu0  ;;  %v6674_v19 = vpop.f32.mrf.mxu1 }
 0x6ef   : > { %v6916_v36 = vpop.f32.mrf.mxu3  ;;  %6996 = vst [vmem:[#allocation2 + $0xf0] sm:$0xff] %v6964_v53  ;;  %v6675_v31 = vadd.f32 %v6674_v19, %v6554_v49  ;;  %v6819_v24 = vpop.f32.mrf.mxu2  ;;  %v6559_v20 = vadd.f32 %v6558_v44, %v11897_v40 }
 0x6f1   : > { %v6820_v14 = vadd.f32 %v6819_v24, %v6675_v31 }
 0x6f3   : > { %v6917_v57 = vadd.f32 %v6916_v36, %v6820_v14  ;;  %v306_v14 = vld [vmem:[#allocation2 + $0x28] sm:$0xff] }
 0x6f5   : > { %v6966_v8 = vadd.f32 %v6917_v57, %v294_v27 }
 0x6f6   : > { %v6563_v22 = vpop.f32.mrf.mxu0  ;;  %v6680_v35 = vpop.f32.mrf.mxu1 }
 0x6f7   : > { %v6920_v50 = vpop.f32.mrf.mxu3  ;;  %6998 = vst [vmem:[#allocation2 + $0x78] sm:$0xff] %v6966_v8  ;;  %v6681_v41 = vadd.f32 %v6680_v35, %v6559_v20  ;;  %v6823_v43 = vpop.f32.mrf.mxu2  ;;  %v6564_v15 = vadd.f32 %v6563_v22, %v11904_v58 }
 0x6f9   : > { %v6824_v17 = vadd.f32 %v6823_v43, %v6681_v41  ;;  %v308_v43 = vld [vmem:[#allocation2 + $0xf8] sm:$0xff] }
 0x6fb   : > { %v6921_v11 = vadd.f32 %v6920_v50, %v6824_v17 }
 0x6fd   : > { %v6968_v52 = vadd.f32 %v6921_v11, %v296_v0 }
 0x6fe   : > { %v6568_v3 = vpop.f32.mrf.mxu0  ;;  %v6686_v28 = vpop.f32.mrf.mxu1 }
 0x6ff   : > { %v6924_v33 = vpop.f32.mrf.mxu3  ;;  %7000 = vst [vmem:[#allocation2 + $0x58] sm:$0xff] %v6968_v52  ;;  %v6687_v2 = vadd.f32 %v6686_v28, %v6564_v15  ;;  %v6827_v51 = vpop.f32.mrf.mxu2  ;;  %v6569_v62 = vadd.f32 %v6568_v3, %v11911_v63 }
 0x701   : > { %v6828_v40 = vadd.f32 %v6827_v51, %v6687_v2 }
 0x703   : > { %v6925_v59 = vadd.f32 %v6924_v33, %v6828_v40 }
 0x705   : > { %v6970_v6 = vadd.f32 %v6925_v59, %v298_v1 }
 0x706   : > { %v6573_v61 = vpop.f32.mrf.mxu0  ;;  %v6692_v54 = vpop.f32.mrf.mxu1 }
 0x707   : > { %v6928_v18 = vpop.f32.mrf.mxu3  ;;  %7002 = vst [vmem:[#allocation2 + $0xc8] sm:$0xff] %v6970_v6  ;;  %v6693_v21 = vadd.f32 %v6692_v54, %v6569_v62  ;;  %v6831_v12 = vpop.f32.mrf.mxu2  ;;  %v6574_v38 = vadd.f32 %v6573_v61, %v11918_v7 }
 0x709   : > { %v6832_v58 = vadd.f32 %v6831_v12, %v6693_v21 }
 0x70b   : > { %v6929_v5 = vadd.f32 %v6928_v18, %v6832_v58 }
 0x70d   : > { %v6972_v9 = vadd.f32 %v6929_v5, %v300_v10 }
 0x70e   : > { %v6578_v26 = vpop.f32.mrf.mxu0  ;;  %v6698_v4 = vpop.f32.mrf.mxu1 }
 0x70f   : > { %v6932_v42 = vpop.f32.mrf.mxu3  ;;  %7004 = vst [vmem:[#allocation2 + $0x90] sm:$0xff] %v6972_v9  ;;  %v6699_v56 = vadd.f32 %v6698_v4, %v6574_v38  ;;  %v6835_v16 = vpop.f32.mrf.mxu2  ;;  %v6579_v60 = vadd.f32 %v6578_v26, %v11925_v29 }
 0x711   : > { %v6836_v63 = vadd.f32 %v6835_v16, %v6699_v56 }
 0x713   : > { %v6933_v30 = vadd.f32 %v6932_v42, %v6836_v63 }
 0x715   : > { %v6974_v45 = vadd.f32 %v6933_v30, %v302_v39 }
 0x716   : > { %v6583_v34 = vpop.f32.mrf.mxu0  ;;  %v6704_v25 = vpop.f32.mrf.mxu1 }
 0x717   : > { %v6936_v23 = vpop.f32.mrf.mxu3  ;;  %7006 = vst [vmem:[#allocation2 + $0xc0] sm:$0xff] %v6974_v45  ;;  %v6705_v13 = vadd.f32 %v6704_v25, %v6579_v60  ;;  %v6839_v46 = vpop.f32.mrf.mxu2  ;;  %v6584_v49 = vadd.f32 %v6583_v34, %v11932_v55 }
 0x719   : > { %v6840_v7 = vadd.f32 %v6839_v46, %v6705_v13 }
 0x71b   : > { %v6937_v37 = vadd.f32 %v6936_v23, %v6840_v7 }
 0x71d   : > { %v6976_v53 = vadd.f32 %v6937_v37, %v304_v47 }
 0x71e   : > { %v6710_v44 = vpop.f32.mrf.mxu1  ;;  %v6588_v24 = vpop.f32.mrf.mxu0 }
 0x71f   : > { %v6940_v36 = vpop.f32.mrf.mxu3  ;;  %7008 = vst [vmem:[#allocation2 + $0xd0] sm:$0xff] %v6976_v53  ;;  %v6711_v19 = vadd.f32 %v6710_v44, %v6584_v49  ;;  %v6843_v31 = vpop.f32.mrf.mxu2  ;;  %v6589_v57 = vadd.f32 %v6588_v24, %v11939_v32  ;;  %v310_v32 = vld [vmem:[#allocation2 + $0x98] sm:$0xff] }
 0x721   : > { %v6844_v29 = vadd.f32 %v6843_v31, %v6711_v19 }
 0x723   : > { %v6941_v27 = vadd.f32 %v6940_v36, %v6844_v29 }
 0x725   : > { %v6978_v20 = vadd.f32 %v6941_v27, %v306_v14 }
 0x726   : > { %v6716_v8 = vpop.f32.mrf.mxu1  ;;  %v6593_v55 = vpop.f32.mrf.mxu0 }
 0x727   : > { %v6944_v50 = vpop.f32.mrf.mxu3  ;;  %7010 = vst [vmem:[#allocation2 + $0x28] sm:$0xff] %v6978_v20  ;;  %v6717_v22 = vadd.f32 %v6716_v8, %v6589_v57  ;;  %v6847_v35 = vpop.f32.mrf.mxu2  ;;  %v6594_v0 = vadd.f32 %v6593_v55, %v11943_v48 }
 0x729   : > { %v6848_v41 = vadd.f32 %v6847_v35, %v6717_v22 }
 0x72b   : > { %v6945_v17 = vadd.f32 %v6944_v50, %v6848_v41 }
 0x72d   : > { %v6980_v11 = vadd.f32 %v6945_v17, %v308_v43 }
 0x72e   : > { %v6722_v15 = vpop.f32.mrf.mxu1 }
 0x72f   : > { %7012 = vst [vmem:[#allocation2 + $0xf8] sm:$0xff] %v6980_v11  ;;  %v6723_v52 = vadd.f32 %v6722_v15, %v6594_v0  ;;  %v6851_v33 = vpop.f32.mrf.mxu2  ;;  %v6948_v3 = vpop.f32.mrf.mxu3 }
 0x731   : > { %v6852_v28 = vadd.f32 %v6851_v33, %v6723_v52 }
 0x733   : > { %v6949_v2 = vadd.f32 %v6948_v3, %v6852_v28  ;;  %7018 = sbr.rel (%p7238_p7) target bundleno = 1881 (0x759), region = 44 }
 0x735   : > { %v6982_v51 = vadd.f32 %v6949_v2, %v310_v32 }
 0x737   : > { %7014 = vst [vmem:[#allocation2 + $0x98] sm:$0xff] %v6982_v51 }
 0x738   : > { %v7019_v40 = vld [vmem:[#allocation2 + $0xb0] sm:$0xff]  ;;  %v7020_v48 = vld [vmem:[#allocation2] sm:$0xff]  ;;  %v7021_v1 = vld [vmem:[#allocation2 + $0xd8] sm:$0xff] }
 0x739   : > { %7051 = vst [vmem:[%s7830_s4] sm:$0xff] %v7019_v40  ;;  %v7022_v59 = vld [vmem:[#allocation2 + $0x18] sm:$0xff]  ;;  %v7023_v62 = vld [vmem:[#allocation2 + $0x50] sm:$0xff]  ;;  %v7024_v6 = vld [vmem:[#allocation2 + $0x68] sm:$0xff] }
 0x73a   : > { %7052 = vst [vmem:[%s7830_s4 + $0x8] sm:$0xff] %v7020_v48  ;;  %v7025_v18 = vld [vmem:[#allocation2 + $0x30] sm:$0xff]  ;;  %v7026_v61 = vld [vmem:[#allocation2 + $0x48] sm:$0xff]  ;;  %v7027_v54 = vld [vmem:[#allocation2 + $0x80] sm:$0xff] }
 0x73b   : > { %7053 = vst [vmem:[%s7830_s4 + $0x10] sm:$0xff] %v7021_v1  ;;  %v7028_v21 = vld [vmem:[#allocation2 + $0x88] sm:$0xff]  ;;  %v7030_v58 = vld [vmem:[#allocation2 + $0xb8] sm:$0xff]  ;;  %v7031_v10 = vld [vmem:[#allocation2 + $0x60] sm:$0xff] }
 0x73c   : > { %7054 = vst [vmem:[%s7830_s4 + $0x18] sm:$0xff] %v7022_v59  ;;  %v7029_v12 = vld [vmem:[#allocation2 + $0xe8] sm:$0xff]  ;;  %v7032_v5 = vld [vmem:[#allocation2 + $0xf0] sm:$0xff]  ;;  %v7034_v9 = vld [vmem:[#allocation2 + $0x78] sm:$0xff] }
 0x73d   : > { %7055 = vst [vmem:[%s7830_s4 + $0x20] sm:$0xff] %v7023_v62  ;;  %v7033_v38 = vld [vmem:[#allocation2 + $0x8] sm:$0xff]  ;;  %v7035_v42 = vld [vmem:[#allocation2 + $0x38] sm:$0xff]  ;;  %v7037_v4 = vld [vmem:[#allocation2 + $0x40] sm:$0xff] }
 0x73e   : > { %7056 = vst [vmem:[%s7830_s4 + $0x28] sm:$0xff] %v7024_v6  ;;  %v7036_v26 = vld [vmem:[#allocation2 + $0x58] sm:$0xff]  ;;  %v7038_v56 = vld [vmem:[#allocation2 + $0xc8] sm:$0xff]  ;;  %v7039_v16 = vld [vmem:[#allocation2 + $0xe0] sm:$0xff] }
 0x73f   : > { %7057 = vst [vmem:[%s7830_s4 + $0x30] sm:$0xff] %v7025_v18  ;;  %v7040_v63 = vld [vmem:[#allocation2 + $0x90] sm:$0xff]  ;;  %v7042_v30 = vld [vmem:[#allocation2 + $0xc0] sm:$0xff]  ;;  %v7043_v60 = vld [vmem:[#allocation2 + $0xa8] sm:$0xff] }
 0x740   : > { %7058 = vst [vmem:[%s7830_s4 + $0x38] sm:$0xff] %v7026_v61  ;;  %v7041_v39 = vld [vmem:[#allocation2 + $0x70] sm:$0xff]  ;;  %v7046_v34 = vld [vmem:[#allocation2 + $0x28] sm:$0xff]  ;;  %v7047_v25 = vld [vmem:[#allocation2 + $0xa0] sm:$0xff] }
 0x741   : > { %7059 = vst [vmem:[%s7830_s4 + $0x40] sm:$0xff] %v7027_v54  ;;  %v7044_v45 = vld [vmem:[#allocation2 + $0xd0] sm:$0xff]  ;;  %v7048_v13 = vld [vmem:[#allocation2 + $0xf8] sm:$0xff]  ;;  %v7049_v46 = vld [vmem:[#allocation2 + $0x20] sm:$0xff] }
 0x742   : > { %7060 = vst [vmem:[%s7830_s4 + $0x48] sm:$0xff] %v7028_v21  ;;  %v7045_v23 = vld [vmem:[#allocation2 + $0x10] sm:$0xff]  ;;  %v7050_v7 = vld [vmem:[#allocation2 + $0x98] sm:$0xff] }
 0x743   : > { %7061 = vst [vmem:[%s7830_s4 + $0x50] sm:$0xff] %v7029_v12 }
 0x744   : > { %7062 = vst [vmem:[%s7830_s4 + $0x58] sm:$0xff] %v7030_v58 }
 0x745   : > { %7063 = vst [vmem:[%s7830_s4 + $0x60] sm:$0xff] %v7031_v10 }
 0x746   : > { %7064 = vst [vmem:[%s7830_s4 + $0x68] sm:$0xff] %v7032_v5 }
 0x747   : > { %7065 = vst [vmem:[%s7830_s4 + $0x70] sm:$0xff] %v7033_v38 }
 0x748   : > { %7066 = vst [vmem:[%s7830_s4 + $0x78] sm:$0xff] %v7034_v9 }
 0x749   : > { %7067 = vst [vmem:[%s7830_s4 + $0x80] sm:$0xff] %v7035_v42 }
 0x74a   : > { %7068 = vst [vmem:[%s7830_s4 + $0x88] sm:$0xff] %v7036_v26 }
 0x74b   : > { %7069 = vst [vmem:[%s7830_s4 + $0x90] sm:$0xff] %v7037_v4 }
 0x74c   : > { %7070 = vst [vmem:[%s7830_s4 + $0x98] sm:$0xff] %v7038_v56 }
 0x74d   : > { %7071 = vst [vmem:[%s7830_s4 + $0xa0] sm:$0xff] %v7039_v16 }
 0x74e   : > { %7072 = vst [vmem:[%s7830_s4 + $0xa8] sm:$0xff] %v7040_v63 }
 0x74f   : > { %7073 = vst [vmem:[%s7830_s4 + $0xb0] sm:$0xff] %v7041_v39 }
 0x750   : > { %7074 = vst [vmem:[%s7830_s4 + $0xb8] sm:$0xff] %v7042_v30 }
 0x751   : > { %7075 = vst [vmem:[%s7830_s4 + $0xc0] sm:$0xff] %v7043_v60 }
 0x752   : > { %7076 = vst [vmem:[%s7830_s4 + $0xc8] sm:$0xff] %v7044_v45 }
 0x753   : > { %7077 = vst [vmem:[%s7830_s4 + $0xd0] sm:$0xff] %v7045_v23 }
 0x754   : > { %7078 = vst [vmem:[%s7830_s4 + $0xd8] sm:$0xff] %v7046_v34 }
 0x755   : > { %7079 = vst [vmem:[%s7830_s4 + $0xe0] sm:$0xff] %v7047_v25 }
 0x756   : > { %7080 = vst [vmem:[%s7830_s4 + $0xe8] sm:$0xff] %v7048_v13 }
 0x757   : > { %7081 = vst [vmem:[%s7830_s4 + $0xf0] sm:$0xff] %v7049_v46 }
 0x758   : > { %7082 = vst [vmem:[%s7830_s4 + $0xf8] sm:$0xff] %v7050_v7 }
 0x759 PF: > { %s7246_s18 = sshll.u32 %s7583_s19, 4  ;;  %s13312_s23 = sld [smem:[#allocation279_spill]] }
 0x75a   : > { %s7099_s29 = sshll.u32 %s7830_s4, 4  ;;  %s7084_s26 = scalar_lea.sflag [#allocation5], %s234_s17  ;;  %s7100_s29 = int_to_ptr.vmem [resolvable:$true] %s7099_s29 }
 0x75f   : > { %s7098_s24 = scalar_lea.hbm %s13312_s23, %s7246_s18  ;;  %s7465_s19 = scalar_lea.hbm %s13312_s23, 1024 }
 0x760   : > { %s7101_s25 = sshll.u32 %s7098_s24, 4  ;;  %s7102_s25 = int_to_ptr.hbm [resolvable:$true] %s7101_s25 }
 0x761   : > { %s7459_s2 = sshra.s32 %s7102_s25, 4  ;;  %s7460_s2 = int_to_ptr.hbm [resolvable:$true] %s7459_s2 }
 0x762   : > { %s7461_s0 = scalar_lea.hbm %s7460_s2, 256  ;;  %p7466_p9 = scmp.lt.s32.totalorder %s7460_s2, %s13312_s23 }
 0x763   : > { %p7462_p8 = scmp.ne.s32.totalorder %s7460_s2, %s7461_s0  ;;  %p7467_p10 = scmp.lt.s32.totalorder %s7465_s19, %s7461_s0 }
 0x765   : > { %p7463_p13 = pnand %p7462_p8, %p7781_p5  ;;  %p7468_p11 = por %p7467_p10, %p7466_p9 }
 0x767   : > { %p7464_p6 = pneg %p7463_p13 }
 0x769   : > { %p7469_p1 = pnand %p7468_p11, %p7464_p6 }
 0x76b   : > { %7472 = shalt.err (!%p7469_p1)
}
 0x76c   : > { %s7601_s7 = smov 256   ;;  %s7602_s11 = smov 1024  }
 0x76d   : > { %s7603_s14 = smov 16  }
 0x76e   : > { %7251 = dma.vmem_to_hbm [thread:$0]  (%p7781_p5), %s7100_s29, 4096, %s7102_s25, %s7084_s26, %s7601_s7, %s7602_s11, %s7603_s14  }
 0x76f PF: > { %p7265_p3 = scmp.ge.s32.totalorder %s7595_s22, 2  ;;  %s7116_s17 = sand.u32 1, %s7543_s9  }
 0x770   : > { %s7117_s6 = scalar_lea.sflag [#allocation5], %s7116_s17 }
 0x771   : > { %p7261_p12 = pnand %p7265_p3, %p7791_p4 }
 0x773   : > { %p7262_p0 = pneg %p7261_p12 }
 0x775   : > { %7538 = dma.done.wait (%p7262_p0), %s7117_s6, 4096  }
 0x776   : > { %7540 = vsyncadd (%p7262_p0), %s7117_s6, 4294963200  ;;  %s21_s22 = sadd.s32 1, %s7595_s22   ;;  %s13314_s28 = sld [smem:[#allocation12_spill]] }
 0x777   : > { %p12016_p2 = scmp.ge.s32.totalorder %s21_s22, 10   ;;  %s13315_s11 = sld [smem:[#allocation18_spill]] }
 0x778   : > { %s13316_s18 = sld [smem:[#allocation13_spill]]  ;;  %s13322_s9 = smov %s7547_s10 }
 0x779   : > { %s13317_s14 = sld [smem:[#allocation19_spill]]  ;;  %s13324_s12 = smov %s7559_s13 }
 0x77a   : > { %s13318_s30 = sld [smem:[#allocation14_spill]]  ;;  %s13326_s15 = smov %s7571_s16 }
 0x77b   : > { %s13319_s17 = sld [smem:[#allocation16_spill]]  ;;  %s13329_s19 = smov %s7591_s21 }
 0x77c   : > { %s13320_s5 = sld [smem:[#allocation15_spill]]  ;;  %s13323_s10 = smov %s13314_s28 }
 0x77d   : > { %s13321_s24 = sld [smem:[#allocation17_spill]] }
 0x77e   : > { %s13325_s13 = smov %s13316_s18  ;;  %s13328_s18 = smov %s7587_s20 }
 0x77f   :  { %20 = sbr.rel (!%p12016_p2) target bundleno = 15 (0xf), region = 94 }
 0x780   : > { %s13327_s16 = smov %s13318_s30 }
 0x782   : > { %s13330_s20 = smov %s13320_s5 }
 0x783   : > { %s13331_s21 = smov %s13321_s24 }
 0x784   :  { %7123 = vsyncpa [#allocation4], 1 }
 0x785   :  { %7125 = vsyncpa [#allocation4 + $0x1], 1 }
 0x786   :  { %7126 = vsyncpa [#allocation7], 1 }
 0x787   :  { %7128 = vsyncpa [#allocation7 + $0x1], 1 }
 0x788   :  { %7129 = vsyncpa [#allocation5], 1 }
 0x789   :  { %7131 = vsyncpa [#allocation5 + $0x1], 1 }

</bundles_post_ra>
